<compile_context>
chip_gen: v7x
topology: tpu7x:2x2x1
jax: 0.10.0
libtpu: 0.0.40
codegen_flags: <defaults>
</compile_context>

<pallas_src>
import jax
import jax.numpy as jnp
from jax import lax
from jax.experimental import pallas as pl
from jax.experimental.pallas import tpu as pltpu

# ---------------- configuration (small shapes consistent with the module) ---
N_HEAD = 4
N_EMBD = 16
C = N_HEAD * N_EMBD          # channels = n_head * n_embd = 64 (multiple of 32)
D_HEAD = C // N_HEAD
N_BATCH = 2
H = W = 8
HW = H * W
D_CTX = 64                   # d_context (kept small instead of 768)
L_CTX = 8                    # context sequence length
N_GROUPS = 32                # GroupNorm(32, channels)
EPS_GN = 1e-6
EPS_LN = 1e-5                # nn.LayerNorm default eps


# ------------------------------- kernel helpers ------------------------------
def _norm(v, eps):
    """Mean/variance normalization only (affine folded into next matmul)."""
    m = jnp.mean(v, axis=-1, keepdims=True)
    var = jnp.mean((v - m) ** 2, axis=-1, keepdims=True)
    return (v - m) * lax.rsqrt(var + eps)


def _mha(q, k, v):
    """Head-batched attention: one batched matmul for scores, one for P@V."""
    sq, sk = q.shape[0], k.shape[0]
    scale = 1.0 / (float(D_HEAD) ** 0.5)          # 0.25 -- exact power of two
    qh = (q * scale).reshape(sq, N_HEAD, D_HEAD).transpose(1, 0, 2).astype(jnp.bfloat16)
    kh = k.reshape(sk, N_HEAD, D_HEAD).transpose(1, 0, 2).astype(jnp.bfloat16)
    vh = v.reshape(sk, N_HEAD, D_HEAD).transpose(1, 0, 2).astype(jnp.bfloat16)
    s = jnp.einsum("hqd,hkd->hqk", qh, kh,
                   preferred_element_type=jnp.float32)               # (H,Sq,Sk) f32
    m = jnp.max(s, axis=-1, keepdims=True)
    p = jnp.exp(s - m)                                                # EUP
    p = p * pl.reciprocal(jnp.sum(p, axis=-1, keepdims=True), approx=True)
    o = jnp.einsum("hqk,hkd->hqd", p.astype(jnp.bfloat16), vh,
                   preferred_element_type=jnp.float32)                # (H,Sq,Dh) f32
    return o.transpose(1, 0, 2).reshape(sq, C).astype(jnp.bfloat16)


# ------------------------------- kernel -------------------------------------
def unet_attn_block_kernel(
    x_ref, ctx_ref,
    gmat_ref,
    wci_ref, bci_ref,
    wqkv1_ref, bqkv1_ref, wo1_ref, bo1_ref,
    wq2_ref, bq2_ref, wkv2_ref, wo2_ref, bo2_ref,
    wg1_ref, bg1_ref, wg2_ref, bg2_ref,
    wco_ref, bco_ref,
    o_ref,
):
    x_chw = x_ref[0]                             # (C, HW) f32 -- NCHW layout slice
    x0 = jnp.transpose(x_chw)                    # (HW, C) f32 -- token-major residue_long
    ctx = ctx_ref[0]                             # (L_CTX, D_CTX) bf16

    # ---- GroupNorm(32, C) statistics (affine folded into conv_input) --------
    s = jnp.sum(x0, axis=0, keepdims=True)                  # (1, C) per-chan sum
    ss = jnp.sum(x0 * x0, axis=0, keepdims=True)            # (1, C) per-chan sq-sum
    st = jnp.concatenate([s, ss], axis=0)                   # (2, C)
    # gmat[i, j] = 1/(HW*group_size) if channels i, j share a group
    g = jnp.dot(st, gmat_ref[...], preferred_element_type=jnp.float32)
    mean = g[0:1, :]
    var = g[1:2, :] - mean * mean
    xg = (x0 - mean) * lax.rsqrt(var + EPS_GN)

    # ---- conv_input: 1x1 conv == per-token linear (GN affine pre-folded) ----
    x = jnp.dot(xg.astype(jnp.bfloat16), wci_ref[...],
                preferred_element_type=jnp.float32) + bci_ref[...]

    # ---- LayerNorm_1 + self-attention (fused QKV) + residual -----------------
    res = x
    xl = _norm(x, EPS_LN).astype(jnp.bfloat16)
    qkv = jnp.dot(xl, wqkv1_ref[...], preferred_element_type=jnp.float32) \
        + bqkv1_ref[...]                                     # (HW, 3C)
    a = _mha(qkv[:, :C], qkv[:, C:2 * C], qkv[:, 2 * C:])
    x = jnp.dot(a, wo1_ref[...], preferred_element_type=jnp.float32) + bo1_ref[...] + res

    # ---- LayerNorm_2 + cross-attention over context (fused KV) + residual ----
    res = x
    xl = _norm(x, EPS_LN).astype(jnp.bfloat16)
    q = jnp.dot(xl, wq2_ref[...], preferred_element_type=jnp.float32) + bq2_ref[...]
    kv = jnp.dot(ctx, wkv2_ref[...], preferred_element_type=jnp.float32)  # (L_CTX, 2C)
    a = _mha(q, kv[:, :C], kv[:, C:])
    x = jnp.dot(a, wo2_ref[...], preferred_element_type=jnp.float32) + bo2_ref[...] + res

    # ---- LayerNorm_3 + GeGLU feed-forward + residual --------------------------
    res = x
    xl = _norm(x, EPS_LN).astype(jnp.bfloat16)
    hcat = jnp.dot(xl, wg1_ref[...], preferred_element_type=jnp.float32) + bg1_ref[...]
    xa = hcat[:, : 4 * C]
    gate = hcat[:, 4 * C:]
    # TODO(synk): PyTorch F.gelu defaults to the exact erf-based GELU; the tanh
    # approximation is used here since erf lowering in Mosaic is not guaranteed.
    xa = (xa * jax.nn.gelu(gate, approximate=True)).astype(jnp.bfloat16)
    x = jnp.dot(xa, wg2_ref[...], preferred_element_type=jnp.float32) + bg2_ref[...] + res

    # ---- conv_output (1x1) + long residual, back to channel-major -------------
    out = jnp.dot(x.astype(jnp.bfloat16), wco_ref[...],
                  preferred_element_type=jnp.float32) + bco_ref[...] + x0
    o_ref[0] = jnp.transpose(out).astype(o_ref.dtype)        # (C, HW)


# ------------------------------- wrapper -------------------------------------
def _full_spec(arr):
    nd = arr.ndim

    def imap(b):
        return (0,) * nd

    return pl.BlockSpec(arr.shape, imap)


def _kernel_weights(p, hw):
    """Convert PyTorch-shaped parameters into kernel operands.

    Matmul weights are transposed to (in, out), fused where possible, have the
    preceding normalization affine folded in (in f32), then are cast to bf16.
    Biases stay f32 as (1, out) rows.
    """
    f32 = jnp.float32
    row = lambda v: v.reshape(1, -1).astype(f32)
    bf = lambda m: m.astype(jnp.bfloat16)

    gs = C // N_GROUPS
    gidx = jnp.arange(C) // gs
    gmat = (gidx[:, None] == gidx[None, :]).astype(f32) / float(hw * gs)

    # GroupNorm affine folded into conv_input.
    wci = p["conv_in_w"][:, :, 0, 0].astype(f32).T                     # (C, C)
    wci_f = wci * p["gn_g"][:, None]
    bci_f = p["gn_b"] @ wci + p["conv_in_b"]

    # LayerNorm_1 affine folded into the fused self-attn QKV in-proj (no bias
    # in the original in_proj, so the folded bias is just beta @ W).
    wqkv1 = p["attn1_in_w"].astype(f32).T                              # (C, 3C), cols [q|k|v]
    wqkv1_f = wqkv1 * p["ln1_g"][:, None]
    bqkv1_f = p["ln1_b"] @ wqkv1

    # LayerNorm_2 affine folded into the cross-attn Q projection.
    wq2 = p["attn2_q_w"].astype(f32).T                                 # (C, C)
    wq2_f = wq2 * p["ln2_g"][:, None]
    bq2_f = p["ln2_b"] @ wq2
    # Fused cross-attn K/V over context: (D_CTX, 2C), cols [k | v].
    wkv2 = jnp.concatenate([p["attn2_k_w"], p["attn2_v_w"]], axis=0).astype(f32).T

    # LayerNorm_3 affine folded into the GeGLU first linear.
    wg1 = p["geglu1_w"].astype(f32).T                                  # (C, 8C)
    wg1_f = wg1 * p["ln3_g"][:, None]
    bg1_f = p["ln3_b"] @ wg1 + p["geglu1_b"]

    return [
        gmat,
        bf(wci_f), row(bci_f),
        bf(wqkv1_f), row(bqkv1_f), bf(p["attn1_out_w"].T), row(p["attn1_out_b"]),
        bf(wq2_f), row(bq2_f), bf(wkv2), bf(p["attn2_out_w"].T), row(p["attn2_out_b"]),
        bf(wg1_f), row(bg1_f), bf(p["geglu2_w"].T), row(p["geglu2_b"]),
        bf(p["conv_out_w"][:, :, 0, 0].T), row(p["conv_out_b"]),
    ]


def unet_attention_block(x_nchw, context, params):
    # NCHW -> (N, C, H*W) is a free reshape; the channel/token transpose is
    # done inside the kernel (XLU), so no standalone XLA transpose ops remain.
    n, c, h, w = x_nchw.shape
    hw = h * w
    x_chw = x_nchw.reshape(n, c, hw).astype(jnp.float32)
    ctx = context.astype(jnp.bfloat16)
    weights = _kernel_weights(params, hw)

    in_specs = [
        pl.BlockSpec((1, c, hw), lambda b: (b, 0, 0)),
        pl.BlockSpec((1, L_CTX, D_CTX), lambda b: (b, 0, 0)),
    ] + [_full_spec(wt) for wt in weights]

    out = pl.pallas_call(
        unet_attn_block_kernel,
        out_shape=jax.ShapeDtypeStruct((n, c, hw), jnp.float32),
        grid=(n,),
        in_specs=in_specs,
        out_specs=pl.BlockSpec((1, c, hw), lambda b: (b, 0, 0)),
        compiler_params=pltpu.CompilerParams(
            dimension_semantics=("parallel",),      # 2-way megacore split on v7x
            vmem_limit_bytes=16 * 1024 * 1024),
    )(x_chw, ctx, *weights)

    return out.reshape(n, c, h, w)


# ------------------------- deterministic params -------------------------------
def init_params(key):
    ks = iter(jax.random.split(key, 30))

    def nrm(shape, scale=0.1):
        return (scale * jax.random.normal(next(ks), shape)).astype(jnp.float32)

    p = {}
    p["gn_g"] = 1.0 + nrm((C,), 0.05)
    p["gn_b"] = nrm((C,), 0.05)
    p["conv_in_w"] = nrm((C, C, 1, 1))
    p["conv_in_b"] = nrm((C,), 0.05)
    p["ln1_g"] = 1.0 + nrm((C,), 0.05)
    p["ln1_b"] = nrm((C,), 0.05)
    p["attn1_in_w"] = nrm((3 * C, C))          # SelfAttention in_proj (no bias)
    p["attn1_out_w"] = nrm((C, C))
    p["attn1_out_b"] = nrm((C,), 0.05)
    p["ln2_g"] = 1.0 + nrm((C,), 0.05)
    p["ln2_b"] = nrm((C,), 0.05)
    p["attn2_q_w"] = nrm((C, C))               # CrossAttention projs (no bias)
    p["attn2_k_w"] = nrm((C, D_CTX))
    p["attn2_v_w"] = nrm((C, D_CTX))
    p["attn2_out_w"] = nrm((C, C))
    p["attn2_out_b"] = nrm((C,), 0.05)
    p["ln3_g"] = 1.0 + nrm((C,), 0.05)
    p["ln3_b"] = nrm((C,), 0.05)
    p["geglu1_w"] = nrm((8 * C, C))            # Linear(C, 4*C*2)
    p["geglu1_b"] = nrm((8 * C,), 0.05)
    p["geglu2_w"] = nrm((C, 4 * C))            # Linear(4*C, C)
    p["geglu2_b"] = nrm((C,), 0.05)
    p["conv_out_w"] = nrm((C, C, 1, 1))
    p["conv_out_b"] = nrm((C,), 0.05)
    return p


# --------------------------- pure-JAX reference --------------------------------
def _mha_ref(q, k, v):
    b, sq, c = q.shape
    sk = k.shape[1]
    dh = c // N_HEAD
    qh = q.reshape(b, sq, N_HEAD, dh).transpose(0, 2, 1, 3)
    kh = k.reshape(b, sk, N_HEAD, dh).transpose(0, 2, 1, 3)
    vh = v.reshape(b, sk, N_HEAD, dh).transpose(0, 2, 1, 3)
    wts = jnp.einsum("bhqd,bhkd->bhqk", qh, kh) / jnp.sqrt(float(dh))
    wts = jax.nn.softmax(wts, axis=-1)
    o = jnp.einsum("bhqk,bhkd->bhqd", wts, vh)
    return o.transpose(0, 2, 1, 3).reshape(b, sq, c)


def reference_forward(x_nchw, context, p):
    n, c, h, w = x_nchw.shape
    residue_long = x_nchw
    xr = x_nchw.reshape(n, N_GROUPS, c // N_GROUPS, h, w)
    mean = xr.mean(axis=(2, 3, 4), keepdims=True)
    var = ((xr - mean) ** 2).mean(axis=(2, 3, 4), keepdims=True)
    xr = (xr - mean) / jnp.sqrt(var + EPS_GN)
    x = xr.reshape(n, c, h, w) * p["gn_g"][None, :, None, None] + p["gn_b"][None, :, None, None]
    x = jnp.einsum("nchw,oc->nohw", x, p["conv_in_w"][:, :, 0, 0]) + p["conv_in_b"][None, :, None, None]
    x = x.reshape(n, c, h * w).transpose(0, 2, 1)

    def ln(v, g, b):
        m = v.mean(-1, keepdims=True)
        va = ((v - m) ** 2).mean(-1, keepdims=True)
        return (v - m) / jnp.sqrt(va + EPS_LN) * g + b

    res = x
    xl = ln(x, p["ln1_g"], p["ln1_b"])
    q, k, v = jnp.split(xl @ p["attn1_in_w"].T, 3, axis=-1)
    x = _mha_ref(q, k, v) @ p["attn1_out_w"].T + p["attn1_out_b"] + res

    res = x
    xl = ln(x, p["ln2_g"], p["ln2_b"])
    q = xl @ p["attn2_q_w"].T
    k = context @ p["attn2_k_w"].T
    v = context @ p["attn2_v_w"].T
    x = _mha_ref(q, k, v) @ p["attn2_out_w"].T + p["attn2_out_b"] + res

    res = x
    xl = ln(x, p["ln3_g"], p["ln3_b"])
    hcat = xl @ p["geglu1_w"].T + p["geglu1_b"]
    xa, gate = jnp.split(hcat, 2, axis=-1)
    xa = xa * jax.nn.gelu(gate, approximate=True)
    x = xa @ p["geglu2_w"].T + p["geglu2_b"] + res

    x = x.transpose(0, 2, 1).reshape(n, c, h, w)
    out = jnp.einsum("nchw,oc->nohw", x, p["conv_out_w"][:, :, 0, 0]) + p["conv_out_b"][None, :, None, None]
    return out + residue_long


# ----------------------------------- main ---------------------------------------
if __name__ == "__main__":
    key = jax.random.PRNGKey(0)
    kx, kc, kp = jax.random.split(key, 3)
    x = jax.random.normal(kx, (N_BATCH, C, H, W), jnp.float32)
    context = jax.random.normal(kc, (N_BATCH, L_CTX, D_CTX), jnp.float32)
    params = init_params(kp)

    out = unet_attention_block(x, context, params)
    out = jax.block_until_ready(out)

    ref = reference_forward(x, context, params)
    err = float(jnp.max(jnp.abs(out - ref)))
    assert out.shape == x.shape, (out.shape, x.shape)
    assert err < 5e-2, f"max abs err too large: {err}"
    print("KERNEL_OK")
</pallas_src>

<mosaic_0001>
module attributes {stable_mosaic.version = 11 : i64} {
  func.func @unet_attn_block_kernel(%arg0: i32, %arg1: memref<1x64x64xf32, #tpu.memory_space<vmem>>, %arg2: memref<1x8x64xbf16, #tpu.memory_space<vmem>>, %arg3: memref<64x64xf32, #tpu.memory_space<vmem>>, %arg4: memref<64x64xbf16, #tpu.memory_space<vmem>>, %arg5: memref<1x64xf32, #tpu.memory_space<vmem>>, %arg6: memref<64x192xbf16, #tpu.memory_space<vmem>>, %arg7: memref<1x192xf32, #tpu.memory_space<vmem>>, %arg8: memref<64x64xbf16, #tpu.memory_space<vmem>>, %arg9: memref<1x64xf32, #tpu.memory_space<vmem>>, %arg10: memref<64x64xbf16, #tpu.memory_space<vmem>>, %arg11: memref<1x64xf32, #tpu.memory_space<vmem>>, %arg12: memref<64x128xbf16, #tpu.memory_space<vmem>>, %arg13: memref<64x64xbf16, #tpu.memory_space<vmem>>, %arg14: memref<1x64xf32, #tpu.memory_space<vmem>>, %arg15: memref<64x512xbf16, #tpu.memory_space<vmem>>, %arg16: memref<1x512xf32, #tpu.memory_space<vmem>>, %arg17: memref<256x64xbf16, #tpu.memory_space<vmem>>, %arg18: memref<1x64xf32, #tpu.memory_space<vmem>>, %arg19: memref<64x64xbf16, #tpu.memory_space<vmem>>, %arg20: memref<1x64xf32, #tpu.memory_space<vmem>>, %arg21: memref<1x64x64xf32, #tpu.memory_space<vmem>>) attributes {dimension_semantics = [#tpu.dimension_semantics<parallel>], iteration_bounds = array<i64: 2>, scalar_prefetch = 0 : i64, scratch_operands = 0 : i64, tpu.core_type = #tpu.core_type<tc>, window_params = [{transform_indices = @transform_0, window_bounds = array<i64: 1, 64, 64>}, {transform_indices = @transform_1, window_bounds = array<i64: 1, 8, 64>}, {pipeline_mode = #tpu.pipeline_mode<synchronous>, transform_indices = @transform_2, window_bounds = array<i64: 64, 64>}, {pipeline_mode = #tpu.pipeline_mode<synchronous>, transform_indices = @transform_3, window_bounds = array<i64: 64, 64>}, {pipeline_mode = #tpu.pipeline_mode<synchronous>, transform_indices = @transform_4, window_bounds = array<i64: 1, 64>}, {pipeline_mode = #tpu.pipeline_mode<synchronous>, transform_indices = @transform_5, window_bounds = array<i64: 64, 192>}, {pipeline_mode = #tpu.pipeline_mode<synchronous>, transform_indices = @transform_6, window_bounds = array<i64: 1, 192>}, {pipeline_mode = #tpu.pipeline_mode<synchronous>, transform_indices = @transform_7, window_bounds = array<i64: 64, 64>}, {pipeline_mode = #tpu.pipeline_mode<synchronous>, transform_indices = @transform_8, window_bounds = array<i64: 1, 64>}, {pipeline_mode = #tpu.pipeline_mode<synchronous>, transform_indices = @transform_9, window_bounds = array<i64: 64, 64>}, {pipeline_mode = #tpu.pipeline_mode<synchronous>, transform_indices = @transform_10, window_bounds = array<i64: 1, 64>}, {pipeline_mode = #tpu.pipeline_mode<synchronous>, transform_indices = @transform_11, window_bounds = array<i64: 64, 128>}, {pipeline_mode = #tpu.pipeline_mode<synchronous>, transform_indices = @transform_12, window_bounds = array<i64: 64, 64>}, {pipeline_mode = #tpu.pipeline_mode<synchronous>, transform_indices = @transform_13, window_bounds = array<i64: 1, 64>}, {pipeline_mode = #tpu.pipeline_mode<synchronous>, transform_indices = @transform_14, window_bounds = array<i64: 64, 512>}, {pipeline_mode = #tpu.pipeline_mode<synchronous>, transform_indices = @transform_15, window_bounds = array<i64: 1, 512>}, {pipeline_mode = #tpu.pipeline_mode<synchronous>, transform_indices = @transform_16, window_bounds = array<i64: 256, 64>}, {pipeline_mode = #tpu.pipeline_mode<synchronous>, transform_indices = @transform_17, window_bounds = array<i64: 1, 64>}, {pipeline_mode = #tpu.pipeline_mode<synchronous>, transform_indices = @transform_18, window_bounds = array<i64: 64, 64>}, {pipeline_mode = #tpu.pipeline_mode<synchronous>, transform_indices = @transform_19, window_bounds = array<i64: 1, 64>}, {transform_indices = @transform_20, window_bounds = array<i64: 1, 64, 64>}]} {
    %c0 = arith.constant 0 : index
    %c0_0 = arith.constant 0 : index
    %c0_1 = arith.constant 0 : index
    %0 = vector.load %arg1[%c0, %c0_0, %c0_1] : memref<1x64x64xf32, #tpu.memory_space<vmem>>, vector<1x64x64xf32>
    %1 = vector.shape_cast %0 : vector<1x64x64xf32> to vector<64x64xf32>
    %2 = tpu.transpose %1, [1, 0] : vector<64x64xf32> -> vector<64x64xf32>
    %c0_2 = arith.constant 0 : index
    %c0_3 = arith.constant 0 : index
    %c0_4 = arith.constant 0 : index
    %3 = vector.load %arg2[%c0_2, %c0_3, %c0_4] : memref<1x8x64xbf16, #tpu.memory_space<vmem>>, vector<1x8x64xbf16>
    %4 = vector.shape_cast %3 : vector<1x8x64xbf16> to vector<8x64xbf16>
    %cst = arith.constant dense<0.000000e+00> : vector<64xf32>
    %5 = vector.multi_reduction <add>, %2, %cst [0] : vector<64x64xf32> to vector<64xf32>
    %6 = vector.shape_cast %5 : vector<64xf32> to vector<1x64xf32>
    %7 = arith.mulf %2, %2 : vector<64x64xf32>
    %cst_5 = arith.constant dense<0.000000e+00> : vector<64xf32>
    %8 = vector.multi_reduction <add>, %7, %cst_5 [0] : vector<64x64xf32> to vector<64xf32>
    %9 = vector.shape_cast %8 : vector<64xf32> to vector<1x64xf32>
    %10 = tpu.concatenate %6, %9 in 0 : vector<1x64xf32>, vector<1x64xf32> -> vector<2x64xf32>
    %c0_6 = arith.constant 0 : index
    %c0_7 = arith.constant 0 : index
    %11 = vector.load %arg3[%c0_6, %c0_7] : memref<64x64xf32, #tpu.memory_space<vmem>>, vector<64x64xf32>
    %cst_8 = arith.constant dense<0.000000e+00> : vector<2x64xf32>
    %12 = tpu.matmul %10, %11, %cst_8 {dimension_numbers = #tpu.dot_dimension_numbers<[1], [0], [0], [1], [0, 0, 1, 1], [], []>} : vector<2x64xf32>, vector<64x64xf32>, vector<2x64xf32> -> vector<2x64xf32>
    %13 = vector.extract_strided_slice %12 {offsets = [0, 0], sizes = [1, 64], strides = [1, 1]} : vector<2x64xf32> to vector<1x64xf32>
    %14 = vector.extract_strided_slice %12 {offsets = [1, 0], sizes = [1, 64], strides = [1, 1]} : vector<2x64xf32> to vector<1x64xf32>
    %15 = arith.mulf %13, %13 : vector<1x64xf32>
    %16 = arith.subf %14, %15 : vector<1x64xf32>
    %17 = vector.broadcast %13 : vector<1x64xf32> to vector<64x64xf32>
    %18 = arith.subf %2, %17 : vector<64x64xf32>
    %cst_9 = arith.constant 9.99999997E-7 : f32
    %19 = vector.broadcast %cst_9 : f32 to vector<1x64xf32>
    %20 = arith.addf %16, %19 : vector<1x64xf32>
    %21 = math.rsqrt %20 : vector<1x64xf32>
    %22 = vector.broadcast %21 : vector<1x64xf32> to vector<64x64xf32>
    %23 = arith.mulf %18, %22 : vector<64x64xf32>
    %24 = arith.truncf %23 : vector<64x64xf32> to vector<64x64xbf16>
    %c0_10 = arith.constant 0 : index
    %c0_11 = arith.constant 0 : index
    %25 = vector.load %arg4[%c0_10, %c0_11] : memref<64x64xbf16, #tpu.memory_space<vmem>>, vector<64x64xbf16>
    %cst_12 = arith.constant dense<0.000000e+00> : vector<64x64xf32>
    %26 = tpu.matmul %24, %25, %cst_12 {dimension_numbers = #tpu.dot_dimension_numbers<[1], [0], [0], [1], [0, 0, 1, 1], [], []>} : vector<64x64xbf16>, vector<64x64xbf16>, vector<64x64xf32> -> vector<64x64xf32>
    %c0_13 = arith.constant 0 : index
    %c0_14 = arith.constant 0 : index
    %27 = vector.load %arg5[%c0_13, %c0_14] : memref<1x64xf32, #tpu.memory_space<vmem>>, vector<1x64xf32>
    %28 = vector.broadcast %27 : vector<1x64xf32> to vector<64x64xf32>
    %29 = arith.addf %26, %28 : vector<64x64xf32>
    %cst_15 = arith.constant dense<0.000000e+00> : vector<64xf32>
    %30 = vector.multi_reduction <add>, %29, %cst_15 [1] : vector<64x64xf32> to vector<64xf32>
    %31 = vector.shape_cast %30 : vector<64xf32> to vector<64x1xf32>
    %cst_16 = arith.constant 6.400000e+01 : f32
    %32 = vector.broadcast %cst_16 : f32 to vector<64x1xf32>
    %33 = arith.divf %31, %32 : vector<64x1xf32>
    %34 = vector.broadcast %33 : vector<64x1xf32> to vector<64x64xf32>
    %35 = arith.subf %29, %34 : vector<64x64xf32>
    %36 = arith.mulf %35, %35 : vector<64x64xf32>
    %cst_17 = arith.constant dense<0.000000e+00> : vector<64xf32>
    %37 = vector.multi_reduction <add>, %36, %cst_17 [1] : vector<64x64xf32> to vector<64xf32>
    %38 = vector.shape_cast %37 : vector<64xf32> to vector<64x1xf32>
    %cst_18 = arith.constant 6.400000e+01 : f32
    %39 = vector.broadcast %cst_18 : f32 to vector<64x1xf32>
    %40 = arith.divf %38, %39 : vector<64x1xf32>
    %41 = vector.broadcast %33 : vector<64x1xf32> to vector<64x64xf32>
    %42 = arith.subf %29, %41 : vector<64x64xf32>
    %cst_19 = arith.constant 9.99999974E-6 : f32
    %43 = vector.broadcast %cst_19 : f32 to vector<64x1xf32>
    %44 = arith.addf %40, %43 : vector<64x1xf32>
    %45 = math.rsqrt %44 : vector<64x1xf32>
    %46 = vector.broadcast %45 : vector<64x1xf32> to vector<64x64xf32>
    %47 = arith.mulf %42, %46 : vector<64x64xf32>
    %48 = arith.truncf %47 : vector<64x64xf32> to vector<64x64xbf16>
    %c0_20 = arith.constant 0 : index
    %c0_21 = arith.constant 0 : index
    %49 = vector.load %arg6[%c0_20, %c0_21] : memref<64x192xbf16, #tpu.memory_space<vmem>>, vector<64x192xbf16>
    %cst_22 = arith.constant dense<0.000000e+00> : vector<64x192xf32>
    %50 = tpu.matmul %48, %49, %cst_22 {dimension_numbers = #tpu.dot_dimension_numbers<[1], [0], [0], [1], [0, 0, 1, 1], [], []>} : vector<64x64xbf16>, vector<64x192xbf16>, vector<64x192xf32> -> vector<64x192xf32>
    %c0_23 = arith.constant 0 : index
    %c0_24 = arith.constant 0 : index
    %51 = vector.load %arg7[%c0_23, %c0_24] : memref<1x192xf32, #tpu.memory_space<vmem>>, vector<1x192xf32>
    %52 = vector.broadcast %51 : vector<1x192xf32> to vector<64x192xf32>
    %53 = arith.addf %50, %52 : vector<64x192xf32>
    %54 = vector.extract_strided_slice %53 {offsets = [0, 0], sizes = [64, 64], strides = [1, 1]} : vector<64x192xf32> to vector<64x64xf32>
    %55 = vector.extract_strided_slice %53 {offsets = [0, 64], sizes = [64, 64], strides = [1, 1]} : vector<64x192xf32> to vector<64x64xf32>
    %56 = vector.extract_strided_slice %53 {offsets = [0, 128], sizes = [64, 64], strides = [1, 1]} : vector<64x192xf32> to vector<64x64xf32>
    %cst_25 = arith.constant 2.500000e-01 : f32
    %57 = vector.broadcast %cst_25 : f32 to vector<64x64xf32>
    %58 = arith.mulf %54, %57 : vector<64x64xf32>
    %59 = vector.shape_cast %58 : vector<64x64xf32> to vector<64x4x16xf32>
    %60 = tpu.transpose %59, [1, 0, 2] : vector<64x4x16xf32> -> vector<4x64x16xf32>
    %61 = arith.truncf %60 : vector<4x64x16xf32> to vector<4x64x16xbf16>
    %62 = vector.shape_cast %55 : vector<64x64xf32> to vector<64x4x16xf32>
    %63 = tpu.transpose %62, [1, 0, 2] : vector<64x4x16xf32> -> vector<4x64x16xf32>
    %64 = arith.truncf %63 : vector<4x64x16xf32> to vector<4x64x16xbf16>
    %65 = vector.shape_cast %56 : vector<64x64xf32> to vector<64x4x16xf32>
    %66 = tpu.transpose %65, [1, 0, 2] : vector<64x4x16xf32> -> vector<4x64x16xf32>
    %67 = arith.truncf %66 : vector<4x64x16xf32> to vector<4x64x16xbf16>
    "tpu.trace_start"() <{level = 10 : i32, message = "hqd,hkd->hqk"}> : () -> ()
    %cst_26 = arith.constant dense<0.000000e+00> : vector<4x64x64xf32>
    %68 = tpu.matmul %61, %64, %cst_26 {dimension_numbers = #tpu.dot_dimension_numbers<[2], [2], [1], [1], [0, 0, 0, 1, 1, 1], [0], [0]>} : vector<4x64x16xbf16>, vector<4x64x16xbf16>, vector<4x64x64xf32> -> vector<4x64x64xf32>
    "tpu.trace_stop"() : () -> ()
    %cst_27 = arith.constant dense<0xFF800000> : vector<4x64xf32>
    %69 = vector.multi_reduction <maximumf>, %68, %cst_27 [2] : vector<4x64x64xf32> to vector<4x64xf32>
    %70 = vector.shape_cast %69 : vector<4x64xf32> to vector<4x64x1xf32>
    %71 = vector.broadcast %70 : vector<4x64x1xf32> to vector<4x64x64xf32>
    %72 = arith.subf %68, %71 : vector<4x64x64xf32>
    %73 = math.exp %72 : vector<4x64x64xf32>
    %cst_28 = arith.constant dense<0.000000e+00> : vector<4x64xf32>
    %74 = vector.multi_reduction <add>, %73, %cst_28 [2] : vector<4x64x64xf32> to vector<4x64xf32>
    %75 = vector.shape_cast %74 : vector<4x64xf32> to vector<4x64x1xf32>
    %76 = tpu.reciprocal %75 {approx = true} : vector<4x64x1xf32> -> vector<4x64x1xf32>
    %77 = vector.broadcast %76 : vector<4x64x1xf32> to vector<4x64x64xf32>
    %78 = arith.mulf %73, %77 : vector<4x64x64xf32>
    %79 = arith.truncf %78 : vector<4x64x64xf32> to vector<4x64x64xbf16>
    "tpu.trace_start"() <{level = 10 : i32, message = "hqk,hkd->hqd"}> : () -> ()
    %cst_29 = arith.constant dense<0.000000e+00> : vector<4x64x16xf32>
    %80 = tpu.matmul %79, %67, %cst_29 {dimension_numbers = #tpu.dot_dimension_numbers<[2], [1], [1], [2], [0, 0, 0, 1, 1, 2], [0], [0]>} : vector<4x64x64xbf16>, vector<4x64x16xbf16>, vector<4x64x16xf32> -> vector<4x64x16xf32>
    "tpu.trace_stop"() : () -> ()
    %81 = tpu.transpose %80, [1, 0, 2] : vector<4x64x16xf32> -> vector<64x4x16xf32>
    %82 = vector.shape_cast %81 : vector<64x4x16xf32> to vector<64x64xf32>
    %83 = arith.truncf %82 : vector<64x64xf32> to vector<64x64xbf16>
    %c0_30 = arith.constant 0 : index
    %c0_31 = arith.constant 0 : index
    %84 = vector.load %arg8[%c0_30, %c0_31] : memref<64x64xbf16, #tpu.memory_space<vmem>>, vector<64x64xbf16>
    %cst_32 = arith.constant dense<0.000000e+00> : vector<64x64xf32>
    %85 = tpu.matmul %83, %84, %cst_32 {dimension_numbers = #tpu.dot_dimension_numbers<[1], [0], [0], [1], [0, 0, 1, 1], [], []>} : vector<64x64xbf16>, vector<64x64xbf16>, vector<64x64xf32> -> vector<64x64xf32>
    %c0_33 = arith.constant 0 : index
    %c0_34 = arith.constant 0 : index
    %86 = vector.load %arg9[%c0_33, %c0_34] : memref<1x64xf32, #tpu.memory_space<vmem>>, vector<1x64xf32>
    %87 = vector.broadcast %86 : vector<1x64xf32> to vector<64x64xf32>
    %88 = arith.addf %85, %87 : vector<64x64xf32>
    %89 = arith.addf %88, %29 : vector<64x64xf32>
    %cst_35 = arith.constant dense<0.000000e+00> : vector<64xf32>
    %90 = vector.multi_reduction <add>, %89, %cst_35 [1] : vector<64x64xf32> to vector<64xf32>
    %91 = vector.shape_cast %90 : vector<64xf32> to vector<64x1xf32>
    %cst_36 = arith.constant 6.400000e+01 : f32
    %92 = vector.broadcast %cst_36 : f32 to vector<64x1xf32>
    %93 = arith.divf %91, %92 : vector<64x1xf32>
    %94 = vector.broadcast %93 : vector<64x1xf32> to vector<64x64xf32>
    %95 = arith.subf %89, %94 : vector<64x64xf32>
    %96 = arith.mulf %95, %95 : vector<64x64xf32>
    %cst_37 = arith.constant dense<0.000000e+00> : vector<64xf32>
    %97 = vector.multi_reduction <add>, %96, %cst_37 [1] : vector<64x64xf32> to vector<64xf32>
    %98 = vector.shape_cast %97 : vector<64xf32> to vector<64x1xf32>
    %cst_38 = arith.constant 6.400000e+01 : f32
    %99 = vector.broadcast %cst_38 : f32 to vector<64x1xf32>
    %100 = arith.divf %98, %99 : vector<64x1xf32>
    %101 = vector.broadcast %93 : vector<64x1xf32> to vector<64x64xf32>
    %102 = arith.subf %89, %101 : vector<64x64xf32>
    %cst_39 = arith.constant 9.99999974E-6 : f32
    %103 = vector.broadcast %cst_39 : f32 to vector<64x1xf32>
    %104 = arith.addf %100, %103 : vector<64x1xf32>
    %105 = math.rsqrt %104 : vector<64x1xf32>
    %106 = vector.broadcast %105 : vector<64x1xf32> to vector<64x64xf32>
    %107 = arith.mulf %102, %106 : vector<64x64xf32>
    %108 = arith.truncf %107 : vector<64x64xf32> to vector<64x64xbf16>
    %c0_40 = arith.constant 0 : index
    %c0_41 = arith.constant 0 : index
    %109 = vector.load %arg10[%c0_40, %c0_41] : memref<64x64xbf16, #tpu.memory_space<vmem>>, vector<64x64xbf16>
    %cst_42 = arith.constant dense<0.000000e+00> : vector<64x64xf32>
    %110 = tpu.matmul %108, %109, %cst_42 {dimension_numbers = #tpu.dot_dimension_numbers<[1], [0], [0], [1], [0, 0, 1, 1], [], []>} : vector<64x64xbf16>, vector<64x64xbf16>, vector<64x64xf32> -> vector<64x64xf32>
    %c0_43 = arith.constant 0 : index
    %c0_44 = arith.constant 0 : index
    %111 = vector.load %arg11[%c0_43, %c0_44] : memref<1x64xf32, #tpu.memory_space<vmem>>, vector<1x64xf32>
    %112 = vector.broadcast %111 : vector<1x64xf32> to vector<64x64xf32>
    %113 = arith.addf %110, %112 : vector<64x64xf32>
    %c0_45 = arith.constant 0 : index
    %c0_46 = arith.constant 0 : index
    %114 = vector.load %arg12[%c0_45, %c0_46] : memref<64x128xbf16, #tpu.memory_space<vmem>>, vector<64x128xbf16>
    %cst_47 = arith.constant dense<0.000000e+00> : vector<8x128xf32>
    %115 = tpu.matmul %4, %114, %cst_47 {dimension_numbers = #tpu.dot_dimension_numbers<[1], [0], [0], [1], [0, 0, 1, 1], [], []>} : vector<8x64xbf16>, vector<64x128xbf16>, vector<8x128xf32> -> vector<8x128xf32>
    %116 = vector.extract_strided_slice %115 {offsets = [0, 0], sizes = [8, 64], strides = [1, 1]} : vector<8x128xf32> to vector<8x64xf32>
    %117 = vector.extract_strided_slice %115 {offsets = [0, 64], sizes = [8, 64], strides = [1, 1]} : vector<8x128xf32> to vector<8x64xf32>
    %cst_48 = arith.constant 2.500000e-01 : f32
    %118 = vector.broadcast %cst_48 : f32 to vector<64x64xf32>
    %119 = arith.mulf %113, %118 : vector<64x64xf32>
    %120 = vector.shape_cast %119 : vector<64x64xf32> to vector<64x4x16xf32>
    %121 = tpu.transpose %120, [1, 0, 2] : vector<64x4x16xf32> -> vector<4x64x16xf32>
    %122 = arith.truncf %121 : vector<4x64x16xf32> to vector<4x64x16xbf16>
    %123 = vector.shape_cast %116 : vector<8x64xf32> to vector<8x4x16xf32>
    %124 = tpu.transpose %123, [1, 0, 2] : vector<8x4x16xf32> -> vector<4x8x16xf32>
    %125 = arith.truncf %124 : vector<4x8x16xf32> to vector<4x8x16xbf16>
    %126 = vector.shape_cast %117 : vector<8x64xf32> to vector<8x4x16xf32>
    %127 = tpu.transpose %126, [1, 0, 2] : vector<8x4x16xf32> -> vector<4x8x16xf32>
    %128 = arith.truncf %127 : vector<4x8x16xf32> to vector<4x8x16xbf16>
    "tpu.trace_start"() <{level = 10 : i32, message = "hqd,hkd->hqk"}> : () -> ()
    %cst_49 = arith.constant dense<0.000000e+00> : vector<4x64x8xf32>
    %129 = tpu.matmul %122, %125, %cst_49 {dimension_numbers = #tpu.dot_dimension_numbers<[2], [2], [1], [1], [0, 0, 0, 1, 1, 1], [0], [0]>} : vector<4x64x16xbf16>, vector<4x8x16xbf16>, vector<4x64x8xf32> -> vector<4x64x8xf32>
    "tpu.trace_stop"() : () -> ()
    %cst_50 = arith.constant dense<0xFF800000> : vector<4x64xf32>
    %130 = vector.multi_reduction <maximumf>, %129, %cst_50 [2] : vector<4x64x8xf32> to vector<4x64xf32>
    %131 = vector.shape_cast %130 : vector<4x64xf32> to vector<4x64x1xf32>
    %132 = vector.broadcast %131 : vector<4x64x1xf32> to vector<4x64x8xf32>
    %133 = arith.subf %129, %132 : vector<4x64x8xf32>
    %134 = math.exp %133 : vector<4x64x8xf32>
    %cst_51 = arith.constant dense<0.000000e+00> : vector<4x64xf32>
    %135 = vector.multi_reduction <add>, %134, %cst_51 [2] : vector<4x64x8xf32> to vector<4x64xf32>
    %136 = vector.shape_cast %135 : vector<4x64xf32> to vector<4x64x1xf32>
    %137 = tpu.reciprocal %136 {approx = true} : vector<4x64x1xf32> -> vector<4x64x1xf32>
    %138 = vector.broadcast %137 : vector<4x64x1xf32> to vector<4x64x8xf32>
    %139 = arith.mulf %134, %138 : vector<4x64x8xf32>
    %140 = arith.truncf %139 : vector<4x64x8xf32> to vector<4x64x8xbf16>
    "tpu.trace_start"() <{level = 10 : i32, message = "hqk,hkd->hqd"}> : () -> ()
    %cst_52 = arith.constant dense<0.000000e+00> : vector<4x64x16xf32>
    %141 = tpu.matmul %140, %128, %cst_52 {dimension_numbers = #tpu.dot_dimension_numbers<[2], [1], [1], [2], [0, 0, 0, 1, 1, 2], [0], [0]>} : vector<4x64x8xbf16>, vector<4x8x16xbf16>, vector<4x64x16xf32> -> vector<4x64x16xf32>
    "tpu.trace_stop"() : () -> ()
    %142 = tpu.transpose %141, [1, 0, 2] : vector<4x64x16xf32> -> vector<64x4x16xf32>
    %143 = vector.shape_cast %142 : vector<64x4x16xf32> to vector<64x64xf32>
    %144 = arith.truncf %143 : vector<64x64xf32> to vector<64x64xbf16>
    %c0_53 = arith.constant 0 : index
    %c0_54 = arith.constant 0 : index
    %145 = vector.load %arg13[%c0_53, %c0_54] : memref<64x64xbf16, #tpu.memory_space<vmem>>, vector<64x64xbf16>
    %cst_55 = arith.constant dense<0.000000e+00> : vector<64x64xf32>
    %146 = tpu.matmul %144, %145, %cst_55 {dimension_numbers = #tpu.dot_dimension_numbers<[1], [0], [0], [1], [0, 0, 1, 1], [], []>} : vector<64x64xbf16>, vector<64x64xbf16>, vector<64x64xf32> -> vector<64x64xf32>
    %c0_56 = arith.constant 0 : index
    %c0_57 = arith.constant 0 : index
    %147 = vector.load %arg14[%c0_56, %c0_57] : memref<1x64xf32, #tpu.memory_space<vmem>>, vector<1x64xf32>
    %148 = vector.broadcast %147 : vector<1x64xf32> to vector<64x64xf32>
    %149 = arith.addf %146, %148 : vector<64x64xf32>
    %150 = arith.addf %149, %89 : vector<64x64xf32>
    %cst_58 = arith.constant dense<0.000000e+00> : vector<64xf32>
    %151 = vector.multi_reduction <add>, %150, %cst_58 [1] : vector<64x64xf32> to vector<64xf32>
    %152 = vector.shape_cast %151 : vector<64xf32> to vector<64x1xf32>
    %cst_59 = arith.constant 6.400000e+01 : f32
    %153 = vector.broadcast %cst_59 : f32 to vector<64x1xf32>
    %154 = arith.divf %152, %153 : vector<64x1xf32>
    %155 = vector.broadcast %154 : vector<64x1xf32> to vector<64x64xf32>
    %156 = arith.subf %150, %155 : vector<64x64xf32>
    %157 = arith.mulf %156, %156 : vector<64x64xf32>
    %cst_60 = arith.constant dense<0.000000e+00> : vector<64xf32>
    %158 = vector.multi_reduction <add>, %157, %cst_60 [1] : vector<64x64xf32> to vector<64xf32>
    %159 = vector.shape_cast %158 : vector<64xf32> to vector<64x1xf32>
    %cst_61 = arith.constant 6.400000e+01 : f32
    %160 = vector.broadcast %cst_61 : f32 to vector<64x1xf32>
    %161 = arith.divf %159, %160 : vector<64x1xf32>
    %162 = vector.broadcast %154 : vector<64x1xf32> to vector<64x64xf32>
    %163 = arith.subf %150, %162 : vector<64x64xf32>
    %cst_62 = arith.constant 9.99999974E-6 : f32
    %164 = vector.broadcast %cst_62 : f32 to vector<64x1xf32>
    %165 = arith.addf %161, %164 : vector<64x1xf32>
    %166 = math.rsqrt %165 : vector<64x1xf32>
    %167 = vector.broadcast %166 : vector<64x1xf32> to vector<64x64xf32>
    %168 = arith.mulf %163, %167 : vector<64x64xf32>
    %169 = arith.truncf %168 : vector<64x64xf32> to vector<64x64xbf16>
    %c0_63 = arith.constant 0 : index
    %c0_64 = arith.constant 0 : index
    %170 = vector.load %arg15[%c0_63, %c0_64] : memref<64x512xbf16, #tpu.memory_space<vmem>>, vector<64x512xbf16>
    %cst_65 = arith.constant dense<0.000000e+00> : vector<64x512xf32>
    %171 = tpu.matmul %169, %170, %cst_65 {dimension_numbers = #tpu.dot_dimension_numbers<[1], [0], [0], [1], [0, 0, 1, 1], [], []>} : vector<64x64xbf16>, vector<64x512xbf16>, vector<64x512xf32> -> vector<64x512xf32>
    %c0_66 = arith.constant 0 : index
    %c0_67 = arith.constant 0 : index
    %172 = vector.load %arg16[%c0_66, %c0_67] : memref<1x512xf32, #tpu.memory_space<vmem>>, vector<1x512xf32>
    %173 = vector.broadcast %172 : vector<1x512xf32> to vector<64x512xf32>
    %174 = arith.addf %171, %173 : vector<64x512xf32>
    %175 = vector.extract_strided_slice %174 {offsets = [0, 0], sizes = [64, 256], strides = [1, 1]} : vector<64x512xf32> to vector<64x256xf32>
    %176 = vector.extract_strided_slice %174 {offsets = [0, 256], sizes = [64, 256], strides = [1, 1]} : vector<64x512xf32> to vector<64x256xf32>
    %177 = arith.mulf %176, %176 : vector<64x256xf32>
    %178 = arith.mulf %176, %177 : vector<64x256xf32>
    %cst_68 = arith.constant 4.471500e-02 : f32
    %179 = vector.broadcast %cst_68 : f32 to vector<64x256xf32>
    %180 = arith.mulf %179, %178 : vector<64x256xf32>
    %181 = arith.addf %176, %180 : vector<64x256xf32>
    %cst_69 = arith.constant 0.797884583 : f32
    %182 = vector.broadcast %cst_69 : f32 to vector<64x256xf32>
    %183 = arith.mulf %182, %181 : vector<64x256xf32>
    %184 = math.tanh %183 : vector<64x256xf32>
    %cst_70 = arith.constant 1.000000e+00 : f32
    %185 = vector.broadcast %cst_70 : f32 to vector<64x256xf32>
    %186 = arith.addf %185, %184 : vector<64x256xf32>
    %cst_71 = arith.constant 5.000000e-01 : f32
    %187 = vector.broadcast %cst_71 : f32 to vector<64x256xf32>
    %188 = arith.mulf %187, %186 : vector<64x256xf32>
    %189 = arith.mulf %176, %188 : vector<64x256xf32>
    %190 = arith.mulf %175, %189 : vector<64x256xf32>
    %191 = arith.truncf %190 : vector<64x256xf32> to vector<64x256xbf16>
    %c0_72 = arith.constant 0 : index
    %c0_73 = arith.constant 0 : index
    %192 = vector.load %arg17[%c0_72, %c0_73] : memref<256x64xbf16, #tpu.memory_space<vmem>>, vector<256x64xbf16>
    %cst_74 = arith.constant dense<0.000000e+00> : vector<64x64xf32>
    %193 = tpu.matmul %191, %192, %cst_74 {dimension_numbers = #tpu.dot_dimension_numbers<[1], [0], [0], [1], [0, 0, 1, 1], [], []>} : vector<64x256xbf16>, vector<256x64xbf16>, vector<64x64xf32> -> vector<64x64xf32>
    %c0_75 = arith.constant 0 : index
    %c0_76 = arith.constant 0 : index
    %194 = vector.load %arg18[%c0_75, %c0_76] : memref<1x64xf32, #tpu.memory_space<vmem>>, vector<1x64xf32>
    %195 = vector.broadcast %194 : vector<1x64xf32> to vector<64x64xf32>
    %196 = arith.addf %193, %195 : vector<64x64xf32>
    %197 = arith.addf %196, %150 : vector<64x64xf32>
    %198 = arith.truncf %197 : vector<64x64xf32> to vector<64x64xbf16>
    %c0_77 = arith.constant 0 : index
    %c0_78 = arith.constant 0 : index
    %199 = vector.load %arg19[%c0_77, %c0_78] : memref<64x64xbf16, #tpu.memory_space<vmem>>, vector<64x64xbf16>
    %cst_79 = arith.constant dense<0.000000e+00> : vector<64x64xf32>
    %200 = tpu.matmul %198, %199, %cst_79 {dimension_numbers = #tpu.dot_dimension_numbers<[1], [0], [0], [1], [0, 0, 1, 1], [], []>} : vector<64x64xbf16>, vector<64x64xbf16>, vector<64x64xf32> -> vector<64x64xf32>
    %c0_80 = arith.constant 0 : index
    %c0_81 = arith.constant 0 : index
    %201 = vector.load %arg20[%c0_80, %c0_81] : memref<1x64xf32, #tpu.memory_space<vmem>>, vector<1x64xf32>
    %202 = vector.broadcast %201 : vector<1x64xf32> to vector<64x64xf32>
    %203 = arith.addf %200, %202 : vector<64x64xf32>
    %204 = arith.addf %203, %2 : vector<64x64xf32>
    %205 = tpu.transpose %204, [1, 0] : vector<64x64xf32> -> vector<64x64xf32>
    %c0_82 = arith.constant 0 : index
    %c0_83 = arith.constant 0 : index
    %c0_84 = arith.constant 0 : index
    %206 = vector.load %arg21[%c0_82, %c0_83, %c0_84] : memref<1x64x64xf32, #tpu.memory_space<vmem>>, vector<1x64x64xf32>
    %207 = vector.shape_cast %206 : vector<1x64x64xf32> to vector<64x64xf32>
    %208 = vector.shape_cast %205 : vector<64x64xf32> to vector<1x64x64xf32>
    tpu.vector_store %arg21[%c0_82, %c0_83, %c0_84], %208 {strides = array<i32>} : memref<1x64x64xf32, #tpu.memory_space<vmem>>, vector<1x64x64xf32>,
    return
  }
  func.func @transform_0(%arg0: i32) -> (i32, i32, i32) {
    %c0_i32 = arith.constant 0 : i32
    %c0_i32_0 = arith.constant 0 : i32
    %c0_i32_1 = arith.constant 0 : i32
    return %arg0, %c0_i32, %c0_i32_0 : i32, i32, i32
  }
  func.func @transform_1(%arg0: i32) -> (i32, i32, i32) {
    %c0_i32 = arith.constant 0 : i32
    %c0_i32_0 = arith.constant 0 : i32
    %c0_i32_1 = arith.constant 0 : i32
    return %arg0, %c0_i32, %c0_i32_0 : i32, i32, i32
  }
  func.func @transform_2(%arg0: i32) -> (i32, i32) {
    %c0_i32 = arith.constant 0 : i32
    %c0_i32_0 = arith.constant 0 : i32
    %c0_i32_1 = arith.constant 0 : i32
    return %c0_i32, %c0_i32_0 : i32, i32
  }
  func.func @transform_3(%arg0: i32) -> (i32, i32) {
    %c0_i32 = arith.constant 0 : i32
    %c0_i32_0 = arith.constant 0 : i32
    %c0_i32_1 = arith.constant 0 : i32
    return %c0_i32, %c0_i32_0 : i32, i32
  }
  func.func @transform_4(%arg0: i32) -> (i32, i32) {
    %c0_i32 = arith.constant 0 : i32
    %c0_i32_0 = arith.constant 0 : i32
    %c0_i32_1 = arith.constant 0 : i32
    return %c0_i32, %c0_i32_0 : i32, i32
  }
  func.func @transform_5(%arg0: i32) -> (i32, i32) {
    %c0_i32 = arith.constant 0 : i32
    %c0_i32_0 = arith.constant 0 : i32
    %c0_i32_1 = arith.constant 0 : i32
    return %c0_i32, %c0_i32_0 : i32, i32
  }
  func.func @transform_6(%arg0: i32) -> (i32, i32) {
    %c0_i32 = arith.constant 0 : i32
    %c0_i32_0 = arith.constant 0 : i32
    %c0_i32_1 = arith.constant 0 : i32
    return %c0_i32, %c0_i32_0 : i32, i32
  }
  func.func @transform_7(%arg0: i32) -> (i32, i32) {
    %c0_i32 = arith.constant 0 : i32
    %c0_i32_0 = arith.constant 0 : i32
    %c0_i32_1 = arith.constant 0 : i32
    return %c0_i32, %c0_i32_0 : i32, i32
  }
  func.func @transform_8(%arg0: i32) -> (i32, i32) {
    %c0_i32 = arith.constant 0 : i32
    %c0_i32_0 = arith.constant 0 : i32
    %c0_i32_1 = arith.constant 0 : i32
    return %c0_i32, %c0_i32_0 : i32, i32
  }
  func.func @transform_9(%arg0: i32) -> (i32, i32) {
    %c0_i32 = arith.constant 0 : i32
    %c0_i32_0 = arith.constant 0 : i32
    %c0_i32_1 = arith.constant 0 : i32
    return %c0_i32, %c0_i32_0 : i32, i32
  }
  func.func @transform_10(%arg0: i32) -> (i32, i32) {
    %c0_i32 = arith.constant 0 : i32
    %c0_i32_0 = arith.constant 0 : i32
    %c0_i32_1 = arith.constant 0 : i32
    return %c0_i32, %c0_i32_0 : i32, i32
  }
  func.func @transform_11(%arg0: i32) -> (i32, i32) {
    %c0_i32 = arith.constant 0 : i32
    %c0_i32_0 = arith.constant 0 : i32
    %c0_i32_1 = arith.constant 0 : i32
    return %c0_i32, %c0_i32_0 : i32, i32
  }
  func.func @transform_12(%arg0: i32) -> (i32, i32) {
    %c0_i32 = arith.constant 0 : i32
    %c0_i32_0 = arith.constant 0 : i32
    %c0_i32_1 = arith.constant 0 : i32
    return %c0_i32, %c0_i32_0 : i32, i32
  }
  func.func @transform_13(%arg0: i32) -> (i32, i32) {
    %c0_i32 = arith.constant 0 : i32
    %c0_i32_0 = arith.constant 0 : i32
    %c0_i32_1 = arith.constant 0 : i32
    return %c0_i32, %c0_i32_0 : i32, i32
  }
  func.func @transform_14(%arg0: i32) -> (i32, i32) {
    %c0_i32 = arith.constant 0 : i32
    %c0_i32_0 = arith.constant 0 : i32
    %c0_i32_1 = arith.constant 0 : i32
    return %c0_i32, %c0_i32_0 : i32, i32
  }
  func.func @transform_15(%arg0: i32) -> (i32, i32) {
    %c0_i32 = arith.constant 0 : i32
    %c0_i32_0 = arith.constant 0 : i32
    %c0_i32_1 = arith.constant 0 : i32
    return %c0_i32, %c0_i32_0 : i32, i32
  }
  func.func @transform_16(%arg0: i32) -> (i32, i32) {
    %c0_i32 = arith.constant 0 : i32
    %c0_i32_0 = arith.constant 0 : i32
    %c0_i32_1 = arith.constant 0 : i32
    return %c0_i32, %c0_i32_0 : i32, i32
  }
  func.func @transform_17(%arg0: i32) -> (i32, i32) {
    %c0_i32 = arith.constant 0 : i32
    %c0_i32_0 = arith.constant 0 : i32
    %c0_i32_1 = arith.constant 0 : i32
    return %c0_i32, %c0_i32_0 : i32, i32
  }
  func.func @transform_18(%arg0: i32) -> (i32, i32) {
    %c0_i32 = arith.constant 0 : i32
    %c0_i32_0 = arith.constant 0 : i32
    %c0_i32_1 = arith.constant 0 : i32
    return %c0_i32, %c0_i32_0 : i32, i32
  }
  func.func @transform_19(%arg0: i32) -> (i32, i32) {
    %c0_i32 = arith.constant 0 : i32
    %c0_i32_0 = arith.constant 0 : i32
    %c0_i32_1 = arith.constant 0 : i32
    return %c0_i32, %c0_i32_0 : i32, i32
  }
  func.func @transform_20(%arg0: i32) -> (i32, i32, i32) {
    %c0_i32 = arith.constant 0 : i32
    %c0_i32_0 = arith.constant 0 : i32
    %c0_i32_1 = arith.constant 0 : i32
    return %arg0, %c0_i32, %c0_i32_0 : i32, i32, i32
  }
}

</mosaic_0001>

<bundles_post_ra>
// kernel: tpu_custom_call.1
= control target key start
LH: loop header
LB: loop body
LE: loop exit
PB: predicated region body
PF: predicated region fallthrough
CT: control target
= control target key end

     0   :  { %s19567_s0 = inlined_call_operand.vmem [shape: f32[2,64,64], index: 0, kind: input, shape index: {}]   ;;  %s19568_s1 = inlined_call_operand.hbm [shape: bf16[2,8,64], index: 1, kind: input, shape index: {}]   ;;  %s19569_s2 = inlined_call_operand.vmem [shape: f32[64,64], index: 2, kind: input, shape index: {}]   ;;  %s19570_s3 = inlined_call_operand.hbm [shape: bf16[64,64], index: 3, kind: input, shape index: {}]   ;;  %s19571_s4 = inlined_call_operand.hbm [shape: f32[1,64], index: 4, kind: input, shape index: {}]   ;;  %s19572_s5 = inlined_call_operand.hbm [shape: bf16[64,192], index: 5, kind: input, shape index: {}]   ;;  %s19573_s6 = inlined_call_operand.hbm [shape: f32[1,192], index: 6, kind: input, shape index: {}]   ;;  %s19574_s7 = inlined_call_operand.hbm [shape: bf16[64,64], index: 7, kind: input, shape index: {}]   ;;  %s19575_s8 = inlined_call_operand.hbm [shape: f32[1,64], index: 8, kind: input, shape index: {}]   ;;  %s19576_s9 = inlined_call_operand.vmem [shape: bf16[64,64], index: 9, kind: input, shape index: {}]   ;;  %s19577_s10 = inlined_call_operand.hbm [shape: f32[1,64], index: 10, kind: input, shape index: {}]   ;;  %s19578_s11 = inlined_call_operand.hbm [shape: bf16[64,128], index: 11, kind: input, shape index: {}]   ;;  %s19579_s12 = inlined_call_operand.hbm [shape: bf16[64,64], index: 12, kind: input, shape index: {}]   ;;  %s19580_s13 = inlined_call_operand.hbm [shape: f32[1,64], index: 13, kind: input, shape index: {}]   ;;  %s19581_s14 = inlined_call_operand.hbm [shape: bf16[64,512], index: 14, kind: input, shape index: {}]   ;;  %s19582_s15 = inlined_call_operand.hbm [shape: f32[1,512], index: 15, kind: input, shape index: {}]   ;;  %s19583_s16 = inlined_call_operand.vmem [shape: bf16[256,64], index: 16, kind: input, shape index: {}]   ;;  %s19584_s17 = inlined_call_operand.hbm [shape: f32[1,64], index: 17, kind: input, shape index: {}]   ;;  %s19585_s18 = inlined_call_operand.vmem [shape: bf16[64,64], index: 18, kind: input, shape index: {}]   ;;  %s19586_s19 = inlined_call_operand.vmem [shape: f32[1,64], index: 19, kind: input, shape index: {}]   ;;  %s19587_s20 = inlined_call_operand.hbm [shape: f32[2,64,64], index: 20, kind: output, shape index: {}]  }
   0x1   :  { %19662 = sst [smem:[#allocation72_spill]] %s19567_s0 }
   0x2   :  { %19663 = sst [smem:[#allocation73_spill]] %s19568_s1 }
   0x3   :  { %19664 = sst [smem:[#allocation74_spill]] %s19569_s2 }
   0x4   :  { %19665 = sst [smem:[#allocation75_spill]] %s19570_s3 }
   0x5   :  { %19666 = sst [smem:[#allocation76_spill]] %s19571_s4 }
   0x6   :  { %19667 = sst [smem:[#allocation77_spill]] %s19572_s5 }
   0x7   :  { %19668 = sst [smem:[#allocation78_spill]] %s19573_s6 }
   0x8   :  { %19669 = sst [smem:[#allocation79_spill]] %s19574_s7 }
   0x9   :  { %19670 = sst [smem:[#allocation80_spill]] %s19575_s8 }
   0xa   :  { %19671 = sst [smem:[#allocation81_spill]] %s19576_s9 }
   0xb   :  { %19672 = sst [smem:[#allocation82_spill]] %s19583_s16 }
   0xc   :  { %19673 = sst [smem:[#allocation83_spill]] %s19585_s18 }
   0xd   :  { %19674 = sst [smem:[#allocation84_spill]] %s19586_s19 }
   0xe   :  { %19675 = sst [smem:[#allocation85_spill]] %s19587_s20 }
   0xf   :  { %25 = vsyncpa [#allocation3], 0 }
  0x10   :  { %27 = vsyncpa [#allocation3 + $0x1], 0 }
  0x11   :  { %28 = vsyncpa [#allocation6], 0 }
  0x12   :  { %29 = vsyncpa [#allocation9], 0 }
  0x13   :  { %30 = vsyncpa [#allocation12], 0 }
  0x14   :  { %31 = vsyncpa [#allocation15], 0 }
  0x15   :  { %32 = vsyncpa [#allocation18], 0 }
  0x16   :  { %33 = vsyncpa [#allocation21], 0 }
  0x17   :  { %34 = vsyncpa [#allocation24], 0 }
  0x18   :  { %35 = vsyncpa [#allocation4], 0 }
  0x19   :  { %37 = vsyncpa [#allocation4 + $0x1], 0  ;;  %s14941_s1 = smov 0   ;;  %s14943_s22 = smov 0  }
  0x1a   :  { %s14945_s23 = smov 0   ;;  %s14947_s24 = smov 0  }
  0x1b LB: > { %19676 = sst [smem:[#allocation35_spill]] %s14786_s1  ;;  %s14800_s2 = smov [#allocation5]   ;;  %s14798_s24 = sphi %s14947_s24, %s19817_s24   ;;  %s14794_s23 = sphi %s14945_s23, %s19816_s23   ;;  %s14790_s22 = sphi %s14943_s22, %s19815_s22   ;;  %s14786_s1 = sphi %s14941_s1, %s19814_s1  }
  0x1c   : > { %s519_s25 = sshll.u32 %s14800_s2, 4  ;;  %s14962_s3 = sadd.s32 4294967295, %s14798_s24   ;;  %s14967_s25 = int_to_ptr.vmem [resolvable:$true] %s519_s25 }
  0x1d   : > { %19677 = sst [smem:[#allocation36_spill]] %s14962_s3  ;;  %p12715_p0 = scmp.ge.s32.totalorder %s14798_s24, 1 }
  0x1e   : > { %p19602_p1 = scmp.eq.s32.totalorder %s14962_s3, 0  ;;  %p504_p2 = scmp.lt.s32.totalorder %s14798_s24, 3 }
  0x1f   : > { %s14801_s27 = smov [#allocation8]   ;;  %s14802_s29 = smov [#allocation11]  }
  0x20   : > { %p14969_p3 = pnand %p12715_p0, %p504_p2  ;;  %s543_s28 = sshll.u32 %s14801_s27, 4  ;;  %s14982_s28 = int_to_ptr.vmem [resolvable:$true] %s543_s28 }
  0x21   : > { %s14984_s30 = sshll.u32 %s14802_s29, 4  ;;  %s19681_s2 = sld [smem:[#allocation75_spill]]  ;;  %s568_s30 = int_to_ptr.vmem [resolvable:$true] %s14984_s30 }
  0x22   : > { %s19678_s26 = scalar_select %p14969_p3, 1, 0 }
  0x23   : > { %p13634_p5 = pneg %p14969_p3 }
  0x24   : > { %19679 = sst [smem:[#allocation37_spill]] %s19678_s26 }
  0x25   : > { %p14978_p6 = pnand %p13634_p5, %p19602_p1 }
  0x27   : > { %s14310_s20 = scalar_lea.hbm %s19681_s2, 512  ;;  %p14994_p8 = pneg %p14978_p6 }
  0x28   : > { %p14311_p7 = scmp.ne.s32.totalorder %s19681_s2, %s14310_s20  ;;  %p14317_p11 = scmp.lt.u32.totalorder %s14310_s20, %s19681_s2 }
  0x2a   : > { %p14313_p9 = pnand %p14994_p8, %p14311_p7 }
  0x2c   : > { %p14314_p10 = pneg %p14313_p9 }
  0x2e   : > { %p14319_p12 = pnand %p14317_p11, %p14314_p10 }
  0x30   : > { %14322 = shalt.err (!%p14319_p12)
}
  0x31   : > { %s14323_s18 = scalar_lea.vmem %s14967_s25, 512  ;;  %p14331_p5 = scmp.lt.s32.totalorder %s14967_s25, %s14967_s25 }
  0x32   : > { %p14324_p13 = scmp.ne.s32.totalorder %s14967_s25, %s14323_s18  ;;  %p14332_p4 = scmp.lt.s32.totalorder %s14323_s18, %s14323_s18 }
  0x34   : > { %p14326_p0 = pnand %p14324_p13, %p14994_p8  ;;  %p14333_p7 = por %p14332_p4, %p14331_p5 }
  0x36   : > { %p14327_p2 = pneg %p14326_p0 }
  0x38   : > { %p14334_p9 = pnand %p14333_p7, %p14327_p2 }
  0x3a   : > { %14337 = shalt.err (!%p14334_p9)
}
  0x3b   : > { %s19600_s19 = smov 64   ;;  %s19605_s16 = smov 4  }
  0x3c   : > { %13637 = dma.hbm_to_vmem [thread:$0]  (!%p14978_p6), %s19681_s2, 512, %s14967_s25, [#allocation6], %s19600_s19, %s19600_s19, %s19605_s16  }
  0x3d   : > { %s19683_s5 = sld [smem:[#allocation77_spill]] }
  0x43   : > { %s14338_s18 = scalar_lea.hbm %s19683_s5, 1024 }
  0x44   : > { %p14339_p4 = scmp.ne.s32.totalorder %s19683_s5, %s14338_s18  ;;  %p14345_p12 = scmp.lt.u32.totalorder %s14338_s18, %s19683_s5 }
  0x46   : > { %p14341_p10 = pnand %p14339_p4, %p14994_p8 }
  0x48   : > { %p14342_p11 = pneg %p14341_p10 }
  0x4a   : > { %p14347_p13 = pnand %p14345_p12, %p14342_p11 }
  0x4c   : > { %14350 = shalt.err (!%p14347_p13)
}
  0x4d   : > { %s14351_s25 = scalar_lea.vmem %s14982_s28, 1024  ;;  %p14359_p7 = scmp.lt.s32.totalorder %s14982_s28, %s14982_s28 }
  0x4e   : > { %p14352_p0 = scmp.ne.s32.totalorder %s14982_s28, %s14351_s25  ;;  %p14360_p9 = scmp.lt.s32.totalorder %s14351_s25, %s14351_s25 }
  0x50   : > { %p14354_p2 = pnand %p14352_p0, %p14994_p8  ;;  %p14361_p4 = por %p14360_p9, %p14359_p7 }
  0x52   : > { %p14355_p5 = pneg %p14354_p2 }
  0x54   : > { %p14362_p10 = pnand %p14361_p4, %p14355_p5 }
  0x56   : > { %14365 = shalt.err (!%p14362_p10)
}
  0x57   : > { %s14805_s9 = smov 128   ;;  %s14806_s1 = smov 8  }
  0x58   : > { %13643 = dma.hbm_to_vmem [thread:$0]  (!%p14978_p6), %s19683_s5, 1024, %s14982_s28, [#allocation9], %s14805_s9, %s14805_s9, %s14806_s1  }
  0x59   : > { %s19684_s7 = sld [smem:[#allocation79_spill]] }
  0x5f   : > { %s14366_s21 = scalar_lea.hbm %s19684_s7, 512 }
  0x60   : > { %p14367_p11 = scmp.ne.s32.totalorder %s19684_s7, %s14366_s21  ;;  %p14373_p0 = scmp.lt.u32.totalorder %s14366_s21, %s19684_s7 }
  0x62   : > { %p14369_p12 = pnand %p14367_p11, %p14994_p8 }
  0x64   : > { %p14370_p13 = pneg %p14369_p12 }
  0x66   : > { %p14375_p2 = pnand %p14373_p0, %p14370_p13 }
  0x68   : > { %14378 = shalt.err (!%p14375_p2)
}
  0x69   : > { %s14379_s3 = scalar_lea.vmem %s568_s30, 512  ;;  %p14387_p4 = scmp.lt.s32.totalorder %s568_s30, %s568_s30 }
  0x6a   : > { %p14380_p5 = scmp.ne.s32.totalorder %s568_s30, %s14379_s3  ;;  %p14388_p10 = scmp.lt.s32.totalorder %s14379_s3, %s14379_s3 }
  0x6c   : > { %p14382_p7 = pnand %p14380_p5, %p14994_p8  ;;  %p14389_p1 = por %p14388_p10, %p14387_p4 }
  0x6e   : > { %p14383_p9 = pneg %p14382_p7 }
  0x70   : > { %p14390_p3 = pnand %p14389_p1, %p14383_p9 }
  0x72   : > { %14393 = shalt.err (!%p14390_p3)
}
  0x73   : > { %s19685_s28 = smov 64   ;;  %s14807_s1 = smov [#allocation14]  }
  0x74   : > { %13649 = dma.hbm_to_vmem [thread:$0]  (!%p14978_p6), %s19684_s7, 512, %s568_s30, [#allocation12], %s19685_s28, %s19685_s28, %s19605_s16  }
  0x75   : > { %s595_s26 = sshll.u32 %s14807_s1, 4  ;;  %s14808_s20 = smov [#allocation17]   ;;  %s596_s26 = int_to_ptr.vmem [resolvable:$true] %s595_s26 }
  0x76   : > { %s618_s0 = sshll.u32 %s14808_s20, 4  ;;  %s14394_s18 = scalar_lea.hbm %s19577_s10, 16  ;;  %s619_s0 = int_to_ptr.vmem [resolvable:$true] %s618_s0 }
  0x77   : > { %p14395_p1 = scmp.ne.s32.totalorder %s19577_s10, %s14394_s18  ;;  %p14401_p12 = scmp.lt.u32.totalorder %s14394_s18, %s19577_s10 }
  0x79   : > { %p14397_p3 = pnand %p14395_p1, %p14994_p8 }
  0x7b   : > { %p14398_p11 = pneg %p14397_p3 }
  0x7d   : > { %p14403_p13 = pnand %p14401_p12, %p14398_p11 }
  0x7f   : > { %14406 = shalt.err (!%p14403_p13)
}
  0x80   : > { %s14407_s30 = scalar_lea.vmem %s596_s26, 16  ;;  %s14414_s9 = scalar_lea.vmem %s596_s26, 32 }
  0x81   : > { %p14408_p0 = scmp.ne.s32.totalorder %s596_s26, %s14407_s30  ;;  %p14415_p7 = scmp.lt.s32.totalorder %s596_s26, %s596_s26 }
  0x82   : > { %p14416_p9 = scmp.lt.s32.totalorder %s14414_s9, %s14407_s30 }
  0x83   : > { %p14410_p2 = pnand %p14408_p0, %p14994_p8 }
  0x84   : > { %p14417_p4 = por %p14416_p9, %p14415_p7 }
  0x85   : > { %p14411_p5 = pneg %p14410_p2 }
  0x87   : > { %p14418_p10 = pnand %p14417_p4, %p14411_p5 }
  0x89   : > { %14421 = shalt.err (!%p14418_p10)
}
  0x8a   : > { %13655 = dma.hbm_to_vmem [thread:$0]  (!%p14978_p6), %s19577_s10, 16, %s596_s26, [#allocation15]  }
  0x8b   : > { %s14422_s29 = scalar_lea.hbm %s19579_s12, 512 }
  0x8c   : > { %p14423_p1 = scmp.ne.s32.totalorder %s19579_s12, %s14422_s29  ;;  %p14429_p12 = scmp.lt.u32.totalorder %s14422_s29, %s19579_s12 }
  0x8e   : > { %p14425_p3 = pnand %p14423_p1, %p14994_p8 }
  0x90   : > { %p14426_p11 = pneg %p14425_p3 }
  0x92   : > { %p14431_p13 = pnand %p14429_p12, %p14426_p11 }
  0x94   : > { %14434 = shalt.err (!%p14431_p13)
}
  0x95   : > { %s14435_s30 = scalar_lea.vmem %s619_s0, 512  ;;  %p14443_p7 = scmp.lt.s32.totalorder %s619_s0, %s619_s0 }
  0x96   : > { %p14436_p0 = scmp.ne.s32.totalorder %s619_s0, %s14435_s30  ;;  %p14444_p9 = scmp.lt.s32.totalorder %s14435_s30, %s14435_s30 }
  0x98   : > { %p14438_p2 = pnand %p14436_p0, %p14994_p8  ;;  %p14445_p4 = por %p14444_p9, %p14443_p7 }
  0x9a   : > { %p14439_p5 = pneg %p14438_p2 }
  0x9c   : > { %p14446_p10 = pnand %p14445_p4, %p14439_p5 }
  0x9e   : > { %14449 = shalt.err (!%p14446_p10)
}
  0x9f   : > { %13661 = dma.hbm_to_vmem [thread:$0]  (!%p14978_p6), %s19579_s12, 512, %s619_s0, [#allocation18], %s19685_s28, %s19685_s28, %s19605_s16  }
  0xa0   : > { %s14809_s1 = smov [#allocation20]   ;;  %s14450_s29 = scalar_lea.hbm %s19581_s14, 2048 }
  0xa1   : > { %s642_s20 = sshll.u32 %s14809_s1, 4  ;;  %p14451_p1 = scmp.ne.s32.totalorder %s19581_s14, %s14450_s29  ;;  %s643_s20 = int_to_ptr.vmem [resolvable:$true] %s642_s20 }
  0xa2   : > { %p14457_p12 = scmp.lt.u32.totalorder %s14450_s29, %s19581_s14 }
  0xa3   : > { %p14453_p3 = pnand %p14451_p1, %p14994_p8 }
  0xa5   : > { %p14454_p11 = pneg %p14453_p3 }
  0xa7   : > { %p14459_p13 = pnand %p14457_p12, %p14454_p11 }
  0xa9   : > { %14462 = shalt.err (!%p14459_p13)
}
  0xaa   : > { %s14463_s0 = scalar_lea.vmem %s643_s20, 2048  ;;  %p14471_p7 = scmp.lt.s32.totalorder %s643_s20, %s643_s20 }
  0xab   : > { %p14464_p0 = scmp.ne.s32.totalorder %s643_s20, %s14463_s0  ;;  %p14472_p9 = scmp.lt.s32.totalorder %s14463_s0, %s14463_s0 }
  0xad   : > { %p14466_p2 = pnand %p14464_p0, %p14994_p8  ;;  %p14473_p4 = por %p14472_p9, %p14471_p7 }
  0xaf   : > { %p14467_p5 = pneg %p14466_p2 }
  0xb1   : > { %p14474_p10 = pnand %p14473_p4, %p14467_p5 }
  0xb3   : > { %14477 = shalt.err (!%p14474_p10)
}
  0xb4   : > { %s14810_s30 = smov 256   ;;  %s14811_s26 = smov 16  }
  0xb5   : > { %13667 = dma.hbm_to_vmem [thread:$0]  (!%p14978_p6), %s19581_s14, 2048, %s643_s20, [#allocation21], %s14810_s30, %s14810_s30, %s14811_s26  }
  0xb6   : > { %s14812_s2 = smov [#allocation7]   ;;  %s14813_s29 = smov [#allocation10]  }
  0xb7   : > { %s533_s21 = sshll.u32 %s14812_s2, 4  ;;  %s557_s18 = sshll.u32 %s14813_s29, 4  ;;  %s534_s21 = int_to_ptr.vmem [resolvable:$true] %s533_s21  ;;  %s15120_s18 = int_to_ptr.vmem [resolvable:$true] %s557_s18 }
  0xb8   : > { %s19686_s19 = sld [smem:[#allocation76_spill]] }
  0xbe   : > { %s14478_s0 = scalar_lea.hbm %s19686_s19, 16 }
  0xbf   : > { %p14479_p1 = scmp.ne.s32.totalorder %s19686_s19, %s14478_s0  ;;  %p14485_p12 = scmp.lt.u32.totalorder %s14478_s0, %s19686_s19 }
  0xc1   : > { %p14481_p3 = pnand %p14479_p1, %p14994_p8 }
  0xc3   : > { %p14482_p11 = pneg %p14481_p3 }
  0xc5   : > { %p14487_p13 = pnand %p14485_p12, %p14482_p11 }
  0xc7   : > { %14490 = shalt.err (!%p14487_p13)
}
  0xc8   : > { %s14491_s30 = scalar_lea.vmem %s534_s21, 16  ;;  %s14498_s26 = scalar_lea.vmem %s534_s21, 32 }
  0xc9   : > { %p14492_p0 = scmp.ne.s32.totalorder %s534_s21, %s14491_s30  ;;  %p14499_p7 = scmp.lt.s32.totalorder %s534_s21, %s534_s21 }
  0xca   : > { %p14500_p9 = scmp.lt.s32.totalorder %s14498_s26, %s14491_s30 }
  0xcb   : > { %p14494_p2 = pnand %p14492_p0, %p14994_p8 }
  0xcc   : > { %p14501_p4 = por %p14500_p9, %p14499_p7 }
  0xcd   : > { %p14495_p5 = pneg %p14494_p2 }
  0xcf   : > { %p14502_p10 = pnand %p14501_p4, %p14495_p5 }
  0xd1   : > { %14505 = shalt.err (!%p14502_p10)
}
  0xd2   : > { %13640 = dma.hbm_to_vmem [thread:$0]  (!%p14978_p6), %s19686_s19, 16, %s534_s21, [#allocation6]  }
  0xd3   : > { %s19687_s6 = sld [smem:[#allocation78_spill]] }
  0xd9   : > { %s14506_s29 = scalar_lea.hbm %s19687_s6, 32 }
  0xda   : > { %p14507_p1 = scmp.ne.s32.totalorder %s19687_s6, %s14506_s29  ;;  %p14513_p12 = scmp.lt.u32.totalorder %s14506_s29, %s19687_s6 }
  0xdc   : > { %p14509_p3 = pnand %p14507_p1, %p14994_p8 }
  0xde   : > { %p14510_p11 = pneg %p14509_p3 }
  0xe0   : > { %p14515_p13 = pnand %p14513_p12, %p14510_p11 }
  0xe2   : > { %14518 = shalt.err (!%p14515_p13)
}
  0xe3   : > { %s14519_s21 = scalar_lea.vmem %s15120_s18, 32  ;;  %p14527_p7 = scmp.lt.s32.totalorder %s15120_s18, %s15120_s18 }
  0xe4   : > { %p14520_p0 = scmp.ne.s32.totalorder %s15120_s18, %s14519_s21  ;;  %p14528_p9 = scmp.lt.s32.totalorder %s14519_s21, %s14519_s21 }
  0xe6   : > { %p14522_p2 = pnand %p14520_p0, %p14994_p8  ;;  %p14529_p4 = por %p14528_p9, %p14527_p7 }
  0xe8   : > { %p14523_p5 = pneg %p14522_p2 }
  0xea   : > { %p14530_p10 = pnand %p14529_p4, %p14523_p5 }
  0xec   : > { %14533 = shalt.err (!%p14530_p10)
}
  0xed   : > { %13646 = dma.hbm_to_vmem [thread:$0]  (!%p14978_p6), %s19687_s6, 32, %s15120_s18, [#allocation9]  }
  0xee   : > { %s14814_s26 = smov [#allocation13]   ;;  %s14815_s16 = smov [#allocation16]  }
  0xef   : > { %s581_s5 = sshll.u32 %s14814_s26, 4  ;;  %s605_s1 = sshll.u32 %s14815_s16, 4  ;;  %s582_s5 = int_to_ptr.vmem [resolvable:$true] %s581_s5  ;;  %s15163_s1 = int_to_ptr.vmem [resolvable:$true] %s605_s1 }
  0xf0   : > { %s19688_s8 = sld [smem:[#allocation80_spill]] }
  0xf6   : > { %s14534_s25 = scalar_lea.hbm %s19688_s8, 16 }
  0xf7   : > { %p14535_p1 = scmp.ne.s32.totalorder %s19688_s8, %s14534_s25  ;;  %p14541_p12 = scmp.lt.u32.totalorder %s14534_s25, %s19688_s8 }
  0xf9   : > { %p14537_p3 = pnand %p14535_p1, %p14994_p8 }
  0xfb   : > { %p14538_p11 = pneg %p14537_p3 }
  0xfd   : > { %p14543_p13 = pnand %p14541_p12, %p14538_p11 }
  0xff   : > { %14546 = shalt.err (!%p14543_p13)
}
 0x100   : > { %s14547_s21 = scalar_lea.vmem %s582_s5, 16  ;;  %s14554_s20 = scalar_lea.vmem %s582_s5, 32 }
 0x101   : > { %p14548_p0 = scmp.ne.s32.totalorder %s582_s5, %s14547_s21  ;;  %p14555_p7 = scmp.lt.s32.totalorder %s582_s5, %s582_s5 }
 0x102   : > { %p14556_p9 = scmp.lt.s32.totalorder %s14554_s20, %s14547_s21 }
 0x103   : > { %p14550_p2 = pnand %p14548_p0, %p14994_p8 }
 0x104   : > { %p14557_p4 = por %p14556_p9, %p14555_p7 }
 0x105   : > { %p14551_p5 = pneg %p14550_p2 }
 0x107   : > { %p14558_p10 = pnand %p14557_p4, %p14551_p5 }
 0x109   : > { %14561 = shalt.err (!%p14558_p10)
}
 0x10a   : > { %13652 = dma.hbm_to_vmem [thread:$0]  (!%p14978_p6), %s19688_s8, 16, %s582_s5, [#allocation12]  }
 0x10b   : > { %s14562_s29 = scalar_lea.hbm %s19578_s11, 512 }
 0x10c   : > { %p14563_p1 = scmp.ne.s32.totalorder %s19578_s11, %s14562_s29  ;;  %p14569_p12 = scmp.lt.u32.totalorder %s14562_s29, %s19578_s11 }
 0x10e   : > { %p14565_p3 = pnand %p14563_p1, %p14994_p8 }
 0x110   : > { %p14566_p11 = pneg %p14565_p3 }
 0x112   : > { %p14571_p13 = pnand %p14569_p12, %p14566_p11 }
 0x114   : > { %14574 = shalt.err (!%p14571_p13)
}
 0x115   : > { %s14575_s5 = scalar_lea.vmem %s15163_s1, 512  ;;  %p14583_p7 = scmp.lt.s32.totalorder %s15163_s1, %s15163_s1 }
 0x116   : > { %p14576_p0 = scmp.ne.s32.totalorder %s15163_s1, %s14575_s5  ;;  %p14584_p9 = scmp.lt.s32.totalorder %s14575_s5, %s14575_s5 }
 0x118   : > { %p14578_p2 = pnand %p14576_p0, %p14994_p8  ;;  %p14585_p4 = por %p14584_p9, %p14583_p7 }
 0x11a   : > { %p14579_p5 = pneg %p14578_p2 }
 0x11c   : > { %p14586_p10 = pnand %p14585_p4, %p14579_p5 }
 0x11e   : > { %14589 = shalt.err (!%p14586_p10)
}
 0x11f   : > { %s19689_s18 = smov 4   ;;  %s14816_s30 = smov [#allocation19]  }
 0x120   : > { %13658 = dma.hbm_to_vmem [thread:$0]  (!%p14978_p6), %s19578_s11, 512, %s15163_s1, [#allocation15], %s19685_s28, %s19685_s28, %s19689_s18  }
 0x121   : > { %s632_s26 = sshll.u32 %s14816_s30, 4  ;;  %s14817_s16 = smov [#allocation22]   ;;  %s633_s26 = int_to_ptr.vmem [resolvable:$true] %s632_s26 }
 0x122   : > { %s656_s2 = sshll.u32 %s14817_s16, 4  ;;  %s14590_s3 = scalar_lea.hbm %s19580_s13, 16  ;;  %s15209_s2 = int_to_ptr.vmem [resolvable:$true] %s656_s2 }
 0x123   : > { %p14591_p1 = scmp.ne.s32.totalorder %s19580_s13, %s14590_s3  ;;  %p14597_p12 = scmp.lt.u32.totalorder %s14590_s3, %s19580_s13 }
 0x125   : > { %p14593_p3 = pnand %p14591_p1, %p14994_p8 }
 0x127   : > { %p14594_p11 = pneg %p14593_p3 }
 0x129   : > { %p14599_p13 = pnand %p14597_p12, %p14594_p11 }
 0x12b   : > { %14602 = shalt.err (!%p14599_p13)
}
 0x12c   : > { %s14603_s1 = scalar_lea.vmem %s633_s26, 16  ;;  %s14610_s18 = scalar_lea.vmem %s633_s26, 32 }
 0x12d   : > { %p14604_p0 = scmp.ne.s32.totalorder %s633_s26, %s14603_s1  ;;  %p14611_p7 = scmp.lt.s32.totalorder %s633_s26, %s633_s26 }
 0x12e   : > { %p14612_p9 = scmp.lt.s32.totalorder %s14610_s18, %s14603_s1 }
 0x12f   : > { %p14606_p2 = pnand %p14604_p0, %p14994_p8 }
 0x130   : > { %p14613_p4 = por %p14612_p9, %p14611_p7 }
 0x131   : > { %p14607_p5 = pneg %p14606_p2 }
 0x133   : > { %p14614_p10 = pnand %p14613_p4, %p14607_p5 }
 0x135   : > { %14617 = shalt.err (!%p14614_p10)
}
 0x136   : > { %13664 = dma.hbm_to_vmem [thread:$0]  (!%p14978_p6), %s19580_s13, 16, %s633_s26, [#allocation18]  }
 0x137   : > { %s14618_s29 = scalar_lea.hbm %s19582_s15, 64 }
 0x138   : > { %p14619_p1 = scmp.ne.s32.totalorder %s19582_s15, %s14618_s29  ;;  %p14625_p12 = scmp.lt.u32.totalorder %s14618_s29, %s19582_s15 }
 0x13a   : > { %p14621_p3 = pnand %p14619_p1, %p14994_p8 }
 0x13c   : > { %p14622_p11 = pneg %p14621_p3 }
 0x13e   : > { %p14627_p13 = pnand %p14625_p12, %p14622_p11 }
 0x140   : > { %14630 = shalt.err (!%p14627_p13)
}
 0x141   : > { %s14631_s26 = scalar_lea.vmem %s15209_s2, 64  ;;  %p14639_p7 = scmp.lt.s32.totalorder %s15209_s2, %s15209_s2 }
 0x142   : > { %p14632_p0 = scmp.ne.s32.totalorder %s15209_s2, %s14631_s26  ;;  %p14640_p9 = scmp.lt.s32.totalorder %s14631_s26, %s14631_s26 }
 0x144   : > { %p14634_p2 = pnand %p14632_p0, %p14994_p8  ;;  %p14641_p4 = por %p14640_p9, %p14639_p7 }
 0x146   : > { %p14635_p5 = pneg %p14634_p2 }
 0x148   : > { %p14642_p10 = pnand %p14641_p4, %p14635_p5 }
 0x14a   : > { %14645 = shalt.err (!%p14642_p10)
}
 0x14b   : > { %13670 = dma.hbm_to_vmem [thread:$0]  (!%p14978_p6), %s19582_s15, 64, %s15209_s2, [#allocation21]  }
 0x14c   : > { %s14818_s1 = smov [#allocation23]   ;;  %s14646_s30 = scalar_lea.hbm %s19584_s17, 16 }
 0x14d   : > { %s670_s18 = sshll.u32 %s14818_s1, 4  ;;  %p14647_p1 = scmp.ne.s32.totalorder %s19584_s17, %s14646_s30  ;;  %s671_s18 = int_to_ptr.vmem [resolvable:$true] %s670_s18 }
 0x14e   : > { %p14653_p12 = scmp.lt.u32.totalorder %s14646_s30, %s19584_s17 }
 0x14f   : > { %p14649_p3 = pnand %p14647_p1, %p14994_p8 }
 0x151   : > { %p14650_p11 = pneg %p14649_p3 }
 0x153   : > { %p14655_p13 = pnand %p14653_p12, %p14650_p11 }
 0x155   : > { %14658 = shalt.err (!%p14655_p13)
}
 0x156   : > { %s14659_s2 = scalar_lea.vmem %s671_s18, 16  ;;  %s14666_s0 = scalar_lea.vmem %s671_s18, 32 }
 0x157   : > { %p14660_p0 = scmp.ne.s32.totalorder %s671_s18, %s14659_s2  ;;  %p14667_p7 = scmp.lt.s32.totalorder %s671_s18, %s671_s18 }
 0x158   : > { %p14668_p9 = scmp.lt.s32.totalorder %s14666_s0, %s14659_s2 }
 0x159   : > { %p14662_p2 = pnand %p14660_p0, %p14994_p8 }
 0x15a   : > { %p14669_p4 = por %p14668_p9, %p14667_p7 }
 0x15b   : > { %p14663_p5 = pneg %p14662_p2 }
 0x15d   : > { %p14670_p10 = pnand %p14669_p4, %p14663_p5 }
 0x15f   : > { %14673 = shalt.err (!%p14670_p10)
}
 0x160   : > { %s19690_s27 = sld [smem:[#allocation35_spill]]  ;;  %s19691_s5 = sld [smem:[#allocation36_spill]] }
 0x161   : > { %13673 = dma.hbm_to_vmem [thread:$0]  (!%p14978_p6), %s19584_s17, 16, %s671_s18, [#allocation24]  }
 0x162   : > { %s12714_s28 = sadd.s32 4294967294, %s14798_s24   ;;  %s15272_s4 = sadd.s32 1, %s14798_s24  }
 0x163   : > { %s76_s1 = sadd.s32 1, %s14794_s23  ;;  %s73_s21 = ssub.s32 %s14798_s24, %s15272_s4 }
 0x164   : > { %p83_p8 = scmp.ne.s32.totalorder %s14794_s23, %s14790_s22  ;;  %p74_p1 = scmp.eq.s32.totalorder %s73_s21, 0 }
 0x165   : > { %p84_p3 = scmp.eq.s32.totalorder %s14798_s24, 0  ;;  %p497_p5 = scmp.eq.s32.totalorder %s12714_s28, 1 }
 0x166   : > { %p89_p11 = scmp.ne.s32.totalorder %s14790_s22, %s19690_s27  ;;  %p491_p12 = scmp.eq.s32.totalorder %s19691_s5, 1 }
 0x167   : > { %s15284_s20 = scalar_select %p74_p1, %s14794_s23, %s76_s1  }
 0x168   : > { %p85_p13 = por %p84_p3, %p83_p8  ;;  %p19692_p0 = scmp.eq.s32.totalorder %s19691_s5, 0 }
 0x169   : > { %p15292_p6 = por %p491_p12, %p83_p8  ;;  %p13695_p7 = scmp.lt.s32.totalorder %s14798_s24, 2 }
 0x16a   : > { %p15288_p2 = por %p19692_p0, %p89_p11  ;;  %s695_s16 = sand.u32 1, %s14794_s23  }
 0x16b   : > { %s19694_s18 = scalar_select %p15292_p6, 1, 0 }
 0x16c   : > { %p15298_p9 = por %p497_p5, %p89_p11  ;;  %s12730_s25 = sshll.u32 %s695_s16, 2 }
 0x16d   : > { %s12731_s3 = sshll.u32 %s14798_s24, 6  ;;  %s19696_s9 = sld [smem:[#allocation73_spill]] }
 0x16e   : > { %s19695_s29 = scalar_select %p15298_p9, 1, 0 }
 0x16f   : > { %s699_s27 = scalar_lea.vmem [#allocation2], %s12730_s25  ;;  %p15308_p4 = pnand %p13695_p7, %p85_p13 }
 0x170   : > { %s706_s5 = sshll.u32 %s699_s27, 4  ;;  %s696_s1 = scalar_lea.sflag [#allocation3], %s695_s16  ;;  %s15312_s5 = int_to_ptr.vmem [resolvable:$true] %s706_s5 }
 0x171   : > { %p14676_p8 = pneg %p15308_p4 }
 0x173   : > { %s15306_s26 = scalar_lea.hbm %s19696_s9, %s12731_s3  ;;  %s14679_s2 = scalar_lea.hbm %s19696_s9, 128 }
 0x174   : > { %s14674_s21 = scalar_lea.hbm %s15306_s26, 64  ;;  %p14680_p11 = scmp.lt.u32.totalorder %s15306_s26, %s19696_s9 }
 0x175   : > { %p14675_p10 = scmp.ne.s32.totalorder %s15306_s26, %s14674_s21  ;;  %p14681_p12 = scmp.lt.u32.totalorder %s14679_s2, %s14674_s21 }
 0x176   : > { %p14683_p0 = scmp.lt.u32.totalorder %s14674_s21, %s15306_s26 }
 0x177   : > { %p14677_p1 = pnand %p14676_p8, %p14675_p10  ;;  %p14682_p13 = por %p14681_p12, %p14680_p11 }
 0x179   : > { %p14678_p3 = pneg %p14677_p1  ;;  %p14684_p5 = por %p14683_p0, %p14682_p13 }
 0x17b   : > { %p14685_p7 = pnand %p14684_p5, %p14678_p3 }
 0x17d   : > { %14688 = shalt.err (!%p14685_p7)
}
 0x17e   : > { %s14689_s16 = scalar_lea.vmem %s15312_s5, 64  ;;  %s14819_s3 = smov [#allocation2]  }
 0x17f   : > { %p14690_p10 = scmp.ne.s32.totalorder %s15312_s5, %s14689_s16  ;;  %s14694_s25 = sshll.u32 %s14819_s3, 4  ;;  %s14695_s25 = int_to_ptr.vmem [resolvable:$false] %s14694_s25 }
 0x180   : > { %s14696_s0 = scalar_lea.vmem %s14695_s25, 128  ;;  %p14697_p6 = scmp.lt.s32.totalorder %s15312_s5, %s14695_s25 }
 0x181   : > { %p14692_p1 = pnand %p14690_p10, %p14676_p8  ;;  %p14698_p11 = scmp.lt.s32.totalorder %s14696_s0, %s14689_s16 }
 0x183   : > { %p14693_p9 = pneg %p14692_p1  ;;  %p14699_p12 = por %p14698_p11, %p14697_p6 }
 0x185   : > { %p14700_p13 = pnand %p14699_p12, %p14693_p9 }
 0x187   : > { %14703 = shalt.err (!%p14700_p13)
}
 0x188   : > { %13677 = dma.hbm_to_vmem [thread:$0]  (!%p15308_p4), %s15306_s26, 64, %s15312_s5, %s696_s1  }
 0x189   : > { %s19698_s21 = sld [smem:[#allocation37_spill]] }
 0x18f   : > { %p19699_p3 = scmp.ne.s32.totalorder %s19698_s21, 0 }
 0x191   : > { %715 = sbr.rel (%p19699_p3) target bundleno = 6288 (0x1890), region = 100 }
 0x198   : > { %s15342_s2 = sand.u32 1, %s14790_s22  }
 0x199   : > { %s12733_s27 = sshll.u32 %s15342_s2, 2  ;;  %s718_s3 = scalar_lea.sflag [#allocation3], %s15342_s2 }
 0x19a   : > { %s15346_s16 = scalar_lea.vmem [#allocation2], %s12733_s27 }
 0x19b   : > { %14749 = dma.done.wait (%p15288_p2), %s718_s3, 64  }
 0x19c   : > { %14751 = vsyncadd (%p15288_p2), %s718_s3, 4294967232  ;;  %s19700_s28 = sld [smem:[#allocation36_spill]] }
 0x1a2   : > { %p19701_p6 = scmp.eq.s32.totalorder %s19700_s28, 0 }
 0x1a4   : > { %14753 = dma.done.wait (%p19701_p6), [#allocation6], 528   ;;  %p19702_p9 = pmov %p19701_p6 }
 0x1a5   : > { %p19703_p4 = pmov %p19701_p6 }
 0x1a6   : > { %14755 = vsyncadd (%p19702_p9), [#allocation6], 4294966768 }
 0x1a7   : > { %14757 = dma.done.wait (%p19703_p4), [#allocation9], 1056   ;;  %p19704_p8 = pmov %p19703_p4 }
 0x1a8   : > { %p19705_p0 = pmov %p19703_p4 }
 0x1a9   : > { %14759 = vsyncadd (%p19704_p8), [#allocation9], 4294966240 }
 0x1aa   : > { %14761 = dma.done.wait (%p19705_p0), [#allocation12], 528   ;;  %p19706_p5 = pmov %p19705_p0 }
 0x1ab   : > { %p19707_p2 = pmov %p19705_p0 }
 0x1ac   : > { %14763 = vsyncadd (%p19706_p5), [#allocation12], 4294966768 }
 0x1ad   : > { %14765 = dma.done.wait (%p19707_p2), [#allocation15], 528   ;;  %p19708_p7 = pmov %p19705_p0 }
 0x1ae   : > { %p19709_p10 = pmov %p19705_p0 }
 0x1af   : > { %14767 = vsyncadd (%p19708_p7), [#allocation15], 4294966768 }
 0x1b0   : > { %14769 = dma.done.wait (%p19709_p10), [#allocation18], 528   ;;  %p19710_p1 = pmov %p19705_p0 }
 0x1b1   : > { %p19711_p11 = pmov %p19705_p0 }
 0x1b2   : > { %14771 = vsyncadd (%p19710_p1), [#allocation18], 4294966768 }
 0x1b3   : > { %14773 = dma.done.wait (%p19711_p11), [#allocation21], 2112   ;;  %p19712_p12 = pmov %p19705_p0 }
 0x1b4   : > { %p19713_p13 = pmov %p19705_p0 }
 0x1b5   : > { %14775 = vsyncadd (%p19712_p12), [#allocation21], 4294965184 }
 0x1b6   : > { %14777 = dma.done.wait (%p19713_p13), [#allocation24], 16   ;;  %p19714_p3 = pmov %p19705_p0 }
 0x1b7   : > { %p835_p6 = scmp.lt.s32.totalorder %s19700_s28, 1  ;;  %s19715_s25 = sld [smem:[#allocation72_spill]]  ;;  %v14820_v11 = vmov 0.0|0.0   ;;  %vm14821_vm0 = vmmov 0   ;;  %v19609_v19 = vmov 0.0   ;;  %vm882_vm1 = vcmask 523264  }
 0x1b8   : > { %14779 = vsyncadd (%p19714_p3), [#allocation24], 4294967280  ;;  %s19716_s3 = sld [smem:[#allocation74_spill]]  ;;  %13542 = vmatprep.subr.bf16.mxu0 %v14820_v11  ;;  %13239 = vmatprep.mubr.msk.f32.mxu0 %vm14821_vm0, %v19609_v19  ;;  %vm933_vm2 = vcmask 1040384   ;;  %s19657_s6 = smov 64   ;;  %vm5053_vm3 = vcmask 130048  }
 0x1b9   : > { %s836_s30 = scalar_select %p835_p6, %s19700_s28, 1  ;;  %vm7278_vm4 = vcmask 261120   ;;  %vm7287_vm5 = vcmask 392192   ;;  %vm9537_vm6 = vcmask 64512   ;;  %vm9918_vm7 = vcmask 1043456  }
 0x1ba   : > { %s14825_s7 = smov 112   ;;  %s14826_s8 = smov 96  }
 0x1bb   : > { %s13023_s26 = sshll.u32 %s836_s30, 6  ;;  %s14827_s1 = smov 80  }
 0x1bc   : > { %s19651_s21 = smov 48   ;;  %s19783_s30 = sld [smem:[#allocation81_spill]] }
 0x1bd   : > { %s839_s0 = scalar_lea.vmem %s19715_s25, %s13023_s26  ;;  %s19655_s25 = smov 32  }
 0x1be   : > { %v841_v0 = vld [vmem:[%s839_s0] sm:$0xff]  ;;  %v842_v1 = vld [vmem:[%s839_s0 + $0x8] sm:$0xff]  ;;  %v843_v2 = vld [vmem:[%s839_s0 + $0x10] sm:$0xff]  ;;  %s19796_s26 = sld [smem:[#allocation83_spill]]  ;;  %p19810_p4 = scmp.ne.s32.totalorder %s19694_s18, 0 }
 0x1bf   : > { %849 = vxpose.xlu0.b32.start [1/8] (short) (narrow) %v841_v0, 64  ;;  %v844_v3 = vld [vmem:[%s839_s0 + $0x18] sm:$0xff]  ;;  %v845_v4 = vld [vmem:[%s839_s0 + $0x20] sm:$0xff]  ;;  %v846_v5 = vld [vmem:[%s839_s0 + $0x28] sm:$0xff] }
 0x1c0   : > { %v847_v6 = vld [vmem:[%s839_s0 + $0x30] sm:$0xff]  ;;  %v848_v7 = vld [vmem:[%s839_s0 + $0x38] sm:$0xff]  ;;  %v935_v8 = vld [vmem:[%s19716_s3] sm:$0xff]  ;;  %s19653_s0 = smov 16  }
 0x1c1   : > { %v936_v9 = vld [vmem:[%s19716_s3 + $0x8] sm:$0xff]  ;;  %v937_v12 = vld [vmem:[%s19716_s3 + $0x10] sm:$0xff]  ;;  %v938_v13 = vld [vmem:[%s19716_s3 + $0x18] sm:$0xff] }
 0x1c2   : > { %v13543_v10 = vpack.c.bf16 %v936_v9, %v935_v8  ;;  %v13546_v14 = vpack.c.bf16 %v938_v13, %v937_v12  ;;  %v939_v15 = vld [vmem:[%s19716_s3 + $0x20] sm:$0xff]  ;;  %v940_v16 = vld [vmem:[%s19716_s3 + $0x28] sm:$0xff]  ;;  %v941_v17 = vld [vmem:[%s19716_s3 + $0x30] sm:$0xff] }
 0x1c3   : > { %850 = vxpose.xlu0.b32.cont [2/8] (short) (narrow) %v842_v1, 64  ;;  %v942_v18 = vld [vmem:[%s19716_s3 + $0x38] sm:$0xff]  ;;  %v13549_v20 = vpack.c.bf16 %v940_v16, %v939_v15  ;;  %s13024_s3 = sshll.u32 %s19700_s28, 10  ;;  %s14833_s28 = smov [#allocation25]  }
 0x1c4   : > { %13544 = vmatpush3.bf16.msra.mxu0 %v13543_v10  ;;  %v13552_v21 = vpack.c.bf16 %v942_v18, %v941_v17  ;;  %v13896_v17 = vld [vmem:[#allocation5] sm:$0xff]   ;;  %v13897_v18 = vld [vmem:[#allocation5 + $0x8] sm:$0xff]  }
 0x1c5   : > { %13545 = vmatprep.subr.bf16.mxu0 %v14820_v11  ;;  %13242 = vmatprep.subr.bf16.mxu1 %v13896_v17 }
 0x1c6   : > { %13243 = vmatpush3.bf16.msra.mxu1 %v13896_v17 }
 0x1c7   : > { %851 = vxpose.xlu0.b32.cont [3/8] (short) (narrow) %v843_v2, 64  ;;  %13244 = vmatprep.subr.bf16.mxu1 %v13897_v18 }
 0x1c8   : > { %13547 = vmatpush3.bf16.msra.mxu0 %v13546_v14 }
 0x1c9   : > { %13548 = vmatprep.subr.bf16.mxu0 %v14820_v11 }
 0x1ca   : > { %13245 = vmatpush3.bf16.msra.mxu1 %v13897_v18 }
 0x1cb   : > { %852 = vxpose.xlu0.b32.cont [4/8] (short) (narrow) %v844_v3, 64 }
 0x1cc   : > { %13550 = vmatpush3.bf16.msra.mxu0 %v13549_v20  ;;  %v13898_v20 = vld [vmem:[#allocation5 + $0x10] sm:$0xff]  }
 0x1cd   : > { %13551 = vmatprep.subr.bf16.mxu0 %v14820_v11  ;;  %13246 = vmatprep.subr.bf16.mxu1 %v13898_v20 }
 0x1ce   : > { %13247 = vmatpush3.bf16.msra.mxu1 %v13898_v20 }
 0x1cf   : > { %853 = vxpose.xlu0.b32.cont [5/8] (short) (narrow) %v845_v4, 64 }
 0x1d0   : > { %13553 = vmatpush3.bf16.msra.mxu0 %v13552_v21  ;;  %v13899_v21 = vld [vmem:[#allocation5 + $0x18] sm:$0xff]  }
 0x1d1   : > { %13248 = vmatprep.subr.bf16.mxu1 %v13899_v21 }
 0x1d2   : > { %13249 = vmatpush3.bf16.msra.mxu1 %v13899_v21 }
 0x1d3   : > { %854 = vxpose.xlu0.b32.cont [6/8] (short) (narrow) %v846_v5, 64 }
 0x1d7   : > { %855 = vxpose.xlu0.b32.cont [7/8] (short) (narrow) %v847_v6, 64 }
 0x1db   : > { %856 = vxpose.xlu0.b32.end [8/8] (short) (narrow) %v848_v7, 64 }
 0x23f   : > { %v15411_v22 = vpop.trf.xlu0 }
 0x240   : > { %19717 = vst [vmem:[#allocation38_spill] sm:$0xff] %v15411_v22  ;;  %v904_v27 = vmul.f32 %v15411_v22, %v15411_v22  ;;  %v883_v31 = vsel %vm882_vm1, %v15411_v22, 0.0 }
 0x242   : > { %v912_v36 = vsel %vm882_vm1, %v904_v27, 0.0 }
 0x243   : > { %v15413_v23 = vpop.trf.xlu0 }
 0x244   : > { %19718 = vst [vmem:[#allocation39_spill] sm:$0xff] %v15413_v23  ;;  %v905_v26 = vmul.f32 %v15413_v23, %v15413_v23  ;;  %v884_v28 = vsel %vm882_vm1, %v15413_v23, 0.0 }
 0x245   : > { %v885_v35 = vadd.f32 %v884_v28, %v883_v31  ;;  %v1021_v31 = vlaneseq }
 0x246   : > { %v913_v32 = vsel %vm882_vm1, %v905_v26, 0.0 }
 0x247   : > { %v15415_v24 = vpop.trf.xlu0  ;;  %v914_v40 = vadd.f32 %v913_v32, %v912_v36 }
 0x248   : > { %19719 = vst [vmem:[#allocation40_spill] sm:$0xff] %v15415_v24  ;;  %v906_v29 = vmul.f32 %v15415_v24, %v15415_v24  ;;  %v886_v33 = vsel %vm882_vm1, %v15415_v24, 0.0 }
 0x249   : > { %v887_v41 = vadd.f32 %v886_v33, %v885_v35  ;;  %v15468_v33 = vshrl.u32 %v1021_v31, 7 }
 0x24a   : > { %v915_v37 = vsel %vm882_vm1, %v906_v29, 0.0 }
 0x24b   : > { %v15417_v25 = vpop.trf.xlu0  ;;  %v916_v46 = vadd.f32 %v915_v37, %v914_v40  ;;  %19725 = vst [vmem:[#allocation46_spill] sm:$0xff] %v15468_v33  ;;  %v15471_v35 = vsub.s32 0, %v15468_v33  ;;  %v15475_v37 = vsub.s32 1, %v15468_v33 }
 0x24c   : > { %19720 = vst [vmem:[#allocation41_spill] sm:$0xff] %v15417_v25  ;;  %v907_v34 = vmul.f32 %v15417_v25, %v15417_v25  ;;  %v888_v38 = vsel %vm882_vm1, %v15417_v25, 0.0 }
 0x24d   : > { %v889_v47 = vadd.f32 %v888_v38, %v887_v41  ;;  %19726 = vst [vmem:[#allocation47_spill] sm:$0xff] %v15471_v35  ;;  %19727 = vst [vmem:[#allocation48_spill] sm:$0xff] %v15475_v37 }
 0x24e   : > { %v917_v43 = vsel %vm882_vm1, %v907_v34, 0.0 }
 0x24f   : > { %v15427_v30 = vpop.trf.xlu0  ;;  %v918_v50 = vadd.f32 %v917_v43, %v916_v46 }
 0x250   : > { %19721 = vst [vmem:[#allocation42_spill] sm:$0xff] %v15427_v30  ;;  %v908_v39 = vmul.f32 %v15427_v30, %v15427_v30  ;;  %v890_v44 = vsel %vm882_vm1, %v15427_v30, 0.0 }
 0x251   : > { %v891_v51 = vadd.f32 %v890_v44, %v889_v47 }
 0x252   : > { %v919_v48 = vsel %vm882_vm1, %v908_v39, 0.0 }
 0x253   : > { %v15442_v42 = vpop.trf.xlu0  ;;  %v920_v56 = vadd.f32 %v919_v48, %v918_v50 }
 0x254   : > { %19722 = vst [vmem:[#allocation43_spill] sm:$0xff] %v15442_v42  ;;  %v909_v45 = vmul.f32 %v15442_v42, %v15442_v42  ;;  %v892_v49 = vsel %vm882_vm1, %v15442_v42, 0.0 }
 0x255   : > { %v893_v57 = vadd.f32 %v892_v49, %v891_v51 }
 0x256   : > { %v921_v53 = vsel %vm882_vm1, %v909_v45, 0.0 }
 0x257   : > { %v15452_v52 = vpop.trf.xlu0  ;;  %v922_v59 = vadd.f32 %v921_v53, %v920_v56 }
 0x258   : > { %19723 = vst [vmem:[#allocation44_spill] sm:$0xff] %v15452_v52  ;;  %v894_v54 = vsel %vm882_vm1, %v15452_v52, 0.0  ;;  %v910_v55 = vmul.f32 %v15452_v52, %v15452_v52 }
 0x259   : > { %v895_v60 = vadd.f32 %v894_v54, %v893_v57 }
 0x25a   : > { %v923_v58 = vsel %vm882_vm1, %v910_v55, 0.0 }
 0x25b   : > { %v15460_v61 = vpop.trf.xlu0  ;;  %v924_v0 = vadd.f32 %v923_v58, %v922_v59 }
 0x25c   : > { %19724 = vst [vmem:[#allocation45_spill] sm:$0xff] %v15460_v61  ;;  %v896_v62 = vsel %vm882_vm1, %v15460_v61, 0.0  ;;  %v911_v63 = vmul.f32 %v15460_v61, %v15460_v61 }
 0x25d   : > { %v897_v1 = vadd.f32 %v896_v62, %v895_v60 }
 0x25e   : > { %v925_v2 = vsel %vm882_vm1, %v911_v63, 0.0  ;;  %v12751_v63 = vld [vmem:[#allocation7] ss:$0 sm:$0xff] }
 0x25f   : > { %v898_v3 = vrot.slane %v897_v1, 4  ;;  %v926_v4 = vadd.f32 %v925_v2, %v924_v0 }
 0x261   : > { %v899_v5 = vadd.f32 %v898_v3, %v897_v1  ;;  %v927_v6 = vrot.slane %v926_v4, 4 }
 0x263   : > { %v900_v7 = vrot.slane %v899_v5, 2  ;;  %v928_v8 = vadd.f32 %v927_v6, %v926_v4 }
 0x265   : > { %v901_v9 = vadd.f32 %v900_v7, %v899_v5  ;;  %v929_v10 = vrot.slane %v928_v8, 2 }
 0x267   : > { %v902_v11 = vrot.slane %v901_v9, 1  ;;  %v930_v12 = vadd.f32 %v929_v10, %v928_v8 }
 0x269   : > { %v931_v13 = vrot.slane %v930_v12, 1  ;;  %v903_v14 = vadd.f32 %v902_v11, %v901_v9 }
 0x26b   : > { %v932_v15 = vadd.f32 %v931_v13, %v930_v12 }
 0x26d   : > { %v934_v16 = vsel %vm933_vm2, %v903_v14, %v932_v15 }
 0x26e   : > { %13240 = vmatmul.mubr.msk.f32.vlgmr.msra.gmra.mrb[0].mxu0 %vm882_vm1, %v934_v16 }
 0x341   : > { %v1012_v26 = vpop.f32.mrb[0].mxu0 }
 0x342   : > { %v1016_v27 = vmul.f32 %v1012_v26, %v1012_v26  ;;  %v13241_v28 = vpop.f32.mrb[1].mxu0  ;;  %v1024_v36 = vrot.slane %v1012_v26, %v15471_v35 }
 0x344   : > { %v1018_v29 = vrot.slane %v1016_v27, 7  ;;  %v1025_v39 = vsub.f32 %v15411_v22, %v1024_v36  ;;  %v1026_v41 = vsub.f32 %v15413_v23, %v1024_v36  ;;  %v1027_v43 = vsub.f32 %v15415_v24, %v1024_v36 }
 0x345   : > { %v1028_v44 = vsub.f32 %v15417_v25, %v1024_v36  ;;  %v1029_v45 = vsub.f32 %v15427_v30, %v1024_v36  ;;  %v1030_v46 = vsub.f32 %v15442_v42, %v1024_v36  ;;  %v1031_v57 = vsub.f32 %v15452_v52, %v1024_v36 }
 0x346   : > { %v1020_v32 = vsub.f32 %v1012_v26, %v1018_v29  ;;  %v1032_v58 = vsub.f32 %v15460_v61, %v1024_v36 }
 0x348   : > { %v1033_v34 = vadd.f32 1e-06, %v1020_v32 }
 0x34a   : > { %13972 = vrsqrt.f32 %v1033_v34 }
 0x354   : > { %v13973_v38 = vpop.eup %13972 }
 0x355   : > { %v1038_v40 = vrot.slane %v13973_v38, %v15475_v37 }
 0x357   : > { %v1039_v47 = vmul.f32 %v1038_v40, %v1025_v39  ;;  %v1040_v48 = vmul.f32 %v1038_v40, %v1026_v41  ;;  %v1041_v49 = vmul.f32 %v1038_v40, %v1027_v43  ;;  %v1042_v50 = vmul.f32 %v1038_v40, %v1028_v44 }
 0x358   : > { %v1043_v51 = vmul.f32 %v1038_v40, %v1029_v45  ;;  %v1044_v53 = vmul.f32 %v1038_v40, %v1030_v46  ;;  %v1045_v59 = vmul.f32 %v1038_v40, %v1031_v57  ;;  %v1046_v60 = vmul.f32 %v1038_v40, %v1032_v58 }
 0x359   : > { %v1047_v54 = vpack.c.bf16 %v1040_v48, %v1039_v47  ;;  %v1048_v55 = vpack.c.bf16 %v1042_v50, %v1041_v49 }
 0x35a   : > { %v1049_v56 = vpack.c.bf16 %v1044_v53, %v1043_v51  ;;  %v1050_v62 = vpack.c.bf16 %v1046_v60, %v1045_v59 }
 0x35b   : > { %13250 = vmatprep.mubr.msk.bf16.mxu1 %vm882_vm1, %v1047_v54 }
 0x35c   : > { %13251 = vmatmul.mubr.msk.bf16.vlgmr.msra.gmra.mrb[0].mxu1 %vm882_vm1, %v1048_v55 }
 0x35d   : > { %13254 = vmatprep.mubr.msk.bf16.mxu1 %vm882_vm1, %v1049_v56 }
 0x364   : > { %13255 = vmatmul.mubr.msk.bf16.gmra.mrb[4].mxu1 %vm882_vm1, %v1050_v62 }
 0x42f   : > { %v13252_v0 = vpop.f32.mrb[0].mxu1 }
 0x430   : > { %v1136_v1 = vpop.f32.mrb[1].mxu1  ;;  %v15496_v7 = vadd.f32 %v13252_v0, %v12751_v63 }
 0x431   : > { %v15490_v2 = vadd.f32 %v12751_v63, %v1136_v1  ;;  %v13253_v3 = vpop.f32.mrb[2].mxu1 }
 0x432   : > { %v1139_v4 = vpop.f32.mrb[3].mxu1  ;;  %19730 = vst [vmem:[#allocation51_spill] sm:$0xff] %v15496_v7  ;;  %v15500_v13 = vadd.f32 %v13253_v3, %v12751_v63  ;;  %v1173_v14 = vsel %vm882_vm1, %v15496_v7, 0.0 }
 0x433   : > { %19728 = vst [vmem:[#allocation49_spill] sm:$0xff] %v15490_v2  ;;  %v15492_v5 = vadd.f32 %v12751_v63, %v1139_v4  ;;  %v1167_v6 = vsel %vm882_vm1, %v15490_v2, 0.0 }
 0x434   : > { %1168 = vadd.xlane.f32.xlu1 %v1167_v6  ;;  %19731 = vst [vmem:[#allocation52_spill] sm:$0xff] %v15500_v13  ;;  %v1176_v16 = vsel %vm882_vm1, %v15500_v13, 0.0 }
 0x435   : > { %19729 = vst [vmem:[#allocation50_spill] sm:$0xff] %v15492_v5  ;;  %v1170_v9 = vsel %vm882_vm1, %v15492_v5, 0.0 }
 0x437   : > { %v13256_v8 = vpop.f32.mrb[4].mxu1 }
 0x438   : > { %v1152_v10 = vpop.f32.mrb[5].mxu1  ;;  %1171 = vadd.xlane.f32.xlu1 %v1170_v9  ;;  %v15512_v20 = vadd.f32 %v13256_v8, %v12751_v63 }
 0x439   : > { %v13257_v11 = vpop.f32.mrb[6].mxu1  ;;  %v15504_v15 = vadd.f32 %v12751_v63, %v1152_v10 }
 0x43a   : > { %v1155_v12 = vpop.f32.mrb[7].mxu1  ;;  %19734 = vst [vmem:[#allocation55_spill] sm:$0xff] %v15512_v20  ;;  %v15516_v26 = vadd.f32 %v13257_v11, %v12751_v63  ;;  %v1185_v27 = vsel %vm882_vm1, %v15512_v20, 0.0  ;;  %v13902_v11 = vld [vmem:[#allocation8 + $0x4] ss:$8 sps:$4 sm:$0xff]  }
 0x43b   : > { %19732 = vst [vmem:[#allocation53_spill] sm:$0xff] %v15504_v15  ;;  %v15508_v17 = vadd.f32 %v12751_v63, %v1155_v12  ;;  %v1179_v18 = vsel %vm882_vm1, %v15504_v15, 0.0  ;;  %v13900_v12 = vld [vmem:[#allocation8] ss:$8 sps:$4 sm:$0xff]   ;;  %1348 = vmatprep.subr.bf16.mxu0 %v13902_v11 }
 0x43c   : > { %1174 = vadd.xlane.f32.xlu1 %v1173_v14  ;;  %19735 = vst [vmem:[#allocation56_spill] sm:$0xff] %v15516_v26  ;;  %v1188_v28 = vsel %vm882_vm1, %v15516_v26, 0.0  ;;  %1349 = vmatpush1.bf16.msra.mxu0 %v13900_v12 }
 0x43d   : > { %19733 = vst [vmem:[#allocation54_spill] sm:$0xff] %v15508_v17  ;;  %v1182_v21 = vsel %vm882_vm1, %v15508_v17, 0.0 }
 0x440   : > { %1177 = vadd.xlane.f32.xlu1 %v1176_v16 }
 0x444   : > { %1180 = vadd.xlane.f32.xlu1 %v1179_v18 }
 0x448   : > { %1183 = vadd.xlane.f32.xlu1 %v1182_v21  ;;  %v13905_v21 = vld [vmem:[#allocation8 + $0x14] ss:$8 sps:$4 sm:$0xff]  }
 0x449   : > { %1350 = vmatprep.subr.bf16.mxu0 %v13905_v21 }
 0x44c   : > { %1186 = vadd.xlane.f32.xlu1 %v1185_v27  ;;  %v13903_v27 = vld [vmem:[#allocation8 + $0x10] ss:$8 sps:$4 sm:$0xff]  }
 0x44d   : > { %1351 = vmatpush1.bf16.msra.mxu0 %v13903_v27 }
 0x450   : > { %1189 = vadd.xlane.f32.xlu1 %v1188_v28 }
 0x4c1   : > { %v1169_v29 = vpop.xlane.xlu1 %1168 }
 0x4c2   : > { %v1192_v31 = vmul.f32 0.015625, %v1169_v29  ;;  %v13908_v29 = vld [vmem:[#allocation8 + $0x24] ss:$8 sps:$4 sm:$0xff]  }
 0x4c3   : > { %1352 = vmatprep.subr.bf16.mxu0 %v13908_v29 }
 0x4c4   : > { %v15523_v32 = vsub.f32 %v15490_v2, %v1192_v31  ;;  %v13906_v31 = vld [vmem:[#allocation8 + $0x20] ss:$8 sps:$4 sm:$0xff]  }
 0x4c5   : > { %v1172_v34 = vpop.xlane.xlu1 %1171  ;;  %1353 = vmatpush1.bf16.msra.mxu0 %v13906_v31 }
 0x4c6   : > { %v1193_v36 = vmul.f32 0.015625, %v1172_v34  ;;  %v1208_v38 = vmul.f32 %v15523_v32, %v15523_v32  ;;  %v13911_v34 = vld [vmem:[#allocation8 + $0x34] ss:$8 sps:$4 sm:$0xff]  }
 0x4c7   : > { %1354 = vmatprep.subr.bf16.mxu0 %v13911_v34 }
 0x4c8   : > { %v15528_v39 = vsub.f32 %v15492_v5, %v1193_v36  ;;  %v1216_v40 = vsel %vm882_vm1, %v1208_v38, 0.0  ;;  %v13909_v36 = vld [vmem:[#allocation8 + $0x30] ss:$8 sps:$4 sm:$0xff]   ;;  %v19607_v38 = vmov 0  }
 0x4c9   : > { %1217 = vadd.xlane.f32.xlu0 %v1216_v40  ;;  %v1175_v41 = vpop.xlane.xlu1 %1174  ;;  %1355 = vmatpush1.bf16.msra.mxu0 %v13909_v36 }
 0x4ca   : > { %v1194_v43 = vmul.f32 0.015625, %v1175_v41  ;;  %v1209_v44 = vmul.f32 %v15528_v39, %v15528_v39  ;;  %1380 = vmatprep.mubr.bf16.mxu0 %v19607_v38 }
 0x4cc   : > { %v15534_v45 = vsub.f32 %v15496_v7, %v1194_v43  ;;  %v1219_v46 = vsel %vm882_vm1, %v1209_v44, 0.0 }
 0x4cd   : > { %1220 = vadd.xlane.f32.xlu1 %v1219_v46  ;;  %v1178_v47 = vpop.xlane.xlu1 %1177 }
 0x4ce   : > { %v1195_v48 = vmul.f32 0.015625, %v1178_v47  ;;  %v1210_v49 = vmul.f32 %v15534_v45, %v15534_v45 }
 0x4d0   : > { %v15540_v50 = vsub.f32 %v15500_v13, %v1195_v48  ;;  %v1222_v51 = vsel %vm882_vm1, %v1210_v49, 0.0 }
 0x4d1   : > { %1223 = vadd.xlane.f32.xlu1 %v1222_v51  ;;  %v1181_v53 = vpop.xlane.xlu1 %1180 }
 0x4d2   : > { %v1196_v54 = vmul.f32 0.015625, %v1181_v53  ;;  %v1211_v55 = vmul.f32 %v15540_v50, %v15540_v50 }
 0x4d4   : > { %v15546_v56 = vsub.f32 %v15504_v15, %v1196_v54  ;;  %v1225_v57 = vsel %vm882_vm1, %v1211_v55, 0.0 }
 0x4d5   : > { %1226 = vadd.xlane.f32.xlu1 %v1225_v57  ;;  %v1184_v58 = vpop.xlane.xlu1 %1183 }
 0x4d6   : > { %v1197_v59 = vmul.f32 0.015625, %v1184_v58  ;;  %v1212_v60 = vmul.f32 %v15546_v56, %v15546_v56 }
 0x4d8   : > { %v15552_v62 = vsub.f32 %v15508_v17, %v1197_v59  ;;  %v1228_v63 = vsel %vm882_vm1, %v1212_v60, 0.0 }
 0x4d9   : > { %1229 = vadd.xlane.f32.xlu1 %v1228_v63  ;;  %v1187_v0 = vpop.xlane.xlu1 %1186 }
 0x4da   : > { %v1198_v1 = vmul.f32 0.015625, %v1187_v0  ;;  %v1213_v3 = vmul.f32 %v15552_v62, %v15552_v62 }
 0x4dc   : > { %v15558_v4 = vsub.f32 %v15512_v20, %v1198_v1  ;;  %v1231_v6 = vsel %vm882_vm1, %v1213_v3, 0.0 }
 0x4dd   : > { %1232 = vadd.xlane.f32.xlu1 %v1231_v6  ;;  %v1190_v8 = vpop.xlane.xlu1 %1189 }
 0x4de   : > { %v1199_v9 = vmul.f32 0.015625, %v1190_v8  ;;  %v1214_v10 = vmul.f32 %v15558_v4, %v15558_v4 }
 0x4e0   : > { %v15564_v14 = vsub.f32 %v15516_v26, %v1199_v9  ;;  %v1234_v16 = vsel %vm882_vm1, %v1214_v10, 0.0 }
 0x4e1   : > { %1235 = vadd.xlane.f32.xlu1 %v1234_v16 }
 0x4e2   : > { %v1215_v18 = vmul.f32 %v15564_v14, %v15564_v14 }
 0x4e4   : > { %v1237_v28 = vsel %vm882_vm1, %v1215_v18, 0.0 }
 0x4e5   : > { %1238 = vadd.xlane.f32.xlu1 %v1237_v28 }
 0x556   : > { %v1218_v40 = vpop.xlane.xlu0 %1217 }
 0x557   : > { %v1240_v41 = vmul.f32 0.015625, %v1218_v40 }
 0x559   : > { %v1248_v43 = vadd.f32 1e-05, %v1240_v41 }
 0x55a   : > { %v1221_v44 = vpop.xlane.xlu1 %1220 }
 0x55b   : > { %v1241_v46 = vmul.f32 0.015625, %v1221_v44  ;;  %13974 = vrsqrt.f32 %v1248_v43 }
 0x55d   : > { %v1249_v47 = vadd.f32 1e-05, %v1241_v46 }
 0x55e   : > { %v1224_v48 = vpop.xlane.xlu1 %1223 }
 0x55f   : > { %13976 = vrsqrt.f32 %v1249_v47  ;;  %v1242_v49 = vmul.f32 0.015625, %v1224_v48  ;;  %v1284_v47 = vld [vmem:[#allocation10] sm:$0x3] }
 0x560   : > { %v15587_v48 = vrot.slane %v1284_v47, %v15471_v35 }
 0x561   : > { %v1250_v51 = vadd.f32 1e-05, %v1242_v49 }
 0x562   : > { %v1227_v53 = vpop.xlane.xlu1 %1226 }
 0x563   : > { %v1243_v54 = vmul.f32 0.015625, %v1227_v53  ;;  %13978 = vrsqrt.f32 %v1250_v51 }
 0x565   : > { %v1251_v55 = vadd.f32 1e-05, %v1243_v54  ;;  %v13975_v58 = vpop.eup %13974 }
 0x566   : > { %v1230_v57 = vpop.xlane.xlu1 %1229  ;;  %v1264_v0 = vmul.f32 %v13975_v58, %v15523_v32 }
 0x567   : > { %13980 = vrsqrt.f32 %v1251_v55  ;;  %v1244_v59 = vmul.f32 0.015625, %v1230_v57 }
 0x569   : > { %v13977_v60 = vpop.eup %13976  ;;  %v1252_v63 = vadd.f32 1e-05, %v1244_v59 }
 0x56a   : > { %v1265_v1 = vmul.f32 %v13977_v60, %v15528_v39  ;;  %v1233_v3 = vpop.xlane.xlu1 %1232 }
 0x56b   : > { %v1245_v6 = vmul.f32 0.015625, %v1233_v3  ;;  %13982 = vrsqrt.f32 %v1252_v63 }
 0x56c   : > { %v1272_v8 = vpack.c.bf16 %v1265_v1, %v1264_v0 }
 0x56d   : > { %v1253_v9 = vadd.f32 1e-05, %v1245_v6  ;;  %v13979_v11 = vpop.eup %13978 }
 0x56e   : > { %12768 = vmatmul.mubr.msk.bf16.vlgmr.msra.gmra.mrb[4].mxu0 %vm882_vm1, %v1272_v8  ;;  %v1236_v10 = vpop.xlane.xlu1 %1235  ;;  %v1266_v32 = vmul.f32 %v13979_v11, %v15534_v45 }
 0x56f   : > { %13984 = vrsqrt.f32 %v1253_v9  ;;  %v1246_v12 = vmul.f32 0.015625, %v1236_v10  ;;  %1390 = vmatprep.mubr.bf16.mxu0 %v19607_v38 }
 0x571   : > { %v13981_v16 = vpop.eup %13980  ;;  %v1254_v18 = vadd.f32 1e-05, %v1246_v12 }
 0x572   : > { %v1239_v21 = vpop.xlane.xlu1 %1238  ;;  %v1267_v39 = vmul.f32 %v13981_v16, %v15540_v50 }
 0x573   : > { %v1247_v27 = vmul.f32 0.015625, %v1239_v21  ;;  %13986 = vrsqrt.f32 %v1254_v18 }
 0x574   : > { %v1273_v28 = vpack.c.bf16 %v1267_v39, %v1266_v32 }
 0x575   : > { %v1255_v29 = vadd.f32 1e-05, %v1247_v27  ;;  %v13983_v31 = vpop.eup %13982 }
 0x576   : > { %12769 = vmatmul.mubr.msk.bf16.gmra.mrb[8].mxu0 %vm882_vm1, %v1273_v28  ;;  %v1268_v36 = vmul.f32 %v13983_v31, %v15546_v56  ;;  %v1293_v56 = vrot.slane %v1284_v47, %v15475_v37 }
 0x577   : > { %13988 = vrsqrt.f32 %v1255_v29  ;;  %1400 = vmatprep.mubr.bf16.mxu0 %v19607_v38 }
 0x579   : > { %v13985_v34 = vpop.eup %13984 }
 0x57a   : > { %v1269_v40 = vmul.f32 %v13985_v34, %v15552_v62 }
 0x57c   : > { %v1274_v41 = vpack.c.bf16 %v1269_v40, %v1268_v36 }
 0x57d   : > { %v13987_v45 = vpop.eup %13986 }
 0x57e   : > { %12770 = vmatmul.mubr.msk.bf16.gmra.mrb[12].mxu0 %vm882_vm1, %v1274_v41  ;;  %v1270_v43 = vmul.f32 %v13987_v45, %v15558_v4 }
 0x57f   : > { %1410 = vmatprep.mubr.bf16.mxu0 %v19607_v38 }
 0x581   : > { %v13989_v50 = vpop.eup %13988 }
 0x582   : > { %v1271_v44 = vmul.f32 %v13989_v50, %v15564_v14 }
 0x584   : > { %v1275_v46 = vpack.c.bf16 %v1271_v44, %v1270_v43 }
 0x586   : > { %12771 = vmatmul.mubr.msk.bf16.gmra.mrb[16].mxu0 %vm882_vm1, %v1275_v46 }
 0x641   : > { %v1382_v62 = vpop.f32.mrb[4].mxu0 }
 0x642   : > { %v1383_v49 = vadd.f32 %v1382_v62, %v15587_v48  ;;  %v1384_v51 = vpop.f32.mrb[5].mxu0 }
 0x643   : > { %v15591_v53 = vadd.f32 %v1384_v51, %v1293_v56  ;;  %v1386_v54 = vpop.f32.mrb[6].mxu0 }
 0x644   : > { %v1388_v55 = vpop.f32.mrb[7].mxu0  ;;  %2669 = vrot.lane.b32.xlu0 %v1383_v49, %s19657_s6  ;;  %2621 = vrot.lane.b32.xlu1 %v1383_v49, %s14825_s7  ;;  %v1387_v14 = vadd.f32 %v1386_v54, %v15587_v48  ;;  %v15600_v59 = vmul.f32 0.25, %v1383_v49 }
 0x645   : > { %19736 = vst [vmem:[#allocation57_spill] sm:$0xff] %v15591_v53  ;;  %v15595_v4 = vadd.f32 %v1388_v55, %v1293_v56 }
 0x646   : > { %v15621_v21 = vmul.f32 0.25, %v1387_v14 }
 0x647   : > { %19737 = vst [vmem:[#allocation58_spill] sm:$0xff] %v15595_v4 }
 0x648   : > { %2623 = vrot.lane.b32.xlu0 %v1387_v14, %s14825_s7  ;;  %2637 = vrot.lane.b32.xlu1 %v1383_v49, %s14826_s8 }
 0x649   : > { %v1392_v57 = vpop.f32.mrb[8].mxu0 }
 0x64a   : > { %v1394_v58 = vpop.f32.mrb[9].mxu0  ;;  %v1393_v6 = vadd.f32 %v1392_v57, %v15587_v48 }
 0x64b   : > { %v15602_v60 = vadd.f32 %v1394_v58, %v1293_v56  ;;  %v1396_v63 = vpop.f32.mrb[10].mxu0 }
 0x64c   : > { %v1398_v0 = vpop.f32.mrb[11].mxu0  ;;  %2653 = vrot.lane.b32.xlu1 %v1383_v49, %s14827_s1  ;;  %1437 = vrot.lane.b32.xlu0 %v15600_v59, %s14825_s7  ;;  %v1397_v34 = vadd.f32 %v1396_v63, %v15587_v48  ;;  %v15674_v41 = vmul.f32 0.25, %v1393_v6 }
 0x64d   : > { %v15607_v1 = vadd.f32 %v1398_v0, %v1293_v56 }
 0x64e   : > { %v15688_v45 = vmul.f32 0.25, %v1397_v34 }
 0x64f   : > { %19738 = vst [vmem:[#allocation59_spill] sm:$0xff] %v15607_v1 }
 0x650   : > { %2639 = vrot.lane.b32.xlu1 %v1387_v14, %s14826_s8  ;;  %1461 = vrot.lane.b32.xlu0 %v15600_v59, %s14826_s8 }
 0x651   : > { %v1402_v3 = vpop.f32.mrb[12].mxu0 }
 0x652   : > { %v1404_v8 = vpop.f32.mrb[13].mxu0  ;;  %v15634_v31 = vadd.f32 %v1402_v3, %v15587_v48 }
 0x653   : > { %v15613_v9 = vadd.f32 %v1404_v8, %v1293_v56  ;;  %v1406_v10 = vpop.f32.mrb[14].mxu0 }
 0x654   : > { %v1408_v11 = vpop.f32.mrb[15].mxu0  ;;  %2655 = vrot.lane.b32.xlu1 %v1387_v14, %s14827_s1  ;;  %2641 = vrot.lane.b32.xlu0 %v1393_v6, %s14826_s8  ;;  %v15660_v40 = vadd.f32 %v1406_v10, %v15587_v48 }
 0x655   : > { %19739 = vst [vmem:[#allocation60_spill] sm:$0xff] %v15613_v9  ;;  %v15617_v12 = vadd.f32 %v1408_v11, %v1293_v56 }
 0x657   : > { %19740 = vst [vmem:[#allocation61_spill] sm:$0xff] %v15617_v12 }
 0x658   : > { %2671 = vrot.lane.b32.xlu1 %v1387_v14, %s19657_s6  ;;  %2657 = vrot.lane.b32.xlu0 %v1393_v6, %s14827_s1 }
 0x659   : > { %v1412_v16 = vpop.f32.mrb[16].mxu0 }
 0x65a   : > { %v1414_v18 = vpop.f32.mrb[17].mxu0  ;;  %v15651_v36 = vadd.f32 %v1412_v16, %v15587_v48 }
 0x65b   : > { %v15623_v32 = vadd.f32 %v1414_v18, %v1293_v56  ;;  %v1416_v39 = vpop.f32.mrb[18].mxu0 }
 0x65c   : > { %v15626_v27 = vadd.f32 %v1416_v39, %v15587_v48  ;;  %v1418_v28 = vpop.f32.mrb[19].mxu0  ;;  %1439 = vrot.lane.b32.xlu1 %v15621_v21, %s14825_s7  ;;  %2673 = vrot.lane.b32.xlu0 %v1393_v6, %s19657_s6  ;;  %v14828_v39 = vmov 1983009808  }
 0x65d   : > { %19741 = vst [vmem:[#allocation62_spill] sm:$0xff] %v15623_v32  ;;  %v15631_v29 = vadd.f32 %v1418_v28, %v1293_v56  ;;  %v1512_v28 = vunpack.c.l.s4 %v14828_v39 }
 0x65f   : > { %19742 = vst [vmem:[#allocation63_spill] sm:$0xff] %v15631_v29 }
 0x660   : > { %1463 = vrot.lane.b32.xlu1 %v15621_v21, %s14826_s8  ;;  %2629 = vrot.lane.b32.xlu0 %v15634_v31, %s14825_s7 }
 0x664   : > { %2625 = vrot.lane.b32.xlu1 %v1393_v6, %s14825_s7  ;;  %2645 = vrot.lane.b32.xlu0 %v15634_v31, %s14826_s8 }
 0x668   : > { %2627 = vrot.lane.b32.xlu1 %v1397_v34, %s14825_s7  ;;  %2661 = vrot.lane.b32.xlu0 %v15634_v31, %s14827_s1 }
 0x66c   : > { %2643 = vrot.lane.b32.xlu1 %v1397_v34, %s14826_s8  ;;  %2677 = vrot.lane.b32.xlu0 %v15634_v31, %s19657_s6 }
 0x670   : > { %2659 = vrot.lane.b32.xlu1 %v1397_v34, %s14827_s1  ;;  %2633 = vrot.lane.b32.xlu0 %v15651_v36, %s14825_s7 }
 0x674   : > { %2675 = vrot.lane.b32.xlu1 %v1397_v34, %s19657_s6  ;;  %2649 = vrot.lane.b32.xlu0 %v15651_v36, %s14826_s8 }
 0x678   : > { %2631 = vrot.lane.b32.xlu1 %v15660_v40, %s14825_s7  ;;  %2665 = vrot.lane.b32.xlu0 %v15651_v36, %s14827_s1 }
 0x67c   : > { %2647 = vrot.lane.b32.xlu1 %v15660_v40, %s14826_s8  ;;  %1485 = vrot.lane.b32.xlu0 %v15600_v59, %s14827_s1 }
 0x680   : > { %2663 = vrot.lane.b32.xlu1 %v15660_v40, %s14827_s1  ;;  %2681 = vrot.lane.b32.xlu0 %v15651_v36, %s19657_s6 }
 0x684   : > { %2679 = vrot.lane.b32.xlu1 %v15660_v40, %s19657_s6  ;;  %1441 = vrot.lane.b32.xlu0 %v15674_v41, %s14825_s7 }
 0x688   : > { %2635 = vrot.lane.b32.xlu1 %v15626_v27, %s14825_s7 }
 0x68c   : > { %2651 = vrot.lane.b32.xlu1 %v15626_v27, %s14826_s8 }
 0x690   : > { %2667 = vrot.lane.b32.xlu1 %v15626_v27, %s14827_s1 }
 0x694   : > { %1487 = vrot.lane.b32.xlu1 %v15621_v21, %s14827_s1 }
 0x698   : > { %1443 = vrot.lane.b32.xlu1 %v15688_v45, %s14825_s7 }
 0x69c   : > { %2683 = vrot.lane.b32.xlu1 %v15626_v27, %s19657_s6 }
 0x6b6   : > { %v15694_v50 = vpop.permute.xlu0 %2669  ;;  %v2622_v43 = vpop.permute.xlu1 %2621 }
 0x6b7   : > { %2685 = vrot.lane.b32.xlu0 %v2622_v43, %s19657_s6 }
 0x6ba   : > { %v2624_v44 = vpop.permute.xlu0 %2623  ;;  %v2638_v46 = vpop.permute.xlu1 %2637 }
 0x6bb   : > { %2687 = vrot.lane.b32.xlu1 %v2624_v44, %s19657_s6  ;;  %2701 = vrot.lane.b32.xlu0 %v2638_v46, %s19657_s6  ;;  %v14829_v44 = vmov 1934713408  }
 0x6bc   : > { %v1544_v46 = vunpack.c.l.s4 %v14829_v44 }
 0x6be   : > { %v2654_v47 = vpop.permute.xlu1 %2653  ;;  %v1438_v48 = vpop.permute.xlu0 %1437 }
 0x6bf   : > { %2717 = vrot.lane.b32.xlu0 %v2654_v47, %s19657_s6  ;;  %v1513_v47 = vunpack.c.0.s8 %v1512_v28 }
 0x6c2   : > { %v2640_v56 = vpop.permute.xlu1 %2639  ;;  %v1462_v62 = vpop.permute.xlu0 %1461 }
 0x6c3   : > { %2703 = vrot.lane.b32.xlu1 %v2640_v56, %s19657_s6 }
 0x6c6   : > { %v2656_v49 = vpop.permute.xlu1 %2655  ;;  %v2642_v51 = vpop.permute.xlu0 %2641 }
 0x6c7   : > { %2719 = vrot.lane.b32.xlu1 %v2656_v49, %s19657_s6 }
 0x6ca   : > { %v15702_v54 = vpop.permute.xlu1 %2671  ;;  %v2658_v55 = vpop.permute.xlu0 %2657 }
 0x6ce   : > { %v15704_v14 = vpop.permute.xlu1 %1439  ;;  %v15706_v57 = vpop.permute.xlu0 %2673 }
 0x6d2   : > { %v15708_v58 = vpop.permute.xlu1 %1463  ;;  %v2630_v63 = vpop.permute.xlu0 %2629 }
 0x6d6   : > { %v2626_v0 = vpop.permute.xlu1 %2625  ;;  %v2646_v3 = vpop.permute.xlu0 %2645 }
 0x6d7   : > { %2689 = vrot.lane.b32.xlu0 %v2626_v0, %s19657_s6  ;;  %v1510_v0 = vcombine.high %v15600_v59, %v1462_v62 }
 0x6da   : > { %v2628_v6 = vpop.permute.xlu1 %2627  ;;  %v2662_v8 = vpop.permute.xlu0 %2661 }
 0x6db   : > { %2691 = vrot.lane.b32.xlu1 %v2628_v6, %s19657_s6  ;;  %2705 = vrot.lane.b32.xlu0 %v2642_v51, %s19657_s6  ;;  %v1545_v51 = vunpack.c.0.s8 %v1544_v46 }
 0x6dd   : > { %v15732_v39 = vsub.s32 %v1545_v51, %v15468_v33 }
 0x6de   : > { %v2644_v10 = vpop.permute.xlu1 %2643  ;;  %v15713_v11 = vpop.permute.xlu0 %2677 }
 0x6df   : > { %2707 = vrot.lane.b32.xlu1 %v2644_v10, %s19657_s6  ;;  %2721 = vrot.lane.b32.xlu0 %v2658_v55, %s19657_s6  ;;  %v15725_v55 = vsub.s32 %v1513_v47, %v15468_v33 }
 0x6e1   : > { %v1524_v28 = vrot.slane %v1510_v0, %v15725_v55 }
 0x6e2   : > { %v2660_v16 = vpop.permute.xlu1 %2659  ;;  %v2634_v18 = vpop.permute.xlu0 %2633 }
 0x6e3   : > { %2723 = vrot.lane.b32.xlu1 %v2660_v16, %s19657_s6  ;;  %2693 = vrot.lane.b32.xlu0 %v2630_v63, %s19657_s6  ;;  %v1509_v63 = vcombine.low %v15600_v59, %v1462_v62 }
 0x6e6   : > { %v15719_v34 = vpop.permute.xlu1 %2675  ;;  %v2650_v43 = vpop.permute.xlu0 %2649 }
 0x6e7   : > { %2709 = vrot.lane.b32.xlu0 %v2646_v3, %s19657_s6 }
 0x6ea   : > { %v2632_v56 = vpop.permute.xlu1 %2631  ;;  %v2666_v49 = vpop.permute.xlu0 %2665 }
 0x6eb   : > { %2695 = vrot.lane.b32.xlu1 %v2632_v56, %s19657_s6  ;;  %2725 = vrot.lane.b32.xlu0 %v2662_v8, %s19657_s6  ;;  %v1517_v8 = vrot.slane %v1509_v63, %v15725_v55 }
 0x6ee   : > { %v2648_v6 = vpop.permute.xlu1 %2647  ;;  %v1486_v10 = vpop.permute.xlu0 %1485 }
 0x6ef   : > { %v1525_v3 = vcombine.low %v1438_v48, %v1486_v10  ;;  %v1526_v16 = vcombine.high %v1438_v48, %v1486_v10  ;;  %2711 = vrot.lane.b32.xlu1 %v2648_v6, %s19657_s6  ;;  %2697 = vrot.lane.b32.xlu0 %v2634_v18, %s19657_s6 }
 0x6f1   : > { %v1533_v44 = vrot.slane %v1525_v3, %v15725_v55  ;;  %v1540_v46 = vrot.slane %v1526_v16, %v15725_v55 }
 0x6f2   : > { %v2664_v59 = vpop.permute.xlu1 %2663 }
 0x6f3   : > { %v1541_v62 = vcombine.low %v1517_v8, %v1533_v44  ;;  %v1542_v47 = vcombine.high %v1517_v8, %v1533_v44  ;;  %v1557_v56 = vcombine.low %v1524_v28, %v1540_v46  ;;  %v1558_v48 = vcombine.high %v1524_v28, %v1540_v46  ;;  %2727 = vrot.lane.b32.xlu1 %v2664_v59, %s19657_s6 }
 0x6f4   : > { %2713 = vrot.lane.b32.xlu0 %v2650_v43, %s19657_s6 }
 0x6f5   : > { %v1549_v18 = vrot.slane %v1541_v62, %v15732_v39  ;;  %v1556_v51 = vrot.slane %v1542_v47, %v15732_v39  ;;  %v1565_v63 = vrot.slane %v1557_v56, %v15732_v39  ;;  %v1572_v0 = vrot.slane %v1558_v48, %v15732_v39 }
 0x6f6   : > { %v15744_v6 = vpop.permute.xlu1 %2679 }
 0x6f7   : > { %v2053_v10 = vcombine.low %v1549_v18, %v1556_v51  ;;  %v12772_v3 = vcombine.high %v1549_v18, %v1556_v51  ;;  %v2069_v16 = vcombine.low %v1565_v63, %v1572_v0  ;;  %v12773_v8 = vcombine.high %v1565_v63, %v1572_v0 }
 0x6f8   : > { %2729 = vrot.lane.b32.xlu0 %v2666_v49, %s19657_s6  ;;  %v15768_v0 = vmul.f32 0.25, %v15634_v31 }
 0x6f9   : > { %v2060_v28 = vrot.slane %v2053_v10, %v15725_v55  ;;  %v2068_v43 = vrot.slane %v12772_v3, %v15725_v55  ;;  %v2076_v44 = vrot.slane %v2069_v16, %v15725_v55  ;;  %v2084_v46 = vrot.slane %v12773_v8, %v15725_v55 }
 0x6fa   : > { %v2636_v59 = vpop.permute.xlu1 %2635  ;;  %v1577_v10 = vcombine.low %v15621_v21, %v15708_v58  ;;  %v1578_v3 = vcombine.high %v15621_v21, %v15708_v58 }
 0x6fb   : > { %2699 = vrot.lane.b32.xlu1 %v2636_v59, %s19657_s6  ;;  %v2086_v62 = vcombine.high %v2060_v28, %v2068_v43  ;;  %v2102_v47 = vcombine.high %v2076_v44, %v2084_v46 }
 0x6fc   : > { %1465 = vrot.lane.b32.xlu0 %v15674_v41, %s14826_s8  ;;  %v1585_v31 = vrot.slane %v1577_v10, %v15725_v55 }
 0x6fd   : > { %v15755_v56 = vrot.slane %v2086_v62, %v15732_v39  ;;  %v15758_v49 = vrot.slane %v2102_v47, %v15732_v39  ;;  %v1592_v62 = vrot.slane %v1578_v3, %v15725_v55 }
 0x6fe   : > { %v2652_v48 = vpop.permute.xlu1 %2651 }
 0x6ff   : > { %2715 = vrot.lane.b32.xlu1 %v2652_v48, %s19657_s6  ;;  %v2119_v18 = vcombine.low %v15755_v56, %v15758_v49 }
 0x700   : > { %1489 = vrot.lane.b32.xlu0 %v15674_v41, %s14827_s1 }
 0x702   : > { %v2668_v63 = vpop.permute.xlu1 %2667 }
 0x703   : > { %2731 = vrot.lane.b32.xlu1 %v2668_v63, %s19657_s6  ;;  %s19784_s6 = smov 64  }
 0x704   : > { %1445 = vrot.lane.b32.xlu0 %v15768_v0, %s14825_s7 }
 0x706   : > { %v1488_v16 = vpop.permute.xlu1 %1487 }
 0x707   : > { %v1593_v8 = vcombine.low %v15704_v14, %v1488_v16  ;;  %v1594_v59 = vcombine.high %v15704_v14, %v1488_v16  ;;  %1467 = vrot.lane.b32.xlu1 %v15688_v45, %s14826_s8  ;;  %v15792_v14 = vmul.f32 0.25, %v15660_v40 }
 0x708   : > { %1469 = vrot.lane.b32.xlu0 %v15768_v0, %s14826_s8 }
 0x709   : > { %v1601_v47 = vrot.slane %v1593_v8, %v15725_v55  ;;  %v1608_v48 = vrot.slane %v1594_v59, %v15725_v55  ;;  %v15799_v59 = vmul.f32 0.25, %v15651_v36 }
 0x70b   : > { %v1609_v21 = vcombine.low %v1585_v31, %v1601_v47  ;;  %v1610_v58 = vcombine.high %v1585_v31, %v1601_v47  ;;  %v1625_v63 = vcombine.low %v1592_v62, %v1608_v48  ;;  %v1626_v38 = vcombine.high %v1592_v62, %v1608_v48  ;;  %1491 = vrot.lane.b32.xlu1 %v15688_v45, %s14827_s1 }
 0x70c   : > { %1493 = vrot.lane.b32.xlu0 %v15768_v0, %s14827_s1  ;;  %v2085_v31 = vcombine.low %v2060_v28, %v2068_v43  ;;  %v2101_v62 = vcombine.low %v2076_v44, %v2084_v46 }
 0x70d   : > { %v1617_v10 = vrot.slane %v1609_v21, %v15732_v39  ;;  %v1624_v3 = vrot.slane %v1610_v58, %v15732_v39  ;;  %v1633_v16 = vrot.slane %v1625_v63, %v15732_v39  ;;  %v1640_v8 = vrot.slane %v1626_v38, %v15732_v39 }
 0x70e   : > { %v2093_v28 = vrot.slane %v2085_v31, %v15732_v39  ;;  %v2109_v43 = vrot.slane %v2101_v62, %v15732_v39 }
 0x70f   : > { %v2121_v47 = vcombine.low %v1617_v10, %v1624_v3  ;;  %v12774_v48 = vcombine.high %v1617_v10, %v1624_v3  ;;  %v2137_v19 = vcombine.low %v1633_v16, %v1640_v8  ;;  %v12775_v51 = vcombine.high %v1633_v16, %v1640_v8  ;;  %1447 = vrot.lane.b32.xlu1 %v15792_v14, %s14825_s7 }
 0x710   : > { %1449 = vrot.lane.b32.xlu0 %v15799_v59, %s14825_s7  ;;  %v2117_v16 = vcombine.low %v2093_v28, %v2109_v43  ;;  %v2118_v8 = vcombine.high %v2093_v28, %v2109_v43  ;;  %v19744_v28 = vcombine.high %v15755_v56, %v15758_v49  ;;  %v15854_v49 = vpop.permute.xlu1 %1443 }
 0x711   : > { %v2128_v40 = vrot.slane %v2121_v47, %v15725_v55  ;;  %v2136_v21 = vrot.slane %v12774_v48, %v15725_v55  ;;  %v2144_v38 = vrot.slane %v2137_v19, %v15725_v55  ;;  %v2152_v36 = vrot.slane %v12775_v51, %v15725_v55 }
 0x713   : > { %1471 = vrot.lane.b32.xlu1 %v15792_v14, %s14826_s8  ;;  %v2153_v44 = vcombine.low %v2128_v40, %v2136_v21  ;;  %v2169_v46 = vcombine.low %v2144_v38, %v2152_v36  ;;  %v2154_v58 = vcombine.high %v2128_v40, %v2136_v21  ;;  %v2170_v63 = vcombine.high %v2144_v38, %v2152_v36 }
 0x714   : > { %1473 = vrot.lane.b32.xlu0 %v15799_v59, %s14826_s8  ;;  %v15824_v40 = vmul.f32 0.25, %v15626_v27  ;;  %v15842_v27 = vpop.permute.xlu0 %2681 }
 0x715   : > { %v2161_v10 = vrot.slane %v2153_v44, %v15732_v39  ;;  %v2177_v19 = vrot.slane %v2169_v46, %v15732_v39  ;;  %v2168_v51 = vrot.slane %v2154_v58, %v15732_v39  ;;  %v2184_v3 = vrot.slane %v2170_v63, %v15732_v39  ;;  %v15864_v44 = vpop.permute.xlu1 %2683 }
 0x717   : > { %1495 = vrot.lane.b32.xlu1 %v15792_v14, %s14827_s1  ;;  %v2185_v31 = vcombine.low %v2161_v10, %v2177_v19  ;;  %v2186_v62 = vcombine.high %v2161_v10, %v2177_v19  ;;  %v2187_v47 = vcombine.low %v2168_v51, %v2184_v3  ;;  %v2188_v48 = vcombine.high %v2168_v51, %v2184_v3 }
 0x718   : > { %1497 = vrot.lane.b32.xlu0 %v15799_v59, %s14827_s1  ;;  %v15852_v56 = vpop.permute.xlu0 %1441 }
 0x719   : > { %v2597_v21 = vpack.c.bf16 %v2185_v31, %v2117_v16  ;;  %v2601_v38 = vpack.c.bf16 %v2186_v62, %v2118_v8  ;;  %v15829_v36 = vpack.c.bf16 %v2187_v47, %v2119_v18  ;;  %v15834_v43 = vpack.c.bf16 %v2188_v48, %v19744_v28 }
 0x71b   : > { %19743 = vst [vmem:[#allocation64_spill] sm:$0xff] %v15829_v36  ;;  %19745 = vst [vmem:[#allocation65_spill] sm:$0xff] %v15834_v43  ;;  %1451 = vrot.lane.b32.xlu1 %v15824_v40, %s14825_s7  ;;  %13266 = vmatprep.mubr.msk.bf16.mxu1 %vm5053_vm3, %v2597_v21 }
 0x71c   : > { %3879 = vrot.lane.b32.xlu0 %v15595_v4, %s14825_s7  ;;  %13282 = vmatprep.mubr.msk.bf16.mxu0 %vm5053_vm3, %v2601_v38 }
 0x71f   : > { %1475 = vrot.lane.b32.xlu1 %v15824_v40, %s14826_s8 }
 0x720   : > { %3925 = vrot.lane.b32.xlu0 %v15591_v53, %s14827_s1 }
 0x723   : > { %1499 = vrot.lane.b32.xlu1 %v15824_v40, %s14827_s1 }
 0x724   : > { %3881 = vrot.lane.b32.xlu0 %v15602_v60, %s14825_s7 }
 0x727   : > { %3877 = vrot.lane.b32.xlu1 %v15591_v53, %s14825_s7 }
 0x728   : > { %3905 = vrot.lane.b32.xlu0 %v15602_v60, %s14826_s8 }
 0x729   : > { %v2686_v18 = vpop.permute.xlu0 %2685 }
 0x72b   : > { %3901 = vrot.lane.b32.xlu1 %v15591_v53, %s14826_s8 }
 0x72c   : > { %3929 = vrot.lane.b32.xlu0 %v15602_v60, %s14827_s1 }
 0x72d   : > { %v2702_v46 = vpop.permute.xlu0 %2701  ;;  %v2688_v10 = vpop.permute.xlu1 %2687 }
 0x72e   : > { %v2765_v58 = vcombine.low %v15694_v50, %v2702_v46  ;;  %v2766_v63 = vcombine.high %v15694_v50, %v2702_v46 }
 0x72f   : > { %3903 = vrot.lane.b32.xlu1 %v15595_v4, %s14826_s8 }
 0x730   : > { %3887 = vrot.lane.b32.xlu0 %v15617_v12, %s14825_s7  ;;  %v2773_v16 = vrot.slane %v2765_v58, %v15725_v55  ;;  %v2780_v8 = vrot.slane %v2766_v63, %v15725_v55 }
 0x731   : > { %v2718_v19 = vpop.permute.xlu0 %2717 }
 0x732   : > { %v2781_v51 = vcombine.low %v2686_v18, %v2718_v19  ;;  %v2782_v3 = vcombine.high %v2686_v18, %v2718_v19 }
 0x733   : > { %3927 = vrot.lane.b32.xlu1 %v15595_v4, %s14827_s1 }
 0x734   : > { %v2789_v31 = vrot.slane %v2781_v51, %v15725_v55  ;;  %v2796_v62 = vrot.slane %v2782_v3, %v15725_v55  ;;  %3933 = vrot.lane.b32.xlu0 %v15613_v9, %s14827_s1 }
 0x735   : > { %v2704_v50 = vpop.permute.xlu1 %2703 }
 0x736   : > { %v2797_v47 = vcombine.low %v2773_v16, %v2789_v31  ;;  %v2798_v48 = vcombine.high %v2773_v16, %v2789_v31  ;;  %v2813_v21 = vcombine.low %v2780_v8, %v2796_v62  ;;  %v2814_v38 = vcombine.high %v2780_v8, %v2796_v62 }
 0x737   : > { %3883 = vrot.lane.b32.xlu1 %v15607_v1, %s14825_s7  ;;  %v2833_v63 = vcombine.low %v15702_v54, %v2704_v50  ;;  %v2834_v19 = vcombine.high %v15702_v54, %v2704_v50 }
 0x738   : > { %v2805_v28 = vrot.slane %v2797_v47, %v15732_v39  ;;  %v2812_v18 = vrot.slane %v2798_v48, %v15732_v39  ;;  %v2821_v46 = vrot.slane %v2813_v21, %v15732_v39  ;;  %v2828_v58 = vrot.slane %v2814_v38, %v15732_v39  ;;  %3889 = vrot.lane.b32.xlu0 %v15623_v32, %s14825_s7 }
 0x739   : > { %v2720_v51 = vpop.permute.xlu1 %2719  ;;  %v2841_v54 = vrot.slane %v2833_v63, %v15725_v55  ;;  %v2848_v50 = vrot.slane %v2834_v19, %v15725_v55 }
 0x73a   : > { %v3309_v3 = vcombine.low %v2805_v28, %v2812_v18  ;;  %v12788_v16 = vcombine.high %v2805_v28, %v2812_v18  ;;  %v3325_v8 = vcombine.low %v2821_v46, %v2828_v58  ;;  %v12789_v31 = vcombine.high %v2821_v46, %v2828_v58 }
 0x73b   : > { %v2849_v62 = vcombine.low %v2688_v10, %v2720_v51  ;;  %v2850_v47 = vcombine.high %v2688_v10, %v2720_v51  ;;  %3907 = vrot.lane.b32.xlu1 %v15607_v1, %s14826_s8 }
 0x73c   : > { %v3316_v48 = vrot.slane %v3309_v3, %v15725_v55  ;;  %v3324_v21 = vrot.slane %v12788_v16, %v15725_v55  ;;  %v3332_v38 = vrot.slane %v3325_v8, %v15725_v55  ;;  %v3340_v61 = vrot.slane %v12789_v31, %v15725_v55  ;;  %3913 = vrot.lane.b32.xlu0 %v15623_v32, %s14826_s8 }
 0x73d   : > { %v2857_v10 = vrot.slane %v2849_v62, %v15725_v55  ;;  %v2864_v28 = vrot.slane %v2850_v47, %v15725_v55 }
 0x73e   : > { %v3342_v18 = vcombine.high %v3316_v48, %v3324_v21  ;;  %v3358_v46 = vcombine.high %v3332_v38, %v3340_v61  ;;  %v3341_v52 = vcombine.low %v3316_v48, %v3324_v21  ;;  %v3357_v42 = vcombine.low %v3332_v38, %v3340_v61 }
 0x73f   : > { %v2865_v58 = vcombine.low %v2841_v54, %v2857_v10  ;;  %v2866_v51 = vcombine.high %v2841_v54, %v2857_v10  ;;  %v2881_v3 = vcombine.low %v2848_v50, %v2864_v28  ;;  %v2882_v16 = vcombine.high %v2848_v50, %v2864_v28  ;;  %3931 = vrot.lane.b32.xlu1 %v15607_v1, %s14827_s1 }
 0x740   : > { %v3356_v8 = vrot.slane %v3342_v18, %v15732_v39  ;;  %v3372_v31 = vrot.slane %v3358_v46, %v15732_v39  ;;  %v3349_v48 = vrot.slane %v3341_v52, %v15732_v39  ;;  %v3365_v61 = vrot.slane %v3357_v42, %v15732_v39 }
 0x741   : > { %v2873_v63 = vrot.slane %v2865_v58, %v15732_v39  ;;  %v2880_v19 = vrot.slane %v2866_v51, %v15732_v39  ;;  %v2889_v62 = vrot.slane %v2881_v3, %v15732_v39  ;;  %v2896_v47 = vrot.slane %v2882_v16, %v15732_v39 }
 0x742   : > { %v3375_v54 = vcombine.low %v3356_v8, %v3372_v31  ;;  %v3376_v10 = vcombine.high %v3356_v8, %v3372_v31  ;;  %v3374_v52 = vcombine.high %v3349_v48, %v3365_v61 }
 0x743   : > { %v3377_v50 = vcombine.low %v2873_v63, %v2880_v19  ;;  %v12790_v28 = vcombine.high %v2873_v63, %v2880_v19  ;;  %v3393_v30 = vcombine.low %v2889_v62, %v2896_v47  ;;  %v12791_v25 = vcombine.high %v2889_v62, %v2896_v47  ;;  %3885 = vrot.lane.b32.xlu1 %v15613_v9, %s14825_s7 }
 0x744   : > { %v3373_v19 = vcombine.low %v3349_v48, %v3365_v61 }
 0x745   : > { %v3384_v18 = vrot.slane %v3377_v50, %v15725_v55  ;;  %v3392_v46 = vrot.slane %v12790_v28, %v15725_v55  ;;  %v3400_v58 = vrot.slane %v3393_v30, %v15725_v55  ;;  %v3408_v51 = vrot.slane %v12791_v25, %v15725_v55 }
 0x747   : > { %3909 = vrot.lane.b32.xlu1 %v15613_v9, %s14826_s8  ;;  %v3409_v21 = vcombine.low %v3384_v18, %v3392_v46  ;;  %v3425_v38 = vcombine.low %v3400_v58, %v3408_v51  ;;  %v3410_v3 = vcombine.high %v3384_v18, %v3392_v46  ;;  %v3426_v16 = vcombine.high %v3400_v58, %v3408_v51 }
 0x749   : > { %v2690_v8 = vpop.permute.xlu0 %2689  ;;  %v3417_v31 = vrot.slane %v3409_v21, %v15732_v39  ;;  %v3433_v63 = vrot.slane %v3425_v38, %v15732_v39  ;;  %v3424_v30 = vrot.slane %v3410_v3, %v15732_v39  ;;  %v3440_v25 = vrot.slane %v3426_v16, %v15732_v39 }
 0x74b   : > { %3911 = vrot.lane.b32.xlu1 %v15617_v12, %s14826_s8  ;;  %v3441_v42 = vcombine.low %v3417_v31, %v3433_v63  ;;  %v3442_v62 = vcombine.high %v3417_v31, %v3433_v63  ;;  %v3443_v47 = vcombine.low %v3424_v30, %v3440_v25  ;;  %v3444_v50 = vcombine.high %v3424_v30, %v3440_v25 }
 0x74d   : > { %v2692_v28 = vpop.permute.xlu1 %2691  ;;  %v2706_v18 = vpop.permute.xlu0 %2705  ;;  %v3853_v46 = vpack.c.bf16 %v3441_v42, %v3373_v19  ;;  %v3857_v58 = vpack.c.bf16 %v3442_v62, %v3374_v52  ;;  %v15926_v51 = vpack.c.bf16 %v3443_v47, %v3375_v54  ;;  %v15928_v21 = vpack.c.bf16 %v3444_v50, %v3376_v10 }
 0x74e   : > { %v2901_v38 = vcombine.low %v15706_v57, %v2706_v18  ;;  %v2902_v3 = vcombine.high %v15706_v57, %v2706_v18 }
 0x74f   : > { %13554 = vmatprep.subr.msk.bf16.mxu1 %vm5053_vm3, %v3853_v46  ;;  %13558 = vmatprep.subr.msk.bf16.mxu0 %vm5053_vm3, %v3857_v58  ;;  %v5067_v48 = vsel %vm5053_vm3, %v3853_v46, 0  ;;  %v5156_v61 = vsel %vm5053_vm3, %v3857_v58, 0 }
 0x750   : > { %3935 = vrot.lane.b32.xlu1 %v15617_v12, %s14827_s1  ;;  %13259 = vmatpush3.bf16.xpose.msra.mxu1 %v5067_v48  ;;  %v2909_v63 = vrot.slane %v2901_v38, %v15725_v55  ;;  %v2916_v30 = vrot.slane %v2902_v3, %v15725_v55 }
 0x751   : > { %13275 = vmatpush3.bf16.xpose.msra.mxu0 %v5156_v61  ;;  %v2708_v54 = vpop.permute.xlu1 %2707  ;;  %v2722_v10 = vpop.permute.xlu0 %2721 }
 0x752   : > { %v2917_v16 = vcombine.low %v2690_v8, %v2722_v10  ;;  %v2918_v31 = vcombine.high %v2690_v8, %v2722_v10  ;;  %v2969_v57 = vcombine.low %v15719_v34, %v2708_v54  ;;  %v2970_v52 = vcombine.high %v15719_v34, %v2708_v54 }
 0x754   : > { %v2925_v25 = vrot.slane %v2917_v16, %v15725_v55  ;;  %v2932_v19 = vrot.slane %v2918_v31, %v15725_v55  ;;  %3891 = vrot.lane.b32.xlu1 %v15631_v29, %s14825_s7  ;;  %v2977_v34 = vrot.slane %v2969_v57, %v15725_v55  ;;  %v2984_v54 = vrot.slane %v2970_v52, %v15725_v55 }
 0x755   : > { %v2724_v42 = vpop.permute.xlu1 %2723  ;;  %v2694_v62 = vpop.permute.xlu0 %2693 }
 0x756   : > { %v2933_v47 = vcombine.low %v2909_v63, %v2925_v25  ;;  %v2934_v50 = vcombine.high %v2909_v63, %v2925_v25  ;;  %v2949_v8 = vcombine.low %v2916_v30, %v2932_v19  ;;  %v2950_v18 = vcombine.high %v2916_v30, %v2932_v19 }
 0x757   : > { %v2985_v46 = vcombine.low %v2692_v28, %v2724_v42  ;;  %v2986_v58 = vcombine.high %v2692_v28, %v2724_v42 }
 0x758   : > { %v2941_v48 = vrot.slane %v2933_v47, %v15732_v39  ;;  %v2948_v61 = vrot.slane %v2934_v50, %v15732_v39  ;;  %v2957_v38 = vrot.slane %v2949_v8, %v15732_v39  ;;  %v2964_v3 = vrot.slane %v2950_v18, %v15732_v39  ;;  %3915 = vrot.lane.b32.xlu1 %v15631_v29, %s14826_s8 }
 0x759   : > { %v2993_v10 = vrot.slane %v2985_v46, %v15725_v55  ;;  %v3000_v16 = vrot.slane %v2986_v58, %v15725_v55  ;;  %v2710_v28 = vpop.permute.xlu0 %2709 }
 0x75a   : > { %v3445_v31 = vcombine.low %v2941_v48, %v2948_v61  ;;  %v12792_v63 = vcombine.high %v2941_v48, %v2948_v61  ;;  %v3461_v30 = vcombine.low %v2957_v38, %v2964_v3  ;;  %v12793_v25 = vcombine.high %v2957_v38, %v2964_v3 }
 0x75b   : > { %v3001_v19 = vcombine.low %v2977_v34, %v2993_v10  ;;  %v3002_v42 = vcombine.high %v2977_v34, %v2993_v10  ;;  %v3017_v47 = vcombine.low %v2984_v54, %v3000_v16  ;;  %v3018_v50 = vcombine.high %v2984_v54, %v3000_v16 }
 0x75c   : > { %v3037_v58 = vcombine.low %v15713_v11, %v2710_v28  ;;  %v3038_v48 = vcombine.high %v15713_v11, %v2710_v28  ;;  %v15963_v3 = vrot.slane %v3445_v31, %v15725_v55  ;;  %v15966_v34 = vrot.slane %v12792_v63, %v15725_v55 }
 0x75d   : > { %v3009_v8 = vrot.slane %v3001_v19, %v15732_v39  ;;  %v3016_v18 = vrot.slane %v3002_v42, %v15732_v39  ;;  %v3025_v57 = vrot.slane %v3017_v47, %v15732_v39  ;;  %v3032_v52 = vrot.slane %v3018_v50, %v15732_v39  ;;  %v2696_v46 = vpop.permute.xlu1 %2695  ;;  %v2726_v24 = vpop.permute.xlu0 %2725 }
 0x75e   : > { %v3053_v61 = vcombine.low %v2694_v62, %v2726_v24  ;;  %v3054_v38 = vcombine.high %v2694_v62, %v2726_v24  ;;  %v15969_v54 = vrot.slane %v3461_v30, %v15725_v55  ;;  %v15972_v10 = vrot.slane %v12793_v25, %v15725_v55 }
 0x75f   : > { %v3045_v16 = vrot.slane %v3037_v58, %v15725_v55  ;;  %v3052_v19 = vrot.slane %v3038_v48, %v15725_v55  ;;  %v3513_v62 = vcombine.low %v3009_v8, %v3016_v18  ;;  %v12794_v28 = vcombine.high %v3009_v8, %v3016_v18 }
 0x760   : > { %v3061_v11 = vrot.slane %v3053_v61, %v15725_v55  ;;  %v3068_v24 = vrot.slane %v3054_v38, %v15725_v55  ;;  %v3529_v31 = vcombine.low %v3025_v57, %v3032_v52  ;;  %v12795_v42 = vcombine.high %v3025_v57, %v3032_v52 }
 0x761   : > { %v2712_v63 = vpop.permute.xlu1 %2711  ;;  %v2698_v47 = vpop.permute.xlu0 %2697  ;;  %v3477_v48 = vcombine.low %v15963_v3, %v15966_v34  ;;  %v3493_v61 = vcombine.low %v15969_v54, %v15972_v10  ;;  %v15993_v38 = vrot.slane %v3513_v62, %v15725_v55 }
 0x762   : > { %v3069_v50 = vcombine.low %v3045_v16, %v3061_v11  ;;  %v3070_v30 = vcombine.high %v3045_v16, %v3061_v11  ;;  %v3085_v23 = vcombine.low %v3052_v19, %v3068_v24  ;;  %v3086_v22 = vcombine.high %v3052_v19, %v3068_v24 }
 0x763   : > { %v3105_v25 = vcombine.low %v15744_v6, %v2712_v63  ;;  %v3106_v58 = vcombine.high %v15744_v6, %v2712_v63  ;;  %v15996_v6 = vrot.slane %v12794_v28, %v15725_v55  ;;  %v15999_v16 = vrot.slane %v3529_v31, %v15725_v55 }
 0x764   : > { %v3077_v8 = vrot.slane %v3069_v50, %v15732_v39  ;;  %v3084_v18 = vrot.slane %v3070_v30, %v15732_v39  ;;  %v15987_v57 = vrot.slane %v3085_v23, %v15732_v39  ;;  %v15990_v52 = vrot.slane %v3086_v22, %v15732_v39 }
 0x765   : > { %v2728_v19 = vpop.permute.xlu1 %2727  ;;  %v16002_v11 = vrot.slane %v12795_v42, %v15725_v55  ;;  %v3113_v50 = vrot.slane %v3105_v25, %v15725_v55  ;;  %v3120_v62 = vrot.slane %v3106_v58, %v15725_v55  ;;  %v3485_v42 = vrot.slane %v3477_v48, %v15732_v39 }
 0x766   : > { %v3581_v24 = vcombine.low %v3077_v8, %v3084_v18  ;;  %v12796_v63 = vcombine.high %v3077_v8, %v3084_v18  ;;  %v3597_v23 = vcombine.low %v15987_v57, %v15990_v52  ;;  %v2714_v22 = vpop.permute.xlu0 %2713  ;;  %v3121_v30 = vcombine.low %v2696_v46, %v2728_v19 }
 0x767   : > { %v3122_v28 = vcombine.high %v2696_v46, %v2728_v19  ;;  %v12797_v31 = vcombine.high %v15987_v57, %v15990_v52  ;;  %v3173_v37 = vcombine.low %v15842_v27, %v2714_v22  ;;  %v3501_v35 = vrot.slane %v3493_v61, %v15732_v39 }
 0x768   : > { %v16014_v8 = vrot.slane %v3581_v24, %v15725_v55  ;;  %v3129_v18 = vrot.slane %v3121_v30, %v15725_v55  ;;  %v3174_v58 = vcombine.high %v15842_v27, %v2714_v22  ;;  %v16020_v46 = vrot.slane %v12796_v63, %v15725_v55 }
 0x769   : > { %v3136_v25 = vrot.slane %v3122_v28, %v15725_v55  ;;  %v16023_v57 = vrot.slane %v3597_v23, %v15725_v55  ;;  %v3545_v48 = vcombine.low %v15993_v38, %v15996_v6  ;;  %v3561_v61 = vcombine.low %v15999_v16, %v16002_v11 }
 0x76a   : > { %v2730_v52 = vpop.permute.xlu0 %2729  ;;  %v3137_v19 = vcombine.low %v3113_v50, %v3129_v18  ;;  %v3138_v24 = vcombine.high %v3113_v50, %v3129_v18  ;;  %v3181_v13 = vrot.slane %v3173_v37, %v15725_v55  ;;  %v3188_v50 = vrot.slane %v3174_v58, %v15725_v55 }
 0x76b   : > { %v3153_v30 = vcombine.low %v3120_v62, %v3136_v25  ;;  %v3154_v33 = vcombine.high %v3120_v62, %v3136_v25  ;;  %v3189_v28 = vcombine.low %v2698_v47, %v2730_v52  ;;  %v3190_v26 = vcombine.high %v2698_v47, %v2730_v52 }
 0x76c   : > { %v3553_v27 = vrot.slane %v3545_v48, %v15732_v39  ;;  %v3569_v63 = vrot.slane %v3561_v61, %v15732_v39  ;;  %v3145_v23 = vrot.slane %v3137_v19, %v15732_v39  ;;  %v3152_v22 = vrot.slane %v3138_v24, %v15732_v39 }
 0x76d   : > { %v3161_v17 = vrot.slane %v3153_v30, %v15732_v39  ;;  %v3168_v20 = vrot.slane %v3154_v33, %v15732_v39  ;;  %v2700_v15 = vpop.permute.xlu1 %2699  ;;  %v3197_v62 = vrot.slane %v3189_v28, %v15725_v55  ;;  %v3204_v47 = vrot.slane %v3190_v26, %v15725_v55 }
 0x76e   : > { %v1466_v18 = vpop.permute.xlu0 %1465  ;;  %v3649_v25 = vcombine.low %v3145_v23, %v3152_v22  ;;  %v12798_v52 = vcombine.high %v3145_v23, %v3152_v22  ;;  %v3577_v48 = vcombine.low %v3553_v27, %v3569_v63  ;;  %v3578_v61 = vcombine.high %v3553_v27, %v3569_v63 }
 0x76f   : > { %v3205_v19 = vcombine.low %v3181_v13, %v3197_v62  ;;  %v3206_v24 = vcombine.high %v3181_v13, %v3197_v62  ;;  %v3221_v5 = vcombine.low %v3188_v50, %v3204_v47  ;;  %v3222_v30 = vcombine.high %v3188_v50, %v3204_v47 }
 0x770   : > { %v3665_v7 = vcombine.low %v3161_v17, %v3168_v20  ;;  %v12799_v33 = vcombine.high %v3161_v17, %v3168_v20  ;;  %v3509_v2 = vcombine.low %v3485_v42, %v3501_v35  ;;  %v3510_v32 = vcombine.high %v3485_v42, %v3501_v35 }
 0x771   : > { %v2716_v37 = vpop.permute.xlu1 %2715  ;;  %v3213_v58 = vrot.slane %v3205_v19, %v15732_v39  ;;  %v3220_v28 = vrot.slane %v3206_v24, %v15732_v39  ;;  %v16042_v26 = vrot.slane %v3221_v5, %v15732_v39  ;;  %v16045_v23 = vrot.slane %v3222_v30, %v15732_v39 }
 0x772   : > { %v1490_v27 = vpop.permute.xlu0 %1489  ;;  %v16048_v13 = vrot.slane %v12797_v31, %v15725_v55  ;;  %v3854_v63 = vpack.c.bf16 %v3577_v48, %v3509_v2  ;;  %v3858_v22 = vpack.c.bf16 %v3578_v61, %v3510_v32  ;;  %v1645_v17 = vcombine.low %v15674_v41, %v1466_v18 }
 0x773   : > { %v16052_v35 = vrot.slane %v3649_v25, %v15725_v55  ;;  %v16055_v20 = vrot.slane %v12798_v52, %v15725_v55  ;;  %v3717_v42 = vcombine.low %v3213_v58, %v3220_v28  ;;  %v1646_v5 = vcombine.high %v15674_v41, %v1466_v18 }
 0x774   : > { %v16059_v50 = vrot.slane %v3665_v7, %v15725_v55  ;;  %v12800_v62 = vcombine.high %v3213_v58, %v3220_v28  ;;  %13555 = vmatprep.subr.msk.bf16.mxu1 %vm5053_vm3, %v3854_v63  ;;  %13559 = vmatprep.subr.msk.bf16.mxu0 %vm5053_vm3, %v3858_v22  ;;  %v5070_v2 = vsel %vm5053_vm3, %v3854_v63, 0  ;;  %v5159_v32 = vsel %vm5053_vm3, %v3858_v22, 0 }
 0x775   : > { %19746 = vst [vmem:[#allocation66_spill] sm:$0xff] %v16052_v35  ;;  %19747 = vst [vmem:[#allocation67_spill] sm:$0xff] %v16055_v20  ;;  %v2732_v31 = vpop.permute.xlu1 %2731  ;;  %v16066_v47 = vrot.slane %v12799_v33, %v15725_v55  ;;  %v3733_v25 = vcombine.low %v16042_v26, %v16045_v23  ;;  %v12801_v7 = vcombine.high %v16042_v26, %v16045_v23  ;;  %13261 = vmatpush3.bf16.xpose.msra.mxu1 %v5070_v2 }
 0x776   : > { %19748 = vst [vmem:[#allocation68_spill] sm:$0xff] %v16059_v50  ;;  %v1653_v41 = vrot.slane %v1645_v17, %v15725_v55  ;;  %13277 = vmatpush3.bf16.xpose.msra.mxu0 %v5159_v32  ;;  %v3241_v18 = vcombine.low %v15864_v44, %v2716_v37  ;;  %v3242_v52 = vcombine.high %v15864_v44, %v2716_v37  ;;  %v16077_v19 = vpop.permute.xlu0 %1445 }
 0x777   : > { %19749 = vst [vmem:[#allocation69_spill] sm:$0xff] %v16066_v47  ;;  %v1661_v48 = vcombine.low %v15852_v56, %v1490_v27  ;;  %v1662_v61 = vcombine.high %v15852_v56, %v1490_v27  ;;  %v16080_v24 = vrot.slane %v3717_v42, %v15725_v55  ;;  %v1660_v30 = vrot.slane %v1646_v5, %v15725_v55 }
 0x778   : > { %v3257_v33 = vcombine.low %v2700_v15, %v2732_v31  ;;  %v3258_v58 = vcombine.high %v2700_v15, %v2732_v31  ;;  %v16084_v28 = vrot.slane %v12800_v62, %v15725_v55  ;;  %v3249_v26 = vrot.slane %v3241_v18, %v15725_v55 }
 0x779   : > { %v1669_v44 = vrot.slane %v1661_v48, %v15725_v55  ;;  %v1676_v37 = vrot.slane %v1662_v61, %v15725_v55  ;;  %v1468_v23 = vpop.permute.xlu1 %1467  ;;  %v3256_v56 = vrot.slane %v3242_v52, %v15725_v55 }
 0x77a   : > { %v3265_v27 = vrot.slane %v3257_v33, %v15725_v55  ;;  %v3272_v63 = vrot.slane %v3258_v58, %v15725_v55  ;;  %v1713_v22 = vcombine.low %v15688_v45, %v1468_v23  ;;  %v1470_v33 = vpop.permute.xlu0 %1469 }
 0x77b   : > { %v1677_v17 = vcombine.low %v1653_v41, %v1669_v44  ;;  %v1678_v15 = vcombine.high %v1653_v41, %v1669_v44  ;;  %v1693_v42 = vcombine.low %v1660_v30, %v1676_v37  ;;  %v1694_v5 = vcombine.high %v1660_v30, %v1676_v37 }
 0x77c   : > { %v3273_v62 = vcombine.low %v3249_v26, %v3265_v27  ;;  %v3274_v2 = vcombine.high %v3249_v26, %v3265_v27  ;;  %v3289_v32 = vcombine.low %v3256_v56, %v3272_v63  ;;  %v3290_v31 = vcombine.high %v3256_v56, %v3272_v63 }
 0x77d   : > { %v1685_v18 = vrot.slane %v1677_v17, %v15732_v39  ;;  %v1692_v48 = vrot.slane %v1678_v15, %v15732_v39  ;;  %v1701_v52 = vrot.slane %v1693_v42, %v15732_v39  ;;  %v1708_v61 = vrot.slane %v1694_v5, %v15732_v39  ;;  %v1492_v27 = vpop.permute.xlu1 %1491 }
 0x77e   : > { %v3281_v58 = vrot.slane %v3273_v62, %v15732_v39  ;;  %v3288_v29 = vrot.slane %v3274_v2, %v15732_v39  ;;  %v3297_v41 = vrot.slane %v3289_v32, %v15732_v39  ;;  %v3304_v30 = vrot.slane %v3290_v31, %v15732_v39 }
 0x77f   : > { %v2189_v26 = vcombine.low %v1685_v18, %v1692_v48  ;;  %v12776_v44 = vcombine.high %v1685_v18, %v1692_v48  ;;  %v2205_v37 = vcombine.low %v1701_v52, %v1708_v61  ;;  %v12777_v56 = vcombine.high %v1701_v52, %v1708_v61 }
 0x780   : > { %v3785_v63 = vcombine.low %v3281_v58, %v3288_v29  ;;  %v12802_v17 = vcombine.high %v3281_v58, %v3288_v29  ;;  %v3801_v15 = vcombine.low %v3297_v41, %v3304_v30  ;;  %v12803_v42 = vcombine.high %v3297_v41, %v3304_v30  ;;  %v1494_v41 = vpop.permute.xlu0 %1493 }
 0x781   : > { %v16102_v5 = vrot.slane %v2189_v26, %v15725_v55  ;;  %v16105_v62 = vrot.slane %v12776_v44, %v15725_v55  ;;  %v16108_v2 = vrot.slane %v2205_v37, %v15725_v55  ;;  %v16111_v32 = vrot.slane %v12777_v56, %v15725_v55 }
 0x782   : > { %v16114_v31 = vrot.slane %v3733_v25, %v15725_v55  ;;  %v1714_v18 = vcombine.high %v15688_v45, %v1468_v23  ;;  %v3613_v29 = vcombine.low %v16014_v8, %v16020_v46  ;;  %v3629_v48 = vcombine.low %v16023_v57, %v16048_v13 }
 0x783   : > { %v16122_v52 = vrot.slane %v12801_v7, %v15725_v55  ;;  %v2221_v61 = vcombine.low %v16102_v5, %v16105_v62  ;;  %v16127_v58 = vrot.slane %v3785_v63, %v15725_v55  ;;  %v16130_v25 = vrot.slane %v12802_v17, %v15725_v55  ;;  %v16147_v63 = vpop.permute.xlu1 %1447 }
 0x784   : > { %v16133_v45 = vrot.slane %v3801_v15, %v15725_v55  ;;  %v16136_v23 = vrot.slane %v12803_v42, %v15725_v55  ;;  %v1781_v30 = vcombine.low %v15768_v0, %v1470_v33  ;;  %v1782_v7 = vcombine.high %v15768_v0, %v1470_v33  ;;  %v16169_v36 = vpop.permute.xlu0 %1449 }
 0x785   : > { %v1721_v56 = vrot.slane %v1713_v22, %v15725_v55  ;;  %v16150_v17 = vrot.slane %v2221_v61, %v15732_v39  ;;  %v1728_v15 = vrot.slane %v1714_v18, %v15725_v55  ;;  %v3621_v0 = vrot.slane %v3613_v29, %v15732_v39 }
 0x786   : > { %v3637_v33 = vrot.slane %v3629_v48, %v15732_v39  ;;  %v3681_v42 = vcombine.low %v16052_v35, %v16055_v20  ;;  %v3697_v44 = vcombine.low %v16059_v50, %v16066_v47  ;;  %v1729_v37 = vcombine.low %v15854_v49, %v1492_v27 }
 0x787   : > { %v1730_v22 = vcombine.high %v15854_v49, %v1492_v27  ;;  %v1789_v26 = vrot.slane %v1781_v30, %v15725_v55  ;;  %v1796_v61 = vrot.slane %v1782_v7, %v15725_v55  ;;  %v1797_v18 = vcombine.low %v16077_v19, %v1494_v41 }
 0x788   : > { %v1798_v29 = vcombine.high %v16077_v19, %v1494_v41  ;;  %v3689_v48 = vrot.slane %v3681_v42, %v15732_v39  ;;  %v3705_v12 = vrot.slane %v3697_v44, %v15732_v39  ;;  %v1737_v9 = vrot.slane %v1729_v37, %v15725_v55  ;;  %v1472_v41 = vpop.permute.xlu1 %1471 }
 0x789   : > { %v1744_v43 = vrot.slane %v1730_v22, %v15725_v55  ;;  %v3645_v1 = vcombine.low %v3621_v0, %v3637_v33  ;;  %v3646_v49 = vcombine.high %v3621_v0, %v3637_v33  ;;  %v1805_v27 = vrot.slane %v1797_v18, %v15725_v55 }
 0x78a   : > { %v1812_v30 = vrot.slane %v1798_v29, %v15725_v55  ;;  %v3713_v7 = vcombine.low %v3689_v48, %v3705_v12  ;;  %v3714_v4 = vcombine.high %v3689_v48, %v3705_v12  ;;  %v1745_v53 = vcombine.low %v1721_v56, %v1737_v9 }
 0x78b   : > { %v1746_v19 = vcombine.high %v1721_v56, %v1737_v9  ;;  %v1761_v42 = vcombine.low %v1728_v15, %v1744_v43  ;;  %v1762_v50 = vcombine.high %v1728_v15, %v1744_v43  ;;  %v1813_v44 = vcombine.low %v1789_v26, %v1805_v27  ;;  %v1474_v43 = vpop.permute.xlu0 %1473 }
 0x78c   : > { %v1814_v47 = vcombine.high %v1789_v26, %v1805_v27  ;;  %v3855_v37 = vpack.c.bf16 %v3713_v7, %v3645_v1  ;;  %v3859_v35 = vpack.c.bf16 %v3714_v4, %v3646_v49  ;;  %v1753_v22 = vrot.slane %v1745_v53, %v15732_v39  ;;  %v1496_v49 = vpop.permute.xlu1 %1495 }
 0x78d   : > { %v1760_v20 = vrot.slane %v1746_v19, %v15732_v39  ;;  %v1769_v0 = vrot.slane %v1761_v42, %v15732_v39  ;;  %v1776_v33 = vrot.slane %v1762_v50, %v15732_v39  ;;  %v1821_v18 = vrot.slane %v1813_v44, %v15732_v39 }
 0x78e   : > { %v1828_v12 = vrot.slane %v1814_v47, %v15732_v39  ;;  %13556 = vmatprep.subr.msk.bf16.mxu1 %vm5053_vm3, %v3855_v37  ;;  %13560 = vmatprep.subr.msk.bf16.mxu0 %vm5053_vm3, %v3859_v35  ;;  %v5073_v9 = vsel %vm5053_vm3, %v3855_v37, 0  ;;  %v5162_v4 = vsel %vm5053_vm3, %v3859_v35, 0  ;;  %v1829_v50 = vcombine.low %v1796_v61, %v1812_v30 }
 0x78f   : > { %v2257_v1 = vcombine.low %v1753_v22, %v1760_v20  ;;  %v12778_v53 = vcombine.high %v1753_v22, %v1760_v20  ;;  %13263 = vmatpush3.bf16.xpose.msra.mxu1 %v5073_v9  ;;  %13279 = vmatpush3.bf16.xpose.msra.mxu0 %v5162_v4  ;;  %v2273_v26 = vcombine.low %v1769_v0, %v1776_v33 }
 0x790   : > { %v12779_v56 = vcombine.high %v1769_v0, %v1776_v33  ;;  %v1830_v29 = vcombine.high %v1796_v61, %v1812_v30  ;;  %v2325_v48 = vcombine.low %v1821_v18, %v1828_v12  ;;  %v12780_v35 = vcombine.high %v1821_v18, %v1828_v12 }
 0x791   : > { %v2264_v15 = vrot.slane %v2257_v1, %v15725_v55  ;;  %v2272_v47 = vrot.slane %v12778_v53, %v15725_v55  ;;  %v2280_v27 = vrot.slane %v2273_v26, %v15725_v55  ;;  %v1849_v20 = vcombine.low %v15792_v14, %v1472_v41  ;;  %v1498_v1 = vpop.permute.xlu0 %1497 }
 0x792   : > { %v2288_v7 = vrot.slane %v12779_v56, %v15725_v55  ;;  %v16189_v44 = vrot.slane %v1829_v50, %v15732_v39  ;;  %v16192_v37 = vrot.slane %v1830_v29, %v15732_v39  ;;  %v19750_v61 = vcombine.high %v16102_v5, %v16105_v62 }
 0x793   : > { %v2289_v19 = vcombine.low %v2264_v15, %v2272_v47  ;;  %v2290_v42 = vcombine.high %v2264_v15, %v2272_v47  ;;  %v19752_v22 = vcombine.low %v16108_v2, %v16111_v32  ;;  %v19753_v33 = vcombine.high %v16108_v2, %v16111_v32 }
 0x794   : > { %v16198_v30 = vrot.slane %v19750_v61, %v15732_v39  ;;  %v2305_v12 = vcombine.low %v2280_v27, %v2288_v7  ;;  %v2306_v9 = vcombine.high %v2280_v27, %v2288_v7  ;;  %v16213_v4 = vrot.slane %v2325_v48, %v15725_v55 }
 0x795   : > { %v16204_v0 = vrot.slane %v19752_v22, %v15732_v39  ;;  %v16210_v18 = vrot.slane %v19753_v33, %v15732_v39  ;;  %v16216_v5 = vrot.slane %v12780_v35, %v15725_v55  ;;  %v1850_v62 = vcombine.high %v15792_v14, %v1472_v41  ;;  %v16233_v41 = vpop.permute.xlu1 %1451  ;;  %v16255_v61 = vpop.permute.xlu0 %3879 }
 0x796   : > { %19751 = vst [vmem:[#allocation70_spill] sm:$0xff] %v16198_v30  ;;  %v16220_v53 = vrot.slane %v2289_v19, %v15732_v39  ;;  %v16223_v26 = vrot.slane %v2290_v42, %v15732_v39  ;;  %v1857_v2 = vrot.slane %v1849_v20, %v15725_v55  ;;  %v1917_v32 = vcombine.low %v15799_v59, %v1474_v43 }
 0x797   : > { %19754 = vst [vmem:[#allocation71_spill] sm:$0xff] %v16210_v18  ;;  %v2341_v56 = vcombine.low %v16189_v44, %v16192_v37  ;;  %v12781_v50 = vcombine.high %v16189_v44, %v16192_v37  ;;  %v1918_v15 = vcombine.high %v15799_v59, %v1474_v43  ;;  %v1865_v14 = vcombine.low %v16147_v63, %v1496_v49 }
 0x798   : > { %v16236_v47 = vrot.slane %v2305_v12, %v15732_v39  ;;  %v1866_v29 = vcombine.high %v16147_v63, %v1496_v49  ;;  %v1933_v48 = vcombine.low %v16169_v36, %v1498_v1  ;;  %v1934_v27 = vcombine.high %v16169_v36, %v1498_v1 }
 0x799   : > { %v16242_v7 = vrot.slane %v2306_v9, %v15732_v39  ;;  %v1864_v35 = vrot.slane %v1850_v62, %v15725_v55  ;;  %v1925_v59 = vrot.slane %v1917_v32, %v15725_v55  ;;  %v1873_v43 = vrot.slane %v1865_v14, %v15725_v55  ;;  %v1476_v14 = vpop.permute.xlu1 %1475 }
 0x79a   : > { %v1932_v20 = vrot.slane %v1918_v15, %v15725_v55  ;;  %v1880_v19 = vrot.slane %v1866_v29, %v15725_v55  ;;  %v1941_v42 = vrot.slane %v1933_v48, %v15725_v55  ;;  %v1948_v63 = vrot.slane %v1934_v27, %v15725_v55 }
 0x79b   : > { %v1881_v49 = vcombine.low %v1857_v2, %v1873_v43  ;;  %v1882_v44 = vcombine.high %v1857_v2, %v1873_v43  ;;  %v3749_v36 = vcombine.low %v16080_v24, %v16084_v28  ;;  %v3765_v37 = vcombine.low %v16114_v31, %v16122_v52 }
 0x79c   : > { %v1897_v22 = vcombine.low %v1864_v35, %v1880_v19  ;;  %v1898_v33 = vcombine.high %v1864_v35, %v1880_v19  ;;  %v1949_v12 = vcombine.low %v1925_v59, %v1941_v42  ;;  %v1950_v9 = vcombine.high %v1925_v59, %v1941_v42 }
 0x79d   : > { %v1889_v62 = vrot.slane %v1881_v49, %v15732_v39  ;;  %v1896_v1 = vrot.slane %v1882_v44, %v15732_v39  ;;  %v1965_v32 = vcombine.low %v1932_v20, %v1948_v63  ;;  %v1966_v15 = vcombine.high %v1932_v20, %v1948_v63 }
 0x79e   : > { %v1905_v2 = vrot.slane %v1897_v22, %v15732_v39  ;;  %v1912_v29 = vrot.slane %v1898_v33, %v15732_v39  ;;  %v1957_v48 = vrot.slane %v1949_v12, %v15732_v39  ;;  %v1964_v27 = vrot.slane %v1950_v9, %v15732_v39  ;;  %v16276_v12 = vpop.permute.xlu0 %3925 }
 0x79f   : > { %v2393_v43 = vcombine.low %v1889_v62, %v1896_v1  ;;  %v12782_v30 = vcombine.high %v1889_v62, %v1896_v1  ;;  %v16264_v35 = vrot.slane %v1965_v32, %v15732_v39  ;;  %v16267_v59 = vrot.slane %v1966_v15, %v15732_v39  ;;  %v1500_v15 = vpop.permute.xlu1 %1499 }
 0x7a0   : > { %v2409_v19 = vcombine.low %v1905_v2, %v1912_v29  ;;  %v12783_v42 = vcombine.high %v1905_v2, %v1912_v29  ;;  %v2461_v20 = vcombine.low %v1957_v48, %v1964_v27  ;;  %v3817_v63 = vcombine.low %v16127_v58, %v16130_v25 }
 0x7a1   : > { %v16272_v49 = vrot.slane %v2341_v56, %v15725_v55  ;;  %v12784_v44 = vcombine.high %v1957_v48, %v1964_v27  ;;  %v3757_v22 = vrot.slane %v3749_v36, %v15732_v39  ;;  %v3773_v33 = vrot.slane %v3765_v37, %v15732_v39 }
 0x7a2   : > { %v16279_v9 = vrot.slane %v12781_v50, %v15725_v55  ;;  %v16282_v62 = vrot.slane %v2393_v43, %v15725_v55  ;;  %v16285_v1 = vrot.slane %v12782_v30, %v15725_v55  ;;  %v16290_v32 = vrot.slane %v2409_v19, %v15725_v55 }
 0x7a3   : > { %v16293_v36 = vrot.slane %v12783_v42, %v15725_v55  ;;  %v16296_v37 = vrot.slane %v2461_v20, %v15725_v55  ;;  %v3825_v2 = vrot.slane %v3817_v63, %v15732_v39  ;;  %v3833_v30 = vcombine.low %v16133_v45, %v16136_v23 }
 0x7a4   : > { %v1985_v29 = vcombine.low %v15824_v40, %v1476_v14  ;;  %v1986_v48 = vcombine.high %v15824_v40, %v1476_v14  ;;  %v16306_v27 = vrot.slane %v12784_v44, %v15725_v55  ;;  %v3781_v43 = vcombine.low %v3757_v22, %v3773_v33 }
 0x7a5   : > { %v3782_v19 = vcombine.high %v3757_v22, %v3773_v33  ;;  %v2253_v42 = vcombine.low %v16150_v17, %v16204_v0  ;;  %v3841_v20 = vrot.slane %v3833_v30, %v15732_v39  ;;  %v2321_v63 = vcombine.low %v16220_v53, %v16236_v47  ;;  %v16324_v33 = vpop.permute.xlu0 %3881 }
 0x7a6   : > { %v2254_v50 = vcombine.high %v16150_v17, %v16204_v0  ;;  %v3478_v56 = vcombine.high %v15963_v3, %v15966_v34  ;;  %v1993_v40 = vrot.slane %v1985_v29, %v15725_v55  ;;  %v2322_v14 = vcombine.high %v16220_v53, %v16236_v47 }
 0x7a7   : > { %v3494_v44 = vcombine.high %v15969_v54, %v15972_v10  ;;  %v3546_v22 = vcombine.high %v15993_v38, %v15996_v6  ;;  %v3849_v30 = vcombine.low %v3825_v2, %v3841_v20  ;;  %v3850_v18 = vcombine.high %v3825_v2, %v3841_v20  ;;  %v3878_v10 = vpop.permute.xlu1 %3877 }
 0x7a8   : > { %v2000_v17 = vrot.slane %v1986_v48, %v15725_v55  ;;  %v3562_v3 = vcombine.high %v15999_v16, %v16002_v11  ;;  %v3492_v34 = vrot.slane %v3478_v56, %v15732_v39  ;;  %v2001_v53 = vcombine.low %v16233_v41, %v1500_v15 }
 0x7a9   : > { %v3560_v0 = vrot.slane %v3546_v22, %v15732_v39  ;;  %v2002_v54 = vcombine.high %v16233_v41, %v1500_v15  ;;  %v3856_v47 = vpack.c.bf16 %v3849_v30, %v3781_v43  ;;  %v3860_v38 = vpack.c.bf16 %v3850_v18, %v3782_v19 }
 0x7aa   : > { %v3508_v6 = vrot.slane %v3494_v44, %v15732_v39  ;;  %v3576_v2 = vrot.slane %v3562_v3, %v15732_v39  ;;  %v2598_v29 = vpack.c.bf16 %v2321_v63, %v2253_v42  ;;  %v2602_v48 = vpack.c.bf16 %v2322_v14, %v2254_v50  ;;  %v3906_v50 = vpop.permute.xlu0 %3905 }
 0x7ab   : > { %v2009_v20 = vrot.slane %v2001_v53, %v15725_v55  ;;  %v2016_v16 = vrot.slane %v2002_v54, %v15725_v55  ;;  %13557 = vmatprep.subr.msk.bf16.mxu1 %vm5053_vm3, %v3856_v47  ;;  %13561 = vmatprep.subr.msk.bf16.mxu0 %vm5053_vm3, %v3860_v38  ;;  %v5076_v11 = vsel %vm5053_vm3, %v3856_v47, 0  ;;  %v5165_v41 = vsel %vm5053_vm3, %v3860_v38, 0 }
 0x7ac   : > { %v3579_v56 = vcombine.low %v3560_v0, %v3576_v2  ;;  %v3580_v18 = vcombine.high %v3560_v0, %v3576_v2  ;;  %13265 = vmatpush3.bf16.xpose.msra.mxu1 %v5076_v11  ;;  %13281 = vmatpush3.bf16.xpose.msra.mxu0 %v5165_v41  ;;  %v5245_v42 = vsel %vm5053_vm3, %v15926_v51, 0  ;;  %v3511_v63 = vcombine.low %v3492_v34, %v3508_v6  ;;  %v3902_v0 = vpop.permute.xlu1 %3901 }
 0x7ad   : > { %v2017_v15 = vcombine.low %v1993_v40, %v2009_v20  ;;  %v2018_v43 = vcombine.high %v1993_v40, %v2009_v20  ;;  %v2033_v19 = vcombine.low %v2000_v17, %v2016_v16  ;;  %13562 = vmatprep.subr.msk.bf16.mxu1 %vm5053_vm3, %v15926_v51  ;;  %13566 = vmatprep.subr.msk.bf16.mxu0 %vm5053_vm3, %v15928_v21 }
 0x7ae   : > { %v2034_v14 = vcombine.high %v2000_v17, %v2016_v16  ;;  %v3965_v44 = vcombine.low %v3878_v10, %v16276_v12  ;;  %v3966_v3 = vcombine.high %v3878_v10, %v16276_v12  ;;  %v3512_v53 = vcombine.high %v3492_v34, %v3508_v6 }
 0x7af   : > { %v16349_v22 = vrot.slane %v2017_v15, %v15732_v39  ;;  %v16352_v40 = vrot.slane %v2018_v43, %v15732_v39  ;;  %v16355_v30 = vrot.slane %v2033_v19, %v15732_v39  ;;  %v4085_v51 = vcombine.low %v15602_v60, %v3906_v50  ;;  %v3930_v19 = vpop.permute.xlu0 %3929 }
 0x7b0   : > { %v16359_v54 = vrot.slane %v2034_v14, %v15732_v39  ;;  %v4086_v17 = vcombine.high %v15602_v60, %v3906_v50  ;;  %v19755_v47 = vcombine.low %v16264_v35, %v16267_v59  ;;  %v19756_v2 = vcombine.high %v16264_v35, %v16267_v59 }
 0x7b1   : > { %v3862_v34 = vpack.c.bf16 %v3579_v56, %v3511_v63  ;;  %v2529_v10 = vcombine.low %v16349_v22, %v16352_v40  ;;  %v3866_v6 = vpack.c.bf16 %v3580_v18, %v3512_v53  ;;  %v12786_v60 = vcombine.high %v16349_v22, %v16352_v40  ;;  %v19760_v63 = vld [vmem:[#allocation68_spill] sm:$0xff] }
 0x7b2   : > { %v16367_v38 = vrot.slane %v19755_v47, %v15725_v55  ;;  %v16373_v12 = vrot.slane %v19756_v2, %v15725_v55  ;;  %v3973_v20 = vrot.slane %v3965_v44, %v15725_v55  ;;  %v3980_v16 = vrot.slane %v3966_v3, %v15725_v55  ;;  %v16406_v44 = vpop.permute.xlu1 %3903 }
 0x7b3   : > { %v2545_v11 = vcombine.low %v16355_v30, %v16359_v54  ;;  %v12787_v35 = vcombine.high %v16355_v30, %v16359_v54  ;;  %v4093_v59 = vrot.slane %v4085_v51, %v15725_v55  ;;  %v3614_v41 = vcombine.high %v16014_v8, %v16020_v46  ;;  %13267 = vmatmul.mubr.msk.bf16.vlgmr.msra.gmra.mrb[8].mxu1 %vm5053_vm3, %v2598_v29  ;;  %v19757_v29 = vld [vmem:[#allocation67_spill] sm:$0xff] }
 0x7b4   : > { %13283 = vmatmul.mubr.msk.bf16.vlgmr.msra.gmra.mrb[20].mxu0 %vm5053_vm3, %v2602_v48  ;;  %v5334_v56 = vsel %vm5053_vm3, %v15928_v21, 0  ;;  %v16393_v18 = vrot.slane %v2529_v10, %v15725_v55  ;;  %v16396_v15 = vrot.slane %v4086_v17, %v15725_v55  ;;  %v3630_v43 = vcombine.high %v16023_v57, %v16048_v13  ;;  %13291 = vmatpush3.bf16.xpose.msra.mxu1 %v5245_v42  ;;  %v19758_v48 = vld [vmem:[#allocation66_spill] sm:$0xff]  ;;  %v19759_v21 = vld [vmem:[#allocation69_spill] sm:$0xff] }
 0x7b5   : > { %13307 = vmatpush3.bf16.xpose.msra.mxu0 %v5334_v56  ;;  %v5248_v8 = vsel %vm5053_vm3, %v3862_v34, 0  ;;  %v3628_v46 = vrot.slane %v3614_v41, %v15732_v39  ;;  %v3682_v50 = vcombine.high %v19758_v48, %v19757_v29  ;;  %v3698_v14 = vcombine.high %v19760_v63, %v19759_v21  ;;  %13563 = vmatprep.subr.msk.bf16.mxu1 %vm5053_vm3, %v3862_v34  ;;  %v19761_v42 = vld [vmem:[#allocation57_spill] sm:$0xff] }
 0x7b6   : > { %13567 = vmatprep.subr.msk.bf16.mxu0 %vm5053_vm3, %v3866_v6  ;;  %v5337_v57 = vsel %vm5053_vm3, %v3866_v6, 0  ;;  %v3644_v13 = vrot.slane %v3630_v43, %v15732_v39  ;;  %v3949_v22 = vcombine.low %v19761_v42, %v3902_v0  ;;  %v3950_v40 = vcombine.high %v19761_v42, %v3902_v0 }
 0x7b7   : > { %v3696_v30 = vrot.slane %v3682_v50, %v15732_v39  ;;  %v3712_v3 = vrot.slane %v3698_v14, %v15732_v39  ;;  %v4101_v53 = vcombine.low %v16324_v33, %v3930_v19  ;;  %v4102_v54 = vcombine.high %v16324_v33, %v3930_v19  ;;  %v3928_v19 = vpop.permute.xlu1 %3927 }
 0x7b8   : > { %v3647_v51 = vcombine.low %v3628_v46, %v3644_v13  ;;  %v3648_v17 = vcombine.high %v3628_v46, %v3644_v13  ;;  %v3957_v47 = vrot.slane %v3949_v22, %v15725_v55  ;;  %v3964_v2 = vrot.slane %v3950_v40, %v15725_v55 }
 0x7b9   : > { %v3715_v34 = vcombine.low %v3696_v30, %v3712_v3  ;;  %v3716_v10 = vcombine.high %v3696_v30, %v3712_v3  ;;  %v4109_v6 = vrot.slane %v4101_v53, %v15725_v55  ;;  %v4116_v0 = vrot.slane %v4102_v54, %v15725_v55 }
 0x7ba   : > { %v3981_v41 = vcombine.low %v3957_v47, %v3973_v20  ;;  %v3982_v56 = vcombine.high %v3957_v47, %v3973_v20  ;;  %v3997_v43 = vcombine.low %v3964_v2, %v3980_v16  ;;  %v3998_v29 = vcombine.high %v3964_v2, %v3980_v16 }
 0x7bb   : > { %v3863_v48 = vpack.c.bf16 %v3715_v34, %v3647_v51  ;;  %v3867_v50 = vpack.c.bf16 %v3716_v10, %v3648_v17  ;;  %v4117_v21 = vcombine.low %v4093_v59, %v4109_v6  ;;  %v4118_v33 = vcombine.high %v4093_v59, %v4109_v6  ;;  %v19762_v51 = vld [vmem:[#allocation58_spill] sm:$0xff]  ;;  %v16473_v2 = vpop.permute.xlu1 %3883 }
 0x7bc   : > { %v16423_v46 = vrot.slane %v3981_v41, %v15732_v39  ;;  %v16426_v63 = vrot.slane %v3982_v56, %v15732_v39  ;;  %v16429_v14 = vrot.slane %v3997_v43, %v15732_v39  ;;  %v16432_v13 = vrot.slane %v3998_v29, %v15732_v39  ;;  %13293 = vmatpush3.bf16.xpose.msra.mxu1 %v5248_v8 }
 0x7bd   : > { %v16435_v20 = vrot.slane %v12786_v60, %v15725_v55  ;;  %v16438_v16 = vrot.slane %v2545_v11, %v15725_v55  ;;  %v16441_v59 = vrot.slane %v12787_v35, %v15725_v55  ;;  %13309 = vmatpush3.bf16.xpose.msra.mxu0 %v5337_v57  ;;  %13564 = vmatprep.subr.msk.bf16.mxu1 %vm5053_vm3, %v3863_v48  ;;  %v5251_v57 = vsel %vm5053_vm3, %v3863_v48, 0 }
 0x7be   : > { %13568 = vmatprep.subr.msk.bf16.mxu0 %vm5053_vm3, %v3867_v50  ;;  %v16446_v42 = vrot.slane %v4117_v21, %v15732_v39  ;;  %v16449_v22 = vrot.slane %v4118_v33, %v15732_v39  ;;  %v4133_v60 = vcombine.low %v16396_v15, %v4116_v0  ;;  %v4493_v11 = vcombine.low %v16423_v46, %v16426_v63 }
 0x7bf   : > { %v12804_v35 = vcombine.high %v16423_v46, %v16426_v63  ;;  %v4134_v8 = vcombine.high %v16396_v15, %v4116_v0  ;;  %v4509_v40 = vcombine.low %v16429_v14, %v16432_v13  ;;  %v2357_v30 = vcombine.low %v16213_v4, %v16216_v5 }
 0x7c0   : > { %v2373_v3 = vcombine.low %v16272_v49, %v16279_v9  ;;  %v2425_v53 = vcombine.low %v16282_v62, %v16285_v1  ;;  %v12805_v54 = vcombine.high %v16429_v14, %v16432_v13  ;;  %v2441_v15 = vcombine.low %v16290_v32, %v16293_v36 }
 0x7c1   : > { %v4017_v17 = vcombine.low %v19762_v51, %v16406_v44  ;;  %v5340_v47 = vsel %vm5053_vm3, %v3867_v50, 0  ;;  %v2365_v34 = vrot.slane %v2357_v30, %v15732_v39  ;;  %v3750_v0 = vcombine.high %v16080_v24, %v16084_v28 }
 0x7c2   : > { %v2381_v10 = vrot.slane %v2373_v3, %v15732_v39  ;;  %v2433_v6 = vrot.slane %v2425_v53, %v15732_v39  ;;  %v16481_v41 = vrot.slane %v4133_v60, %v15732_v39  ;;  %v16484_v56 = vrot.slane %v4134_v8, %v15732_v39 }
 0x7c3   : > { %v2449_v43 = vrot.slane %v2441_v15, %v15732_v39  ;;  %v4018_v29 = vcombine.high %v19762_v51, %v16406_v44  ;;  %v4025_v21 = vrot.slane %v4017_v17, %v15725_v55  ;;  %v3764_v33 = vrot.slane %v3750_v0, %v15732_v39  ;;  %v3908_v17 = vpop.permute.xlu1 %3907 }
 0x7c4   : > { %v2389_v48 = vcombine.low %v2365_v34, %v2381_v10  ;;  %v2390_v50 = vcombine.high %v2365_v34, %v2381_v10  ;;  %13295 = vmatpush3.bf16.xpose.msra.mxu1 %v5251_v57  ;;  %v3766_v24 = vcombine.high %v16114_v31, %v16122_v52  ;;  %v3818_v28 = vcombine.high %v16127_v58, %v16130_v25 }
 0x7c5   : > { %v2457_v30 = vcombine.low %v2433_v6, %v2449_v43  ;;  %v2458_v3 = vcombine.high %v2433_v6, %v2449_v43  ;;  %13311 = vmatpush3.bf16.xpose.msra.mxu0 %v5340_v47  ;;  %v3834_v60 = vcombine.high %v16133_v45, %v16136_v23  ;;  %v4033_v44 = vcombine.low %v16255_v61, %v3928_v19 }
 0x7c6   : > { %v4034_v8 = vcombine.high %v16255_v61, %v3928_v19  ;;  %v4032_v51 = vrot.slane %v4018_v29, %v15725_v55  ;;  %v3780_v57 = vrot.slane %v3766_v24, %v15732_v39  ;;  %v3832_v47 = vrot.slane %v3818_v28, %v15732_v39 }
 0x7c7   : > { %v2599_v53 = vpack.c.bf16 %v2457_v30, %v2389_v48  ;;  %v2603_v15 = vpack.c.bf16 %v2458_v3, %v2390_v50  ;;  %v3848_v31 = vrot.slane %v3834_v60, %v15732_v39  ;;  %v4041_v52 = vrot.slane %v4033_v44, %v15725_v55  ;;  %v3932_v60 = vpop.permute.xlu1 %3931 }
 0x7c8   : > { %v4048_v58 = vrot.slane %v4034_v8, %v15725_v55  ;;  %v3783_v25 = vcombine.low %v3764_v33, %v3780_v57  ;;  %v3784_v45 = vcombine.high %v3764_v33, %v3780_v57  ;;  %v2493_v23 = vcombine.low %v16296_v37, %v16306_v27 }
 0x7c9   : > { %13270 = vmatprep.mubr.msk.bf16.mxu1 %vm5053_vm3, %v2599_v53  ;;  %13286 = vmatprep.mubr.msk.bf16.mxu0 %vm5053_vm3, %v2603_v15  ;;  %v3851_v61 = vcombine.low %v3832_v47, %v3848_v31  ;;  %v3852_v19 = vcombine.high %v3832_v47, %v3848_v31  ;;  %v4049_v34 = vcombine.low %v4025_v21, %v4041_v52 }
 0x7ca   : > { %v4050_v10 = vcombine.high %v4025_v21, %v4041_v52  ;;  %v4065_v6 = vcombine.low %v4032_v51, %v4048_v58  ;;  %v4066_v0 = vcombine.high %v4032_v51, %v4048_v58  ;;  %v2509_v43 = vcombine.low %v16367_v38, %v16373_v12 }
 0x7cb   : > { %v2561_v29 = vcombine.low %v16393_v18, %v16435_v20  ;;  %v3864_v48 = vpack.c.bf16 %v3851_v61, %v3783_v25  ;;  %v3868_v50 = vpack.c.bf16 %v3852_v19, %v3784_v45  ;;  %v16514_v30 = vrot.slane %v4049_v34, %v15732_v39  ;;  %v19763_v25 = vld [vmem:[#allocation59_spill] sm:$0xff] }
 0x7cc   : > { %v16517_v33 = vrot.slane %v4050_v10, %v15732_v39  ;;  %v4629_v3 = vcombine.low %v16446_v42, %v16449_v22  ;;  %v16522_v21 = vrot.slane %v4065_v6, %v15732_v39  ;;  %v16525_v24 = vrot.slane %v4066_v0, %v15732_v39 }
 0x7cd   : > { %v2501_v28 = vrot.slane %v2493_v23, %v15732_v39  ;;  %13565 = vmatprep.subr.msk.bf16.mxu1 %vm5053_vm3, %v3864_v48  ;;  %13569 = vmatprep.subr.msk.bf16.mxu0 %vm5053_vm3, %v3868_v50  ;;  %v2517_v44 = vrot.slane %v2509_v43, %v15732_v39  ;;  %v2569_v8 = vrot.slane %v2561_v29, %v15732_v39  ;;  %v5254_v15 = vsel %vm5053_vm3, %v3864_v48, 0 }
 0x7ce   : > { %v2577_v53 = vcombine.low %v16438_v16, %v16441_v59  ;;  %v12808_v51 = vcombine.high %v16446_v42, %v16449_v22  ;;  %v4645_v57 = vcombine.low %v16481_v41, %v16484_v56  ;;  %v4561_v31 = vcombine.low %v16514_v30, %v16517_v33  ;;  %13297 = vmatpush3.bf16.xpose.msra.mxu1 %v5254_v15  ;;  %v3886_v15 = vpop.permute.xlu1 %3885 }
 0x7cf   : > { %v5343_v58 = vsel %vm5053_vm3, %v3868_v50, 0  ;;  %v4153_v45 = vcombine.low %v19763_v25, %v3908_v17  ;;  %v4154_v23 = vcombine.high %v19763_v25, %v3908_v17  ;;  %v12806_v61 = vcombine.high %v16514_v30, %v16517_v33  ;;  %v16557_v25 = vpop.permute.xlu0 %3887 }
 0x7d0   : > { %v2585_v52 = vrot.slane %v2577_v53, %v15732_v39  ;;  %v4577_v19 = vcombine.low %v16522_v21, %v16525_v24  ;;  %13313 = vmatpush3.bf16.xpose.msra.mxu0 %v5343_v58  ;;  %v4169_v34 = vcombine.low %v16473_v2, %v3932_v60  ;;  %v4170_v10 = vcombine.high %v16473_v2, %v3932_v60 }
 0x7d1   : > { %v2525_v6 = vcombine.low %v2501_v28, %v2517_v44  ;;  %v2526_v43 = vcombine.high %v2501_v28, %v2517_v44  ;;  %v4161_v48 = vrot.slane %v4153_v45, %v15725_v55  ;;  %v4168_v50 = vrot.slane %v4154_v23, %v15725_v55  ;;  %v19764_v45 = vld [vmem:[#allocation71_spill] sm:$0xff]  ;;  %v19765_v23 = vld [vmem:[#allocation70_spill] sm:$0xff] }
 0x7d2   : > { %v2593_v0 = vcombine.low %v2569_v8, %v2585_v52  ;;  %v2594_v29 = vcombine.high %v2569_v8, %v2585_v52  ;;  %v4177_v17 = vrot.slane %v4169_v34, %v15725_v55  ;;  %v4184_v53 = vrot.slane %v4170_v10, %v15725_v55 }
 0x7d3   : > { %v12807_v58 = vcombine.high %v16522_v21, %v16525_v24  ;;  %v2323_v28 = vcombine.low %v16223_v26, %v16242_v7  ;;  %v2255_v34 = vcombine.low %v19765_v23, %v19764_v45  ;;  %v2256_v10 = vcombine.high %v19765_v23, %v19764_v45 }
 0x7d4   : > { %v2600_v47 = vpack.c.bf16 %v2593_v0, %v2525_v6  ;;  %v2604_v2 = vpack.c.bf16 %v2594_v29, %v2526_v43  ;;  %v4185_v60 = vcombine.low %v4161_v48, %v4177_v17  ;;  %v4186_v44 = vcombine.high %v4161_v48, %v4177_v17  ;;  %v19766_v0 = vld [vmem:[#allocation64_spill] sm:$0xff]  ;;  %v19767_v43 = vld [vmem:[#allocation65_spill] sm:$0xff] }
 0x7d5   : > { %v4201_v8 = vcombine.low %v4168_v50, %v4184_v53  ;;  %v4202_v52 = vcombine.high %v4168_v50, %v4184_v53  ;;  %v2324_v6 = vcombine.high %v16223_v26, %v16242_v7  ;;  %v2606_v17 = vpack.c.bf16 %v2323_v28, %v2255_v34 }
 0x7d6   : > { %13271 = vmatmul.mubr.msk.bf16.gmra.mrb[12].mxu1 %vm5053_vm3, %v2600_v47  ;;  %13287 = vmatmul.mubr.msk.bf16.gmra.mrb[24].mxu0 %vm5053_vm3, %v2604_v2  ;;  %v16576_v29 = vrot.slane %v4185_v60, %v15732_v39  ;;  %v16579_v47 = vrot.slane %v4186_v44, %v15732_v39  ;;  %v2358_v26 = vcombine.high %v16213_v4, %v16216_v5 }
 0x7d7   : > { %13298 = vmatprep.mubr.msk.bf16.mxu1 %vm5053_vm3, %v19766_v0  ;;  %13314 = vmatprep.mubr.msk.bf16.mxu0 %vm5053_vm3, %v19767_v43  ;;  %v16582_v48 = vrot.slane %v4201_v8, %v15732_v39  ;;  %v16585_v50 = vrot.slane %v4202_v52, %v15732_v39  ;;  %v2374_v7 = vcombine.high %v16272_v49, %v16279_v9  ;;  %v3910_v8 = vpop.permute.xlu1 %3909  ;;  %v3934_v52 = vpop.permute.xlu0 %3933 }
 0x7d8   : > { %v4697_v53 = vcombine.low %v16576_v29, %v16579_v47  ;;  %v2610_v2 = vpack.c.bf16 %v2324_v6, %v2256_v10  ;;  %v2426_v60 = vcombine.high %v16282_v62, %v16285_v1  ;;  %v2442_v44 = vcombine.high %v16290_v32, %v16293_v36  ;;  %v19768_v36 = vld [vmem:[#allocation60_spill] sm:$0xff] }
 0x7d9   : > { %v12810_v28 = vcombine.high %v16576_v29, %v16579_v47  ;;  %v4713_v4 = vcombine.low %v16582_v48, %v16585_v50  ;;  %v2372_v5 = vrot.slane %v2358_v26, %v15732_v39  ;;  %v2388_v49 = vrot.slane %v2374_v7, %v15732_v39 }
 0x7da   : > { %v2440_v9 = vrot.slane %v2426_v60, %v15732_v39  ;;  %v2456_v45 = vrot.slane %v2442_v44, %v15732_v39  ;;  %v4237_v62 = vcombine.low %v3886_v15, %v3934_v52  ;;  %v4238_v1 = vcombine.high %v3886_v15, %v3934_v52 }
 0x7db   : > { %v2391_v23 = vcombine.low %v2372_v5, %v2388_v49  ;;  %v2392_v32 = vcombine.high %v2372_v5, %v2388_v49  ;;  %v4221_v34 = vcombine.low %v19768_v36, %v3910_v8  ;;  %v4222_v10 = vcombine.high %v19768_v36, %v3910_v8 }
 0x7dc   : > { %v2459_v6 = vcombine.low %v2440_v9, %v2456_v45  ;;  %v2460_v0 = vcombine.high %v2440_v9, %v2456_v45  ;;  %v4245_v43 = vrot.slane %v4237_v62, %v15725_v55  ;;  %v4252_v26 = vrot.slane %v4238_v1, %v15725_v55  ;;  %v3912_v62 = vpop.permute.xlu1 %3911 }
 0x7dd   : > { %v4229_v7 = vrot.slane %v4221_v34, %v15725_v55  ;;  %v4236_v15 = vrot.slane %v4222_v10, %v15725_v55  ;;  %v2494_v60 = vcombine.high %v16296_v37, %v16306_v27  ;;  %v2510_v8 = vcombine.high %v16367_v38, %v16373_v12 }
 0x7de   : > { %13299 = vmatmul.mubr.msk.bf16.vlgmr.msra.gmra.mrb[16].mxu1 %vm5053_vm3, %v2606_v17  ;;  %13315 = vmatmul.mubr.msk.bf16.vlgmr.msra.gmra.mrb[28].mxu0 %vm5053_vm3, %v2610_v2  ;;  %v2607_v44 = vpack.c.bf16 %v2459_v6, %v2391_v23  ;;  %v2611_v52 = vpack.c.bf16 %v2460_v0, %v2392_v32  ;;  %v2562_v5 = vcombine.high %v16393_v18, %v16435_v20 }
 0x7df   : > { %v4253_v49 = vcombine.low %v4229_v7, %v4245_v43  ;;  %v4254_v9 = vcombine.high %v4229_v7, %v4245_v43  ;;  %v4269_v17 = vcombine.low %v4236_v15, %v4252_v26  ;;  %v4270_v45 = vcombine.high %v4236_v15, %v4252_v26 }
 0x7e0   : > { %v12811_v2 = vcombine.high %v16582_v48, %v16585_v50  ;;  %13302 = vmatprep.mubr.msk.bf16.mxu1 %vm5053_vm3, %v2607_v44  ;;  %13318 = vmatprep.mubr.msk.bf16.mxu0 %vm5053_vm3, %v2611_v52  ;;  %v2508_v37 = vrot.slane %v2494_v60, %v15732_v39  ;;  %v2524_v27 = vrot.slane %v2510_v8, %v15732_v39  ;;  %v3936_v24 = vpop.permute.xlu1 %3935 }
 0x7e1   : > { %v16626_v38 = vrot.slane %v4253_v49, %v15732_v39  ;;  %v16629_v12 = vrot.slane %v4254_v9, %v15732_v39  ;;  %v16632_v18 = vrot.slane %v4269_v17, %v15732_v39  ;;  %v16635_v20 = vrot.slane %v4270_v45, %v15732_v39 }
 0x7e2   : > { %v2527_v1 = vcombine.low %v2508_v37, %v2524_v27  ;;  %v2576_v23 = vrot.slane %v2562_v5, %v15732_v39  ;;  %v2578_v32 = vcombine.high %v16438_v16, %v16441_v59  ;;  %v16644_v36 = vrot.slane %v4493_v11, %v15725_v55 }
 0x7e3   : > { %v4765_v34 = vcombine.low %v16626_v38, %v16629_v12  ;;  %v12812_v10 = vcombine.high %v16626_v38, %v16629_v12  ;;  %v4781_v6 = vcombine.low %v16632_v18, %v16635_v20  ;;  %v2528_v0 = vcombine.high %v2508_v37, %v2524_v27 }
 0x7e4   : > { %v2592_v43 = vrot.slane %v2578_v32, %v15732_v39  ;;  %v16657_v16 = vrot.slane %v12804_v35, %v15725_v55  ;;  %v16663_v59 = vrot.slane %v4509_v40, %v15725_v55  ;;  %v16669_v11 = vrot.slane %v12805_v54, %v15725_v55 }
 0x7e5   : > { %v16675_v26 = vrot.slane %v4561_v31, %v15725_v55  ;;  %v16681_v46 = vrot.slane %v12806_v61, %v15725_v55  ;;  %v16687_v63 = vrot.slane %v4577_v19, %v15725_v55  ;;  %v16693_v14 = vrot.slane %v12807_v58, %v15725_v55  ;;  %v19769_v31 = vld [vmem:[#allocation61_spill] sm:$0xff] }
 0x7e6   : > { %v2595_v13 = vcombine.low %v2576_v23, %v2592_v43  ;;  %v2596_v35 = vcombine.high %v2576_v23, %v2592_v43  ;;  %v4525_v40 = vcombine.low %v16644_v36, %v16657_v16  ;;  %v4541_v54 = vcombine.low %v16663_v59, %v16669_v11 }
 0x7e7   : > { %v4593_v30 = vcombine.low %v16675_v26, %v16681_v46  ;;  %v4609_v33 = vcombine.low %v16687_v63, %v16693_v14  ;;  %v4289_v61 = vcombine.low %v19769_v31, %v3912_v62  ;;  %v4290_v21 = vcombine.high %v19769_v31, %v3912_v62 }
 0x7e8   : > { %v2608_v19 = vpack.c.bf16 %v2595_v13, %v2527_v1  ;;  %v2612_v58 = vpack.c.bf16 %v2596_v35, %v2528_v0  ;;  %v4533_v7 = vrot.slane %v4525_v40, %v15732_v39  ;;  %v4549_v15 = vrot.slane %v4541_v54, %v15732_v39 }
 0x7e9   : > { %v4601_v60 = vrot.slane %v4593_v30, %v15732_v39  ;;  %v4617_v44 = vrot.slane %v4609_v33, %v15732_v39  ;;  %v4297_v52 = vrot.slane %v4289_v61, %v15725_v55  ;;  %v4304_v8 = vrot.slane %v4290_v21, %v15725_v55 }
 0x7ea   : > { %13303 = vmatmul.mubr.msk.bf16.gmra.mrb[20].mxu1 %vm5053_vm3, %v2608_v19  ;;  %13319 = vmatmul.mubr.msk.bf16.gmra.mrb[32].mxu0 %vm5053_vm3, %v2612_v58  ;;  %v4557_v5 = vcombine.low %v4533_v7, %v4549_v15  ;;  %v4558_v49 = vcombine.high %v4533_v7, %v4549_v15  ;;  %v4305_v9 = vcombine.low %v16557_v25, %v3936_v24 }
 0x7eb   : > { %v4625_v17 = vcombine.low %v4601_v60, %v4617_v44  ;;  %v4626_v45 = vcombine.high %v4601_v60, %v4617_v44  ;;  %v4306_v37 = vcombine.high %v16557_v25, %v3936_v24  ;;  %v16719_v27 = vrot.slane %v4629_v3, %v15725_v55 }
 0x7ec   : > { %v4313_v62 = vrot.slane %v4305_v9, %v15725_v55  ;;  %v16726_v1 = vrot.slane %v12808_v51, %v15725_v55  ;;  %v16732_v23 = vrot.slane %v4645_v57, %v15725_v55  ;;  %v19770_v25 = vcombine.high %v16481_v41, %v16484_v56 }
 0x7ed   : > { %v5037_v32 = vpack.c.bf16 %v4625_v17, %v4557_v5  ;;  %v5041_v0 = vpack.c.bf16 %v4626_v45, %v4558_v49  ;;  %v4320_v43 = vrot.slane %v4306_v37, %v15725_v55  ;;  %v16745_v42 = vrot.slane %v4697_v53, %v15725_v55 }
 0x7ee   : > { %v16738_v3 = vrot.slane %v19770_v25, %v15725_v55  ;;  %v4321_v22 = vcombine.low %v4297_v52, %v4313_v62  ;;  %v4322_v51 = vcombine.high %v4297_v52, %v4313_v62  ;;  %v4661_v57 = vcombine.low %v16719_v27, %v16726_v1 }
 0x7ef   : > { %13322 = vmatprep.subr.bf16.mxu1 %v5037_v32  ;;  %13338 = vmatprep.subr.bf16.mxu0 %v5041_v0  ;;  %v4337_v56 = vcombine.low %v4304_v8, %v4320_v43  ;;  %v4338_v13 = vcombine.high %v4304_v8, %v4320_v43  ;;  %v16755_v35 = vrot.slane %v12810_v28, %v15725_v55 }
 0x7f0   : > { %v4677_v41 = vcombine.low %v16732_v23, %v16738_v3  ;;  %v12813_v53 = vcombine.high %v16632_v18, %v16635_v20  ;;  %13323 = vmatpush3.bf16.msra.mxu1 %v5037_v32  ;;  %13339 = vmatpush3.bf16.msra.mxu0 %v5041_v0  ;;  %v4329_v40 = vrot.slane %v4321_v22, %v15732_v39 }
 0x7f1   : > { %v4336_v54 = vrot.slane %v4322_v51, %v15732_v39  ;;  %v4345_v30 = vrot.slane %v4337_v56, %v15732_v39  ;;  %v4352_v33 = vrot.slane %v4338_v13, %v15732_v39  ;;  %v4669_v31 = vrot.slane %v4661_v57, %v15732_v39 }
 0x7f2   : > { %v16768_v29 = vrot.slane %v4713_v4, %v15725_v55  ;;  %v4685_v28 = vrot.slane %v4677_v41, %v15732_v39  ;;  %v4728_v61 = vrot.slane %v12811_v2, %v15725_v55  ;;  %v4729_v21 = vcombine.low %v16745_v42, %v16755_v35 }
 0x7f3   : > { %v4833_v47 = vcombine.low %v4329_v40, %v4336_v54  ;;  %v12814_v24 = vcombine.high %v4329_v40, %v4336_v54  ;;  %v4849_v19 = vcombine.low %v4345_v30, %v4352_v33  ;;  %v12815_v58 = vcombine.high %v4345_v30, %v4352_v33 }
 0x7f4   : > { %v4737_v7 = vrot.slane %v4729_v21, %v15732_v39  ;;  %v4745_v15 = vcombine.low %v16768_v29, %v4728_v61  ;;  %v16783_v4 = vrot.slane %v4765_v34, %v15725_v55  ;;  %v16789_v48 = vrot.slane %v12812_v10, %v15725_v55 }
 0x7f5   : > { %v16795_v50 = vrot.slane %v4781_v6, %v15725_v55  ;;  %v4796_v2 = vrot.slane %v12813_v53, %v15725_v55  ;;  %v4693_v60 = vcombine.low %v4669_v31, %v4685_v28  ;;  %v4694_v52 = vcombine.high %v4669_v31, %v4685_v28 }
 0x7f6   : > { %v4753_v44 = vrot.slane %v4745_v15, %v15732_v39  ;;  %v16800_v34 = vrot.slane %v4833_v47, %v15725_v55  ;;  %v4797_v38 = vcombine.low %v16783_v4, %v16789_v48  ;;  %v4848_v10 = vrot.slane %v12814_v24, %v15725_v55 }
 0x7f7   : > { %v4813_v12 = vcombine.low %v16795_v50, %v4796_v2  ;;  %v4856_v18 = vrot.slane %v4849_v19, %v15725_v55  ;;  %v4864_v8 = vrot.slane %v12815_v58, %v15725_v55  ;;  %v4526_v5 = vcombine.high %v16644_v36, %v16657_v16 }
 0x7f8   : > { %v4761_v20 = vcombine.low %v4737_v7, %v4753_v44  ;;  %v4762_v6 = vcombine.high %v4737_v7, %v4753_v44  ;;  %v4805_v49 = vrot.slane %v4797_v38, %v15732_v39  ;;  %v4865_v17 = vcombine.low %v16800_v34, %v4848_v10 }
 0x7f9   : > { %v4821_v9 = vrot.slane %v4813_v12, %v15732_v39  ;;  %v4542_v45 = vcombine.high %v16663_v59, %v16669_v11  ;;  %v4881_v25 = vcombine.low %v4856_v18, %v4864_v8  ;;  %v4540_v32 = vrot.slane %v4526_v5, %v15732_v39 }
 0x7fa   : > { %v5038_v37 = vpack.c.bf16 %v4761_v20, %v4693_v60  ;;  %v5042_v62 = vpack.c.bf16 %v4762_v6, %v4694_v52  ;;  %v4873_v43 = vrot.slane %v4865_v17, %v15732_v39  ;;  %v4594_v51 = vcombine.high %v16675_v26, %v16681_v46 }
 0x7fb   : > { %v4829_v0 = vcombine.low %v4805_v49, %v4821_v9  ;;  %v4830_v22 = vcombine.high %v4805_v49, %v4821_v9  ;;  %v4556_v36 = vrot.slane %v4542_v45, %v15732_v39  ;;  %v4889_v16 = vrot.slane %v4881_v25, %v15732_v39 }
 0x7fc   : > { %13324 = vmatprep.subr.bf16.mxu1 %v5038_v37  ;;  %13340 = vmatprep.subr.bf16.mxu0 %v5042_v62  ;;  %v4610_v59 = vcombine.high %v16687_v63, %v16693_v14  ;;  %v4662_v41 = vcombine.high %v16719_v27, %v16726_v1  ;;  %v4608_v53 = vrot.slane %v4594_v51, %v15732_v39 }
 0x7fd   : > { %13325 = vmatpush3.bf16.msra.mxu1 %v5038_v37  ;;  %13341 = vmatpush3.bf16.msra.mxu0 %v5042_v62  ;;  %v4559_v11 = vcombine.low %v4540_v32, %v4556_v36  ;;  %v4560_v57 = vcombine.high %v4540_v32, %v4556_v36  ;;  %v4897_v56 = vcombine.low %v4873_v43, %v4889_v16 }
 0x7fe   : > { %v4898_v13 = vcombine.high %v4873_v43, %v4889_v16  ;;  %v4624_v40 = vrot.slane %v4610_v59, %v15732_v39  ;;  %v4676_v54 = vrot.slane %v4662_v41, %v15732_v39  ;;  %v4678_v26 = vcombine.high %v16732_v23, %v16738_v3 }
 0x7ff   : > { %v4730_v46 = vcombine.high %v16745_v42, %v16755_v35  ;;  %v4746_v63 = vcombine.high %v16768_v29, %v4728_v61  ;;  %v5039_v14 = vpack.c.bf16 %v4897_v56, %v4829_v0  ;;  %v4798_v28 = vcombine.high %v16783_v4, %v16789_v48 }
 0x800   : > { %v5043_v30 = vpack.c.bf16 %v4898_v13, %v4830_v22  ;;  %v4627_v33 = vcombine.low %v4608_v53, %v4624_v40  ;;  %v4628_v27 = vcombine.high %v4608_v53, %v4624_v40  ;;  %v4692_v1 = vrot.slane %v4678_v26, %v15732_v39 }
 0x801   : > { %v4744_v31 = vrot.slane %v4730_v46, %v15732_v39  ;;  %v4760_v47 = vrot.slane %v4746_v63, %v15732_v39  ;;  %13326 = vmatprep.subr.bf16.mxu1 %v5039_v14  ;;  %v4814_v42 = vcombine.high %v16795_v50, %v4796_v2  ;;  %v4812_v61 = vrot.slane %v4798_v28, %v15732_v39 }
 0x802   : > { %13342 = vmatprep.subr.bf16.mxu0 %v5043_v30  ;;  %v16838_v23 = vpack.c.bf16 %v4627_v33, %v4559_v11  ;;  %v16840_v3 = vpack.c.bf16 %v4628_v27, %v4560_v57  ;;  %13327 = vmatpush3.bf16.msra.mxu1 %v5039_v14  ;;  %v4695_v35 = vcombine.low %v4676_v54, %v4692_v1 }
 0x803   : > { %13343 = vmatpush3.bf16.msra.mxu0 %v5043_v30  ;;  %v4763_v29 = vcombine.low %v4744_v31, %v4760_v47  ;;  %v4828_v21 = vrot.slane %v4814_v42, %v15732_v39  ;;  %v4866_v24 = vcombine.high %v16800_v34, %v4848_v10  ;;  %v4882_v19 = vcombine.high %v4856_v18, %v4864_v8 }
 0x804   : > { %v4696_v58 = vcombine.high %v4676_v54, %v4692_v1  ;;  %v4764_v15 = vcombine.high %v4744_v31, %v4760_v47 }
 0x805   : > { %v16846_v7 = vpack.c.bf16 %v4763_v29, %v4695_v35  ;;  %v4831_v4 = vcombine.low %v4812_v61, %v4828_v21  ;;  %v4880_v48 = vrot.slane %v4866_v24, %v15732_v39  ;;  %v4896_v50 = vrot.slane %v4882_v19, %v15732_v39 }
 0x806   : > { %v4832_v2 = vcombine.high %v4812_v61, %v4828_v21  ;;  %v16850_v60 = vpack.c.bf16 %v4764_v15, %v4696_v58 }
 0x807   : > { %v4899_v44 = vcombine.low %v4880_v48, %v4896_v50  ;;  %v4900_v52 = vcombine.high %v4880_v48, %v4896_v50 }
 0x809   : > { %v16852_v38 = vpack.c.bf16 %v4899_v44, %v4831_v4  ;;  %v16854_v12 = vpack.c.bf16 %v4900_v52, %v4832_v2 }
 0x886   : > { %v16856_v34 = vpop.f32.mrb[8].mxu1 }
 0x887   : > { %v16858_v10 = vpop.f32.mrb[20].mxu0  ;;  %v16860_v18 = vpop.f32.mrb[9].mxu1  ;;  %v5416_v6 = vsel %vm882_vm1, %v16856_v34, -inf }
 0x888   : > { %v16862_v20 = vpop.f32.mrb[21].mxu0  ;;  %5417 = vmax.xlane.f32.xlu1 %v5416_v6  ;;  %v16868_v5 = vpop.f32.mrb[10].mxu1  ;;  %v5410_v49 = vsel %vm882_vm1, %v16860_v18, -inf  ;;  %v5440_v45 = vsel %vm882_vm1, %v16858_v10, -inf }
 0x889   : > { %v16866_v8 = vpop.f32.mrb[22].mxu0  ;;  %5411 = vmax.xlane.f32.xlu0 %v5410_v49  ;;  %v16874_v17 = vpop.f32.mrb[11].mxu1  ;;  %v5434_v37 = vsel %vm882_vm1, %v16862_v20, -inf  ;;  %v5419_v25 = vsel %vm882_vm1, %v16868_v5, -inf }
 0x88a   : > { %v16872_v9 = vpop.f32.mrb[23].mxu0  ;;  %v5413_v62 = vsel %vm882_vm1, %v16874_v17, -inf  ;;  %v5443_v32 = vsel %vm882_vm1, %v16866_v8, -inf }
 0x88b   : > { %v5437_v0 = vsel %vm882_vm1, %v16872_v9, -inf }
 0x88c   : > { %5441 = vmax.xlane.f32.xlu1 %v5440_v45 }
 0x88d   : > { %5435 = vmax.xlane.f32.xlu0 %v5434_v37 }
 0x890   : > { %5414 = vmax.xlane.f32.xlu1 %v5413_v62 }
 0x891   : > { %5420 = vmax.xlane.f32.xlu0 %v5419_v25 }
 0x895   : > { %5444 = vmax.xlane.f32.xlu0 %v5443_v32 }
 0x899   : > { %5438 = vmax.xlane.f32.xlu0 %v5437_v0 }
 0x8a9   : > { %v16888_v43 = vpop.f32.mrb[12].mxu1  ;;  %v16890_v22 = vpop.f32.mrb[24].mxu0 }
 0x8aa   : > { %v16892_v36 = vpop.f32.mrb[13].mxu1  ;;  %v16894_v16 = vpop.f32.mrb[25].mxu0  ;;  %v5428_v51 = vsel %vm882_vm1, %v16888_v43, -inf  ;;  %v5452_v13 = vsel %vm882_vm1, %v16890_v22, -inf }
 0x8ab   : > { %v16898_v59 = vpop.f32.mrb[26].mxu0  ;;  %5429 = vmax.xlane.f32.xlu1 %v5428_v51  ;;  %v16900_v11 = vpop.f32.mrb[14].mxu1  ;;  %v5422_v63 = vsel %vm882_vm1, %v16892_v36, -inf  ;;  %v5446_v31 = vsel %vm882_vm1, %v16894_v16, -inf  ;;  %v19771_v51 = vld [vmem:[#allocation63_spill] sm:$0xff] }
 0x8ac   : > { %v16902_v57 = vpop.f32.mrb[15].mxu1  ;;  %v16904_v41 = vpop.f32.mrb[27].mxu0  ;;  %v5431_v56 = vsel %vm882_vm1, %v16900_v11, -inf  ;;  %v5455_v53 = vsel %vm882_vm1, %v16898_v59, -inf }
 0x8ad   : > { %5432 = vmax.xlane.f32.xlu0 %v5431_v56  ;;  %v5425_v1 = vsel %vm882_vm1, %v16902_v57, -inf  ;;  %v5449_v47 = vsel %vm882_vm1, %v16904_v41, -inf  ;;  %v19772_v56 = vld [vmem:[#allocation62_spill] sm:$0xff] }
 0x8af   : > { %5453 = vmax.xlane.f32.xlu1 %v5452_v13  ;;  %v16988_v13 = vpop.permute.xlu1 %3891 }
 0x8b1   : > { %v16912_v40 = vpop.f32.mrb[28].mxu0  ;;  %5456 = vmax.xlane.f32.xlu0 %v5455_v53  ;;  %v16914_v54 = vpop.f32.mrb[16].mxu1 }
 0x8b2   : > { %v16916_v26 = vpop.f32.mrb[17].mxu1  ;;  %v16918_v46 = vpop.f32.mrb[29].mxu0  ;;  %v5464_v28 = vsel %vm882_vm1, %v16914_v54, -inf  ;;  %v5488_v61 = vsel %vm882_vm1, %v16912_v40, -inf }
 0x8b3   : > { %v16922_v14 = vpop.f32.mrb[30].mxu0  ;;  %5423 = vmax.xlane.f32.xlu1 %v5422_v63  ;;  %v16924_v30 = vpop.f32.mrb[18].mxu1  ;;  %v5458_v50 = vsel %vm882_vm1, %v16916_v26, -inf  ;;  %v5482_v44 = vsel %vm882_vm1, %v16918_v46, -inf }
 0x8b4   : > { %v16926_v33 = vpop.f32.mrb[19].mxu1  ;;  %v16928_v27 = vpop.f32.mrb[31].mxu0  ;;  %v5467_v42 = vsel %vm882_vm1, %v16924_v30, -inf  ;;  %v5491_v15 = vsel %vm882_vm1, %v16922_v14, -inf }
 0x8b5   : > { %5426 = vmax.xlane.f32.xlu0 %v5425_v1  ;;  %v5461_v2 = vsel %vm882_vm1, %v16926_v33, -inf  ;;  %v5485_v52 = vsel %vm882_vm1, %v16928_v27, -inf  ;;  %v16990_v53 = vpop.permute.xlu0 %3889  ;;  %v16992_v63 = vpop.permute.xlu1 %3915 }
 0x8b7   : > { %5447 = vmax.xlane.f32.xlu1 %v5446_v31 }
 0x8b9   : > { %5450 = vmax.xlane.f32.xlu0 %v5449_v47  ;;  %v16994_v1 = vpop.permute.xlu0 %3913 }
 0x8bb   : > { %5465 = vmax.xlane.f32.xlu1 %v5464_v28 }
 0x8bd   : > { %5468 = vmax.xlane.f32.xlu0 %v5467_v42  ;;  %v16940_v35 = vpop.f32.mrb[32].mxu0  ;;  %v16942_v29 = vpop.f32.mrb[20].mxu1 }
 0x8be   : > { %v16946_v21 = vpop.f32.mrb[21].mxu1  ;;  %v16948_v24 = vpop.f32.mrb[33].mxu0  ;;  %v5476_v6 = vsel %vm882_vm1, %v16942_v29, -inf  ;;  %v5500_v45 = vsel %vm882_vm1, %v16940_v35, -inf }
 0x8bf   : > { %5489 = vmax.xlane.f32.xlu1 %v5488_v61  ;;  %v16950_v19 = vpop.f32.mrb[34].mxu0  ;;  %v16952_v58 = vpop.f32.mrb[22].mxu1  ;;  %v5470_v62 = vsel %vm882_vm1, %v16946_v21, -inf  ;;  %v5494_v32 = vsel %vm882_vm1, %v16948_v24, -inf }
 0x8c0   : > { %v16956_v4 = vpop.f32.mrb[23].mxu1  ;;  %v16958_v48 = vpop.f32.mrb[35].mxu0  ;;  %v5479_v49 = vsel %vm882_vm1, %v16952_v58, -inf  ;;  %v5503_v37 = vsel %vm882_vm1, %v16950_v19, -inf }
 0x8c1   : > { %5492 = vmax.xlane.f32.xlu0 %v5491_v15  ;;  %v5473_v25 = vsel %vm882_vm1, %v16956_v4, -inf  ;;  %v5497_v0 = vsel %vm882_vm1, %v16958_v48, -inf }
 0x8c3   : > { %5459 = vmax.xlane.f32.xlu1 %v5458_v50 }
 0x8c5   : > { %5462 = vmax.xlane.f32.xlu0 %v5461_v2 }
 0x8c7   : > { %5483 = vmax.xlane.f32.xlu1 %v5482_v44 }
 0x8c9   : > { %5486 = vmax.xlane.f32.xlu0 %v5485_v52 }
 0x8cb   : > { %5477 = vmax.xlane.f32.xlu1 %v5476_v6 }
 0x8cd   : > { %5480 = vmax.xlane.f32.xlu0 %v5479_v49 }
 0x8cf   : > { %5501 = vmax.xlane.f32.xlu1 %v5500_v45 }
 0x8d1   : > { %5504 = vmax.xlane.f32.xlu0 %v5503_v37 }
 0x8d3   : > { %5471 = vmax.xlane.f32.xlu1 %v5470_v62 }
 0x8d5   : > { %5474 = vmax.xlane.f32.xlu0 %v5473_v25 }
 0x8d7   : > { %5495 = vmax.xlane.f32.xlu1 %v5494_v32 }
 0x8d9   : > { %5498 = vmax.xlane.f32.xlu0 %v5497_v0 }
 0x8e8   : > { %3939 = vrot.lane.b32.xlu1 %v19771_v51, %s14827_s1 }
 0x8ef   : > { %3937 = vrot.lane.b32.xlu0 %v19772_v56, %s14827_s1 }
 0x915   : > { %v5418_v31 = vpop.xlane.xlu1 %5417 }
 0x916   : > { %v5508_v47 = vsub.f32 %v16856_v34, %v5418_v31  ;;  %v5412_v28 = vpop.xlane.xlu0 %5411 }
 0x917   : > { %v5506_v42 = vsub.f32 %v16860_v18, %v5412_v28 }
 0x918   : > { %v5542_v61 = vmul.f32 1.442695, %v5508_v47 }
 0x919   : > { %v5538_v15 = vmul.f32 1.442695, %v5506_v42  ;;  %v5442_v50 = vpop.xlane.xlu1 %5441 }
 0x91a   : > { %13990 = vpow2.f32 %v5542_v61  ;;  %v5516_v2 = vsub.f32 %v16858_v10, %v5442_v50  ;;  %v5436_v44 = vpop.xlane.xlu0 %5435 }
 0x91b   : > { %13992 = vpow2.f32 %v5538_v15  ;;  %v5514_v52 = vsub.f32 %v16862_v20, %v5436_v44 }
 0x91c   : > { %v5558_v6 = vmul.f32 1.442695, %v5516_v2 }
 0x91d   : > { %v5554_v49 = vmul.f32 1.442695, %v5514_v52  ;;  %v5415_v45 = vpop.xlane.xlu1 %5414 }
 0x91e   : > { %13994 = vpow2.f32 %v5558_v6  ;;  %v5507_v37 = vsub.f32 %v16874_v17, %v5415_v45  ;;  %v5421_v34 = vpop.xlane.xlu0 %5420 }
 0x91f   : > { %13996 = vpow2.f32 %v5554_v49  ;;  %v5509_v18 = vsub.f32 %v16868_v5, %v5421_v34 }
 0x920   : > { %v5540_v62 = vmul.f32 1.442695, %v5507_v37 }
 0x921   : > { %v5544_v25 = vmul.f32 1.442695, %v5509_v18 }
 0x922   : > { %13998 = vpow2.f32 %v5540_v62  ;;  %v5445_v32 = vpop.xlane.xlu0 %5444 }
 0x923   : > { %14000 = vpow2.f32 %v5544_v25  ;;  %v5517_v10 = vsub.f32 %v16866_v8, %v5445_v32 }
 0x924   : > { %v17003_v0 = vpop.eup %13990 }
 0x925   : > { %v17005_v20 = vpop.eup %13992  ;;  %v5560_v31 = vmul.f32 1.442695, %v5517_v10  ;;  %v5608_v47 = vsel %vm882_vm1, %v17003_v0, 0.0 }
 0x926   : > { %5609 = vadd.xlane.f32.xlu1 %v5608_v47  ;;  %v5439_v17 = vpop.xlane.xlu0 %5438  ;;  %v5602_v5 = vsel %vm882_vm1, %v17005_v20, 0.0 }
 0x927   : > { %14002 = vpow2.f32 %v5560_v31  ;;  %v5515_v28 = vsub.f32 %v16872_v9, %v5439_v17  ;;  %5603 = vadd.xlane.f32.xlu0 %v5602_v5 }
 0x928   : > { %v17012_v42 = vpop.eup %13994 }
 0x929   : > { %v17014_v8 = vpop.eup %13996  ;;  %v5556_v61 = vmul.f32 1.442695, %v5515_v28  ;;  %v5632_v15 = vsel %vm882_vm1, %v17012_v42, 0.0 }
 0x92a   : > { %5633 = vadd.xlane.f32.xlu1 %v5632_v15  ;;  %v5626_v50 = vsel %vm882_vm1, %v17014_v8, 0.0 }
 0x92b   : > { %14004 = vpow2.f32 %v5556_v61  ;;  %5627 = vadd.xlane.f32.xlu0 %v5626_v50 }
 0x92c   : > { %v17020_v2 = vpop.eup %13998 }
 0x92d   : > { %v17022_v44 = vpop.eup %14000  ;;  %v5605_v9 = vsel %vm882_vm1, %v17020_v2, 0.0 }
 0x92e   : > { %5606 = vadd.xlane.f32.xlu1 %v5605_v9  ;;  %v5611_v52 = vsel %vm882_vm1, %v17022_v44, 0.0 }
 0x92f   : > { %5612 = vadd.xlane.f32.xlu0 %v5611_v52 }
 0x931   : > { %v17028_v6 = vpop.eup %14002 }
 0x932   : > { %v5635_v49 = vsel %vm882_vm1, %v17028_v6, 0.0 }
 0x933   : > { %5636 = vadd.xlane.f32.xlu0 %v5635_v49 }
 0x935   : > { %v17032_v45 = vpop.eup %14004 }
 0x936   : > { %v5629_v37 = vsel %vm882_vm1, %v17032_v45, 0.0 }
 0x937   : > { %5630 = vadd.xlane.f32.xlu0 %v5629_v37 }
 0x938   : > { %v5430_v34 = vpop.xlane.xlu1 %5429 }
 0x939   : > { %v5512_v18 = vsub.f32 %v16888_v43, %v5430_v34 }
 0x93a   : > { %v5433_v62 = vpop.xlane.xlu0 %5432 }
 0x93b   : > { %v5550_v25 = vmul.f32 1.442695, %v5512_v18  ;;  %v5513_v61 = vsub.f32 %v16900_v11, %v5433_v62 }
 0x93c   : > { %v5454_v32 = vpop.xlane.xlu1 %5453 }
 0x93d   : > { %14006 = vpow2.f32 %v5550_v25  ;;  %v5520_v10 = vsub.f32 %v16890_v22, %v5454_v32  ;;  %v5552_v22 = vmul.f32 1.442695, %v5513_v61 }
 0x93e   : > { %v5457_v31 = vpop.xlane.xlu0 %5456 }
 0x93f   : > { %v5566_v47 = vmul.f32 1.442695, %v5520_v10  ;;  %v5521_v34 = vsub.f32 %v16898_v59, %v5457_v31 }
 0x940   : > { %v5424_v17 = vpop.xlane.xlu1 %5423 }
 0x941   : > { %14008 = vpow2.f32 %v5566_v47  ;;  %v5510_v5 = vsub.f32 %v16892_v36, %v5424_v17 }
 0x942   : > { %v5427_v28 = vpop.xlane.xlu0 %5426 }
 0x943   : > { %v5546_v15 = vmul.f32 1.442695, %v5510_v5  ;;  %v5511_v50 = vsub.f32 %v16902_v57, %v5427_v28 }
 0x944   : > { %v5448_v9 = vpop.xlane.xlu1 %5447 }
 0x945   : > { %14010 = vpow2.f32 %v5546_v15  ;;  %v5548_v43 = vmul.f32 1.442695, %v5511_v50  ;;  %v5518_v52 = vsub.f32 %v16894_v16, %v5448_v9  ;;  %v5568_v16 = vmul.f32 1.442695, %v5521_v34 }
 0x946   : > { %v5451_v49 = vpop.xlane.xlu0 %5450 }
 0x947   : > { %v17042_v37 = vpop.eup %14006  ;;  %14012 = vpow2.f32 %v5548_v43  ;;  %v5562_v18 = vmul.f32 1.442695, %v5518_v52  ;;  %v5519_v32 = vsub.f32 %v16904_v41, %v5451_v49 }
 0x948   : > { %v5466_v36 = vpop.xlane.xlu1 %5465  ;;  %v5620_v11 = vsel %vm882_vm1, %v17042_v37, 0.0 }
 0x949   : > { %14014 = vpow2.f32 %v5562_v18  ;;  %v5524_v57 = vsub.f32 %v16914_v54, %v5466_v36  ;;  %5621 = vadd.xlane.f32.xlu1 %v5620_v11  ;;  %v5564_v54 = vmul.f32 1.442695, %v5519_v32 }
 0x94a   : > { %v5469_v62 = vpop.xlane.xlu0 %5468  ;;  %14016 = vpow2.f32 %v5552_v22 }
 0x94b   : > { %v17048_v25 = vpop.eup %14008  ;;  %v5574_v10 = vmul.f32 1.442695, %v5524_v57  ;;  %v5525_v28 = vsub.f32 %v16924_v30, %v5469_v62 }
 0x94c   : > { %v5490_v47 = vpop.xlane.xlu1 %5489  ;;  %v5644_v59 = vsel %vm882_vm1, %v17048_v25, 0.0 }
 0x94d   : > { %14018 = vpow2.f32 %v5574_v10  ;;  %v5532_v31 = vsub.f32 %v16912_v40, %v5490_v47  ;;  %5645 = vadd.xlane.f32.xlu1 %v5644_v59  ;;  %v5576_v49 = vmul.f32 1.442695, %v5525_v28 }
 0x94e   : > { %v5493_v17 = vpop.xlane.xlu0 %5492  ;;  %14020 = vpow2.f32 %v5568_v16 }
 0x94f   : > { %v17054_v5 = vpop.eup %14010  ;;  %v5590_v61 = vmul.f32 1.442695, %v5532_v31  ;;  %v5533_v30 = vsub.f32 %v16922_v14, %v5493_v17 }
 0x950   : > { %v5460_v15 = vpop.xlane.xlu1 %5459  ;;  %v5614_v41 = vsel %vm882_vm1, %v17054_v5, 0.0 }
 0x951   : > { %v17059_v50 = vpop.eup %14012  ;;  %14022 = vpow2.f32 %v5590_v61  ;;  %v5522_v9 = vsub.f32 %v16916_v26, %v5460_v15  ;;  %5615 = vadd.xlane.f32.xlu0 %v5614_v41  ;;  %v5592_v62 = vmul.f32 1.442695, %v5533_v30 }
 0x952   : > { %v5463_v40 = vpop.xlane.xlu0 %5462  ;;  %v5617_v43 = vsel %vm882_vm1, %v17059_v50, 0.0  ;;  %14024 = vpow2.f32 %v5564_v54 }
 0x953   : > { %v17064_v52 = vpop.eup %14014  ;;  %v5570_v22 = vmul.f32 1.442695, %v5522_v9  ;;  %5618 = vadd.xlane.f32.xlu1 %v5617_v43  ;;  %v5523_v16 = vsub.f32 %v16926_v33, %v5463_v40 }
 0x954   : > { %v5484_v34 = vpop.xlane.xlu1 %5483  ;;  %v5638_v18 = vsel %vm882_vm1, %v17064_v52, 0.0  ;;  %v17069_v36 = vpop.eup %14016 }
 0x955   : > { %14026 = vpow2.f32 %v5570_v22  ;;  %v5530_v26 = vsub.f32 %v16918_v46, %v5484_v34  ;;  %5639 = vadd.xlane.f32.xlu0 %v5638_v18  ;;  %v5623_v10 = vsel %vm882_vm1, %v17069_v36, 0.0  ;;  %v5572_v33 = vmul.f32 1.442695, %v5523_v16 }
 0x956   : > { %v5487_v11 = vpop.xlane.xlu0 %5486  ;;  %14028 = vpow2.f32 %v5576_v49 }
 0x957   : > { %v17072_v57 = vpop.eup %14018  ;;  %v5586_v14 = vmul.f32 1.442695, %v5530_v26  ;;  %v5531_v46 = vsub.f32 %v16928_v27, %v5487_v11 }
 0x958   : > { %v5478_v32 = vpop.xlane.xlu1 %5477  ;;  %v5656_v47 = vsel %vm882_vm1, %v17072_v57, 0.0  ;;  %v17079_v59 = vpop.eup %14020 }
 0x959   : > { %14030 = vpow2.f32 %v5586_v14  ;;  %v5528_v31 = vsub.f32 %v16942_v29, %v5478_v32  ;;  %5624 = vadd.xlane.f32.xlu0 %v5623_v10  ;;  %5657 = vadd.xlane.f32.xlu1 %v5656_v47  ;;  %v5647_v15 = vsel %vm882_vm1, %v17079_v59, 0.0  ;;  %v5588_v27 = vmul.f32 1.442695, %v5531_v46 }
 0x95a   : > { %v5481_v17 = vpop.xlane.xlu0 %5480  ;;  %14032 = vpow2.f32 %v5592_v62 }
 0x95b   : > { %v17083_v54 = vpop.eup %14022  ;;  %v5582_v28 = vmul.f32 1.442695, %v5528_v31  ;;  %v5529_v29 = vsub.f32 %v16952_v58, %v5481_v17  ;;  %v4357_v31 = vcombine.low %v19772_v56, %v16994_v1 }
 0x95c   : > { %v5502_v61 = vpop.xlane.xlu1 %5501  ;;  %v5680_v41 = vsel %vm882_vm1, %v17083_v54, 0.0  ;;  %v17089_v9 = vpop.eup %14024 }
 0x95d   : > { %14034 = vpow2.f32 %v5582_v28  ;;  %5648 = vadd.xlane.f32.xlu0 %v5647_v15  ;;  %5681 = vadd.xlane.f32.xlu1 %v5680_v41  ;;  %v5641_v22 = vsel %vm882_vm1, %v17089_v9, 0.0  ;;  %v5584_v18 = vmul.f32 1.442695, %v5529_v29  ;;  %v5536_v62 = vsub.f32 %v16940_v35, %v5502_v61 }
 0x95e   : > { %v5505_v40 = vpop.xlane.xlu0 %5504  ;;  %14036 = vpow2.f32 %v5572_v33 }
 0x95f   : > { %v17092_v43 = vpop.eup %14026  ;;  %14038 = vpow2.f32 %v5588_v27  ;;  %v5537_v32 = vsub.f32 %v16950_v19, %v5505_v40  ;;  %v4425_v19 = vcombine.low %v19771_v51, %v16992_v63  ;;  %v5598_v61 = vmul.f32 1.442695, %v5536_v62 }
 0x960   : > { %v5472_v49 = vpop.xlane.xlu1 %5471  ;;  %v5650_v30 = vsel %vm882_vm1, %v17092_v43, 0.0  ;;  %v17098_v34 = vpop.eup %14028  ;;  %14040 = vpow2.f32 %v5584_v18 }
 0x961   : > { %v5526_v26 = vsub.f32 %v16946_v21, %v5472_v49  ;;  %5651 = vadd.xlane.f32.xlu1 %v5650_v30  ;;  %5642 = vadd.xlane.f32.xlu0 %v5641_v22  ;;  %v5659_v46 = vsel %vm882_vm1, %v17098_v34, 0.0  ;;  %v5600_v27 = vmul.f32 1.442695, %v5537_v32  ;;  %v4365_v49 = vrot.slane %v4357_v31, %v15725_v55 }
 0x962   : > { %v5475_v58 = vpop.xlane.xlu0 %5474 }
 0x963   : > { %v17101_v11 = vpop.eup %14030  ;;  %v5578_v16 = vmul.f32 1.442695, %v5526_v26  ;;  %v5527_v14 = vsub.f32 %v16956_v4, %v5475_v58  ;;  %v4426_v4 = vcombine.high %v19771_v51, %v16992_v63 }
 0x964   : > { %v5496_v10 = vpop.xlane.xlu1 %5495  ;;  %v5674_v47 = vsel %vm882_vm1, %v17101_v11, 0.0  ;;  %v17110_v21 = vpop.eup %14032 }
 0x965   : > { %v5534_v35 = vsub.f32 %v16948_v24, %v5496_v10  ;;  %5675 = vadd.xlane.f32.xlu1 %v5674_v47  ;;  %5660 = vadd.xlane.f32.xlu0 %v5659_v46  ;;  %14042 = vpow2.f32 %v5578_v16  ;;  %v5580_v17 = vmul.f32 1.442695, %v5527_v14  ;;  %v4358_v24 = vcombine.high %v19772_v56, %v16994_v1 }
 0x966   : > { %v5499_v33 = vpop.xlane.xlu0 %5498  ;;  %v5683_v51 = vsel %vm882_vm1, %v17110_v21, 0.0  ;;  %v4433_v56 = vrot.slane %v4425_v19, %v15725_v55  ;;  %v4440_v1 = vrot.slane %v4426_v4, %v15725_v55 }
 0x967   : > { %v17119_v28 = vpop.eup %14034  ;;  %v5594_v15 = vmul.f32 1.442695, %v5534_v35  ;;  %v5535_v41 = vsub.f32 %v16958_v48, %v5499_v33 }
 0x968   : > { %v3940_v29 = vpop.permute.xlu1 %3939  ;;  %v5668_v40 = vsel %vm882_vm1, %v17119_v28, 0.0  ;;  %v17128_v63 = vpop.eup %14036 }
 0x969   : > { %14044 = vpow2.f32 %v5594_v15  ;;  %v4441_v30 = vcombine.low %v16988_v13, %v3940_v29  ;;  %v4442_v48 = vcombine.high %v16988_v13, %v3940_v29  ;;  %5669 = vadd.xlane.f32.xlu1 %v5668_v40  ;;  %5684 = vadd.xlane.f32.xlu0 %v5683_v51  ;;  %v5596_v22 = vmul.f32 1.442695, %v5535_v41  ;;  %v17135_v26 = vpop.eup %14038 }
 0x96a   : > { %14046 = vpow2.f32 %v5580_v17  ;;  %v3938_v18 = vpop.permute.xlu0 %3937  ;;  %v4372_v13 = vrot.slane %v4358_v24, %v15725_v55  ;;  %v5653_v32 = vsel %vm882_vm1, %v17128_v63, 0.0  ;;  %v5677_v4 = vsel %vm882_vm1, %v17135_v26, 0.0  ;;  %v17148_v17 = vpop.eup %14040 }
 0x96b   : > { %14048 = vpow2.f32 %v5598_v61  ;;  %v4449_v58 = vrot.slane %v4441_v30, %v15725_v55  ;;  %v4456_v62 = vrot.slane %v4442_v48, %v15725_v55  ;;  %v4373_v16 = vcombine.low %v16990_v53, %v3938_v18 }
 0x96c   : > { %14050 = vpow2.f32 %v5600_v27  ;;  %v4374_v14 = vcombine.high %v16990_v53, %v3938_v18 }
 0x96d   : > { %v4457_v10 = vcombine.low %v4433_v56, %v4449_v58  ;;  %v4458_v47 = vcombine.high %v4433_v56, %v4449_v58  ;;  %v4473_v46 = vcombine.low %v4440_v1, %v4456_v62  ;;  %v4474_v31 = vcombine.high %v4440_v1, %v4456_v62  ;;  %5654 = vadd.xlane.f32.xlu0 %v5653_v32 }
 0x96e   : > { %14052 = vpow2.f32 %v5596_v22  ;;  %v4381_v35 = vrot.slane %v4373_v16, %v15725_v55  ;;  %v4388_v19 = vrot.slane %v4374_v14, %v15725_v55  ;;  %v5671_v16 = vsel %vm882_vm1, %v17148_v17, 0.0 }
 0x96f   : > { %v4465_v53 = vrot.slane %v4457_v10, %v15732_v39  ;;  %v4472_v33 = vrot.slane %v4458_v47, %v15732_v39  ;;  %v4481_v61 = vrot.slane %v4473_v46, %v15732_v39  ;;  %v4488_v15 = vrot.slane %v4474_v31, %v15732_v39  ;;  %v17154_v41 = vpop.eup %14042 }
 0x970   : > { %v4389_v24 = vcombine.low %v4365_v49, %v4381_v35  ;;  %v4390_v27 = vcombine.high %v4365_v49, %v4381_v35  ;;  %v4405_v29 = vcombine.low %v4372_v13, %v4388_v19  ;;  %v4406_v40 = vcombine.high %v4372_v13, %v4388_v19 }
 0x971   : > { %v4969_v51 = vcombine.low %v4465_v53, %v4472_v33  ;;  %v12818_v30 = vcombine.high %v4465_v53, %v4472_v33  ;;  %v4985_v48 = vcombine.low %v4481_v61, %v4488_v15  ;;  %v12819_v56 = vcombine.high %v4481_v61, %v4488_v15  ;;  %5678 = vadd.xlane.f32.xlu0 %v5677_v4 }
 0x972   : > { %v4397_v1 = vrot.slane %v4389_v24, %v15732_v39  ;;  %v4404_v22 = vrot.slane %v4390_v27, %v15732_v39  ;;  %v4413_v18 = vrot.slane %v4405_v29, %v15732_v39  ;;  %v4420_v58 = vrot.slane %v4406_v40, %v15732_v39 }
 0x973   : > { %v17160_v62 = vpop.eup %14044  ;;  %v5662_v49 = vsel %vm882_vm1, %v17154_v41, 0.0  ;;  %v4976_v13 = vrot.slane %v4969_v51, %v15725_v55  ;;  %v4984_v14 = vrot.slane %v12818_v30, %v15725_v55  ;;  %v4992_v4 = vrot.slane %v4985_v48, %v15725_v55 }
 0x974   : > { %v17168_v32 = vpop.eup %14046  ;;  %v4901_v10 = vcombine.low %v4397_v1, %v4404_v22  ;;  %v12816_v47 = vcombine.high %v4397_v1, %v4404_v22  ;;  %v4917_v46 = vcombine.low %v4413_v18, %v4420_v58  ;;  %v12817_v31 = vcombine.high %v4413_v18, %v4420_v58  ;;  %5663 = vadd.xlane.f32.xlu1 %v5662_v49 }
 0x975   : > { %v17170_v35 = vpop.eup %14048  ;;  %v5686_v19 = vsel %vm882_vm1, %v17160_v62, 0.0  ;;  %5672 = vadd.xlane.f32.xlu0 %v5671_v16  ;;  %v5000_v53 = vrot.slane %v12819_v56, %v15725_v55  ;;  %v5001_v33 = vcombine.low %v4976_v13, %v4984_v14  ;;  %v5665_v29 = vsel %vm882_vm1, %v17168_v32, 0.0 }
 0x976   : > { %v17176_v61 = vpop.eup %14050  ;;  %v4908_v15 = vrot.slane %v4901_v10, %v15725_v55  ;;  %v4916_v24 = vrot.slane %v12816_v47, %v15725_v55  ;;  %v4924_v27 = vrot.slane %v4917_v46, %v15725_v55  ;;  %v4932_v40 = vrot.slane %v12817_v31, %v15725_v55 }
 0x977   : > { %v5017_v51 = vcombine.low %v4992_v4, %v5000_v53  ;;  %v5002_v30 = vcombine.high %v4976_v13, %v4984_v14  ;;  %v5009_v56 = vrot.slane %v5001_v33, %v15732_v39  ;;  %v5018_v18 = vcombine.high %v4992_v4, %v5000_v53 }
 0x978   : > { %v17184_v1 = vpop.eup %14052  ;;  %5687 = vadd.xlane.f32.xlu1 %v5686_v19  ;;  %v4933_v48 = vcombine.low %v4908_v15, %v4916_v24  ;;  %v4934_v22 = vcombine.high %v4908_v15, %v4916_v24  ;;  %v4949_v58 = vcombine.low %v4924_v27, %v4932_v40  ;;  %v4950_v16 = vcombine.high %v4924_v27, %v4932_v40 }
 0x979   : > { %5666 = vadd.xlane.f32.xlu0 %v5665_v29  ;;  %v5025_v49 = vrot.slane %v5017_v51, %v15732_v39  ;;  %v5016_v10 = vrot.slane %v5002_v30, %v15732_v39  ;;  %v5032_v13 = vrot.slane %v5018_v18, %v15732_v39  ;;  %v5692_v14 = vsel %vm882_vm1, %v17170_v35, 0.0 }
 0x97a   : > { %v4941_v47 = vrot.slane %v4933_v48, %v15732_v39  ;;  %v4948_v46 = vrot.slane %v4934_v22, %v15732_v39  ;;  %v5689_v31 = vsel %vm882_vm1, %v17184_v1, 0.0  ;;  %v4957_v19 = vrot.slane %v4949_v58, %v15732_v39 }
 0x97b   : > { %v4964_v4 = vrot.slane %v4950_v16, %v15732_v39  ;;  %v5033_v53 = vcombine.low %v5009_v56, %v5025_v49  ;;  %v5034_v33 = vcombine.high %v5009_v56, %v5025_v49  ;;  %v5035_v15 = vcombine.low %v5016_v10, %v5032_v13 }
 0x97c   : > { %5693 = vadd.xlane.f32.xlu1 %v5692_v14  ;;  %v5036_v24 = vcombine.high %v5016_v10, %v5032_v13  ;;  %v4965_v27 = vcombine.low %v4941_v47, %v4957_v19  ;;  %v4966_v29 = vcombine.high %v4941_v47, %v4957_v19  ;;  %v5695_v58 = vsel %vm882_vm1, %v17176_v61, 0.0 }
 0x97d   : > { %5690 = vadd.xlane.f32.xlu0 %v5689_v31  ;;  %v4967_v40 = vcombine.low %v4948_v46, %v4964_v4  ;;  %v4968_v51 = vcombine.high %v4948_v46, %v4964_v4 }
 0x97e   : > { %v5040_v30 = vpack.c.bf16 %v5033_v53, %v4965_v27  ;;  %v5044_v48 = vpack.c.bf16 %v5034_v33, %v4966_v29 }
 0x97f   : > { %v5048_v22 = vpack.c.bf16 %v5035_v15, %v4967_v40  ;;  %v17198_v18 = vpack.c.bf16 %v5036_v24, %v4968_v51 }
 0x980   : > { %13328 = vmatprep.subr.bf16.mxu1 %v5040_v30  ;;  %13344 = vmatprep.subr.bf16.mxu0 %v5044_v48 }
 0x981   : > { %13329 = vmatpush3.bf16.msra.mxu1 %v5040_v30  ;;  %13345 = vmatpush3.bf16.msra.mxu0 %v5044_v48 }
 0x982   : > { %5696 = vadd.xlane.f32.xlu0 %v5695_v58  ;;  %13354 = vmatprep.subr.bf16.mxu1 %v16838_v23 }
 0x983   : > { %13370 = vmatprep.subr.bf16.mxu0 %v16840_v3 }
 0x9b3   : > { %v5610_v56 = vpop.xlane.xlu1 %5609 }
 0x9b4   : > { %v5604_v49 = vpop.xlane.xlu0 %5603 }
 0x9b5   : > { %14054 = vrcp.f32 %v5604_v49 }
 0x9b6   : > { %14056 = vrcp.f32 %v5610_v56 }
 0x9b7   : > { %v5634_v16 = vpop.xlane.xlu1 %5633 }
 0x9b8   : > { %v5628_v10 = vpop.xlane.xlu0 %5627 }
 0x9bb   : > { %v5607_v47 = vpop.xlane.xlu1 %5606 }
 0x9bc   : > { %14058 = vrcp.f32 %v5607_v47  ;;  %v5613_v46 = vpop.xlane.xlu0 %5612 }
 0x9bd   : > { %14060 = vrcp.f32 %v5613_v46 }
 0x9bf   : > { %v14055_v14 = vpop.eup %14054 }
 0x9c0   : > { %v5637_v13 = vpop.xlane.xlu0 %5636  ;;  %v14057_v19 = vpop.eup %14056  ;;  %v5730_v33 = vmul.f32 %v14055_v14, %v17005_v20 }
 0x9c1   : > { %14062 = vrcp.f32 %v5637_v13  ;;  %v5732_v24 = vmul.f32 %v14057_v19, %v17003_v0 }
 0x9c2   : > { %14064 = vrcp.f32 %v5628_v10 }
 0x9c3   : > { %14066 = vrcp.f32 %v5634_v16 }
 0x9c4   : > { %v5631_v31 = vpop.xlane.xlu0 %5630 }
 0x9c5   : > { %14068 = vrcp.f32 %v5631_v31 }
 0x9c6   : > { %v14059_v4 = vpop.eup %14058 }
 0x9c7   : > { %v14061_v53 = vpop.eup %14060  ;;  %v5731_v15 = vmul.f32 %v14059_v4, %v17020_v2 }
 0x9c8   : > { %v5733_v27 = vmul.f32 %v14061_v53, %v17022_v44 }
 0x9c9   : > { %v5762_v29 = vpack.c.bf16 %v5731_v15, %v5730_v33 }
 0x9ca   : > { %v5763_v40 = vpack.c.bf16 %v5733_v27, %v5732_v24 }
 0x9cb   : > { %13330 = vmatprep.mubr.msk.bf16.mxu1 %vm882_vm1, %v5762_v29  ;;  %v14063_v51 = vpop.eup %14062 }
 0x9cc   : > { %13331 = vmatmul.mubr.msk.bf16.vlgmr.msra.gmra.mrb[24].mxu1 %vm882_vm1, %v5763_v40  ;;  %v14065_v30 = vpop.eup %14064  ;;  %v5741_v2 = vmul.f32 %v14063_v51, %v17028_v6 }
 0x9cd   : > { %13355 = vmatpush3.bf16.msra.mxu1 %v16838_v23  ;;  %v14067_v48 = vpop.eup %14066  ;;  %v5738_v0 = vmul.f32 %v14065_v30, %v17014_v8 }
 0x9ce   : > { %13356 = vmatprep.subr.bf16.mxu1 %v16846_v7  ;;  %v5740_v58 = vmul.f32 %v14067_v48, %v17012_v42 }
 0x9cf   : > { %v14069_v20 = vpop.eup %14068 }
 0x9d0   : > { %v5739_v44 = vmul.f32 %v14069_v20, %v17032_v45  ;;  %v5767_v49 = vpack.c.bf16 %v5741_v2, %v5740_v58 }
 0x9d1   : > { %13357 = vmatpush3.bf16.msra.mxu1 %v16846_v7 }
 0x9d2   : > { %13358 = vmatprep.subr.bf16.mxu1 %v16852_v38  ;;  %v5766_v56 = vpack.c.bf16 %v5739_v44, %v5738_v0 }
 0x9d4   : > { %13346 = vmatprep.mubr.msk.bf16.mxu0 %vm882_vm1, %v5766_v56 }
 0x9d5   : > { %13359 = vmatpush3.bf16.msra.mxu1 %v16852_v38  ;;  %13347 = vmatmul.mubr.msk.bf16.vlgmr.msra.gmra.mrb[36].mxu0 %vm882_vm1, %v5767_v49 }
 0x9d6   : > { %v5622_v23 = vpop.xlane.xlu1 %5621  ;;  %13360 = vmatprep.subr.bf16.mxu1 %v5048_v22  ;;  %13371 = vmatpush3.bf16.msra.mxu0 %v16840_v3 }
 0x9d7   : > { %13372 = vmatprep.subr.bf16.mxu0 %v16850_v60 }
 0x9d9   : > { %13361 = vmatpush3.bf16.msra.mxu1 %v5048_v22 }
 0x9da   : > { %13373 = vmatpush3.bf16.msra.mxu0 %v16850_v60  ;;  %v5646_v7 = vpop.xlane.xlu1 %5645 }
 0x9db   : > { %13374 = vmatprep.subr.bf16.mxu0 %v16854_v12 }
 0x9de   : > { %v5616_v42 = vpop.xlane.xlu0 %5615  ;;  %13375 = vmatpush3.bf16.msra.mxu0 %v16854_v12 }
 0x9df   : > { %14070 = vrcp.f32 %v5616_v42  ;;  %13376 = vmatprep.subr.bf16.mxu0 %v17198_v18 }
 0x9e0   : > { %v5619_v8 = vpop.xlane.xlu1 %5618 }
 0x9e1   : > { %14072 = vrcp.f32 %v5619_v8 }
 0x9e2   : > { %v5640_v38 = vpop.xlane.xlu0 %5639  ;;  %13377 = vmatpush3.bf16.msra.mxu0 %v17198_v18  ;;  %14074 = vrcp.f32 %v5622_v23 }
 0x9e6   : > { %v5658_v3 = vpop.xlane.xlu1 %5657  ;;  %v5625_v6 = vpop.xlane.xlu0 %5624 }
 0x9e7   : > { %14076 = vrcp.f32 %v5625_v6 }
 0x9e9   : > { %v14071_v45 = vpop.eup %14070 }
 0x9ea   : > { %v5649_v60 = vpop.xlane.xlu0 %5648  ;;  %v5682_v16 = vpop.xlane.xlu1 %5681  ;;  %v5734_v10 = vmul.f32 %v14071_v45, %v17054_v5 }
 0x9eb   : > { %v14073_v22 = vpop.eup %14072  ;;  %14078 = vrcp.f32 %v5649_v60 }
 0x9ec   : > { %v5735_v47 = vmul.f32 %v14073_v22, %v17059_v50  ;;  %14080 = vrcp.f32 %v5640_v38  ;;  %v14075_v13 = vpop.eup %14074 }
 0x9ed   : > { %14082 = vrcp.f32 %v5646_v7  ;;  %v5736_v19 = vmul.f32 %v14075_v13, %v17042_v37 }
 0x9ee   : > { %v5643_v12 = vpop.xlane.xlu0 %5642  ;;  %v5764_v46 = vpack.c.bf16 %v5735_v47, %v5734_v10  ;;  %v5652_v18 = vpop.xlane.xlu1 %5651 }
 0x9ef   : > { %14084 = vrcp.f32 %v5643_v12 }
 0x9f0   : > { %13334 = vmatprep.mubr.msk.bf16.mxu1 %vm882_vm1, %v5764_v46 }
 0x9f1   : > { %v14077_v14 = vpop.eup %14076 }
 0x9f2   : > { %v5661_v31 = vpop.xlane.xlu0 %5660  ;;  %v5737_v4 = vmul.f32 %v14077_v14, %v17069_v36  ;;  %v5676_v50 = vpop.xlane.xlu1 %5675 }
 0x9f3   : > { %14086 = vrcp.f32 %v5661_v31 }
 0x9f4   : > { %v5765_v53 = vpack.c.bf16 %v5737_v4, %v5736_v19  ;;  %14088 = vrcp.f32 %v5652_v18 }
 0x9f5   : > { %v14079_v33 = vpop.eup %14078  ;;  %14090 = vrcp.f32 %v5658_v3 }
 0x9f6   : > { %v5685_v5 = vpop.xlane.xlu0 %5684  ;;  %13335 = vmatmul.mubr.msk.bf16.gmra.mrb[28].mxu1 %vm882_vm1, %v5765_v53  ;;  %v14081_v15 = vpop.eup %14080  ;;  %v5745_v40 = vmul.f32 %v14079_v33, %v17079_v59 }
 0x9f7   : > { %v14083_v24 = vpop.eup %14082  ;;  %v5742_v37 = vmul.f32 %v14081_v15, %v17064_v52  ;;  %v5670_v30 = vpop.xlane.xlu1 %5669 }
 0x9f8   : > { %v5744_v51 = vmul.f32 %v14083_v24, %v17048_v25 }
 0x9f9   : > { %v14085_v27 = vpop.eup %14084 }
 0x9fa   : > { %v5655_v29 = vpop.xlane.xlu0 %5654  ;;  %v5743_v36 = vmul.f32 %v14085_v27, %v17089_v9  ;;  %v5769_v2 = vpack.c.bf16 %v5745_v40, %v5744_v51 }
 0x9fb   : > { %14092 = vrcp.f32 %v5655_v29 }
 0x9fc   : > { %14094 = vrcp.f32 %v5685_v5  ;;  %v5768_v48 = vpack.c.bf16 %v5743_v36, %v5742_v37 }
 0x9fd   : > { %14096 = vrcp.f32 %v5676_v50  ;;  %v14087_v0 = vpop.eup %14086 }
 0x9fe   : > { %14098 = vrcp.f32 %v5682_v16  ;;  %v5679_v20 = vpop.xlane.xlu0 %5678  ;;  %13350 = vmatprep.mubr.msk.bf16.mxu0 %vm882_vm1, %v5768_v48  ;;  %v14089_v52 = vpop.eup %14088  ;;  %v5749_v25 = vmul.f32 %v14087_v0, %v17098_v34 }
 0x9ff   : > { %14100 = vrcp.f32 %v5679_v20  ;;  %13351 = vmatmul.mubr.msk.bf16.gmra.mrb[40].mxu0 %vm882_vm1, %v5769_v2  ;;  %v14091_v58 = vpop.eup %14090  ;;  %v5746_v7 = vmul.f32 %v14089_v52, %v17092_v43 }
 0xa00   : > { %v5748_v38 = vmul.f32 %v14091_v58, %v17072_v57 }
 0xa01   : > { %v5664_v59 = vpop.xlane.xlu1 %5663 }
 0xa02   : > { %v5673_v44 = vpop.xlane.xlu0 %5672  ;;  %v5771_v60 = vpack.c.bf16 %v5749_v25, %v5748_v38 }
 0xa03   : > { %14102 = vrcp.f32 %v5673_v44 }
 0xa04   : > { %14104 = vrcp.f32 %v5664_v59 }
 0xa05   : > { %v14093_v9 = vpop.eup %14092  ;;  %14106 = vrcp.f32 %v5670_v30  ;;  %v5688_v49 = vpop.xlane.xlu1 %5687 }
 0xa06   : > { %v14095_v56 = vpop.eup %14094  ;;  %v5667_v23 = vpop.xlane.xlu0 %5666  ;;  %v5747_v42 = vmul.f32 %v14093_v9, %v17128_v63 }
 0xa07   : > { %v14097_v8 = vpop.eup %14096  ;;  %14108 = vrcp.f32 %v5667_v23  ;;  %v5757_v22 = vmul.f32 %v14095_v56, %v17110_v21 }
 0xa08   : > { %v14099_v3 = vpop.eup %14098  ;;  %v5770_v6 = vpack.c.bf16 %v5747_v42, %v5746_v7  ;;  %14110 = vrcp.f32 %v5688_v49  ;;  %v5754_v16 = vmul.f32 %v14097_v8, %v17101_v11 }
 0xa09   : > { %v14101_v45 = vpop.eup %14100  ;;  %v5756_v63 = vmul.f32 %v14099_v3, %v17083_v54  ;;  %v5694_v57 = vpop.xlane.xlu1 %5693 }
 0xa0a   : > { %13362 = vmatprep.mubr.msk.bf16.mxu1 %vm882_vm1, %v5770_v6  ;;  %v5691_v34 = vpop.xlane.xlu0 %5690  ;;  %v5755_v43 = vmul.f32 %v14101_v45, %v17135_v26 }
 0xa0b   : > { %14112 = vrcp.f32 %v5691_v34  ;;  %13363 = vmatmul.mubr.msk.bf16.vlgmr.msra.gmra.mrb[32].mxu1 %vm882_vm1, %v5771_v60  ;;  %v5775_v47 = vpack.c.bf16 %v5757_v22, %v5756_v63 }
 0xa0c   : > { %v5774_v10 = vpack.c.bf16 %v5755_v43, %v5754_v16  ;;  %14114 = vrcp.f32 %v5694_v57 }
 0xa0d   : > { %v14103_v12 = vpop.eup %14102 }
 0xa0e   : > { %13378 = vmatprep.mubr.msk.bf16.mxu0 %vm882_vm1, %v5774_v10  ;;  %v14105_v21 = vpop.eup %14104  ;;  %v5753_v26 = vmul.f32 %v14103_v12, %v17148_v17 }
 0xa0f   : > { %13379 = vmatmul.mubr.msk.bf16.vlgmr.msra.gmra.mrb[44].mxu0 %vm882_vm1, %v5775_v47  ;;  %v14107_v46 = vpop.eup %14106  ;;  %v5697_v13 = vpop.xlane.xlu0 %5696  ;;  %v5750_v54 = vmul.f32 %v14105_v21, %v17154_v41 }
 0xa10   : > { %14116 = vrcp.f32 %v5697_v13  ;;  %v5752_v31 = vmul.f32 %v14107_v46, %v17119_v28 }
 0xa11   : > { %v14109_v11 = vpop.eup %14108 }
 0xa12   : > { %v5751_v18 = vmul.f32 %v14109_v11, %v17168_v32  ;;  %v14111_v14 = vpop.eup %14110  ;;  %v5773_v53 = vpack.c.bf16 %v5753_v26, %v5752_v31 }
 0xa13   : > { %v5758_v5 = vmul.f32 %v14111_v14, %v17160_v62 }
 0xa14   : > { %v5772_v19 = vpack.c.bf16 %v5751_v18, %v5750_v54 }
 0xa15   : > { %v14113_v4 = vpop.eup %14112 }
 0xa16   : > { %13366 = vmatprep.mubr.msk.bf16.mxu1 %vm882_vm1, %v5772_v19  ;;  %v5759_v33 = vmul.f32 %v14113_v4, %v17184_v1  ;;  %v14115_v17 = vpop.eup %14114 }
 0xa17   : > { %13367 = vmatmul.mubr.msk.bf16.gmra.mrb[36].mxu1 %vm882_vm1, %v5773_v53  ;;  %v5760_v32 = vmul.f32 %v14115_v17, %v17170_v35 }
 0xa18   : > { %v5776_v50 = vpack.c.bf16 %v5759_v33, %v5758_v5 }
 0xa1a   : > { %13382 = vmatprep.mubr.msk.bf16.mxu0 %vm882_vm1, %v5776_v50  ;;  %v14117_v41 = vpop.eup %14116 }
 0xa1b   : > { %v5761_v28 = vmul.f32 %v14117_v41, %v17176_v61 }
 0xa1d   : > { %v5777_v15 = vpack.c.bf16 %v5761_v28, %v5760_v32 }
 0xa1f   : > { %13383 = vmatmul.mubr.msk.bf16.gmra.mrb[48].mxu0 %vm882_vm1, %v5777_v15 }
 0xa9f   : > { %v13332_v24 = vpop.f32.mrb[24].mxu1 }
 0xaa0   : > { %v5824_v27 = vpop.f32.mrb[25].mxu1 }
 0xaa1   : > { %v13333_v29 = vpop.f32.mrb[26].mxu1 }
 0xaa2   : > { %v5827_v62 = vpop.f32.mrb[27].mxu1 }
 0xaa8   : > { %v13348_v40 = vpop.f32.mrb[36].mxu0 }
 0xaa9   : > { %v5901_v1 = vpop.f32.mrb[37].mxu0 }
 0xaaa   : > { %v17264_v37 = vpop.f32.mrb[38].mxu0 }
 0xaab   : > { %v17266_v36 = vpop.f32.mrb[39].mxu0 }
 0xac9   : > { %v17268_v51 = vpop.f32.mrb[28].mxu1 }
 0xaca   : > { %v17270_v30 = vpop.f32.mrb[29].mxu1 }
 0xacb   : > { %v17272_v35 = vpop.f32.mrb[30].mxu1 }
 0xacc   : > { %v17274_v61 = vpop.f32.mrb[31].mxu1 }
 0xad2   : > { %v17276_v48 = vpop.f32.mrb[40].mxu0 }
 0xad3   : > { %v17278_v20 = vpop.f32.mrb[41].mxu0 }
 0xad4   : > { %v17280_v2 = vpop.f32.mrb[42].mxu0 }
 0xad5   : > { %v17282_v59 = vpop.f32.mrb[43].mxu0 }
 0xade   : > { %v13364_v0 = vpop.f32.mrb[32].mxu1 }
 0xadf   : > { %v6222_v44 = vcombine.low %v13332_v24, %v13364_v0  ;;  %v6223_v52 = vcombine.high %v13332_v24, %v13364_v0  ;;  %v5978_v58 = vpop.f32.mrb[33].mxu1 }
 0xae0   : > { %v6086_v9 = vcombine.low %v5824_v27, %v5978_v58  ;;  %v6087_v25 = vcombine.high %v5824_v27, %v5978_v58  ;;  %v13365_v56 = vpop.f32.mrb[34].mxu1 }
 0xae1   : > { %v6230_v49 = vrot.slane %v6222_v44, %v15725_v55  ;;  %v6237_v23 = vrot.slane %v6223_v52, %v15725_v55  ;;  %v6290_v7 = vcombine.low %v13333_v29, %v13365_v56  ;;  %v6291_v42 = vcombine.high %v13333_v29, %v13365_v56  ;;  %v5981_v8 = vpop.f32.mrb[35].mxu1 }
 0xae2   : > { %v6094_v38 = vrot.slane %v6086_v9, %v15725_v55  ;;  %v6101_v3 = vrot.slane %v6087_v25, %v15725_v55  ;;  %v6154_v6 = vcombine.low %v5827_v62, %v5981_v8  ;;  %v6155_v45 = vcombine.high %v5827_v62, %v5981_v8  ;;  %v13380_v60 = vpop.f32.mrb[44].mxu0 }
 0xae3   : > { %v17289_v22 = vrot.slane %v6290_v7, %v15725_v55  ;;  %v17292_v34 = vrot.slane %v6291_v42, %v15725_v55  ;;  %v6238_v16 = vcombine.low %v13348_v40, %v13380_v60  ;;  %v6239_v43 = vcombine.high %v13348_v40, %v13380_v60  ;;  %v6055_v63 = vpop.f32.mrb[45].mxu0 }
 0xae4   : > { %v17295_v57 = vrot.slane %v6154_v6, %v15725_v55  ;;  %v17298_v10 = vrot.slane %v6155_v45, %v15725_v55  ;;  %v6102_v47 = vcombine.low %v5901_v1, %v6055_v63  ;;  %v6103_v12 = vcombine.high %v5901_v1, %v6055_v63  ;;  %v13381_v21 = vpop.f32.mrb[46].mxu0 }
 0xae5   : > { %v6246_v46 = vrot.slane %v6238_v16, %v15725_v55  ;;  %v6253_v13 = vrot.slane %v6239_v43, %v15725_v55  ;;  %v6306_v11 = vcombine.low %v17264_v37, %v13381_v21  ;;  %v6307_v26 = vcombine.high %v17264_v37, %v13381_v21  ;;  %v6058_v54 = vpop.f32.mrb[47].mxu0 }
 0xae6   : > { %v6110_v18 = vrot.slane %v6102_v47, %v15725_v55  ;;  %v6117_v14 = vrot.slane %v6103_v12, %v15725_v55  ;;  %v6170_v31 = vcombine.low %v17266_v36, %v6058_v54  ;;  %v6171_v19 = vcombine.high %v17266_v36, %v6058_v54 }
 0xae7   : > { %v6254_v4 = vcombine.low %v6230_v49, %v6246_v46  ;;  %v6255_v53 = vcombine.high %v6230_v49, %v6246_v46  ;;  %v6270_v5 = vcombine.low %v6237_v23, %v6253_v13  ;;  %v6271_v33 = vcombine.high %v6237_v23, %v6253_v13 }
 0xae8   : > { %v6118_v50 = vcombine.low %v6094_v38, %v6110_v18  ;;  %v6119_v17 = vcombine.high %v6094_v38, %v6110_v18  ;;  %v6134_v41 = vcombine.low %v6101_v3, %v6117_v14  ;;  %v6135_v32 = vcombine.high %v6101_v3, %v6117_v14 }
 0xae9   : > { %v6262_v28 = vrot.slane %v6254_v4, %v15732_v39  ;;  %v6269_v15 = vrot.slane %v6255_v53, %v15732_v39  ;;  %v6278_v24 = vrot.slane %v6270_v5, %v15732_v39  ;;  %v6285_v27 = vrot.slane %v6271_v33, %v15732_v39 }
 0xaea   : > { %v6126_v29 = vrot.slane %v6118_v50, %v15732_v39  ;;  %v6133_v62 = vrot.slane %v6119_v17, %v15732_v39  ;;  %v6142_v40 = vrot.slane %v6134_v41, %v15732_v39  ;;  %v6149_v1 = vrot.slane %v6135_v32, %v15732_v39  ;;  %v17316_v37 = vpop.f32.mrb[36].mxu1 }
 0xaeb   : > { %v6766_v36 = vcombine.low %v6262_v28, %v6269_v15  ;;  %v12856_v0 = vcombine.high %v6262_v28, %v6269_v15  ;;  %v6782_v44 = vcombine.low %v6278_v24, %v6285_v27  ;;  %v12857_v52 = vcombine.high %v6278_v24, %v6285_v27  ;;  %v17318_v58 = vpop.f32.mrb[37].mxu1 }
 0xaec   : > { %v6630_v9 = vcombine.low %v6126_v29, %v6133_v62  ;;  %v12852_v25 = vcombine.high %v6126_v29, %v6133_v62  ;;  %v6646_v56 = vcombine.low %v6142_v40, %v6149_v1  ;;  %v12853_v49 = vcombine.high %v6142_v40, %v6149_v1  ;;  %v17320_v23 = vpop.f32.mrb[38].mxu1 }
 0xaed   : > { %v17323_v7 = vrot.slane %v6766_v36, %v15725_v55  ;;  %v17326_v42 = vrot.slane %v12856_v0, %v15725_v55  ;;  %v17329_v8 = vrot.slane %v6782_v44, %v15725_v55  ;;  %v17332_v38 = vrot.slane %v12857_v52, %v15725_v55  ;;  %v17334_v3 = vpop.f32.mrb[39].mxu1 }
 0xaee   : > { %v17337_v6 = vrot.slane %v6630_v9, %v15725_v55  ;;  %v17340_v45 = vrot.slane %v12852_v25, %v15725_v55  ;;  %v17343_v60 = vrot.slane %v6646_v56, %v15725_v55  ;;  %v17346_v16 = vrot.slane %v12853_v49, %v15725_v55 }
 0xaef   : > { %v6314_v43 = vrot.slane %v6306_v11, %v15725_v55  ;;  %v6321_v63 = vrot.slane %v6307_v26, %v15725_v55  ;;  %v6178_v47 = vrot.slane %v6170_v31, %v15725_v55  ;;  %v6185_v12 = vrot.slane %v6171_v19, %v15725_v55 }
 0xaf0   : > { %v6494_v21 = vcombine.low %v17268_v51, %v17316_v37  ;;  %v6495_v46 = vcombine.high %v17268_v51, %v17316_v37  ;;  %v6358_v13 = vcombine.low %v17270_v30, %v17318_v58  ;;  %v6359_v54 = vcombine.high %v17270_v30, %v17318_v58 }
 0xaf1   : > { %v6322_v11 = vcombine.low %v17289_v22, %v6314_v43  ;;  %v6323_v26 = vcombine.high %v17289_v22, %v6314_v43  ;;  %v6338_v18 = vcombine.low %v17292_v34, %v6321_v63  ;;  %v6339_v14 = vcombine.high %v17292_v34, %v6321_v63 }
 0xaf2   : > { %v6186_v31 = vcombine.low %v17295_v57, %v6178_v47  ;;  %v6187_v19 = vcombine.high %v17295_v57, %v6178_v47  ;;  %v6202_v51 = vcombine.low %v17298_v10, %v6185_v12  ;;  %v6203_v4 = vcombine.high %v17298_v10, %v6185_v12  ;;  %v13384_v33 = vpop.f32.mrb[48].mxu0 }
 0xaf3   : > { %v6330_v53 = vrot.slane %v6322_v11, %v15732_v39  ;;  %v6337_v30 = vrot.slane %v6323_v26, %v15732_v39  ;;  %v6346_v5 = vrot.slane %v6338_v18, %v15732_v39  ;;  %v6353_v22 = vrot.slane %v6339_v14, %v15732_v39  ;;  %v6071_v41 = vpop.f32.mrb[49].mxu0 }
 0xaf4   : > { %v6194_v50 = vrot.slane %v6186_v31, %v15732_v39  ;;  %v6201_v34 = vrot.slane %v6187_v19, %v15732_v39  ;;  %v6210_v17 = vrot.slane %v6202_v51, %v15732_v39  ;;  %v6217_v57 = vrot.slane %v6203_v4, %v15732_v39  ;;  %v17376_v24 = vpop.f32.mrb[50].mxu0 }
 0xaf5   : > { %v6834_v32 = vcombine.low %v6330_v53, %v6337_v30  ;;  %v12858_v10 = vcombine.high %v6330_v53, %v6337_v30  ;;  %v6850_v28 = vcombine.low %v6346_v5, %v6353_v22  ;;  %v12859_v15 = vcombine.high %v6346_v5, %v6353_v22  ;;  %v17378_v1 = vpop.f32.mrb[51].mxu0 }
 0xaf6   : > { %v6698_v27 = vcombine.low %v6194_v50, %v6201_v34  ;;  %v12854_v29 = vcombine.high %v6194_v50, %v6201_v34  ;;  %v6714_v62 = vcombine.low %v6210_v17, %v6217_v57  ;;  %v12855_v40 = vcombine.high %v6210_v17, %v6217_v57 }
 0xaf7   : > { %v17381_v37 = vrot.slane %v6834_v32, %v15725_v55  ;;  %v17384_v36 = vrot.slane %v12858_v10, %v15725_v55  ;;  %v17387_v0 = vrot.slane %v6850_v28, %v15725_v55  ;;  %v17390_v44 = vrot.slane %v12859_v15, %v15725_v55 }
 0xaf8   : > { %v17393_v52 = vrot.slane %v6698_v27, %v15725_v55  ;;  %v17396_v58 = vrot.slane %v12854_v29, %v15725_v55  ;;  %v17399_v9 = vrot.slane %v6714_v62, %v15725_v55  ;;  %v17402_v25 = vrot.slane %v12855_v40, %v15725_v55 }
 0xaf9   : > { %v6502_v56 = vrot.slane %v6494_v21, %v15725_v55  ;;  %v6509_v49 = vrot.slane %v6495_v46, %v15725_v55  ;;  %v6366_v43 = vrot.slane %v6358_v13, %v15725_v55  ;;  %v6373_v63 = vrot.slane %v6359_v54, %v15725_v55 }
 0xafa   : > { %v6562_v47 = vcombine.low %v17272_v35, %v17320_v23  ;;  %v6563_v12 = vcombine.high %v17272_v35, %v17320_v23  ;;  %v6426_v11 = vcombine.low %v17274_v61, %v17334_v3  ;;  %v6427_v26 = vcombine.high %v17274_v61, %v17334_v3 }
 0xafb   : > { %v6510_v21 = vcombine.low %v17276_v48, %v13384_v33  ;;  %v6511_v46 = vcombine.high %v17276_v48, %v13384_v33  ;;  %v6374_v13 = vcombine.low %v17278_v20, %v6071_v41  ;;  %v6375_v54 = vcombine.high %v17278_v20, %v6071_v41 }
 0xafc   : > { %v6570_v18 = vrot.slane %v6562_v47, %v15725_v55  ;;  %v17422_v14 = vrot.slane %v6563_v12, %v15725_v55  ;;  %v17425_v35 = vrot.slane %v6426_v11, %v15725_v55  ;;  %v17428_v23 = vrot.slane %v6427_v26, %v15725_v55 }
 0xafd   : > { %v6518_v61 = vrot.slane %v6510_v21, %v15725_v55  ;;  %v6525_v3 = vrot.slane %v6511_v46, %v15725_v55  ;;  %v6382_v48 = vrot.slane %v6374_v13, %v15725_v55  ;;  %v6389_v31 = vrot.slane %v6375_v54, %v15725_v55 }
 0xafe   : > { %v6578_v20 = vcombine.low %v17280_v2, %v17376_v24  ;;  %v6579_v19 = vcombine.high %v17280_v2, %v17376_v24  ;;  %v6442_v51 = vcombine.low %v17282_v59, %v17378_v1  ;;  %v6443_v4 = vcombine.high %v17282_v59, %v17378_v1 }
 0xaff   : > { %v6526_v53 = vcombine.low %v6502_v56, %v6518_v61  ;;  %v6527_v30 = vcombine.high %v6502_v56, %v6518_v61  ;;  %v6542_v5 = vcombine.low %v6509_v49, %v6525_v3  ;;  %v6543_v22 = vcombine.high %v6509_v49, %v6525_v3 }
 0xb00   : > { %v6390_v33 = vcombine.low %v6366_v43, %v6382_v48  ;;  %v6391_v50 = vcombine.high %v6366_v43, %v6382_v48  ;;  %v6406_v34 = vcombine.low %v6373_v63, %v6389_v31  ;;  %v6407_v17 = vcombine.high %v6373_v63, %v6389_v31 }
 0xb01   : > { %v6534_v57 = vrot.slane %v6526_v53, %v15732_v39  ;;  %v6541_v41 = vrot.slane %v6527_v30, %v15732_v39  ;;  %v6550_v2 = vrot.slane %v6542_v5, %v15732_v39  ;;  %v6557_v32 = vrot.slane %v6543_v22, %v15732_v39 }
 0xb02   : > { %v6398_v10 = vrot.slane %v6390_v33, %v15732_v39  ;;  %v6405_v59 = vrot.slane %v6391_v50, %v15732_v39  ;;  %v6414_v28 = vrot.slane %v6406_v34, %v15732_v39  ;;  %v6421_v15 = vrot.slane %v6407_v17, %v15732_v39 }
 0xb03   : > { %v7038_v24 = vcombine.low %v6534_v57, %v6541_v41  ;;  %v12864_v27 = vcombine.high %v6534_v57, %v6541_v41  ;;  %v7054_v29 = vcombine.low %v6550_v2, %v6557_v32  ;;  %v12865_v62 = vcombine.high %v6550_v2, %v6557_v32 }
 0xb04   : > { %v6902_v40 = vcombine.low %v6398_v10, %v6405_v59  ;;  %v12860_v1 = vcombine.high %v6398_v10, %v6405_v59  ;;  %v6918_v56 = vcombine.low %v6414_v28, %v6421_v15  ;;  %v12861_v49 = vcombine.high %v6414_v28, %v6421_v15 }
 0xb05   : > { %v17451_v43 = vrot.slane %v7038_v24, %v15725_v55  ;;  %v17454_v63 = vrot.slane %v12864_v27, %v15725_v55  ;;  %v17457_v47 = vrot.slane %v7054_v29, %v15725_v55  ;;  %v17460_v12 = vrot.slane %v12865_v62, %v15725_v55 }
 0xb06   : > { %v17463_v11 = vrot.slane %v6902_v40, %v15725_v55  ;;  %v17466_v26 = vrot.slane %v12860_v1, %v15725_v55  ;;  %v17469_v21 = vrot.slane %v6918_v56, %v15725_v55  ;;  %v17472_v46 = vrot.slane %v12861_v49, %v15725_v55  ;;  %v13912_v56 = vld [vmem:[#allocation11] sm:$0xff]  }
 0xb07   : > { %v6586_v13 = vrot.slane %v6578_v20, %v15725_v55  ;;  %v6593_v54 = vrot.slane %v6579_v19, %v15725_v55  ;;  %v6450_v61 = vrot.slane %v6442_v51, %v15725_v55  ;;  %v6457_v3 = vrot.slane %v6443_v4, %v15725_v55  ;;  %13386 = vmatprep.subr.bf16.mxu1 %v13912_v56 }
 0xb08   : > { %v6799_v48 = vcombine.high %v17323_v7, %v17326_v42  ;;  %v6815_v31 = vcombine.high %v17329_v8, %v17332_v38  ;;  %v6867_v53 = vcombine.high %v17381_v37, %v17384_v36  ;;  %v6883_v30 = vcombine.high %v17387_v0, %v17390_v44  ;;  %13387 = vmatpush3.bf16.msra.mxu1 %v13912_v56 }
 0xb09   : > { %v6594_v5 = vcombine.low %v6570_v18, %v6586_v13  ;;  %v6595_v20 = vcombine.high %v6570_v18, %v6586_v13  ;;  %v6610_v19 = vcombine.low %v17422_v14, %v6593_v54  ;;  %v6611_v51 = vcombine.high %v17422_v14, %v6593_v54 }
 0xb0a   : > { %v6458_v4 = vcombine.low %v17425_v35, %v6450_v61  ;;  %v6459_v22 = vcombine.high %v17425_v35, %v6450_v61  ;;  %v6474_v33 = vcombine.low %v17428_v23, %v6457_v3  ;;  %v6475_v50 = vcombine.high %v17428_v23, %v6457_v3 }
 0xb0b   : > { %v6602_v34 = vrot.slane %v6594_v5, %v15732_v39  ;;  %v6609_v17 = vrot.slane %v6595_v20, %v15732_v39  ;;  %v6618_v57 = vrot.slane %v6610_v19, %v15732_v39  ;;  %v6625_v18 = vrot.slane %v6611_v51, %v15732_v39 }
 0xb0c   : > { %v6466_v41 = vrot.slane %v6458_v4, %v15732_v39  ;;  %v6473_v14 = vrot.slane %v6459_v22, %v15732_v39  ;;  %v6482_v2 = vrot.slane %v6474_v33, %v15732_v39  ;;  %v6489_v35 = vrot.slane %v6475_v50, %v15732_v39 }
 0xb0d   : > { %v7106_v32 = vcombine.low %v6602_v34, %v6609_v17  ;;  %v12866_v10 = vcombine.high %v6602_v34, %v6609_v17  ;;  %v7122_v59 = vcombine.low %v6618_v57, %v6625_v18  ;;  %v12867_v23 = vcombine.high %v6618_v57, %v6625_v18 }
 0xb0e   : > { %v6970_v28 = vcombine.low %v6466_v41, %v6473_v14  ;;  %v12862_v15 = vcombine.high %v6466_v41, %v6473_v14  ;;  %v6986_v24 = vcombine.low %v6482_v2, %v6489_v35  ;;  %v12863_v27 = vcombine.high %v6482_v2, %v6489_v35  ;;  %v13914_v41 = vld [vmem:[#allocation11 + $0x10] sm:$0xff]  }
 0xb0f   : > { %v17501_v29 = vrot.slane %v7106_v32, %v15725_v55  ;;  %v17504_v62 = vrot.slane %v12866_v10, %v15725_v55  ;;  %v17507_v40 = vrot.slane %v7122_v59, %v15725_v55  ;;  %v17510_v1 = vrot.slane %v12867_v23, %v15725_v55 }
 0xb10   : > { %v17513_v49 = vrot.slane %v6970_v28, %v15725_v55  ;;  %v17516_v13 = vrot.slane %v12862_v15, %v15725_v55  ;;  %v17519_v54 = vrot.slane %v6986_v24, %v15725_v55  ;;  %v17522_v61 = vrot.slane %v12863_v27, %v15725_v55 }
 0xb11   : > { %v6813_v3 = vrot.slane %v6799_v48, %v15732_v39  ;;  %v6829_v5 = vrot.slane %v6815_v31, %v15732_v39  ;;  %v6881_v20 = vrot.slane %v6867_v53, %v15732_v39  ;;  %v6897_v19 = vrot.slane %v6883_v30, %v15732_v39  ;;  %v13913_v48 = vld [vmem:[#allocation11 + $0x8] sm:$0xff]  }
 0xb12   : > { %v6798_v51 = vcombine.low %v17323_v7, %v17326_v42  ;;  %v6814_v4 = vcombine.low %v17329_v8, %v17332_v38  ;;  %v6866_v22 = vcombine.low %v17381_v37, %v17384_v36  ;;  %v6882_v33 = vcombine.low %v17387_v0, %v17390_v44  ;;  %13388 = vmatprep.subr.bf16.mxu1 %v13913_v48 }
 0xb13   : > { %v6832_v31 = vcombine.low %v6813_v3, %v6829_v5  ;;  %v6900_v50 = vcombine.low %v6881_v20, %v6897_v19  ;;  %v6833_v53 = vcombine.high %v6813_v3, %v6829_v5  ;;  %v6901_v34 = vcombine.high %v6881_v20, %v6897_v19  ;;  %13389 = vmatpush3.bf16.msra.mxu1 %v13913_v48 }
 0xb14   : > { %v17537_v30 = vrot.slane %v6798_v51, %v15732_v39  ;;  %v17540_v7 = vrot.slane %v6814_v4, %v15732_v39  ;;  %v17543_v42 = vrot.slane %v6866_v22, %v15732_v39  ;;  %v17546_v8 = vrot.slane %v6882_v33, %v15732_v39  ;;  %13390 = vmatprep.subr.bf16.mxu1 %v13914_v41 }
 0xb15   : > { %v13781_v38 = vpack.i.bf16 %v6900_v50, %v6832_v31  ;;  %v13786_v37 = vpack.i.bf16 %v6901_v34, %v6833_v53  ;;  %v6663_v36 = vcombine.high %v17337_v6, %v17340_v45  ;;  %v6679_v0 = vcombine.high %v17343_v60, %v17346_v16 }
 0xb16   : > { %v6831_v44 = vcombine.high %v17537_v30, %v17540_v7  ;;  %v6899_v17 = vcombine.high %v17543_v42, %v17546_v8  ;;  %v6731_v57 = vcombine.high %v17393_v52, %v17396_v58  ;;  %v6747_v18 = vcombine.high %v17399_v9, %v17402_v25 }
 0xb17   : > { %13782 = vrot.lane.b32.xlu1 %v13781_v38, %s19655_s25  ;;  %v6677_v14 = vrot.slane %v6663_v36, %v15732_v39  ;;  %v6693_v2 = vrot.slane %v6679_v0, %v15732_v39  ;;  %v6662_v35 = vcombine.low %v17337_v6, %v17340_v45  ;;  %v6678_v32 = vcombine.low %v17343_v60, %v17346_v16 }
 0xb18   : > { %v13776_v10 = vpack.i.bf16 %v6899_v17, %v6831_v44  ;;  %v6745_v59 = vrot.slane %v6731_v57, %v15732_v39  ;;  %v6761_v23 = vrot.slane %v6747_v18, %v15732_v39  ;;  %v6730_v28 = vcombine.low %v17393_v52, %v17396_v58  ;;  %v13915_v58 = vld [vmem:[#allocation11 + $0x18] sm:$0xff]   ;;  %13391 = vmatpush3.bf16.msra.mxu1 %v13914_v41 }
 0xb19   : > { %v6697_v15 = vcombine.high %v6677_v14, %v6693_v2  ;;  %v17572_v24 = vrot.slane %v6662_v35, %v15732_v39  ;;  %v17575_v27 = vrot.slane %v6678_v32, %v15732_v39  ;;  %v6746_v6 = vcombine.low %v17399_v9, %v17402_v25  ;;  %13392 = vmatprep.subr.bf16.mxu1 %v13915_v58 }
 0xb1a   : > { %13777 = vrot.lane.b32.xlu0 %v13776_v10, %s19653_s0  ;;  %v6765_v45 = vcombine.high %v6745_v59, %v6761_v23  ;;  %v17581_v60 = vrot.slane %v6730_v28, %v15732_v39  ;;  %v6696_v16 = vcombine.low %v6677_v14, %v6693_v2  ;;  %v6764_v52 = vcombine.low %v6745_v59, %v6761_v23 }
 0xb1b   : > { %13787 = vrot.lane.b32.xlu1 %v13786_v37, %s19651_s21  ;;  %v6695_v56 = vcombine.high %v17572_v24, %v17575_v27  ;;  %v17587_v3 = vrot.slane %v6746_v6, %v15732_v39  ;;  %v7070_v9 = vcombine.low %v17451_v43, %v17454_v63  ;;  %v7086_v25 = vcombine.low %v17457_v47, %v17460_v12 }
 0xb1c   : > { %v13801_v5 = vpack.i.bf16 %v6765_v45, %v6697_v15  ;;  %v13796_v20 = vpack.i.bf16 %v6764_v52, %v6696_v16  ;;  %v7138_v19 = vcombine.low %v17501_v29, %v17504_v62  ;;  %v7154_v51 = vcombine.low %v17507_v40, %v17510_v1  ;;  %13393 = vmatpush3.bf16.msra.mxu1 %v13915_v58 }
 0xb1d   : > { %v6763_v4 = vcombine.high %v17581_v60, %v17587_v3  ;;  %v17600_v22 = vrot.slane %v7070_v9, %v15732_v39  ;;  %v17603_v33 = vrot.slane %v7086_v25, %v15732_v39  ;;  %v6934_v48 = vcombine.low %v17463_v11, %v17466_v26 }
 0xb1e   : > { %13802 = vrot.lane.b32.xlu0 %v13801_v5, %s19651_s21  ;;  %v17609_v31 = vrot.slane %v7138_v19, %v15732_v39  ;;  %v17612_v50 = vrot.slane %v7154_v51, %v15732_v39  ;;  %v6950_v53 = vcombine.low %v17469_v21, %v17472_v46  ;;  %v7002_v34 = vcombine.low %v17513_v49, %v17516_v13 }
 0xb1f   : > { %v13791_v38 = vpack.i.bf16 %v6763_v4, %v6695_v56  ;;  %v7103_v37 = vcombine.high %v17600_v22, %v17603_v33  ;;  %v17621_v36 = vrot.slane %v6934_v48, %v15732_v39  ;;  %v7018_v0 = vcombine.low %v17519_v54, %v17522_v61 }
 0xb20   : > { %v7171_v44 = vcombine.high %v17609_v31, %v17612_v50  ;;  %v17628_v17 = vrot.slane %v6950_v53, %v15732_v39  ;;  %v17631_v57 = vrot.slane %v7002_v34, %v15732_v39  ;;  %v7071_v18 = vcombine.high %v17451_v43, %v17454_v63 }
 0xb21   : > { %13792 = vrot.lane.b32.xlu1 %v13791_v38, %s19653_s0  ;;  %v17637_v41 = vrot.slane %v7018_v0, %v15732_v39  ;;  %v7087_v14 = vcombine.high %v17457_v47, %v17460_v12  ;;  %v7139_v2 = vcombine.high %v17501_v29, %v17504_v62  ;;  %v7155_v35 = vcombine.high %v17507_v40, %v17510_v1 }
 0xb22   : > { %v13806_v32 = vpack.i.bf16 %v7171_v44, %v7103_v37  ;;  %v6967_v10 = vcombine.high %v17621_v36, %v17628_v17  ;;  %v7085_v43 = vrot.slane %v7071_v18, %v15732_v39  ;;  %v6935_v63 = vcombine.high %v17463_v11, %v17466_v26 }
 0xb23   : > { %v19773_v59 = vmov 0.0   ;;  %v7035_v47 = vcombine.high %v17631_v57, %v17637_v41  ;;  %v7101_v12 = vrot.slane %v7087_v14, %v15732_v39  ;;  %v7153_v29 = vrot.slane %v7139_v2, %v15732_v39 }
 0xb24   : > { %13418 = vmatprep.subr.bf16.mxu1 %v19773_v59  ;;  %v7169_v62 = vrot.slane %v7155_v35, %v15732_v39  ;;  %v6949_v40 = vrot.slane %v6935_v63, %v15732_v39  ;;  %v6951_v1 = vcombine.high %v17469_v21, %v17472_v46  ;;  %v7003_v23 = vcombine.high %v17513_v49, %v17516_v13 }
 0xb25   : > { %v7019_v11 = vcombine.high %v17519_v54, %v17522_v61  ;;  %13797 = vrot.lane.b32.xlu1 %v13796_v20, %s19655_s25  ;;  %v13816_v26 = vpack.i.bf16 %v7035_v47, %v6967_v10  ;;  %v7104_v28 = vcombine.low %v7085_v43, %v7101_v12  ;;  %v7105_v6 = vcombine.high %v7085_v43, %v7101_v12 }
 0xb26   : > { %v7172_v15 = vcombine.low %v7153_v29, %v7169_v62  ;;  %v6965_v45 = vrot.slane %v6951_v1, %v15732_v39  ;;  %v7017_v16 = vrot.slane %v7003_v23, %v15732_v39  ;;  %v7173_v58 = vcombine.high %v7153_v29, %v7169_v62 }
 0xb27   : > { %v7033_v52 = vrot.slane %v7019_v11, %v15732_v39  ;;  %13817 = vrot.lane.b32.xlu0 %v13816_v26, %s19653_s0  ;;  %v6830_v46 = vcombine.low %v17537_v30, %v17540_v7  ;;  %v6898_v49 = vcombine.low %v17543_v42, %v17546_v8  ;;  %v6694_v25 = vcombine.low %v17572_v24, %v17575_v27 }
 0xb28   : > { %v13811_v21 = vpack.i.bf16 %v7172_v15, %v7104_v28  ;;  %v6968_v13 = vcombine.low %v6949_v40, %v6965_v45  ;;  %v13831_v61 = vpack.i.bf16 %v7173_v58, %v7105_v6  ;;  %v6969_v56 = vcombine.high %v6949_v40, %v6965_v45 }
 0xb29   : > { %v7036_v54 = vcombine.low %v7017_v16, %v7033_v52  ;;  %13807 = vrot.lane.b32.xlu1 %v13806_v32, %s19653_s0  ;;  %v7037_v9 = vcombine.high %v7017_v16, %v7033_v52  ;;  %v6762_v5 = vcombine.low %v17581_v60, %v17587_v3  ;;  %v7102_v30 = vcombine.low %v17600_v22, %v17603_v33  ;;  %s19800_s0 = sld [smem:[#allocation84_spill]] }
 0xb2a   : > { %v7170_v7 = vcombine.low %v17609_v31, %v17612_v50  ;;  %v6966_v42 = vcombine.low %v17621_v36, %v17628_v17  ;;  %v7034_v19 = vcombine.low %v17631_v57, %v17637_v41 }
 0xb2b   : > { %v13821_v20 = vpack.i.bf16 %v7036_v54, %v6968_v13  ;;  %v13826_v8 = vpack.i.bf16 %v7037_v9, %v6969_v56 }
 0xb2d   : > { %13822 = vrot.lane.b32.xlu0 %v13821_v20, %s19655_s25  ;;  %13812 = vrot.lane.b32.xlu1 %v13811_v21, %s19655_s25  ;;  %s12492_s25 = scalar_lea.sflag [#allocation4], %s15342_s2 }
 0xb31   : > { %13827 = vrot.lane.b32.xlu0 %v13826_v8, %s19651_s21  ;;  %13832 = vrot.lane.b32.xlu1 %v13831_v61, %s19651_s21  ;;  %s19795_s21 = sld [smem:[#allocation82_spill]] }
 0xb89   : > { %v13783_v24 = vpop.permute.xlu1 %13782 }
 0xb8a   : > { %v13785_v27 = vunpack.i.h.bf16 %v13783_v24  ;;  %v13784_v60 = vunpack.i.l.bf16 %v13783_v24 }
 0xb8c   : > { %v13778_v3 = vpop.permute.xlu0 %13777 }
 0xb8d   : > { %v13780_v51 = vunpack.i.h.bf16 %v13778_v3  ;;  %v13779_v4 = vunpack.i.l.bf16 %v13778_v3  ;;  %v13788_v22 = vpop.permute.xlu1 %13787  ;;  %v12868_v3 = vld [vmem:[#allocation13] ss:$0 sm:$0xff] }
 0xb8e   : > { %v13790_v33 = vunpack.i.h.bf16 %v13788_v22  ;;  %v13789_v48 = vunpack.i.l.bf16 %v13788_v22 }
 0xb8f   : > { %v7273_v31 = vsel %vm5053_vm3, %v6898_v49, %v13780_v51  ;;  %v7272_v50 = vsel %vm5053_vm3, %v6830_v46, %v13779_v4 }
 0xb90   : > { %v7281_v53 = vsel %vm7278_vm4, %v7272_v50, %v13784_v60  ;;  %v7282_v34 = vsel %vm7278_vm4, %v7273_v31, %v13785_v27  ;;  %v13803_v44 = vpop.permute.xlu0 %13802  ;;  %v19774_v50 = vld [vmem:[#allocation49_spill] sm:$0xff] }
 0xb91   : > { %v7290_v38 = vsel %vm7287_vm5, %v7281_v53, %v13789_v48  ;;  %v7291_v37 = vsel %vm7287_vm5, %v7282_v34, %v13790_v33  ;;  %v13805_v2 = vunpack.i.h.bf16 %v13803_v44  ;;  %v13804_v35 = vunpack.i.l.bf16 %v13803_v44 }
 0xb92   : > { %v7297_v36 = vpack.c.bf16 %v7291_v37, %v7290_v38  ;;  %v19775_v38 = vld [vmem:[#allocation51_spill] sm:$0xff] }
 0xb93   : > { %v13793_v0 = vpop.permute.xlu1 %13792 }
 0xb94   : > { %v13795_v17 = vunpack.i.h.bf16 %v13793_v0  ;;  %v13794_v57 = vunpack.i.l.bf16 %v13793_v0  ;;  %v19776_v0 = vld [vmem:[#allocation50_spill] sm:$0xff] }
 0xb96   : > { %v7270_v32 = vsel %vm5053_vm3, %v6694_v25, %v13794_v57  ;;  %v7271_v10 = vsel %vm5053_vm3, %v6762_v5, %v13795_v17 }
 0xb97   : > { %v13798_v18 = vpop.permute.xlu1 %13797 }
 0xb98   : > { %v13800_v41 = vunpack.i.h.bf16 %v13798_v18  ;;  %v13799_v14 = vunpack.i.l.bf16 %v13798_v18 }
 0xb99   : > { %v13818_v43 = vpop.permute.xlu0 %13817 }
 0xb9a   : > { %v7279_v63 = vsel %vm7278_vm4, %v7270_v32, %v13799_v14  ;;  %v7280_v47 = vsel %vm7278_vm4, %v7271_v10, %v13800_v41  ;;  %v13820_v1 = vunpack.i.h.bf16 %v13818_v43  ;;  %v13819_v23 = vunpack.i.l.bf16 %v13818_v43  ;;  %v19777_v41 = vld [vmem:[#allocation52_spill] sm:$0xff] }
 0xb9b   : > { %v13808_v12 = vpop.permute.xlu1 %13807  ;;  %v7288_v29 = vsel %vm7287_vm5, %v7279_v63, %v13804_v35  ;;  %v7289_v62 = vsel %vm7287_vm5, %v7280_v47, %v13805_v2  ;;  %v19778_v47 = vld [vmem:[#allocation53_spill] sm:$0xff] }
 0xb9c   : > { %v7296_v40 = vpack.c.bf16 %v7289_v62, %v7288_v29  ;;  %v13810_v26 = vunpack.i.h.bf16 %v13808_v12  ;;  %v13809_v28 = vunpack.i.l.bf16 %v13808_v12  ;;  %v7275_v58 = vsel %vm5053_vm3, %v7034_v19, %v13820_v1  ;;  %v19779_v1 = vld [vmem:[#allocation55_spill] sm:$0xff] }
 0xb9d   : > { %v7274_v21 = vsel %vm5053_vm3, %v6966_v42, %v13819_v23 }
 0xb9e   : > { %13394 = vmatprep.mubr.msk.bf16.mxu1 %vm882_vm1, %v7296_v40  ;;  %v7276_v49 = vsel %vm5053_vm3, %v7102_v30, %v13809_v28  ;;  %v7277_v13 = vsel %vm5053_vm3, %v7170_v7, %v13810_v26 }
 0xb9f   : > { %v13823_v11 = vpop.permute.xlu0 %13822  ;;  %v13813_v15 = vpop.permute.xlu1 %13812  ;;  %13395 = vmatmul.mubr.msk.bf16.vlgmr.msra.gmra.mrb[40].mxu1 %vm882_vm1, %v7297_v36 }
 0xba0   : > { %v13825_v6 = vunpack.i.h.bf16 %v13823_v11  ;;  %v13824_v45 = vunpack.i.l.bf16 %v13823_v11  ;;  %v13815_v16 = vunpack.i.h.bf16 %v13813_v15  ;;  %v13814_v52 = vunpack.i.l.bf16 %v13813_v15  ;;  %v19780_v11 = vld [vmem:[#allocation54_spill] sm:$0xff] }
 0xba2   : > { %v7283_v9 = vsel %vm7278_vm4, %v7274_v21, %v13824_v45  ;;  %v7284_v25 = vsel %vm7278_vm4, %v7275_v58, %v13825_v6  ;;  %v7285_v8 = vsel %vm7278_vm4, %v7276_v49, %v13814_v52  ;;  %v7286_v19 = vsel %vm7278_vm4, %v7277_v13, %v13815_v16  ;;  %v19781_v6 = vld [vmem:[#allocation56_spill] sm:$0xff]  ;;  %v13916_v58 = vld [vmem:[#allocation16] sm:$0xff]   ;;  %v13917_v21 = vld [vmem:[#allocation16 + $0x8] sm:$0xff]  }
 0xba3   : > { %v13828_v46 = vpop.permute.xlu0 %13827  ;;  %v13833_v54 = vpop.permute.xlu1 %13832  ;;  %13419 = vmatpush3.bf16.msra.mxu1 %v13916_v58  ;;  %v13919_v49 = vld [vmem:[#allocation16 + $0x18] sm:$0xff]   ;;  %v881_v13 = vld [vmem:[%s15346_s16] sm:$0xf]  ;;  %s12747_s16 = sshll.u32 %s15342_s2, 6 }
 0xba4   : > { %v13830_v61 = vunpack.i.h.bf16 %v13828_v46  ;;  %v13829_v56 = vunpack.i.l.bf16 %v13828_v46  ;;  %v13835_v5 = vunpack.i.h.bf16 %v13833_v54  ;;  %v13834_v20 = vunpack.i.l.bf16 %v13833_v54  ;;  %13420 = vmatprep.subr.bf16.mxu1 %v19773_v59  ;;  %v13918_v46 = vld [vmem:[#allocation16 + $0x10] sm:$0xff]   ;;  %s834_s27 = scalar_lea.vmem [#allocation25], %s12747_s16  ;;  %s14708_s16 = sshll.u32 %s14833_s28, 4  ;;  %s14709_s16 = int_to_ptr.vmem [resolvable:$false] %s14708_s16 }
 0xba5   : > { %s12505_s5 = sshll.u32 %s834_s27, 4  ;;  %s14710_s9 = scalar_lea.vmem %s14709_s16, 2048  ;;  %s19516_s5 = int_to_ptr.vmem [resolvable:$true] %s12505_s5 }
 0xba6   : > { %v7292_v42 = vsel %vm7287_vm5, %v7283_v9, %v13829_v56  ;;  %v7293_v24 = vsel %vm7287_vm5, %v7284_v25, %v13830_v61  ;;  %v7294_v30 = vsel %vm7287_vm5, %v7285_v8, %v13834_v20  ;;  %v7295_v7 = vsel %vm7287_vm5, %v7286_v19, %v13835_v5  ;;  %p14711_p5 = scmp.lt.s32.totalorder %s19516_s5, %s14709_s16 }
 0xba7   : > { %v7298_v27 = vpack.c.bf16 %v7293_v24, %v7292_v42  ;;  %v7299_v60 = vpack.c.bf16 %v7295_v7, %v7294_v30  ;;  %13421 = vmatpush3.bf16.msra.mxu1 %v13917_v21 }
 0xba8   : > { %13422 = vmatprep.subr.bf16.mxu1 %v19773_v59 }
 0xba9   : > { %13398 = vmatprep.mubr.msk.bf16.mxu1 %vm882_vm1, %v7298_v27 }
 0xbaa   : > { %13399 = vmatmul.mubr.msk.bf16.gmra.mrb[44].mxu1 %vm882_vm1, %v7299_v60 }
 0xbab   : > { %13426 = vmatprep.mubr.msk.bf16.mxu1 %vm14821_vm0, %v19773_v59  ;;  %13423 = vmatpush3.bf16.msra.mxu1 %v13918_v46 }
 0xbac   : > { %13424 = vmatprep.subr.bf16.mxu1 %v19773_v59 }
 0xbaf   : > { %13425 = vmatpush3.bf16.msra.mxu1 %v13919_v49 }
 0xbb2   : > { %13427 = vmatmul.mubr.msk.bf16.vlgmr.msra.gmra.mrb[48].mxu1 %vm882_vm1, %v881_v13 }
 0xc72   : > { %v13396_v51 = vpop.f32.mrb[40].mxu1 }
 0xc73   : > { %v7385_v4 = vpop.f32.mrb[41].mxu1  ;;  %v7394_v22 = vadd.f32 %v13396_v51, %v12868_v3 }
 0xc74   : > { %v7386_v33 = vadd.f32 %v12868_v3, %v7385_v4  ;;  %v13397_v48 = vpop.f32.mrb[42].mxu1 }
 0xc75   : > { %v7388_v31 = vpop.f32.mrb[43].mxu1  ;;  %v17723_v37 = vadd.f32 %v7394_v22, %v19775_v38  ;;  %v7397_v36 = vadd.f32 %v13397_v48, %v12868_v3 }
 0xc76   : > { %v17720_v53 = vadd.f32 %v7386_v33, %v19774_v50  ;;  %v7389_v34 = vadd.f32 %v12868_v3, %v7388_v31 }
 0xc77   : > { %v17733_v14 = vadd.f32 %v7397_v36, %v19777_v41  ;;  %v7430_v2 = vsel %vm882_vm1, %v17723_v37, 0.0 }
 0xc78   : > { %v17726_v44 = vadd.f32 %v7389_v34, %v19776_v0  ;;  %v7424_v17 = vsel %vm882_vm1, %v17720_v53, 0.0 }
 0xc79   : > { %7425 = vadd.xlane.f32.xlu0 %v7424_v17  ;;  %v7433_v40 = vsel %vm882_vm1, %v17733_v14, 0.0 }
 0xc7a   : > { %v7427_v57 = vsel %vm882_vm1, %v17726_v44, 0.0 }
 0xc7b   : > { %7428 = vadd.xlane.f32.xlu1 %v7427_v57 }
 0xc7d   : > { %v13400_v18 = vpop.f32.mrb[44].mxu1  ;;  %7431 = vadd.xlane.f32.xlu0 %v7430_v2 }
 0xc7e   : > { %v7401_v35 = vpop.f32.mrb[45].mxu1  ;;  %v7410_v32 = vadd.f32 %v13400_v18, %v12868_v3 }
 0xc7f   : > { %v7402_v10 = vadd.f32 %v12868_v3, %v7401_v35  ;;  %v13401_v43 = vpop.f32.mrb[46].mxu1 }
 0xc80   : > { %v7404_v63 = vpop.f32.mrb[47].mxu1  ;;  %v7413_v62 = vadd.f32 %v13401_v43, %v12868_v3  ;;  %v17743_v23 = vadd.f32 %v7410_v32, %v19779_v1  ;;  %v13922_v1 = vld [vmem:[%s19783_s30 + $0x10] sm:$0xff]  }
 0xc81   : > { %v17738_v12 = vadd.f32 %v7402_v10, %v19778_v47  ;;  %v7405_v29 = vadd.f32 %v12868_v3, %v7404_v63  ;;  %7434 = vadd.xlane.f32.xlu0 %v7433_v40  ;;  %v13921_v40 = vld [vmem:[%s19783_s30 + $0x8] sm:$0xff]  }
 0xc82   : > { %v17753_v45 = vadd.f32 %v7413_v62, %v19781_v6  ;;  %v7442_v16 = vsel %vm882_vm1, %v17743_v23, 0.0  ;;  %v13920_v62 = vld [vmem:[%s19783_s30] sm:$0xff]  }
 0xc83   : > { %v17746_v26 = vadd.f32 %v7405_v29, %v19780_v11  ;;  %v7436_v28 = vsel %vm882_vm1, %v17738_v12, 0.0  ;;  %13402 = vmatprep.subr.bf16.mxu0 %v13920_v62  ;;  %v13923_v11 = vld [vmem:[%s19783_s30 + $0x18] sm:$0xff]  }
 0xc84   : > { %7437 = vadd.xlane.f32.xlu1 %v7436_v28  ;;  %19782 = vst [vmem:[#allocation67_spill] sm:$0xff] %v17753_v45  ;;  %v7445_v52 = vsel %vm882_vm1, %v17753_v45, 0.0  ;;  %13403 = vmatpush3.bf16.msra.mxu0 %v13920_v62 }
 0xc85   : > { %v7439_v15 = vsel %vm882_vm1, %v17746_v26, 0.0  ;;  %13404 = vmatprep.subr.bf16.mxu0 %v13921_v40  ;;  %v17824_v28 = vpop.f32.mrb[48].mxu1 }
 0xc86   : > { %7440 = vadd.xlane.f32.xlu0 %v7439_v15  ;;  %v13428_v15 = vpop.f32.mrb[49].mxu1 }
 0xc87   : > { %v7720_v6 = vpop.f32.mrb[50].mxu1 }
 0xc88   : > { %7443 = vadd.xlane.f32.xlu1 %v7442_v16  ;;  %13405 = vmatpush3.bf16.msra.mxu0 %v13921_v40  ;;  %v13429_v16 = vpop.f32.mrb[51].mxu1 }
 0xc89   : > { %13406 = vmatprep.subr.bf16.mxu0 %v13922_v1 }
 0xc8a   : > { %7446 = vadd.xlane.f32.xlu0 %v7445_v52 }
 0xc8c   : > { %13407 = vmatpush3.bf16.msra.mxu0 %v13922_v1 }
 0xc8d   : > { %13408 = vmatprep.subr.bf16.mxu0 %v13923_v11 }
 0xc90   : > { %13409 = vmatpush3.bf16.msra.mxu0 %v13923_v11 }
 0xd06   : > { %v7426_v54 = vpop.xlane.xlu0 %7425 }
 0xd07   : > { %v7448_v61 = vmul.f32 0.015625, %v7426_v54 }
 0xd08   : > { %v7429_v56 = vpop.xlane.xlu1 %7428 }
 0xd09   : > { %v17765_v9 = vsub.f32 %v17720_v53, %v7448_v61  ;;  %v7449_v25 = vmul.f32 0.015625, %v7429_v56 }
 0xd0a   : > { %v7432_v5 = vpop.xlane.xlu0 %7431 }
 0xd0b   : > { %v17768_v20 = vsub.f32 %v17726_v44, %v7449_v25  ;;  %v7450_v8 = vmul.f32 0.015625, %v7432_v5  ;;  %v7464_v19 = vmul.f32 %v17765_v9, %v17765_v9 }
 0xd0d   : > { %v17773_v59 = vsub.f32 %v17723_v37, %v7450_v8  ;;  %v7472_v42 = vsel %vm882_vm1, %v7464_v19, 0.0  ;;  %v7465_v24 = vmul.f32 %v17768_v20, %v17768_v20 }
 0xd0e   : > { %7473 = vadd.xlane.f32.xlu1 %v7472_v42  ;;  %v7435_v30 = vpop.xlane.xlu0 %7434 }
 0xd0f   : > { %v7451_v7 = vmul.f32 0.015625, %v7435_v30  ;;  %v7475_v27 = vsel %vm882_vm1, %v7465_v24, 0.0  ;;  %v7466_v3 = vmul.f32 %v17773_v59, %v17773_v59 }
 0xd10   : > { %7476 = vadd.xlane.f32.xlu0 %v7475_v27 }
 0xd11   : > { %v7438_v60 = vpop.xlane.xlu1 %7437  ;;  %v17782_v4 = vsub.f32 %v17733_v14, %v7451_v7  ;;  %v7478_v22 = vsel %vm882_vm1, %v7466_v3, 0.0 }
 0xd12   : > { %v7452_v51 = vmul.f32 0.015625, %v7438_v60  ;;  %7479 = vadd.xlane.f32.xlu1 %v7478_v22 }
 0xd13   : > { %v7441_v48 = vpop.xlane.xlu0 %7440  ;;  %v7467_v34 = vmul.f32 %v17782_v4, %v17782_v4 }
 0xd14   : > { %v17786_v33 = vsub.f32 %v17738_v12, %v7452_v51  ;;  %v7453_v31 = vmul.f32 0.015625, %v7441_v48 }
 0xd15   : > { %v7444_v50 = vpop.xlane.xlu1 %7443  ;;  %v7481_v17 = vsel %vm882_vm1, %v7467_v34, 0.0 }
 0xd16   : > { %v7454_v38 = vmul.f32 0.015625, %v7444_v50  ;;  %v7468_v36 = vmul.f32 %v17786_v33, %v17786_v33  ;;  %v17793_v0 = vsub.f32 %v17746_v26, %v7453_v31  ;;  %7482 = vadd.xlane.f32.xlu0 %v7481_v17 }
 0xd17   : > { %v7447_v18 = vpop.xlane.xlu0 %7446 }
 0xd18   : > { %v17797_v57 = vsub.f32 %v17743_v23, %v7454_v38  ;;  %v7484_v41 = vsel %vm882_vm1, %v7468_v36, 0.0  ;;  %v7455_v2 = vmul.f32 0.015625, %v7447_v18  ;;  %v7469_v35 = vmul.f32 %v17793_v0, %v17793_v0 }
 0xd19   : > { %7485 = vadd.xlane.f32.xlu1 %v7484_v41 }
 0xd1a   : > { %v7470_v32 = vmul.f32 %v17797_v57, %v17797_v57  ;;  %v17805_v10 = vsub.f32 %v17753_v45, %v7455_v2  ;;  %v7487_v43 = vsel %vm882_vm1, %v7469_v35, 0.0 }
 0xd1b   : > { %7488 = vadd.xlane.f32.xlu0 %v7487_v43 }
 0xd1c   : > { %v7490_v63 = vsel %vm882_vm1, %v7470_v32, 0.0  ;;  %v7471_v47 = vmul.f32 %v17805_v10, %v17805_v10 }
 0xd1d   : > { %7491 = vadd.xlane.f32.xlu1 %v7490_v63 }
 0xd1e   : > { %v7493_v29 = vsel %vm882_vm1, %v7471_v47, 0.0 }
 0xd1f   : > { %7494 = vadd.xlane.f32.xlu0 %v7493_v29 }
 0xd2e   : > { %8916 = vrot.lane.b32.xlu1 %v17824_v28, %s14825_s7 }
 0xd32   : > { %8922 = vrot.lane.b32.xlu1 %v17824_v28, %s14827_s1 }
 0xd35   : > { %8919 = vrot.lane.b32.xlu0 %v17824_v28, %s14826_s8 }
 0xd9b   : > { %v7474_v52 = vpop.xlane.xlu1 %7473 }
 0xd9c   : > { %v7496_v58 = vmul.f32 0.015625, %v7474_v52 }
 0xd9d   : > { %v7477_v21 = vpop.xlane.xlu0 %7476 }
 0xd9e   : > { %v7504_v46 = vadd.f32 1e-05, %v7496_v58  ;;  %v7497_v49 = vmul.f32 0.015625, %v7477_v21 }
 0xd9f   : > { %v7480_v13 = vpop.xlane.xlu1 %7479 }
 0xda0   : > { %14118 = vrsqrt.f32 %v7504_v46  ;;  %v7505_v54 = vadd.f32 1e-05, %v7497_v49  ;;  %v7498_v61 = vmul.f32 0.015625, %v7480_v13 }
 0xda2   : > { %14120 = vrsqrt.f32 %v7505_v54  ;;  %v7506_v56 = vadd.f32 1e-05, %v7498_v61 }
 0xda3   : > { %v7483_v25 = vpop.xlane.xlu0 %7482 }
 0xda4   : > { %v7499_v5 = vmul.f32 0.015625, %v7483_v25  ;;  %14122 = vrsqrt.f32 %v7506_v56 }
 0xda6   : > { %v7486_v8 = vpop.xlane.xlu1 %7485  ;;  %v7507_v42 = vadd.f32 1e-05, %v7499_v5 }
 0xda7   : > { %v7500_v19 = vmul.f32 0.015625, %v7486_v8 }
 0xda8   : > { %v7489_v30 = vpop.xlane.xlu0 %7488  ;;  %14124 = vrsqrt.f32 %v7507_v42 }
 0xda9   : > { %v7508_v24 = vadd.f32 1e-05, %v7500_v19  ;;  %v7501_v7 = vmul.f32 0.015625, %v7489_v30 }
 0xdaa   : > { %v7492_v27 = vpop.xlane.xlu1 %7491  ;;  %v14119_v3 = vpop.eup %14118 }
 0xdab   : > { %v7502_v60 = vmul.f32 0.015625, %v7492_v27  ;;  %14126 = vrsqrt.f32 %v7508_v24  ;;  %v7509_v51 = vadd.f32 1e-05, %v7501_v7  ;;  %v7520_v34 = vmul.f32 %v14119_v3, %v17765_v9 }
 0xdac   : > { %v7495_v48 = vpop.xlane.xlu0 %7494  ;;  %v14121_v31 = vpop.eup %14120 }
 0xdad   : > { %v7510_v22 = vadd.f32 1e-05, %v7502_v60  ;;  %14128 = vrsqrt.f32 %v7509_v51  ;;  %v7503_v50 = vmul.f32 0.015625, %v7495_v48  ;;  %v7521_v38 = vmul.f32 %v14121_v31, %v17768_v20 }
 0xdae   : > { %v14123_v18 = vpop.eup %14122 }
 0xdaf   : > { %14130 = vrsqrt.f32 %v7510_v22  ;;  %v7511_v36 = vadd.f32 1e-05, %v7503_v50  ;;  %v7528_v17 = vpack.c.bf16 %v7521_v38, %v7520_v34  ;;  %v7522_v2 = vmul.f32 %v14123_v18, %v17773_v59 }
 0xdb0   : > { %v17848_v15 = vpop.permute.xlu0 %8919 }
 0xdb1   : > { %14132 = vrsqrt.f32 %v7511_v36  ;;  %13410 = vmatprep.mubr.msk.bf16.mxu0 %vm882_vm1, %v7528_v17 }
 0xdb2   : > { %v14125_v41 = vpop.eup %14124 }
 0xdb3   : > { %v7523_v35 = vmul.f32 %v14125_v41, %v17782_v4  ;;  %v17844_v4 = vpop.permute.xlu1 %8916 }
 0xdb5   : > { %v14127_v32 = vpop.eup %14126  ;;  %v7529_v43 = vpack.c.bf16 %v7523_v35, %v7522_v2 }
 0xdb6   : > { %v7524_v9 = vmul.f32 %v14127_v32, %v17786_v33 }
 0xdb7   : > { %v14129_v63 = vpop.eup %14128  ;;  %13411 = vmatmul.mubr.msk.bf16.vlgmr.msra.gmra.mrb[52].mxu0 %vm882_vm1, %v7529_v43  ;;  %v17846_v11 = vpop.permute.xlu1 %8922 }
 0xdb8   : > { %v7525_v20 = vmul.f32 %v14129_v63, %v17793_v0  ;;  %v8941_v33 = vcombine.low %v17844_v4, %v17846_v11  ;;  %v8942_v0 = vcombine.high %v17844_v4, %v17846_v11 }
 0xdb9   : > { %v14131_v47 = vpop.eup %14130 }
 0xdba   : > { %v7530_v29 = vpack.c.bf16 %v7525_v20, %v7524_v9  ;;  %v7526_v40 = vmul.f32 %v14131_v47, %v17797_v57  ;;  %v8925_v57 = vcombine.low %v17824_v28, %v17848_v15  ;;  %v8949_v6 = vrot.slane %v8941_v33, %v15725_v55  ;;  %v12877_v9 = vld [vmem:[#allocation14] ss:$0 sm:$0xff] }
 0xdbb   : > { %v14133_v62 = vpop.eup %14132  ;;  %v8956_v16 = vrot.slane %v8942_v0, %v15725_v55 }
 0xdbc   : > { %13414 = vmatprep.mubr.msk.bf16.mxu0 %vm882_vm1, %v7530_v29  ;;  %v7527_v59 = vmul.f32 %v14133_v62, %v17805_v10  ;;  %v8926_v10 = vcombine.high %v17824_v28, %v17848_v15  ;;  %v8933_v52 = vrot.slane %v8925_v57, %v15725_v55 }
 0xdbe   : > { %v7531_v1 = vpack.c.bf16 %v7527_v59, %v7526_v40  ;;  %v8940_v58 = vrot.slane %v8926_v10, %v15725_v55  ;;  %v8957_v21 = vcombine.low %v8933_v52, %v8949_v6  ;;  %v8958_v46 = vcombine.high %v8933_v52, %v8949_v6 }
 0xdc0   : > { %13415 = vmatmul.mubr.msk.bf16.gmra.mrb[56].mxu0 %vm882_vm1, %v7531_v1  ;;  %v8973_v49 = vcombine.low %v8940_v58, %v8956_v16  ;;  %v8974_v13 = vcombine.high %v8940_v58, %v8956_v16  ;;  %v8965_v54 = vrot.slane %v8957_v21, %v15732_v39  ;;  %v8972_v61 = vrot.slane %v8958_v46, %v15732_v39 }
 0xdc2   : > { %v8981_v56 = vrot.slane %v8973_v49, %v15732_v39  ;;  %v8988_v25 = vrot.slane %v8974_v13, %v15732_v39  ;;  %v8993_v5 = vcombine.low %v8965_v54, %v8972_v61  ;;  %v12907_v8 = vcombine.high %v8965_v54, %v8972_v61 }
 0xdc4   : > { %v9009_v19 = vcombine.low %v8981_v56, %v8988_v25  ;;  %v12908_v42 = vcombine.high %v8981_v56, %v8988_v25  ;;  %v9000_v24 = vrot.slane %v8993_v5, %v15725_v55  ;;  %v9008_v30 = vrot.slane %v12907_v8, %v15725_v55 }
 0xdc6   : > { %v9016_v7 = vrot.slane %v9009_v19, %v15725_v55  ;;  %v9024_v27 = vrot.slane %v12908_v42, %v15725_v55  ;;  %v9025_v60 = vcombine.low %v9000_v24, %v9008_v30  ;;  %v9026_v51 = vcombine.high %v9000_v24, %v9008_v30 }
 0xdc8   : > { %v9041_v3 = vcombine.low %v9016_v7, %v9024_v27  ;;  %v9042_v22 = vcombine.high %v9016_v7, %v9024_v27  ;;  %v9033_v48 = vrot.slane %v9025_v60, %v15732_v39  ;;  %v9040_v50 = vrot.slane %v9026_v51, %v15732_v39 }
 0xdca   : > { %v9049_v31 = vrot.slane %v9041_v3, %v15732_v39  ;;  %v9056_v34 = vrot.slane %v9042_v22, %v15732_v39 }
 0xdcc   : > { %v9057_v38 = vcombine.low %v9033_v48, %v9049_v31  ;;  %v9058_v36 = vcombine.high %v9033_v48, %v9049_v31  ;;  %v9059_v17 = vcombine.low %v9040_v50, %v9056_v34  ;;  %v9060_v18 = vcombine.high %v9040_v50, %v9056_v34 }
 0xdce   : > { %v9061_v41 = vpack.c.bf16 %v9057_v38, %v9057_v38  ;;  %v9062_v2 = vpack.c.bf16 %v9058_v36, %v9058_v36  ;;  %v17874_v35 = vpack.c.bf16 %v9059_v17, %v9059_v17  ;;  %v17876_v32 = vpack.c.bf16 %v9060_v18, %v9060_v18 }
 0xdd0   : > { %13570 = vmatprep.subr.msk.bf16.mxu1 %vm5053_vm3, %v9061_v41  ;;  %13571 = vmatprep.subr.msk.bf16.mxu0 %vm5053_vm3, %v9062_v2  ;;  %v9230_v43 = vsel %vm5053_vm3, %v9061_v41, 0  ;;  %v9310_v63 = vsel %vm5053_vm3, %v9062_v2, 0 }
 0xdd1   : > { %13431 = vmatpush3.bf16.xpose.msra.mxu1 %v9230_v43  ;;  %13441 = vmatpush3.bf16.xpose.msra.mxu0 %v9310_v63 }
 0xdd2   : > { %13572 = vmatprep.subr.msk.bf16.mxu1 %vm5053_vm3, %v17874_v35  ;;  %13573 = vmatprep.subr.msk.bf16.mxu0 %vm5053_vm3, %v17876_v32 }
 0xe8a   : > { %v13412_v20 = vpop.f32.mrb[52].mxu0 }
 0xe8b   : > { %v7626_v47 = vadd.f32 %v13412_v20, %v12877_v9  ;;  %v7617_v29 = vpop.f32.mrb[53].mxu0 }
 0xe8c   : > { %v13413_v62 = vpop.f32.mrb[54].mxu0  ;;  %v7618_v6 = vadd.f32 %v12877_v9, %v7617_v29 }
 0xe8d   : > { %v7725_v40 = vmul.f32 0.25, %v7626_v47  ;;  %v7629_v59 = vadd.f32 %v13413_v62, %v12877_v9  ;;  %v7620_v1 = vpop.f32.mrb[55].mxu0 }
 0xe8e   : > { %v7621_v52 = vadd.f32 %v12877_v9, %v7620_v1  ;;  %v17895_v58 = vmul.f32 0.25, %v7618_v6 }
 0xe8f   : > { %v17886_v33 = vmul.f32 0.25, %v7629_v59  ;;  %7743 = vrot.lane.b32.xlu1 %v7725_v40, %s14825_s7 }
 0xe90   : > { %v17899_v21 = vmul.f32 0.25, %v7621_v52 }
 0xe91   : > { %7745 = vrot.lane.b32.xlu0 %v17886_v33, %s14825_s7 }
 0xe93   : > { %v13416_v0 = vpop.f32.mrb[56].mxu0  ;;  %7767 = vrot.lane.b32.xlu1 %v7725_v40, %s14826_s8 }
 0xe94   : > { %v7633_v57 = vpop.f32.mrb[57].mxu0  ;;  %v7642_v46 = vadd.f32 %v13416_v0, %v12877_v9 }
 0xe95   : > { %v13417_v10 = vpop.f32.mrb[58].mxu0  ;;  %7769 = vrot.lane.b32.xlu0 %v17886_v33, %s14826_s8  ;;  %v7634_v61 = vadd.f32 %v12877_v9, %v7633_v57 }
 0xe96   : > { %v7636_v16 = vpop.f32.mrb[59].mxu0  ;;  %v7645_v49 = vadd.f32 %v13417_v10, %v12877_v9  ;;  %v17911_v13 = vmul.f32 0.25, %v7642_v46 }
 0xe97   : > { %7791 = vrot.lane.b32.xlu1 %v7725_v40, %s14827_s1  ;;  %v7637_v56 = vadd.f32 %v12877_v9, %v7636_v16  ;;  %v17923_v25 = vmul.f32 0.25, %v7634_v61 }
 0xe98   : > { %v17915_v54 = vmul.f32 0.25, %v7645_v49 }
 0xe99   : > { %7793 = vrot.lane.b32.xlu0 %v17886_v33, %s14827_s1  ;;  %v17927_v5 = vmul.f32 0.25, %v7637_v56 }
 0xe9b   : > { %7739 = vrot.lane.b32.xlu1 %v17895_v58, %s14825_s7 }
 0xe9d   : > { %7741 = vrot.lane.b32.xlu0 %v17899_v21, %s14825_s7 }
 0xe9f   : > { %7763 = vrot.lane.b32.xlu1 %v17895_v58, %s14826_s8 }
 0xea1   : > { %7765 = vrot.lane.b32.xlu0 %v17899_v21, %s14826_s8 }
 0xea3   : > { %7787 = vrot.lane.b32.xlu1 %v17895_v58, %s14827_s1 }
 0xea5   : > { %7789 = vrot.lane.b32.xlu0 %v17899_v21, %s14827_s1 }
 0xea7   : > { %7751 = vrot.lane.b32.xlu1 %v17911_v13, %s14825_s7 }
 0xea9   : > { %7753 = vrot.lane.b32.xlu0 %v17915_v54, %s14825_s7 }
 0xeab   : > { %7775 = vrot.lane.b32.xlu1 %v17911_v13, %s14826_s8 }
 0xead   : > { %7777 = vrot.lane.b32.xlu0 %v17915_v54, %s14826_s8 }
 0xeaf   : > { %7747 = vrot.lane.b32.xlu1 %v17923_v25, %s14825_s7 }
 0xeb1   : > { %7749 = vrot.lane.b32.xlu0 %v17927_v5, %s14825_s7  ;;  %s19791_s7 = smov 32  }
 0xeb3   : > { %7771 = vrot.lane.b32.xlu1 %v17923_v25, %s14826_s8 }
 0xeb5   : > { %7773 = vrot.lane.b32.xlu0 %v17927_v5, %s14826_s8  ;;  %s19792_s8 = smov 16  }
 0xeb7   : > { %7795 = vrot.lane.b32.xlu1 %v17923_v25, %s14827_s1 }
 0xeb9   : > { %7797 = vrot.lane.b32.xlu0 %v17927_v5, %s14827_s1 }
 0xebb   : > { %7799 = vrot.lane.b32.xlu1 %v17911_v13, %s14827_s1 }
 0xebd   : > { %7801 = vrot.lane.b32.xlu0 %v17915_v54, %s14827_s1  ;;  %s19793_s1 = smov 48  }
 0xebf   : > { %9067 = vrot.lane.b32.xlu1 %v17844_v4, %s19784_s6 }
 0xec1   : > { %9065 = vrot.lane.b32.xlu0 %v17824_v28, %s19784_s6 }
 0xf01   : > { %v7744_v8 = vpop.permute.xlu1 %7743 }
 0xf03   : > { %v7746_v19 = vpop.permute.xlu0 %7745 }
 0xf05   : > { %v7768_v42 = vpop.permute.xlu1 %7767 }
 0xf06   : > { %v7947_v24 = vcombine.low %v7725_v40, %v7768_v42  ;;  %v7948_v30 = vcombine.high %v7725_v40, %v7768_v42 }
 0xf07   : > { %v7770_v7 = vpop.permute.xlu0 %7769 }
 0xf08   : > { %v7955_v51 = vrot.slane %v7947_v24, %v15725_v55  ;;  %v7962_v22 = vrot.slane %v7948_v30, %v15725_v55  ;;  %v8015_v48 = vcombine.low %v17886_v33, %v7770_v7  ;;  %v8016_v4 = vcombine.high %v17886_v33, %v7770_v7 }
 0xf09   : > { %v7792_v27 = vpop.permute.xlu1 %7791 }
 0xf0a   : > { %v7963_v60 = vcombine.low %v7744_v8, %v7792_v27  ;;  %v7964_v3 = vcombine.high %v7744_v8, %v7792_v27  ;;  %v8023_v43 = vrot.slane %v8015_v48, %v15725_v55  ;;  %v8030_v63 = vrot.slane %v8016_v4, %v15725_v55 }
 0xf0b   : > { %v7794_v31 = vpop.permute.xlu0 %7793 }
 0xf0c   : > { %v7971_v28 = vrot.slane %v7963_v60, %v15725_v55  ;;  %v7978_v50 = vrot.slane %v7964_v3, %v15725_v55  ;;  %v8031_v34 = vcombine.low %v7746_v19, %v7794_v31  ;;  %v8032_v38 = vcombine.high %v7746_v19, %v7794_v31 }
 0xf0d   : > { %v17955_v36 = vpop.permute.xlu1 %7739 }
 0xf0e   : > { %v7979_v17 = vcombine.low %v7955_v51, %v7971_v28  ;;  %v7980_v18 = vcombine.high %v7955_v51, %v7971_v28  ;;  %v7995_v41 = vcombine.low %v7962_v22, %v7978_v50  ;;  %v7996_v2 = vcombine.high %v7962_v22, %v7978_v50 }
 0xf0f   : > { %v8039_v9 = vrot.slane %v8031_v34, %v15725_v55  ;;  %v8046_v20 = vrot.slane %v8032_v38, %v15725_v55  ;;  %v7742_v47 = vpop.permute.xlu0 %7741 }
 0xf10   : > { %v7987_v29 = vrot.slane %v7979_v17, %v15732_v39  ;;  %v7994_v62 = vrot.slane %v7980_v18, %v15732_v39  ;;  %v8003_v40 = vrot.slane %v7995_v41, %v15732_v39  ;;  %v8010_v59 = vrot.slane %v7996_v2, %v15732_v39 }
 0xf11   : > { %v8047_v1 = vcombine.low %v8023_v43, %v8039_v9  ;;  %v8048_v33 = vcombine.high %v8023_v43, %v8039_v9  ;;  %v8063_v0 = vcombine.low %v8030_v63, %v8046_v20  ;;  %v8064_v57 = vcombine.high %v8030_v63, %v8046_v20  ;;  %v7764_v10 = vpop.permute.xlu1 %7763 }
 0xf12   : > { %v8491_v6 = vcombine.low %v7987_v29, %v7994_v62  ;;  %v12895_v16 = vcombine.high %v7987_v29, %v7994_v62  ;;  %v8507_v52 = vcombine.low %v8003_v40, %v8010_v59  ;;  %v12896_v46 = vcombine.high %v8003_v40, %v8010_v59 }
 0xf13   : > { %v8055_v49 = vrot.slane %v8047_v1, %v15732_v39  ;;  %v8062_v61 = vrot.slane %v8048_v33, %v15732_v39  ;;  %v8071_v56 = vrot.slane %v8063_v0, %v15732_v39  ;;  %v8078_v8 = vrot.slane %v8064_v57, %v15732_v39  ;;  %v7766_v19 = vpop.permute.xlu0 %7765 }
 0xf14   : > { %v17970_v42 = vrot.slane %v8491_v6, %v15725_v55  ;;  %v17973_v24 = vrot.slane %v12895_v16, %v15725_v55  ;;  %v17976_v30 = vrot.slane %v8507_v52, %v15725_v55  ;;  %v17979_v7 = vrot.slane %v12896_v46, %v15725_v55 }
 0xf15   : > { %v8559_v27 = vcombine.low %v8055_v49, %v8062_v61  ;;  %v12897_v60 = vcombine.high %v8055_v49, %v8062_v61  ;;  %v8575_v3 = vcombine.low %v8071_v56, %v8078_v8  ;;  %v12898_v51 = vcombine.high %v8071_v56, %v8078_v8  ;;  %v7788_v22 = vpop.permute.xlu1 %7787 }
 0xf16   : > { %v8523_v34 = vcombine.low %v17970_v42, %v17973_v24  ;;  %v7811_v38 = vcombine.low %v17895_v58, %v7764_v10  ;;  %v7812_v17 = vcombine.high %v17895_v58, %v7764_v10  ;;  %v8539_v41 = vcombine.low %v17976_v30, %v17979_v7 }
 0xf17   : > { %v17982_v48 = vrot.slane %v8559_v27, %v15725_v55  ;;  %v17985_v4 = vrot.slane %v12897_v60, %v15725_v55  ;;  %v17988_v31 = vrot.slane %v8575_v3, %v15725_v55  ;;  %v17991_v28 = vrot.slane %v12898_v51, %v15725_v55  ;;  %v7790_v50 = vpop.permute.xlu0 %7789 }
 0xf18   : > { %v7879_v20 = vcombine.low %v17899_v21, %v7766_v19  ;;  %v7880_v29 = vcombine.high %v17899_v21, %v7766_v19  ;;  %v7819_v62 = vrot.slane %v7811_v38, %v15725_v55  ;;  %v7826_v40 = vrot.slane %v7812_v17, %v15725_v55 }
 0xf19   : > { %v18005_v63 = vpop.permute.xlu1 %7751  ;;  %v7827_v59 = vcombine.low %v17955_v36, %v7788_v22  ;;  %v7828_v1 = vcombine.high %v17955_v36, %v7788_v22  ;;  %v7895_v10 = vcombine.low %v7742_v47, %v7790_v50  ;;  %v7896_v6 = vcombine.high %v7742_v47, %v7790_v50 }
 0xf1a   : > { %v7887_v0 = vrot.slane %v7879_v20, %v15725_v55  ;;  %v7894_v57 = vrot.slane %v7880_v29, %v15725_v55  ;;  %v18024_v46 = vrot.slane %v8523_v34, %v15732_v39  ;;  %v18027_v49 = vrot.slane %v8539_v41, %v15732_v39 }
 0xf1b   : > { %v18017_v33 = vpop.permute.xlu0 %7753  ;;  %v7835_v16 = vrot.slane %v7827_v59, %v15725_v55  ;;  %v7842_v21 = vrot.slane %v7828_v1, %v15725_v55  ;;  %v7903_v36 = vrot.slane %v7895_v10, %v15725_v55  ;;  %v7910_v61 = vrot.slane %v7896_v6, %v15725_v55 }
 0xf1d   : > { %v7776_v52 = vpop.permute.xlu1 %7775  ;;  %v7843_v47 = vcombine.low %v7819_v62, %v7835_v16  ;;  %v7844_v19 = vcombine.high %v7819_v62, %v7835_v16  ;;  %v7859_v27 = vcombine.low %v7826_v40, %v7842_v21  ;;  %v7860_v60 = vcombine.high %v7826_v40, %v7842_v21 }
 0xf1e   : > { %v8219_v56 = vcombine.low %v17911_v13, %v7776_v52  ;;  %v8220_v8 = vcombine.high %v17911_v13, %v7776_v52  ;;  %v7911_v51 = vcombine.low %v7887_v0, %v7903_v36  ;;  %v7912_v22 = vcombine.high %v7887_v0, %v7903_v36 }
 0xf1f   : > { %v7778_v3 = vpop.permute.xlu0 %7777  ;;  %v7927_v50 = vcombine.low %v7894_v57, %v7910_v61  ;;  %v7928_v34 = vcombine.high %v7894_v57, %v7910_v61  ;;  %v7851_v38 = vrot.slane %v7843_v47, %v15732_v39  ;;  %v7858_v17 = vrot.slane %v7844_v19, %v15732_v39 }
 0xf20   : > { %v7867_v41 = vrot.slane %v7859_v27, %v15732_v39  ;;  %v7874_v20 = vrot.slane %v7860_v60, %v15732_v39  ;;  %v7919_v13 = vrot.slane %v7911_v51, %v15732_v39  ;;  %v7926_v62 = vrot.slane %v7912_v22, %v15732_v39 }
 0xf21   : > { %v7748_v29 = vpop.permute.xlu1 %7747  ;;  %v7935_v40 = vrot.slane %v7927_v50, %v15732_v39  ;;  %v7942_v59 = vrot.slane %v7928_v34, %v15732_v39  ;;  %v8355_v1 = vcombine.low %v7851_v38, %v7858_v17  ;;  %v12891_v0 = vcombine.high %v7851_v38, %v7858_v17 }
 0xf22   : > { %v8371_v57 = vcombine.low %v7867_v41, %v7874_v20  ;;  %v12892_v10 = vcombine.high %v7867_v41, %v7874_v20  ;;  %v8423_v16 = vcombine.low %v7919_v13, %v7926_v62  ;;  %v12893_v21 = vcombine.high %v7919_v13, %v7926_v62 }
 0xf23   : > { %v7750_v6 = vpop.permute.xlu0 %7749  ;;  %v8439_v52 = vcombine.low %v7935_v40, %v7942_v59  ;;  %v12894_v36 = vcombine.high %v7935_v40, %v7942_v59  ;;  %v18042_v61 = vrot.slane %v8355_v1, %v15725_v55  ;;  %v18045_v47 = vrot.slane %v12891_v0, %v15725_v55 }
 0xf24   : > { %v18048_v19 = vrot.slane %v8371_v57, %v15725_v55  ;;  %v18051_v27 = vrot.slane %v12892_v10, %v15725_v55  ;;  %v18054_v51 = vrot.slane %v8423_v16, %v15725_v55  ;;  %v18057_v22 = vrot.slane %v12893_v21, %v15725_v55 }
 0xf25   : > { %v7772_v60 = vpop.permute.xlu1 %7771  ;;  %v18060_v50 = vrot.slane %v8439_v52, %v15725_v55  ;;  %v18063_v34 = vrot.slane %v12894_v36, %v15725_v55  ;;  %v18066_v38 = vrot.slane %v8219_v56, %v15725_v55  ;;  %v18069_v17 = vrot.slane %v8220_v8, %v15725_v55 }
 0xf26   : > { %v8287_v41 = vcombine.low %v17915_v54, %v7778_v3  ;;  %v8288_v20 = vcombine.high %v17915_v54, %v7778_v3  ;;  %v8083_v62 = vcombine.low %v17923_v25, %v7772_v60  ;;  %v8084_v40 = vcombine.high %v17923_v25, %v7772_v60 }
 0xf27   : > { %v7774_v13 = vpop.permute.xlu0 %7773  ;;  %v8387_v57 = vcombine.low %v18042_v61, %v18045_v47  ;;  %v8403_v54 = vcombine.low %v18048_v19, %v18051_v27 }
 0xf28   : > { %v8151_v59 = vcombine.low %v17927_v5, %v7774_v13  ;;  %v8152_v1 = vcombine.high %v17927_v5, %v7774_v13  ;;  %v18078_v0 = vrot.slane %v8287_v41, %v15725_v55  ;;  %v18081_v56 = vrot.slane %v8288_v20, %v15725_v55 }
 0xf29   : > { %v7796_v8 = vpop.permute.xlu1 %7795  ;;  %v8091_v3 = vrot.slane %v8083_v62, %v15725_v55  ;;  %v8098_v25 = vrot.slane %v8084_v40, %v15725_v55  ;;  %v8395_v36 = vrot.slane %v8387_v57, %v15732_v39  ;;  %v8411_v60 = vrot.slane %v8403_v54, %v15732_v39 }
 0xf2a   : > { %v8159_v10 = vrot.slane %v8151_v59, %v15725_v55  ;;  %v8166_v5 = vrot.slane %v8152_v1, %v15725_v55  ;;  %v8099_v16 = vcombine.low %v7748_v29, %v7796_v8  ;;  %v8100_v21 = vcombine.high %v7748_v29, %v7796_v8 }
 0xf2b   : > { %v7798_v52 = vpop.permute.xlu0 %7797  ;;  %v8455_v13 = vcombine.low %v18054_v51, %v18057_v22  ;;  %v8471_v62 = vcombine.low %v18060_v50, %v18063_v34  ;;  %v8419_v1 = vcombine.low %v8395_v36, %v8411_v60  ;;  %v8420_v9 = vcombine.high %v8395_v36, %v8411_v60 }
 0xf2c   : > { %v8167_v41 = vcombine.low %v7750_v6, %v7798_v52  ;;  %v8168_v20 = vcombine.high %v7750_v6, %v7798_v52  ;;  %v8107_v40 = vrot.slane %v8099_v16, %v15725_v55  ;;  %v8114_v59 = vrot.slane %v8100_v21, %v15725_v55 }
 0xf2d   : > { %v8463_v57 = vrot.slane %v8455_v13, %v15732_v39  ;;  %v8479_v6 = vrot.slane %v8471_v62, %v15732_v39 }
 0xf2e   : > { %v8175_v29 = vrot.slane %v8167_v41, %v15725_v55  ;;  %v8182_v8 = vrot.slane %v8168_v20, %v15725_v55  ;;  %v8115_v54 = vcombine.low %v8091_v3, %v8107_v40  ;;  %v8116_v52 = vcombine.high %v8091_v3, %v8107_v40 }
 0xf2f   : > { %v8131_v2 = vcombine.low %v8098_v25, %v8114_v59  ;;  %v8132_v18 = vcombine.high %v8098_v25, %v8114_v59 }
 0xf30   : > { %v8183_v58 = vcombine.low %v8159_v10, %v8175_v29  ;;  %v8184_v43 = vcombine.high %v8159_v10, %v8175_v29  ;;  %v8199_v45 = vcombine.low %v8166_v5, %v8182_v8  ;;  %v8200_v16 = vcombine.high %v8166_v5, %v8182_v8 }
 0xf31   : > { %v8123_v21 = vrot.slane %v8115_v54, %v15732_v39  ;;  %v8130_v36 = vrot.slane %v8116_v52, %v15732_v39  ;;  %v8139_v60 = vrot.slane %v8131_v2, %v15732_v39  ;;  %v8146_v41 = vrot.slane %v8132_v18, %v15732_v39  ;;  %v7800_v52 = vpop.permute.xlu1 %7799 }
 0xf32   : > { %v8191_v20 = vrot.slane %v8183_v58, %v15732_v39  ;;  %v8198_v13 = vrot.slane %v8184_v43, %v15732_v39  ;;  %v8207_v3 = vrot.slane %v8199_v45, %v15732_v39  ;;  %v8214_v25 = vrot.slane %v8200_v16, %v15732_v39 }
 0xf33   : > { %v8627_v62 = vcombine.low %v8123_v21, %v8130_v36  ;;  %v12899_v10 = vcombine.high %v8123_v21, %v8130_v36  ;;  %v8643_v40 = vcombine.low %v8139_v60, %v8146_v41  ;;  %v12900_v5 = vcombine.high %v8139_v60, %v8146_v41 }
 0xf34   : > { %v8695_v59 = vcombine.low %v8191_v20, %v8198_v13  ;;  %v12901_v29 = vcombine.high %v8191_v20, %v8198_v13  ;;  %v8711_v8 = vcombine.low %v8207_v3, %v8214_v25  ;;  %v12902_v54 = vcombine.high %v8207_v3, %v8214_v25  ;;  %v7802_v3 = vpop.permute.xlu0 %7801 }
 0xf35   : > { %v18112_v2 = vrot.slane %v8627_v62, %v15725_v55  ;;  %v18115_v18 = vrot.slane %v12899_v10, %v15725_v55  ;;  %v18118_v43 = vrot.slane %v8643_v40, %v15725_v55  ;;  %v18121_v45 = vrot.slane %v12900_v5, %v15725_v55 }
 0xf36   : > { %v18124_v58 = vrot.slane %v8695_v59, %v15725_v55  ;;  %v18127_v16 = vrot.slane %v12901_v29, %v15725_v55  ;;  %v18130_v21 = vrot.slane %v8711_v8, %v15725_v55  ;;  %v18133_v36 = vrot.slane %v12902_v54, %v15725_v55 }
 0xf37   : > { %v8487_v60 = vcombine.low %v8463_v57, %v8479_v6  ;;  %v8488_v41 = vcombine.high %v8463_v57, %v8479_v6  ;;  %v8235_v20 = vcombine.low %v18005_v63, %v7800_v52  ;;  %v8236_v13 = vcombine.high %v18005_v63, %v7800_v52 }
 0xf38   : > { %v8555_v25 = vcombine.low %v18024_v46, %v18027_v49  ;;  %v8556_v62 = vcombine.high %v18024_v46, %v18027_v49  ;;  %v19785_v10 = vcombine.low %v17982_v48, %v17985_v4  ;;  %v19786_v57 = vcombine.low %v17988_v31, %v17991_v28 }
 0xf39   : > { %v8899_v5 = vpack.c.bf16 %v8487_v60, %v8419_v1  ;;  %v8903_v59 = vpack.c.bf16 %v8488_v41, %v8420_v9  ;;  %v8243_v63 = vrot.slane %v8235_v20, %v15725_v55  ;;  %v8250_v29 = vrot.slane %v8236_v13, %v15725_v55 }
 0xf3a   : > { %v8599_v40 = vrot.slane %v19785_v10, %v15732_v39  ;;  %v8615_v6 = vrot.slane %v19786_v57, %v15732_v39  ;;  %v8303_v46 = vcombine.low %v18017_v33, %v7802_v3  ;;  %v8304_v49 = vcombine.high %v18017_v33, %v7802_v3 }
 0xf3b   : > { %13432 = vmatprep.mubr.msk.bf16.mxu1 %vm5053_vm3, %v8899_v5  ;;  %13442 = vmatprep.mubr.msk.bf16.mxu0 %vm5053_vm3, %v8903_v59  ;;  %v8251_v52 = vcombine.low %v18066_v38, %v8243_v63  ;;  %v8252_v10 = vcombine.high %v18066_v38, %v8243_v63  ;;  %v8267_v9 = vcombine.low %v18069_v17, %v8250_v29  ;;  %v9390_v1 = vsel %vm5053_vm3, %v17874_v35, 0 }
 0xf3c   : > { %v8623_v8 = vcombine.low %v8599_v40, %v8615_v6  ;;  %v8624_v54 = vcombine.high %v8599_v40, %v8615_v6  ;;  %v8268_v60 = vcombine.high %v18069_v17, %v8250_v29  ;;  %v8311_v13 = vrot.slane %v8303_v46, %v15725_v55 }
 0xf3d   : > { %v8259_v33 = vrot.slane %v8251_v52, %v15732_v39  ;;  %v8266_v3 = vrot.slane %v8252_v10, %v15732_v39  ;;  %v8275_v40 = vrot.slane %v8267_v9, %v15732_v39  ;;  %v8318_v57 = vrot.slane %v8304_v49, %v15725_v55 }
 0xf3e   : > { %v8900_v41 = vpack.c.bf16 %v8623_v8, %v8555_v25  ;;  %v8904_v20 = vpack.c.bf16 %v8624_v54, %v8556_v62  ;;  %v8282_v38 = vrot.slane %v8268_v60, %v15732_v39  ;;  %v9470_v35 = vsel %vm5053_vm3, %v17876_v32, 0 }
 0xf3f   : > { %v8319_v17 = vcombine.low %v18078_v0, %v8311_v13  ;;  %v8320_v25 = vcombine.high %v18078_v0, %v8311_v13  ;;  %v8763_v62 = vcombine.low %v8259_v33, %v8266_v3  ;;  %v12903_v6 = vcombine.high %v8259_v33, %v8266_v3 }
 0xf40   : > { %13433 = vmatmul.mubr.msk.bf16.vlgmr.msra.gmra.mrb[52].mxu1 %vm5053_vm3, %v8900_v41  ;;  %13443 = vmatmul.mubr.msk.bf16.vlgmr.msra.gmra.mrb[60].mxu0 %vm5053_vm3, %v8904_v20  ;;  %v8335_v5 = vcombine.low %v18081_v56, %v8318_v57  ;;  %v8779_v59 = vcombine.low %v8275_v40, %v8282_v38  ;;  %v12904_v63 = vcombine.high %v8275_v40, %v8282_v38 }
 0xf41   : > { %13451 = vmatpush3.bf16.xpose.msra.mxu1 %v9390_v1  ;;  %13461 = vmatpush3.bf16.xpose.msra.mxu0 %v9470_v35  ;;  %v8327_v29 = vrot.slane %v8319_v17, %v15732_v39  ;;  %v8334_v8 = vrot.slane %v8320_v25, %v15732_v39  ;;  %v18177_v54 = vrot.slane %v8763_v62, %v15725_v55 }
 0xf42   : > { %v18180_v32 = vrot.slane %v12903_v6, %v15725_v55  ;;  %v8336_v0 = vcombine.high %v18081_v56, %v8318_v57  ;;  %v8343_v46 = vrot.slane %v8335_v5, %v15732_v39  ;;  %v18185_v49 = vrot.slane %v8779_v59, %v15725_v55 }
 0xf43   : > { %v18188_v52 = vrot.slane %v12904_v63, %v15725_v55  ;;  %v8831_v10 = vcombine.low %v8327_v29, %v8334_v8  ;;  %v12905_v9 = vcombine.high %v8327_v29, %v8334_v8  ;;  %v8659_v60 = vcombine.low %v18112_v2, %v18115_v18 }
 0xf44   : > { %v8350_v1 = vrot.slane %v8336_v0, %v15732_v39  ;;  %v8675_v41 = vcombine.low %v18118_v43, %v18121_v45  ;;  %v8727_v56 = vcombine.low %v18124_v58, %v18127_v16  ;;  %v8743_v33 = vcombine.low %v18130_v21, %v18133_v36 }
 0xf45   : > { %v18198_v20 = vrot.slane %v8831_v10, %v15725_v55  ;;  %v18201_v13 = vrot.slane %v12905_v9, %v15725_v55  ;;  %v8795_v3 = vcombine.low %v18177_v54, %v18180_v32  ;;  %v8667_v38 = vrot.slane %v8659_v60, %v15732_v39 }
 0xf46   : > { %v8847_v40 = vcombine.low %v8343_v46, %v8350_v1  ;;  %v12906_v57 = vcombine.high %v8343_v46, %v8350_v1  ;;  %v8683_v35 = vrot.slane %v8675_v41, %v15732_v39  ;;  %v8735_v17 = vrot.slane %v8727_v56, %v15732_v39 }
 0xf47   : > { %v8751_v25 = vrot.slane %v8743_v33, %v15732_v39  ;;  %v8803_v62 = vrot.slane %v8795_v3, %v15732_v39  ;;  %v8811_v6 = vcombine.low %v18185_v49, %v18188_v52  ;;  %v8863_v10 = vcombine.low %v18198_v20, %v18201_v13 }
 0xf48   : > { %v18215_v5 = vrot.slane %v8847_v40, %v15725_v55  ;;  %v18218_v59 = vrot.slane %v12906_v57, %v15725_v55  ;;  %v8691_v63 = vcombine.low %v8667_v38, %v8683_v35  ;;  %v8692_v29 = vcombine.high %v8667_v38, %v8683_v35 }
 0xf49   : > { %v8759_v8 = vcombine.low %v8735_v17, %v8751_v25  ;;  %v8760_v0 = vcombine.high %v8735_v17, %v8751_v25  ;;  %v8819_v46 = vrot.slane %v8811_v6, %v15732_v39  ;;  %v8388_v1 = vcombine.high %v18042_v61, %v18045_v47 }
 0xf4a   : > { %v8879_v9 = vcombine.low %v18215_v5, %v18218_v59  ;;  %v8404_v60 = vcombine.high %v18048_v19, %v18051_v27  ;;  %v8456_v41 = vcombine.high %v18054_v51, %v18057_v22  ;;  %v8608_v56 = vcombine.high %v17988_v31, %v17991_v28 }
 0xf4b   : > { %v8901_v33 = vpack.c.bf16 %v8759_v8, %v8691_v63  ;;  %v8905_v3 = vpack.c.bf16 %v8760_v0, %v8692_v29  ;;  %v8871_v40 = vrot.slane %v8863_v10, %v15732_v39  ;;  %v19787_v57 = vcombine.high %v17970_v42, %v17973_v24 }
 0xf4c   : > { %v8887_v61 = vrot.slane %v8879_v9, %v15732_v39  ;;  %v8402_v47 = vrot.slane %v8388_v1, %v15732_v39  ;;  %v8418_v19 = vrot.slane %v8404_v60, %v15732_v39  ;;  %v8470_v31 = vrot.slane %v8456_v41, %v15732_v39 }
 0xf4d   : > { %v8538_v38 = vrot.slane %v19787_v57, %v15732_v39  ;;  %13436 = vmatprep.mubr.msk.bf16.mxu1 %vm5053_vm3, %v8901_v33  ;;  %13446 = vmatprep.mubr.msk.bf16.mxu0 %vm5053_vm3, %v8905_v3  ;;  %v8472_v28 = vcombine.high %v18060_v50, %v18063_v34  ;;  %v8827_v27 = vcombine.low %v8803_v62, %v8819_v46 }
 0xf4e   : > { %v8895_v51 = vcombine.low %v8871_v40, %v8887_v61  ;;  %v8828_v22 = vcombine.high %v8803_v62, %v8819_v46  ;;  %v8896_v42 = vcombine.high %v8871_v40, %v8887_v61  ;;  %v19788_v24 = vcombine.high %v17976_v30, %v17979_v7 }
 0xf4f   : > { %v19789_v17 = vcombine.high %v17982_v48, %v17985_v4  ;;  %v8622_v6 = vrot.slane %v8608_v56, %v15732_v39  ;;  %v8486_v63 = vrot.slane %v8472_v28, %v15732_v39  ;;  %v8660_v34 = vcombine.high %v18112_v2, %v18115_v18 }
 0xf50   : > { %v8554_v35 = vrot.slane %v19788_v24, %v15732_v39  ;;  %v8902_v29 = vpack.c.bf16 %v8895_v51, %v8827_v27  ;;  %v8906_v50 = vpack.c.bf16 %v8896_v42, %v8828_v22  ;;  %v8676_v62 = vcombine.high %v18118_v43, %v18121_v45 }
 0xf51   : > { %v8606_v25 = vrot.slane %v19789_v17, %v15732_v39  ;;  %v8421_v8 = vcombine.low %v8402_v47, %v8418_v19  ;;  %v8489_v30 = vcombine.low %v8470_v31, %v8486_v63  ;;  %v8422_v7 = vcombine.high %v8402_v47, %v8418_v19 }
 0xf52   : > { %v8490_v0 = vcombine.high %v8470_v31, %v8486_v63  ;;  %13437 = vmatmul.mubr.msk.bf16.gmra.mrb[56].mxu1 %vm5053_vm3, %v8902_v29  ;;  %13447 = vmatmul.mubr.msk.bf16.gmra.mrb[64].mxu0 %vm5053_vm3, %v8906_v50  ;;  %v8674_v48 = vrot.slane %v8660_v34, %v15732_v39  ;;  %v8728_v4 = vcombine.high %v18124_v58, %v18127_v16 }
 0xf53   : > { %v8907_v46 = vpack.c.bf16 %v8489_v30, %v8421_v8  ;;  %v8690_v2 = vrot.slane %v8676_v62, %v15732_v39  ;;  %v8744_v18 = vcombine.high %v18130_v21, %v18133_v36  ;;  %v8625_v43 = vcombine.low %v8606_v25, %v8622_v6 }
 0xf54   : > { %v8911_v10 = vpack.c.bf16 %v8490_v0, %v8422_v7  ;;  %v8626_v45 = vcombine.high %v8606_v25, %v8622_v6  ;;  %v8742_v9 = vrot.slane %v8728_v4, %v15732_v39  ;;  %v8557_v1 = vcombine.low %v8538_v38, %v8554_v35 }
 0xf55   : > { %13452 = vmatprep.mubr.msk.bf16.mxu1 %vm5053_vm3, %v8907_v46  ;;  %v8758_v60 = vrot.slane %v8744_v18, %v15732_v39  ;;  %v8864_v58 = vcombine.high %v18198_v20, %v18201_v13  ;;  %v8558_v16 = vcombine.high %v8538_v38, %v8554_v35  ;;  %v8796_v41 = vcombine.high %v18177_v54, %v18180_v32 }
 0xf56   : > { %13462 = vmatprep.mubr.msk.bf16.mxu0 %vm5053_vm3, %v8911_v10  ;;  %v8812_v21 = vcombine.high %v18185_v49, %v18188_v52  ;;  %v8880_v36 = vcombine.high %v18215_v5, %v18218_v59  ;;  %v8693_v56 = vcombine.low %v8674_v48, %v8690_v2  ;;  %v8694_v3 = vcombine.high %v8674_v48, %v8690_v2 }
 0xf57   : > { %v8761_v33 = vcombine.low %v8742_v9, %v8758_v60  ;;  %v8762_v40 = vcombine.high %v8742_v9, %v8758_v60  ;;  %v8908_v57 = vpack.c.bf16 %v8625_v43, %v8557_v1  ;;  %v8912_v61 = vpack.c.bf16 %v8626_v45, %v8558_v16 }
 0xf58   : > { %v8878_v47 = vrot.slane %v8864_v58, %v15732_v39  ;;  %v8894_v20 = vrot.slane %v8880_v36, %v15732_v39  ;;  %v8810_v54 = vrot.slane %v8796_v41, %v15732_v39  ;;  %v8826_v32 = vrot.slane %v8812_v21, %v15732_v39 }
 0xf59   : > { %v8909_v13 = vpack.c.bf16 %v8761_v33, %v8693_v56  ;;  %v8913_v38 = vpack.c.bf16 %v8762_v40, %v8694_v3 }
 0xf5a   : > { %13453 = vmatmul.mubr.msk.bf16.vlgmr.msra.gmra.mrb[60].mxu1 %vm5053_vm3, %v8908_v57  ;;  %13463 = vmatmul.mubr.msk.bf16.vlgmr.msra.gmra.mrb[68].mxu0 %vm5053_vm3, %v8912_v61  ;;  %v8897_v49 = vcombine.low %v8878_v47, %v8894_v20  ;;  %v8898_v52 = vcombine.high %v8878_v47, %v8894_v20  ;;  %v8829_v5 = vcombine.low %v8810_v54, %v8826_v32 }
 0xf5b   : > { %13456 = vmatprep.mubr.msk.bf16.mxu1 %vm5053_vm3, %v8909_v13  ;;  %13466 = vmatprep.mubr.msk.bf16.mxu0 %vm5053_vm3, %v8913_v38  ;;  %v8830_v59 = vcombine.high %v8810_v54, %v8826_v32 }
 0xf5c   : > { %v8910_v19 = vpack.c.bf16 %v8897_v49, %v8829_v5 }
 0xf5d   : > { %v8914_v31 = vpack.c.bf16 %v8898_v52, %v8830_v59 }
 0xf62   : > { %13457 = vmatmul.mubr.msk.bf16.gmra.mrb[64].mxu1 %vm5053_vm3, %v8910_v19  ;;  %13467 = vmatmul.mubr.msk.bf16.gmra.mrb[72].mxu0 %vm5053_vm3, %v8914_v31 }
0x1013   : > { %v18290_v28 = vpop.f32.mrb[52].mxu1  ;;  %v18292_v27 = vpop.f32.mrb[60].mxu0 }
0x1014   : > { %v18294_v51 = vpop.f32.mrb[53].mxu1  ;;  %v18296_v22 = vpop.f32.mrb[61].mxu0  ;;  %v9544_v42 = vsel %vm9537_vm6, %v18290_v28, -inf  ;;  %v9568_v63 = vsel %vm9537_vm6, %v18292_v27, -inf }
0x1015   : > { %v18300_v24 = vpop.f32.mrb[62].mxu0  ;;  %9545 = vmax.xlane.f32.xlu0 %v9544_v42  ;;  %v18302_v35 = vpop.f32.mrb[54].mxu1  ;;  %v9538_v17 = vsel %vm9537_vm6, %v18294_v51, -inf  ;;  %v9562_v50 = vsel %vm9537_vm6, %v18296_v22, -inf }
0x1016   : > { %v18306_v25 = vpop.f32.mrb[63].mxu0  ;;  %9539 = vmax.xlane.f32.xlu1 %v9538_v17  ;;  %v18308_v6 = vpop.f32.mrb[55].mxu1  ;;  %v9547_v29 = vsel %vm9537_vm6, %v18302_v35, -inf  ;;  %v9571_v34 = vsel %vm9537_vm6, %v18300_v24, -inf }
0x1017   : > { %v9541_v62 = vsel %vm9537_vm6, %v18308_v6, -inf  ;;  %v9565_v8 = vsel %vm9537_vm6, %v18306_v25, -inf }
0x1019   : > { %9569 = vmax.xlane.f32.xlu0 %v9568_v63 }
0x101a   : > { %9548 = vmax.xlane.f32.xlu1 %v9547_v29 }
0x101d   : > { %9563 = vmax.xlane.f32.xlu0 %v9562_v50 }
0x101e   : > { %9572 = vmax.xlane.f32.xlu1 %v9571_v34 }
0x1021   : > { %9542 = vmax.xlane.f32.xlu0 %v9541_v62 }
0x1022   : > { %9566 = vmax.xlane.f32.xlu1 %v9565_v8 }
0x1025   : > { %v18322_v30 = vpop.f32.mrb[56].mxu1  ;;  %v18324_v7 = vpop.f32.mrb[64].mxu0 }
0x1026   : > { %v18326_v0 = vpop.f32.mrb[57].mxu1  ;;  %v18328_v48 = vpop.f32.mrb[65].mxu0  ;;  %v9556_v4 = vsel %vm9537_vm6, %v18322_v30, -inf  ;;  %v9580_v45 = vsel %vm9537_vm6, %v18324_v7, -inf }
0x1027   : > { %v18332_v46 = vpop.f32.mrb[66].mxu0  ;;  %9557 = vmax.xlane.f32.xlu0 %v9556_v4  ;;  %v18334_v10 = vpop.f32.mrb[58].mxu1  ;;  %v9550_v41 = vsel %vm9537_vm6, %v18326_v0, -inf  ;;  %v9574_v40 = vsel %vm9537_vm6, %v18328_v48, -inf }
0x1028   : > { %v18336_v2 = vpop.f32.mrb[59].mxu1  ;;  %v18338_v18 = vpop.f32.mrb[67].mxu0  ;;  %v9559_v43 = vsel %vm9537_vm6, %v18334_v10, -inf  ;;  %v9583_v9 = vsel %vm9537_vm6, %v18332_v46, -inf }
0x1029   : > { %9560 = vmax.xlane.f32.xlu1 %v9559_v43  ;;  %v9553_v3 = vsel %vm9537_vm6, %v18336_v2, -inf  ;;  %v9577_v57 = vsel %vm9537_vm6, %v18338_v18, -inf }
0x102b   : > { %9581 = vmax.xlane.f32.xlu0 %v9580_v45 }
0x102d   : > { %v18346_v1 = vpop.f32.mrb[68].mxu0  ;;  %9584 = vmax.xlane.f32.xlu1 %v9583_v9  ;;  %v18348_v60 = vpop.f32.mrb[60].mxu1 }
0x102e   : > { %v18350_v58 = vpop.f32.mrb[61].mxu1  ;;  %v18352_v16 = vpop.f32.mrb[69].mxu0  ;;  %v9592_v38 = vsel %vm9537_vm6, %v18348_v60, -inf  ;;  %v9616_v59 = vsel %vm9537_vm6, %v18346_v1, -inf }
0x102f   : > { %v18356_v21 = vpop.f32.mrb[70].mxu0  ;;  %9551 = vmax.xlane.f32.xlu0 %v9550_v41  ;;  %v18358_v36 = vpop.f32.mrb[62].mxu1  ;;  %v9586_v31 = vsel %vm9537_vm6, %v18350_v58, -inf  ;;  %v9610_v17 = vsel %vm9537_vm6, %v18352_v16, -inf }
0x1030   : > { %v18360_v56 = vpop.f32.mrb[63].mxu1  ;;  %v18362_v33 = vpop.f32.mrb[71].mxu0  ;;  %v9595_v5 = vsel %vm9537_vm6, %v18358_v36, -inf  ;;  %v9619_v19 = vsel %vm9537_vm6, %v18356_v21, -inf }
0x1031   : > { %9554 = vmax.xlane.f32.xlu1 %v9553_v3  ;;  %v9589_v42 = vsel %vm9537_vm6, %v18360_v56, -inf  ;;  %v9613_v63 = vsel %vm9537_vm6, %v18362_v33, -inf  ;;  %v18422_v9 = vpop.permute.xlu0 %9065  ;;  %v18424_v41 = vpop.permute.xlu1 %9067 }
0x1033   : > { %9575 = vmax.xlane.f32.xlu0 %v9574_v40 }
0x1035   : > { %v18370_v61 = vpop.f32.mrb[72].mxu0  ;;  %9578 = vmax.xlane.f32.xlu1 %v9577_v57  ;;  %v18372_v47 = vpop.f32.mrb[64].mxu1 }
0x1036   : > { %v18374_v20 = vpop.f32.mrb[65].mxu1  ;;  %v18376_v13 = vpop.f32.mrb[73].mxu0  ;;  %v9604_v29 = vsel %vm9537_vm6, %v18372_v47, -inf  ;;  %v9628_v34 = vsel %vm9537_vm6, %v18370_v61, -inf }
0x1037   : > { %v18380_v54 = vpop.f32.mrb[74].mxu0  ;;  %9593 = vmax.xlane.f32.xlu0 %v9592_v38  ;;  %v18382_v32 = vpop.f32.mrb[66].mxu1  ;;  %v9598_v8 = vsel %vm9537_vm6, %v18374_v20, -inf  ;;  %v9622_v43 = vsel %vm9537_vm6, %v18376_v13, -inf }
0x1038   : > { %v18384_v49 = vpop.f32.mrb[67].mxu1  ;;  %v18386_v52 = vpop.f32.mrb[75].mxu0  ;;  %v9607_v50 = vsel %vm9537_vm6, %v18382_v32, -inf  ;;  %v9631_v62 = vsel %vm9537_vm6, %v18380_v54, -inf }
0x1039   : > { %9596 = vmax.xlane.f32.xlu1 %v9595_v5  ;;  %v9601_v4 = vsel %vm9537_vm6, %v18384_v49, -inf  ;;  %v9625_v45 = vsel %vm9537_vm6, %v18386_v52, -inf }
0x103b   : > { %9617 = vmax.xlane.f32.xlu0 %v9616_v59 }
0x103d   : > { %9620 = vmax.xlane.f32.xlu1 %v9619_v19 }
0x103f   : > { %9587 = vmax.xlane.f32.xlu0 %v9586_v31 }
0x1041   : > { %9590 = vmax.xlane.f32.xlu1 %v9589_v42 }
0x1043   : > { %9611 = vmax.xlane.f32.xlu0 %v9610_v17 }
0x1045   : > { %9614 = vmax.xlane.f32.xlu1 %v9613_v63 }
0x1047   : > { %9605 = vmax.xlane.f32.xlu0 %v9604_v29 }
0x1049   : > { %9608 = vmax.xlane.f32.xlu1 %v9607_v50 }
0x104b   : > { %9629 = vmax.xlane.f32.xlu0 %v9628_v34 }
0x104d   : > { %9632 = vmax.xlane.f32.xlu1 %v9631_v62 }
0x104f   : > { %9599 = vmax.xlane.f32.xlu0 %v9598_v8 }
0x1051   : > { %9602 = vmax.xlane.f32.xlu1 %v9601_v4 }
0x1053   : > { %9623 = vmax.xlane.f32.xlu0 %v9622_v43 }
0x1055   : > { %9626 = vmax.xlane.f32.xlu1 %v9625_v45 }
0x1066   : > { %9069 = vrot.lane.b32.xlu1 %v17848_v15, %s19784_s6 }
0x1069   : > { %9071 = vrot.lane.b32.xlu0 %v17846_v11, %s19784_s6 }
0x10a2   : > { %v9546_v3 = vpop.xlane.xlu0 %9545 }
0x10a3   : > { %v9636_v40 = vsub.f32 %v18290_v28, %v9546_v3  ;;  %v9540_v57 = vpop.xlane.xlu1 %9539 }
0x10a4   : > { %v9634_v5 = vsub.f32 %v18294_v51, %v9540_v57 }
0x10a5   : > { %v9670_v38 = vmul.f32 1.442695, %v9636_v40 }
0x10a6   : > { %v9570_v59 = vpop.xlane.xlu0 %9569  ;;  %v9666_v42 = vmul.f32 1.442695, %v9634_v5 }
0x10a7   : > { %14134 = vpow2.f32 %v9670_v38  ;;  %v9644_v19 = vsub.f32 %v18292_v27, %v9570_v59  ;;  %v9549_v31 = vpop.xlane.xlu1 %9548 }
0x10a8   : > { %v9637_v15 = vsub.f32 %v18302_v35, %v9549_v31 }
0x10a9   : > { %v9686_v11 = vmul.f32 1.442695, %v9644_v19 }
0x10aa   : > { %v9672_v17 = vmul.f32 1.442695, %v9637_v15  ;;  %v9564_v63 = vpop.xlane.xlu0 %9563 }
0x10ab   : > { %14136 = vpow2.f32 %v9686_v11  ;;  %v9642_v29 = vsub.f32 %v18296_v22, %v9564_v63  ;;  %v9573_v50 = vpop.xlane.xlu1 %9572 }
0x10ac   : > { %14138 = vpow2.f32 %v9672_v17  ;;  %v9645_v28 = vsub.f32 %v18300_v24, %v9573_v50 }
0x10ad   : > { %14140 = vpow2.f32 %v9666_v42  ;;  %v9682_v51 = vmul.f32 1.442695, %v9642_v29 }
0x10ae   : > { %v9688_v34 = vmul.f32 1.442695, %v9645_v28  ;;  %v9543_v62 = vpop.xlane.xlu0 %9542 }
0x10af   : > { %v9635_v27 = vsub.f32 %v18308_v6, %v9543_v62  ;;  %v9567_v8 = vpop.xlane.xlu1 %9566 }
0x10b0   : > { %14142 = vpow2.f32 %v9688_v34  ;;  %v9643_v35 = vsub.f32 %v18306_v25, %v9567_v8 }
0x10b1   : > { %v18434_v4 = vpop.eup %14134  ;;  %14144 = vpow2.f32 %v9682_v51  ;;  %v9668_v43 = vmul.f32 1.442695, %v9635_v27 }
0x10b2   : > { %v9684_v45 = vmul.f32 1.442695, %v9643_v35  ;;  %v9736_v22 = vsel %vm9537_vm6, %v18434_v4, 0.0 }
0x10b3   : > { %14146 = vpow2.f32 %v9668_v43  ;;  %9737 = vadd.xlane.f32.xlu0 %v9736_v22 }
0x10b4   : > { %v9558_v3 = vpop.xlane.xlu0 %9557  ;;  %14148 = vpow2.f32 %v9684_v45 }
0x10b5   : > { %v18438_v24 = vpop.eup %14136  ;;  %v9640_v25 = vsub.f32 %v18322_v30, %v9558_v3 }
0x10b6   : > { %v18440_v40 = vpop.eup %14138  ;;  %v9760_v6 = vsel %vm9537_vm6, %v18438_v24, 0.0  ;;  %v9561_v5 = vpop.xlane.xlu1 %9560 }
0x10b7   : > { %v18445_v57 = vpop.eup %14140  ;;  %9761 = vadd.xlane.f32.xlu0 %v9760_v6  ;;  %v9739_v38 = vsel %vm9537_vm6, %v18440_v40, 0.0  ;;  %v9678_v59 = vmul.f32 1.442695, %v9640_v25  ;;  %v9641_v63 = vsub.f32 %v18334_v10, %v9561_v5 }
0x10b8   : > { %9740 = vadd.xlane.f32.xlu1 %v9739_v38  ;;  %v9582_v19 = vpop.xlane.xlu0 %9581  ;;  %v9730_v15 = vsel %vm9537_vm6, %v18445_v57, 0.0 }
0x10b9   : > { %14150 = vpow2.f32 %v9678_v59  ;;  %v9648_v42 = vsub.f32 %v18324_v7, %v9582_v19  ;;  %v9680_v10 = vmul.f32 1.442695, %v9641_v63 }
0x10ba   : > { %v18449_v31 = vpop.eup %14142  ;;  %v9585_v17 = vpop.xlane.xlu1 %9584 }
0x10bb   : > { %v18454_v11 = vpop.eup %14144  ;;  %9731 = vadd.xlane.f32.xlu0 %v9730_v15  ;;  %v9763_v30 = vsel %vm9537_vm6, %v18449_v31, 0.0  ;;  %v9694_v29 = vmul.f32 1.442695, %v9648_v42  ;;  %v9649_v62 = vsub.f32 %v18332_v46, %v9585_v17 }
0x10bc   : > { %9764 = vadd.xlane.f32.xlu1 %v9763_v30  ;;  %v9552_v28 = vpop.xlane.xlu0 %9551  ;;  %v9754_v51 = vsel %vm9537_vm6, %v18454_v11, 0.0 }
0x10bd   : > { %v18459_v50 = vpop.eup %14146  ;;  %14152 = vpow2.f32 %v9694_v29  ;;  %v9638_v34 = vsub.f32 %v18326_v0, %v9552_v28  ;;  %v9696_v3 = vmul.f32 1.442695, %v9649_v62 }
0x10be   : > { %v9733_v7 = vsel %vm9537_vm6, %v18459_v50, 0.0  ;;  %v9555_v27 = vpop.xlane.xlu1 %9554  ;;  %v18467_v8 = vpop.eup %14148 }
0x10bf   : > { %9755 = vadd.xlane.f32.xlu0 %v9754_v51  ;;  %v9674_v35 = vmul.f32 1.442695, %v9638_v34  ;;  %v9639_v43 = vsub.f32 %v18336_v2, %v9555_v27  ;;  %v9757_v6 = vsel %vm9537_vm6, %v18467_v8, 0.0 }
0x10c0   : > { %9734 = vadd.xlane.f32.xlu1 %v9733_v7  ;;  %v9576_v45 = vpop.xlane.xlu0 %9575 }
0x10c1   : > { %14154 = vpow2.f32 %v9674_v35  ;;  %v9646_v22 = vsub.f32 %v18328_v48, %v9576_v45  ;;  %v9676_v46 = vmul.f32 1.442695, %v9639_v43 }
0x10c2   : > { %v9579_v0 = vpop.xlane.xlu1 %9578  ;;  %14156 = vpow2.f32 %v9680_v10 }
0x10c3   : > { %v18473_v25 = vpop.eup %14150  ;;  %v9690_v38 = vmul.f32 1.442695, %v9646_v22  ;;  %v9647_v5 = vsub.f32 %v18338_v18, %v9579_v0 }
0x10c4   : > { %9758 = vadd.xlane.f32.xlu1 %v9757_v6  ;;  %v9594_v59 = vpop.xlane.xlu0 %9593  ;;  %v9748_v2 = vsel %vm9537_vm6, %v18473_v25, 0.0 }
0x10c5   : > { %14158 = vpow2.f32 %v9690_v38  ;;  %v9652_v48 = vsub.f32 %v18348_v60, %v9594_v59  ;;  %9749 = vadd.xlane.f32.xlu0 %v9748_v2  ;;  %v9692_v19 = vmul.f32 1.442695, %v9647_v5 }
0x10c6   : > { %14160 = vpow2.f32 %v9696_v3  ;;  %v9597_v15 = vpop.xlane.xlu1 %9596 }
0x10c7   : > { %v18479_v42 = vpop.eup %14152  ;;  %14162 = vpow2.f32 %v9676_v46  ;;  %v9702_v30 = vmul.f32 1.442695, %v9652_v48  ;;  %v9653_v17 = vsub.f32 %v18358_v36, %v9597_v15 }
0x10c8   : > { %v9618_v63 = vpop.xlane.xlu0 %9617  ;;  %v9772_v18 = vsel %vm9537_vm6, %v18479_v42, 0.0  ;;  %14164 = vpow2.f32 %v9692_v19 }
0x10c9   : > { %9773 = vadd.xlane.f32.xlu0 %v9772_v18  ;;  %14166 = vpow2.f32 %v9702_v30  ;;  %v9704_v60 = vmul.f32 1.442695, %v9653_v17  ;;  %v9660_v36 = vsub.f32 %v18346_v1, %v9618_v63 }
0x10ca   : > { %v9621_v29 = vpop.xlane.xlu1 %9620 }
0x10cb   : > { %v18484_v28 = vpop.eup %14154  ;;  %14168 = vpow2.f32 %v9704_v60  ;;  %v9718_v46 = vmul.f32 1.442695, %v9660_v36 }
0x10cc   : > { %v9588_v51 = vpop.xlane.xlu0 %9587  ;;  %v9742_v7 = vsel %vm9537_vm6, %v18484_v28, 0.0  ;;  %v18488_v34 = vpop.eup %14156 }
0x10cd   : > { %v9650_v62 = vsub.f32 %v18350_v58, %v9588_v51  ;;  %9743 = vadd.xlane.f32.xlu1 %v9742_v7  ;;  %v9751_v3 = vsel %vm9537_vm6, %v18488_v34, 0.0 }
0x10ce   : > { %v9591_v27 = vpop.xlane.xlu1 %9590 }
0x10cf   : > { %v18492_v10 = vpop.eup %14158  ;;  %v9698_v35 = vmul.f32 1.442695, %v9650_v62  ;;  %v9651_v43 = vsub.f32 %v18360_v56, %v9591_v27  ;;  %v9661_v56 = vsub.f32 %v18356_v21, %v9621_v29 }
0x10d0   : > { %v18495_v45 = vpop.eup %14160  ;;  %v9612_v22 = vpop.xlane.xlu0 %9611  ;;  %v9766_v6 = vsel %vm9537_vm6, %v18492_v10, 0.0 }
0x10d1   : > { %v18501_v58 = vpop.eup %14162  ;;  %14170 = vpow2.f32 %v9698_v35  ;;  %v9700_v1 = vmul.f32 1.442695, %v9651_v43  ;;  %v9658_v0 = vsub.f32 %v18352_v16, %v9612_v22  ;;  %9752 = vadd.xlane.f32.xlu1 %v9751_v3  ;;  %9767 = vadd.xlane.f32.xlu0 %v9766_v6  ;;  %v9775_v19 = vsel %vm9537_vm6, %v18495_v45, 0.0 }
0x10d2   : > { %v9615_v38 = vpop.xlane.xlu1 %9614  ;;  %v18506_v2 = vpop.eup %14164  ;;  %v9745_v15 = vsel %vm9537_vm6, %v18501_v58, 0.0  ;;  %v9720_v17 = vmul.f32 1.442695, %v9661_v56 }
0x10d3   : > { %14172 = vpow2.f32 %v9700_v1  ;;  %v9714_v5 = vmul.f32 1.442695, %v9658_v0  ;;  %v9659_v59 = vsub.f32 %v18362_v33, %v9615_v38  ;;  %v18512_v16 = vpop.eup %14166  ;;  %v9769_v60 = vsel %vm9537_vm6, %v18506_v2, 0.0 }
0x10d4   : > { %v9606_v48 = vpop.xlane.xlu0 %9605  ;;  %v9784_v51 = vsel %vm9537_vm6, %v18512_v16, 0.0 }
0x10d5   : > { %14174 = vpow2.f32 %v9714_v5  ;;  %v9716_v30 = vmul.f32 1.442695, %v9659_v59  ;;  %v9656_v21 = vsub.f32 %v18372_v47, %v9606_v48  ;;  %9776 = vadd.xlane.f32.xlu1 %v9775_v19  ;;  %9746 = vadd.xlane.f32.xlu0 %v9745_v15  ;;  %v18520_v7 = vpop.eup %14168 }
0x10d6   : > { %14176 = vpow2.f32 %v9718_v46  ;;  %v9609_v33 = vpop.xlane.xlu1 %9608 }
0x10d7   : > { %14178 = vpow2.f32 %v9716_v30  ;;  %v9710_v63 = vmul.f32 1.442695, %v9656_v21  ;;  %v9657_v18 = vsub.f32 %v18382_v32, %v9609_v33  ;;  %v9787_v32 = vsel %vm9537_vm6, %v18520_v7, 0.0 }
0x10d8   : > { %v9630_v29 = vpop.xlane.xlu0 %9629  ;;  %14180 = vpow2.f32 %v9720_v17 }
0x10d9   : > { %9770 = vadd.xlane.f32.xlu1 %v9769_v60  ;;  %9785 = vadd.xlane.f32.xlu0 %v9784_v51  ;;  %14182 = vpow2.f32 %v9710_v63  ;;  %v9712_v36 = vmul.f32 1.442695, %v9657_v18  ;;  %v9664_v3 = vsub.f32 %v18370_v61, %v9630_v29 }
0x10da   : > { %v9633_v47 = vpop.xlane.xlu1 %9632 }
0x10db   : > { %v18522_v62 = vpop.eup %14170  ;;  %14184 = vpow2.f32 %v9712_v36  ;;  %v9726_v19 = vmul.f32 1.442695, %v9664_v3 }
0x10dc   : > { %v9600_v27 = vpop.xlane.xlu0 %9599  ;;  %v9778_v35 = vsel %vm9537_vm6, %v18522_v62, 0.0 }
0x10dd   : > { %v18528_v43 = vpop.eup %14172  ;;  %v9654_v22 = vsub.f32 %v18374_v20, %v9600_v27  ;;  %9788 = vadd.xlane.f32.xlu1 %v9787_v32  ;;  %9779 = vadd.xlane.f32.xlu0 %v9778_v35 }
0x10de   : > { %v9603_v6 = vpop.xlane.xlu1 %9602  ;;  %v9781_v5 = vsel %vm9537_vm6, %v18528_v43, 0.0 }
0x10df   : > { %v18532_v1 = vpop.eup %14174  ;;  %v9706_v0 = vmul.f32 1.442695, %v9654_v22  ;;  %v9655_v46 = vsub.f32 %v18384_v49, %v9603_v6  ;;  %v9665_v49 = vsub.f32 %v18380_v54, %v9633_v47 }
0x10e0   : > { %v18535_v56 = vpop.eup %14176  ;;  %v9624_v38 = vpop.xlane.xlu0 %9623  ;;  %v9802_v20 = vsel %vm9537_vm6, %v18532_v1, 0.0 }
0x10e1   : > { %v18541_v59 = vpop.eup %14178  ;;  %14186 = vpow2.f32 %v9706_v0  ;;  %v9708_v61 = vmul.f32 1.442695, %v9655_v46  ;;  %v9662_v48 = vsub.f32 %v18376_v13, %v9624_v38  ;;  %9782 = vadd.xlane.f32.xlu1 %v9781_v5  ;;  %9803 = vadd.xlane.f32.xlu0 %v9802_v20  ;;  %v9808_v18 = vsel %vm9537_vm6, %v18535_v56, 0.0 }
0x10e2   : > { %v9627_v15 = vpop.xlane.xlu1 %9626  ;;  %v18546_v17 = vpop.eup %14180  ;;  %v9805_v63 = vsel %vm9537_vm6, %v18541_v59, 0.0  ;;  %v9728_v60 = vmul.f32 1.442695, %v9665_v49 }
0x10e3   : > { %14188 = vpow2.f32 %v9708_v61  ;;  %v9722_v30 = vmul.f32 1.442695, %v9662_v48  ;;  %v9663_v21 = vsub.f32 %v18386_v52, %v9627_v15  ;;  %v18552_v13 = vpop.eup %14182  ;;  %v9811_v27 = vsel %vm9537_vm6, %v18546_v17, 0.0 }
0x10e4   : > { %v9072_v33 = vpop.permute.xlu0 %9071  ;;  %v9796_v32 = vsel %vm9537_vm6, %v18552_v13, 0.0 }
0x10e5   : > { %14190 = vpow2.f32 %v9722_v30  ;;  %v9724_v29 = vmul.f32 1.442695, %v9663_v21  ;;  %v9093_v54 = vcombine.low %v18424_v41, %v9072_v33  ;;  %9806 = vadd.xlane.f32.xlu1 %v9805_v63  ;;  %9809 = vadd.xlane.f32.xlu0 %v9808_v18  ;;  %v9094_v52 = vcombine.high %v18424_v41, %v9072_v33  ;;  %v18562_v35 = vpop.eup %14184 }
0x10e6   : > { %14192 = vpow2.f32 %v9726_v19  ;;  %v9070_v51 = vpop.permute.xlu1 %9069  ;;  %v9799_v20 = vsel %vm9537_vm6, %v18562_v35, 0.0 }
0x10e7   : > { %14194 = vpow2.f32 %v9724_v29  ;;  %v9077_v47 = vcombine.low %v18422_v9, %v9070_v51  ;;  %v9078_v36 = vcombine.high %v18422_v9, %v9070_v51  ;;  %v9101_v22 = vrot.slane %v9093_v54, %v15725_v55 }
0x10e8   : > { %14196 = vpow2.f32 %v9728_v60  ;;  %v9108_v41 = vrot.slane %v9094_v52, %v15725_v55 }
0x10e9   : > { %v9085_v3 = vrot.slane %v9077_v47, %v15725_v55  ;;  %9812 = vadd.xlane.f32.xlu1 %v9811_v27  ;;  %9797 = vadd.xlane.f32.xlu0 %v9796_v32  ;;  %v9092_v6 = vrot.slane %v9078_v36, %v15725_v55 }
0x10eb   : > { %v18568_v9 = vpop.eup %14186  ;;  %v9109_v0 = vcombine.low %v9085_v3, %v9101_v22  ;;  %v9110_v46 = vcombine.high %v9085_v3, %v9101_v22  ;;  %v9125_v38 = vcombine.low %v9092_v6, %v9108_v41  ;;  %v9126_v5 = vcombine.high %v9092_v6, %v9108_v41 }
0x10ec   : > { %v9790_v61 = vsel %vm9537_vm6, %v18568_v9, 0.0 }
0x10ed   : > { %v18574_v48 = vpop.eup %14188  ;;  %v9117_v19 = vrot.slane %v9109_v0, %v15732_v39  ;;  %v9124_v49 = vrot.slane %v9110_v46, %v15732_v39  ;;  %9800 = vadd.xlane.f32.xlu1 %v9799_v20  ;;  %9791 = vadd.xlane.f32.xlu0 %v9790_v61  ;;  %v9133_v15 = vrot.slane %v9125_v38, %v15732_v39 }
0x10ee   : > { %v9140_v30 = vrot.slane %v9126_v5, %v15732_v39  ;;  %v9793_v60 = vsel %vm9537_vm6, %v18574_v48, 0.0 }
0x10ef   : > { %v18580_v21 = vpop.eup %14190  ;;  %v9145_v33 = vcombine.low %v9117_v19, %v9124_v49  ;;  %v12909_v63 = vcombine.high %v9117_v19, %v9124_v49 }
0x10f0   : > { %v18582_v18 = vpop.eup %14192  ;;  %v9161_v29 = vcombine.low %v9133_v15, %v9140_v30  ;;  %v12910_v54 = vcombine.high %v9133_v15, %v9140_v30  ;;  %v9814_v52 = vsel %vm9537_vm6, %v18580_v21, 0.0 }
0x10f1   : > { %v18588_v51 = vpop.eup %14194  ;;  %v9152_v47 = vrot.slane %v9145_v33, %v15725_v55  ;;  %v9160_v36 = vrot.slane %v12909_v63, %v15725_v55  ;;  %9794 = vadd.xlane.f32.xlu1 %v9793_v60  ;;  %9815 = vadd.xlane.f32.xlu0 %v9814_v52  ;;  %v9820_v0 = vsel %vm9537_vm6, %v18582_v18, 0.0 }
0x10f2   : > { %v9168_v27 = vrot.slane %v9161_v29, %v15725_v55  ;;  %v9176_v32 = vrot.slane %v12910_v54, %v15725_v55  ;;  %v18594_v41 = vpop.eup %14196  ;;  %v9817_v6 = vsel %vm9537_vm6, %v18588_v51, 0.0 }
0x10f3   : > { %v9177_v22 = vcombine.low %v9152_v47, %v9160_v36  ;;  %v9178_v3 = vcombine.high %v9152_v47, %v9160_v36  ;;  %v9823_v49 = vsel %vm9537_vm6, %v18594_v41, 0.0 }
0x10f4   : > { %v9193_v46 = vcombine.low %v9168_v27, %v9176_v32  ;;  %v9194_v38 = vcombine.high %v9168_v27, %v9176_v32 }
0x10f5   : > { %9818 = vadd.xlane.f32.xlu1 %v9817_v6  ;;  %9821 = vadd.xlane.f32.xlu0 %v9820_v0  ;;  %v9185_v5 = vrot.slane %v9177_v22, %v15732_v39  ;;  %v9192_v20 = vrot.slane %v9178_v3, %v15732_v39 }
0x10f6   : > { %v9201_v61 = vrot.slane %v9193_v46, %v15732_v39  ;;  %v9208_v19 = vrot.slane %v9194_v38, %v15732_v39 }
0x10f8   : > { %v9209_v15 = vcombine.low %v9185_v5, %v9201_v61  ;;  %v9210_v30 = vcombine.high %v9185_v5, %v9201_v61  ;;  %v9211_v33 = vcombine.low %v9192_v20, %v9208_v19  ;;  %v9212_v63 = vcombine.high %v9192_v20, %v9208_v19 }
0x10f9   : > { %9824 = vadd.xlane.f32.xlu1 %v9823_v49 }
0x10fa   : > { %v9213_v29 = vpack.c.bf16 %v9209_v15, %v9209_v15  ;;  %v9214_v54 = vpack.c.bf16 %v9210_v30, %v9210_v30  ;;  %v9215_v60 = vpack.c.bf16 %v9211_v33, %v9211_v33  ;;  %v9216_v52 = vpack.c.bf16 %v9212_v63, %v9212_v63 }
0x10fc   : > { %13574 = vmatprep.subr.msk.bf16.mxu1 %vm9918_vm7, %v9213_v29  ;;  %13575 = vmatprep.subr.msk.bf16.mxu0 %vm9918_vm7, %v9214_v54  ;;  %v9920_v47 = vsel %vm9918_vm7, %v9213_v29, 0  ;;  %v10000_v36 = vsel %vm9918_vm7, %v9214_v54, 0  ;;  %v10080_v27 = vsel %vm9918_vm7, %v9215_v60, 0  ;;  %v10160_v32 = vsel %vm9918_vm7, %v9216_v52, 0 }
0x10fd   : > { %13471 = vmatpush3.bf16.msra.mxu1 %v9920_v47  ;;  %13481 = vmatpush3.bf16.msra.mxu0 %v10000_v36 }
0x10fe   : > { %13576 = vmatprep.subr.msk.bf16.mxu1 %vm9918_vm7, %v9215_v60  ;;  %13577 = vmatprep.subr.msk.bf16.mxu0 %vm9918_vm7, %v9216_v52 }
0x1140   : > { %v9738_v22 = vpop.xlane.xlu0 %9737 }
0x1144   : > { %v9762_v3 = vpop.xlane.xlu0 %9761 }
0x1145   : > { %v9741_v6 = vpop.xlane.xlu1 %9740 }
0x1146   : > { %14198 = vrcp.f32 %v9741_v6 }
0x1148   : > { %v9732_v0 = vpop.xlane.xlu0 %9731 }
0x1149   : > { %v9765_v46 = vpop.xlane.xlu1 %9764  ;;  %14200 = vrcp.f32 %v9732_v0 }
0x114a   : > { %14202 = vrcp.f32 %v9738_v22 }
0x114c   : > { %v9756_v38 = vpop.xlane.xlu0 %9755 }
0x114d   : > { %v9735_v5 = vpop.xlane.xlu1 %9734 }
0x114e   : > { %14204 = vrcp.f32 %v9735_v5 }
0x114f   : > { %14206 = vrcp.f32 %v9765_v46 }
0x1150   : > { %14208 = vrcp.f32 %v9756_v38  ;;  %v14199_v61 = vpop.eup %14198 }
0x1151   : > { %14210 = vrcp.f32 %v9762_v3  ;;  %v9759_v20 = vpop.xlane.xlu1 %9758  ;;  %v9861_v33 = vmul.f32 %v14199_v61, %v18440_v40 }
0x1152   : > { %14212 = vrcp.f32 %v9759_v20  ;;  %v9750_v19 = vpop.xlane.xlu0 %9749 }
0x1153   : > { %v14201_v49 = vpop.eup %14200  ;;  %14214 = vrcp.f32 %v9750_v19 }
0x1154   : > { %v14203_v15 = vpop.eup %14202  ;;  %v9858_v29 = vmul.f32 %v14201_v49, %v18445_v57 }
0x1155   : > { %v9860_v52 = vmul.f32 %v14203_v15, %v18434_v4 }
0x1156   : > { %v9774_v36 = vpop.xlane.xlu0 %9773 }
0x1157   : > { %v9891_v0 = vpack.c.bf16 %v9861_v33, %v9860_v52 }
0x1158   : > { %v14205_v30 = vpop.eup %14204 }
0x1159   : > { %v14207_v63 = vpop.eup %14206  ;;  %v9859_v54 = vmul.f32 %v14205_v30, %v18459_v50 }
0x115a   : > { %v14209_v60 = vpop.eup %14208  ;;  %v9744_v3 = vpop.xlane.xlu1 %9743  ;;  %v9869_v46 = vmul.f32 %v14207_v63, %v18449_v31 }
0x115b   : > { %v14211_v47 = vpop.eup %14210  ;;  %v9890_v22 = vpack.c.bf16 %v9859_v54, %v9858_v29  ;;  %v9866_v40 = vmul.f32 %v14209_v60, %v18454_v11 }
0x115c   : > { %v14213_v6 = vpop.eup %14212  ;;  %v9868_v57 = vmul.f32 %v14211_v47, %v18438_v24 }
0x115d   : > { %13472 = vmatprep.mubr.msk.bf16.mxu1 %vm9537_vm6, %v9890_v22  ;;  %v9867_v38 = vmul.f32 %v14213_v6, %v18467_v8 }
0x115e   : > { %13473 = vmatmul.mubr.msk.bf16.vlgmr.msra.gmra.mrb[68].mxu1 %vm9537_vm6, %v9891_v0  ;;  %v9753_v50 = vpop.xlane.xlu1 %9752  ;;  %v9768_v5 = vpop.xlane.xlu0 %9767  ;;  %v9895_v20 = vpack.c.bf16 %v9869_v46, %v9868_v57 }
0x115f   : > { %13491 = vmatpush3.bf16.msra.mxu1 %v10080_v27  ;;  %v9894_v4 = vpack.c.bf16 %v9867_v38, %v9866_v40  ;;  %14216 = vrcp.f32 %v9753_v50  ;;  %v14215_v27 = vpop.eup %14214 }
0x1160   : > { %14218 = vrcp.f32 %v9744_v3 }
0x1161   : > { %13482 = vmatprep.mubr.msk.bf16.mxu0 %vm9537_vm6, %v9894_v4 }
0x1162   : > { %13483 = vmatmul.mubr.msk.bf16.vlgmr.msra.gmra.mrb[76].mxu0 %vm9537_vm6, %v9895_v20  ;;  %v9777_v31 = vpop.xlane.xlu1 %9776  ;;  %v9747_v11 = vpop.xlane.xlu0 %9746 }
0x1163   : > { %13501 = vmatpush3.bf16.msra.mxu0 %v10160_v32  ;;  %14220 = vrcp.f32 %v9777_v31 }
0x1164   : > { %14222 = vrcp.f32 %v9747_v11 }
0x1165   : > { %14224 = vrcp.f32 %v9768_v5 }
0x1166   : > { %14226 = vrcp.f32 %v9774_v36  ;;  %v9771_v24 = vpop.xlane.xlu1 %9770  ;;  %v9786_v8 = vpop.xlane.xlu0 %9785  ;;  %v9864_v36 = vmul.f32 %v14215_v27, %v18473_v25 }
0x1167   : > { %14228 = vrcp.f32 %v9771_v24 }
0x1169   : > { %v14217_v19 = vpop.eup %14216 }
0x116a   : > { %v9789_v61 = vpop.xlane.xlu1 %9788  ;;  %v9780_v49 = vpop.xlane.xlu0 %9779  ;;  %v9865_v29 = vmul.f32 %v14217_v19, %v18488_v34 }
0x116b   : > { %v14219_v15 = vpop.eup %14218  ;;  %14230 = vrcp.f32 %v9789_v61 }
0x116c   : > { %14232 = vrcp.f32 %v9780_v49  ;;  %v9862_v60 = vmul.f32 %v14219_v15, %v18484_v28  ;;  %v9893_v40 = vpack.c.bf16 %v9865_v29, %v9864_v36 }
0x116d   : > { %v14221_v30 = vpop.eup %14220  ;;  %14234 = vrcp.f32 %v9786_v8 }
0x116e   : > { %v14223_v33 = vpop.eup %14222  ;;  %v9783_v32 = vpop.xlane.xlu1 %9782  ;;  %v9873_v6 = vmul.f32 %v14221_v30, %v18495_v45 }
0x116f   : > { %v9804_v63 = vpop.xlane.xlu0 %9803  ;;  %v14225_v54 = vpop.eup %14224  ;;  %14236 = vrcp.f32 %v9783_v32  ;;  %v9863_v52 = vmul.f32 %v14223_v33, %v18501_v58 }
0x1170   : > { %v14227_v47 = vpop.eup %14226  ;;  %14238 = vrcp.f32 %v9804_v63  ;;  %v9870_v38 = vmul.f32 %v14225_v54, %v18492_v10 }
0x1171   : > { %v14229_v22 = vpop.eup %14228  ;;  %v9892_v3 = vpack.c.bf16 %v9863_v52, %v9862_v60  ;;  %v9872_v28 = vmul.f32 %v14227_v47, %v18479_v42 }
0x1172   : > { %v9807_v0 = vpop.xlane.xlu1 %9806  ;;  %v9871_v34 = vmul.f32 %v14229_v22, %v18506_v2 }
0x1173   : > { %v9810_v46 = vpop.xlane.xlu0 %9809  ;;  %14240 = vrcp.f32 %v9807_v0  ;;  %13476 = vmatprep.mubr.msk.bf16.mxu1 %vm9537_vm6, %v9892_v3  ;;  %v9897_v58 = vpack.c.bf16 %v9873_v6, %v9872_v28 }
0x1174   : > { %13477 = vmatmul.mubr.msk.bf16.gmra.mrb[72].mxu1 %vm9537_vm6, %v9893_v40  ;;  %v9896_v25 = vpack.c.bf16 %v9871_v34, %v9870_v38  ;;  %14242 = vrcp.f32 %v9810_v46 }
0x1175   : > { %v14231_v57 = vpop.eup %14230 }
0x1176   : > { %v9813_v4 = vpop.xlane.xlu1 %9812  ;;  %13486 = vmatprep.mubr.msk.bf16.mxu0 %vm9537_vm6, %v9896_v25  ;;  %v14233_v50 = vpop.eup %14232  ;;  %v9877_v5 = vmul.f32 %v14231_v57, %v18520_v7  ;;  %v19790_v25 = vmov 0  }
0x1177   : > { %v9798_v45 = vpop.xlane.xlu0 %9797  ;;  %14244 = vrcp.f32 %v9813_v4  ;;  %13487 = vmatmul.mubr.msk.bf16.gmra.mrb[80].mxu0 %vm9537_vm6, %v9897_v58  ;;  %v14235_v10 = vpop.eup %14234  ;;  %v9874_v31 = vmul.f32 %v14233_v50, %v18522_v62  ;;  %v13924_v58 = vld [vmem:[#allocation17] sm:$0xff]  }
0x1178   : > { %v9876_v8 = vmul.f32 %v14235_v10, %v18512_v16  ;;  %13510 = vmatprep.subr.bf16.mxu1 %v13924_v58 }
0x1179   : > { %v14237_v2 = vpop.eup %14236 }
0x117a   : > { %v9801_v20 = vpop.xlane.xlu1 %9800  ;;  %v9875_v11 = vmul.f32 %v14237_v2, %v18528_v43  ;;  %v14239_v24 = vpop.eup %14238  ;;  %v9899_v49 = vpack.c.bf16 %v9877_v5, %v9876_v8 }
0x117b   : > { %v9792_v42 = vpop.xlane.xlu0 %9791  ;;  %14246 = vrcp.f32 %v9801_v20  ;;  %v9882_v7 = vmul.f32 %v14239_v24, %v18532_v1 }
0x117c   : > { %v9898_v27 = vpack.c.bf16 %v9875_v11, %v9874_v31  ;;  %14248 = vrcp.f32 %v9792_v42 }
0x117d   : > { %v14241_v61 = vpop.eup %14240  ;;  %14250 = vrcp.f32 %v9798_v45 }
0x117e   : > { %v9795_v19 = vpop.xlane.xlu1 %9794  ;;  %13492 = vmatprep.mubr.msk.bf16.mxu1 %vm9537_vm6, %v9898_v27  ;;  %v9883_v30 = vmul.f32 %v14241_v61, %v18541_v59  ;;  %v14243_v62 = vpop.eup %14242 }
0x117f   : > { %v9816_v15 = vpop.xlane.xlu0 %9815  ;;  %14252 = vrcp.f32 %v9795_v19  ;;  %13493 = vmatmul.mubr.msk.bf16.vlgmr.msra.gmra.mrb[76].mxu1 %vm9537_vm6, %v9899_v49  ;;  %v9884_v33 = vmul.f32 %v14243_v62, %v18535_v56 }
0x1180   : > { %v9902_v43 = vpack.c.bf16 %v9883_v30, %v9882_v7  ;;  %14254 = vrcp.f32 %v9816_v15  ;;  %13511 = vmatpush3.bf16.msra.mxu1 %v13924_v58 }
0x1181   : > { %v14245_v16 = vpop.eup %14244 }
0x1182   : > { %v9885_v32 = vmul.f32 %v14245_v16, %v18546_v17  ;;  %v9819_v63 = vpop.xlane.xlu1 %9818  ;;  %13502 = vmatprep.mubr.msk.bf16.mxu0 %vm9537_vm6, %v9902_v43 }
0x1183   : > { %v9822_v29 = vpop.xlane.xlu0 %9821  ;;  %14256 = vrcp.f32 %v9819_v63 }
0x1184   : > { %v9903_v54 = vpack.c.bf16 %v9885_v32, %v9884_v33  ;;  %14258 = vrcp.f32 %v9822_v29 }
0x1185   : > { %v14247_v1 = vpop.eup %14246 }
0x1186   : > { %v9825_v59 = vpop.xlane.xlu1 %9824  ;;  %13503 = vmatmul.mubr.msk.bf16.vlgmr.msra.gmra.mrb[84].mxu0 %vm9537_vm6, %v9903_v54  ;;  %v14249_v60 = vpop.eup %14248  ;;  %v9881_v36 = vmul.f32 %v14247_v1, %v18562_v35 }
0x1187   : > { %14260 = vrcp.f32 %v9825_v59  ;;  %v14251_v52 = vpop.eup %14250  ;;  %v9878_v56 = vmul.f32 %v14249_v60, %v18568_v9 }
0x1188   : > { %v9880_v3 = vmul.f32 %v14251_v52, %v18552_v13 }
0x1189   : > { %v14253_v47 = vpop.eup %14252 }
0x118a   : > { %v9879_v17 = vmul.f32 %v14253_v47, %v18574_v48  ;;  %v14255_v22 = vpop.eup %14254  ;;  %v9901_v46 = vpack.c.bf16 %v9881_v36, %v9880_v3 }
0x118b   : > { %v9886_v40 = vmul.f32 %v14255_v22, %v18580_v21 }
0x118c   : > { %v9900_v6 = vpack.c.bf16 %v9879_v17, %v9878_v56 }
0x118d   : > { %v14257_v0 = vpop.eup %14256 }
0x118e   : > { %13496 = vmatprep.mubr.msk.bf16.mxu1 %vm9537_vm6, %v9900_v6  ;;  %v9887_v38 = vmul.f32 %v14257_v0, %v18588_v51  ;;  %v14259_v34 = vpop.eup %14258 }
0x118f   : > { %13497 = vmatmul.mubr.msk.bf16.gmra.mrb[80].mxu1 %vm9537_vm6, %v9901_v46  ;;  %v9888_v9 = vmul.f32 %v14259_v34, %v18582_v18 }
0x1190   : > { %v9904_v35 = vpack.c.bf16 %v9887_v38, %v9886_v40 }
0x1191   : > { %v14261_v28 = vpop.eup %14260 }
0x1192   : > { %13506 = vmatprep.mubr.msk.bf16.mxu0 %vm9537_vm6, %v9904_v35  ;;  %v9889_v13 = vmul.f32 %v14261_v28, %v18594_v41 }
0x1194   : > { %v9905_v48 = vpack.c.bf16 %v9889_v13, %v9888_v9 }
0x1196   : > { %13507 = vmatmul.mubr.msk.bf16.gmra.mrb[88].mxu0 %vm9537_vm6, %v9905_v48 }
0x1197   : > { %11833 = vmatprep.mubr.bf16.mxu0 %v19790_v25 }
0x1231   : > { %v13474_v21 = vpop.f32.mrb[68].mxu1 }
0x1232   : > { %v9956_v51 = vpop.f32.mrb[69].mxu1 }
0x1233   : > { %v13475_v57 = vpop.f32.mrb[70].mxu1 }
0x1234   : > { %v9959_v4 = vpop.f32.mrb[71].mxu1 }
0x1235   : > { %v13484_v45 = vpop.f32.mrb[76].mxu0 }
0x1236   : > { %v10036_v50 = vpop.f32.mrb[77].mxu0 }
0x1237   : > { %v18655_v10 = vpop.f32.mrb[78].mxu0 }
0x1238   : > { %v18657_v2 = vpop.f32.mrb[79].mxu0 }
0x1247   : > { %v18659_v18 = vpop.f32.mrb[72].mxu1 }
0x1248   : > { %v18661_v41 = vpop.f32.mrb[73].mxu1 }
0x1249   : > { %v18663_v5 = vpop.f32.mrb[74].mxu1 }
0x124a   : > { %v18665_v20 = vpop.f32.mrb[75].mxu1  ;;  %v18667_v42 = vpop.f32.mrb[80].mxu0 }
0x124b   : > { %v18669_v31 = vpop.f32.mrb[81].mxu0 }
0x124c   : > { %v18671_v11 = vpop.f32.mrb[82].mxu0 }
0x124d   : > { %v18673_v24 = vpop.f32.mrb[83].mxu0 }
0x1252   : > { %v13494_v8 = vpop.f32.mrb[76].mxu1 }
0x1253   : > { %v10363_v27 = vcombine.low %v13474_v21, %v13494_v8  ;;  %v10364_v61 = vcombine.high %v13474_v21, %v13494_v8  ;;  %v10116_v49 = vpop.f32.mrb[77].mxu1 }
0x1254   : > { %v10227_v19 = vcombine.low %v9956_v51, %v10116_v49  ;;  %v10228_v15 = vcombine.high %v9956_v51, %v10116_v49  ;;  %v13495_v7 = vpop.f32.mrb[78].mxu1 }
0x1255   : > { %v10431_v30 = vcombine.low %v13475_v57, %v13495_v7  ;;  %v10432_v62 = vcombine.high %v13475_v57, %v13495_v7  ;;  %v10119_v43 = vpop.f32.mrb[79].mxu1  ;;  %v10371_v32 = vrot.slane %v10363_v27, %v15725_v55  ;;  %v10378_v63 = vrot.slane %v10364_v61, %v15725_v55 }
0x1256   : > { %v10295_v16 = vcombine.low %v9959_v4, %v10119_v43  ;;  %v10296_v33 = vcombine.high %v9959_v4, %v10119_v43  ;;  %v10235_v29 = vrot.slane %v10227_v19, %v15725_v55  ;;  %v10242_v54 = vrot.slane %v10228_v15, %v15725_v55 }
0x1257   : > { %v18680_v59 = vrot.slane %v10431_v30, %v15725_v55  ;;  %v18683_v60 = vrot.slane %v10432_v62, %v15725_v55 }
0x1258   : > { %v18686_v56 = vrot.slane %v10295_v16, %v15725_v55  ;;  %v18689_v17 = vrot.slane %v10296_v33, %v15725_v55 }
0x1259   : > { %v13504_v1 = vpop.f32.mrb[84].mxu0 }
0x125a   : > { %v10379_v52 = vcombine.low %v13484_v45, %v13504_v1  ;;  %v10380_v47 = vcombine.high %v13484_v45, %v13504_v1  ;;  %v10196_v36 = vpop.f32.mrb[85].mxu0 }
0x125b   : > { %v10243_v22 = vcombine.low %v10036_v50, %v10196_v36  ;;  %v10244_v3 = vcombine.high %v10036_v50, %v10196_v36  ;;  %v13505_v6 = vpop.f32.mrb[86].mxu0 }
0x125c   : > { %v10387_v0 = vrot.slane %v10379_v52, %v15725_v55  ;;  %v10394_v46 = vrot.slane %v10380_v47, %v15725_v55  ;;  %v10447_v40 = vcombine.low %v18655_v10, %v13505_v6  ;;  %v10448_v38 = vcombine.high %v18655_v10, %v13505_v6  ;;  %v10199_v34 = vpop.f32.mrb[87].mxu0 }
0x125d   : > { %v10251_v35 = vrot.slane %v10243_v22, %v15725_v55  ;;  %v10258_v28 = vrot.slane %v10244_v3, %v15725_v55  ;;  %v10311_v9 = vcombine.low %v18657_v2, %v10199_v34  ;;  %v10312_v13 = vcombine.high %v18657_v2, %v10199_v34 }
0x125e   : > { %v10395_v48 = vcombine.low %v10371_v32, %v10387_v0  ;;  %v10396_v58 = vcombine.high %v10371_v32, %v10387_v0  ;;  %v10411_v21 = vcombine.low %v10378_v63, %v10394_v46  ;;  %v10412_v51 = vcombine.high %v10378_v63, %v10394_v46 }
0x125f   : > { %v10259_v57 = vcombine.low %v10235_v29, %v10251_v35  ;;  %v10260_v4 = vcombine.high %v10235_v29, %v10251_v35  ;;  %v10275_v45 = vcombine.low %v10242_v54, %v10258_v28  ;;  %v10276_v50 = vcombine.high %v10242_v54, %v10258_v28 }
0x1260   : > { %v10403_v8 = vrot.slane %v10395_v48, %v15732_v39  ;;  %v10410_v10 = vrot.slane %v10396_v58, %v15732_v39  ;;  %v10419_v27 = vrot.slane %v10411_v21, %v15732_v39  ;;  %v10426_v61 = vrot.slane %v10412_v51, %v15732_v39 }
0x1261   : > { %v10267_v49 = vrot.slane %v10259_v57, %v15732_v39  ;;  %v10274_v2 = vrot.slane %v10260_v4, %v15732_v39  ;;  %v10283_v19 = vrot.slane %v10275_v45, %v15732_v39  ;;  %v10290_v15 = vrot.slane %v10276_v50, %v15732_v39 }
0x1262   : > { %v10907_v7 = vcombine.low %v10403_v8, %v10410_v10  ;;  %v12947_v30 = vcombine.high %v10403_v8, %v10410_v10  ;;  %v10923_v62 = vcombine.low %v10419_v27, %v10426_v61  ;;  %v12948_v43 = vcombine.high %v10419_v27, %v10426_v61  ;;  %v13498_v16 = vpop.f32.mrb[80].mxu1 }
0x1263   : > { %v10771_v33 = vcombine.low %v10267_v49, %v10274_v2  ;;  %v12943_v32 = vcombine.high %v10267_v49, %v10274_v2  ;;  %v10787_v63 = vcombine.low %v10283_v19, %v10290_v15  ;;  %v12944_v29 = vcombine.high %v10283_v19, %v10290_v15  ;;  %v10132_v54 = vpop.f32.mrb[81].mxu1 }
0x1264   : > { %v18708_v1 = vrot.slane %v10907_v7, %v15725_v55  ;;  %v18711_v52 = vrot.slane %v12947_v30, %v15725_v55  ;;  %v18714_v47 = vrot.slane %v10923_v62, %v15725_v55  ;;  %v18717_v36 = vrot.slane %v12948_v43, %v15725_v55  ;;  %v18719_v22 = vpop.f32.mrb[82].mxu1 }
0x1265   : > { %v18722_v3 = vrot.slane %v10771_v33, %v15725_v55  ;;  %v18725_v6 = vrot.slane %v12943_v32, %v15725_v55  ;;  %v18728_v0 = vrot.slane %v10787_v63, %v15725_v55  ;;  %v18731_v46 = vrot.slane %v12944_v29, %v15725_v55  ;;  %v10135_v34 = vpop.f32.mrb[83].mxu1 }
0x1266   : > { %v10455_v35 = vrot.slane %v10447_v40, %v15725_v55  ;;  %v10462_v28 = vrot.slane %v10448_v38, %v15725_v55  ;;  %v10319_v48 = vrot.slane %v10311_v9, %v15725_v55  ;;  %v10326_v58 = vrot.slane %v10312_v13, %v15725_v55 }
0x1267   : > { %v10635_v21 = vcombine.low %v18659_v18, %v13498_v16  ;;  %v10636_v51 = vcombine.high %v18659_v18, %v13498_v16  ;;  %v10499_v57 = vcombine.low %v18661_v41, %v10132_v54  ;;  %v10500_v4 = vcombine.high %v18661_v41, %v10132_v54 }
0x1268   : > { %v10463_v45 = vcombine.low %v18680_v59, %v10455_v35  ;;  %v10464_v50 = vcombine.high %v18680_v59, %v10455_v35  ;;  %v10479_v40 = vcombine.low %v18683_v60, %v10462_v28  ;;  %v10480_v38 = vcombine.high %v18683_v60, %v10462_v28 }
0x1269   : > { %v10327_v9 = vcombine.low %v18686_v56, %v10319_v48  ;;  %v10328_v13 = vcombine.high %v18686_v56, %v10319_v48  ;;  %v10343_v8 = vcombine.low %v18689_v17, %v10326_v58  ;;  %v10344_v18 = vcombine.high %v18689_v17, %v10326_v58  ;;  %v13508_v10 = vpop.f32.mrb[88].mxu0 }
0x126a   : > { %v10471_v27 = vrot.slane %v10463_v45, %v15732_v39  ;;  %v10478_v41 = vrot.slane %v10464_v50, %v15732_v39  ;;  %v10487_v61 = vrot.slane %v10479_v40, %v15732_v39  ;;  %v10494_v59 = vrot.slane %v10480_v38, %v15732_v39  ;;  %v10212_v49 = vpop.f32.mrb[89].mxu0 }
0x126b   : > { %v10335_v60 = vrot.slane %v10327_v9, %v15732_v39  ;;  %v10342_v2 = vrot.slane %v10328_v13, %v15732_v39  ;;  %v10351_v56 = vrot.slane %v10343_v8, %v15732_v39  ;;  %v10358_v19 = vrot.slane %v10344_v18, %v15732_v39  ;;  %v18757_v15 = vpop.f32.mrb[90].mxu0 }
0x126c   : > { %v10975_v17 = vcombine.low %v10471_v27, %v10478_v41  ;;  %v12949_v7 = vcombine.high %v10471_v27, %v10478_v41  ;;  %v10991_v30 = vcombine.low %v10487_v61, %v10494_v59  ;;  %v12950_v62 = vcombine.high %v10487_v61, %v10494_v59  ;;  %v18759_v43 = vpop.f32.mrb[91].mxu0 }
0x126d   : > { %v10839_v16 = vcombine.low %v10335_v60, %v10342_v2  ;;  %v12945_v33 = vcombine.high %v10335_v60, %v10342_v2  ;;  %v10855_v32 = vcombine.low %v10351_v56, %v10358_v19  ;;  %v12946_v63 = vcombine.high %v10351_v56, %v10358_v19 }
0x126e   : > { %v18762_v29 = vrot.slane %v10975_v17, %v15725_v55  ;;  %v18765_v54 = vrot.slane %v12949_v7, %v15725_v55  ;;  %v18768_v35 = vrot.slane %v10991_v30, %v15725_v55  ;;  %v18771_v28 = vrot.slane %v12950_v62, %v15725_v55 }
0x126f   : > { %v18774_v48 = vrot.slane %v10839_v16, %v15725_v55  ;;  %v18777_v58 = vrot.slane %v12945_v33, %v15725_v55  ;;  %v18780_v45 = vrot.slane %v10855_v32, %v15725_v55  ;;  %v18783_v50 = vrot.slane %v12946_v63, %v15725_v55 }
0x1270   : > { %v10643_v40 = vrot.slane %v10635_v21, %v15725_v55  ;;  %v10650_v38 = vrot.slane %v10636_v51, %v15725_v55  ;;  %v10507_v9 = vrot.slane %v10499_v57, %v15725_v55  ;;  %v10514_v13 = vrot.slane %v10500_v4, %v15725_v55 }
0x1271   : > { %v10703_v8 = vcombine.low %v18663_v5, %v18719_v22  ;;  %v10704_v18 = vcombine.high %v18663_v5, %v18719_v22  ;;  %v10567_v27 = vcombine.low %v18665_v20, %v10135_v34  ;;  %v10568_v41 = vcombine.high %v18665_v20, %v10135_v34 }
0x1272   : > { %v10651_v61 = vcombine.low %v18667_v42, %v13508_v10  ;;  %v10652_v21 = vcombine.high %v18667_v42, %v13508_v10  ;;  %v10515_v51 = vcombine.low %v18669_v31, %v10212_v49  ;;  %v10516_v57 = vcombine.high %v18669_v31, %v10212_v49 }
0x1273   : > { %v10711_v4 = vrot.slane %v10703_v8, %v15725_v55  ;;  %v18801_v59 = vrot.slane %v10704_v18, %v15725_v55  ;;  %v18804_v60 = vrot.slane %v10567_v27, %v15725_v55  ;;  %v18807_v5 = vrot.slane %v10568_v41, %v15725_v55 }
0x1274   : > { %v10659_v20 = vrot.slane %v10651_v61, %v15725_v55  ;;  %v10666_v22 = vrot.slane %v10652_v21, %v15725_v55  ;;  %v10523_v42 = vrot.slane %v10515_v51, %v15725_v55  ;;  %v10530_v34 = vrot.slane %v10516_v57, %v15725_v55 }
0x1275   : > { %v10719_v31 = vcombine.low %v18671_v11, %v18757_v15  ;;  %v10720_v10 = vcombine.high %v18671_v11, %v18757_v15  ;;  %v10583_v49 = vcombine.low %v18673_v24, %v18759_v43  ;;  %v10584_v2 = vcombine.high %v18673_v24, %v18759_v43 }
0x1276   : > { %v10667_v56 = vcombine.low %v10643_v40, %v10659_v20  ;;  %v10668_v19 = vcombine.high %v10643_v40, %v10659_v20  ;;  %v10683_v17 = vcombine.low %v10650_v38, %v10666_v22  ;;  %v10684_v7 = vcombine.high %v10650_v38, %v10666_v22 }
0x1277   : > { %v10531_v30 = vcombine.low %v10507_v9, %v10523_v42  ;;  %v10532_v62 = vcombine.high %v10507_v9, %v10523_v42  ;;  %v10547_v16 = vcombine.low %v10514_v13, %v10530_v34  ;;  %v10548_v33 = vcombine.high %v10514_v13, %v10530_v34 }
0x1278   : > { %v10675_v32 = vrot.slane %v10667_v56, %v15732_v39  ;;  %v10682_v63 = vrot.slane %v10668_v19, %v15732_v39  ;;  %v10691_v11 = vrot.slane %v10683_v17, %v15732_v39  ;;  %v10698_v15 = vrot.slane %v10684_v7, %v15732_v39 }
0x1279   : > { %v10539_v8 = vrot.slane %v10531_v30, %v15732_v39  ;;  %v10546_v24 = vrot.slane %v10532_v62, %v15732_v39  ;;  %v10555_v43 = vrot.slane %v10547_v16, %v15732_v39  ;;  %v10562_v40 = vrot.slane %v10548_v33, %v15732_v39 }
0x127a   : > { %v11179_v38 = vcombine.low %v10675_v32, %v10682_v63  ;;  %v12955_v9 = vcombine.high %v10675_v32, %v10682_v63  ;;  %v11195_v18 = vcombine.low %v10691_v11, %v10698_v15  ;;  %v12956_v13 = vcombine.high %v10691_v11, %v10698_v15 }
0x127b   : > { %v11043_v27 = vcombine.low %v10539_v8, %v10546_v24  ;;  %v12951_v41 = vcombine.high %v10539_v8, %v10546_v24  ;;  %v11059_v61 = vcombine.low %v10555_v43, %v10562_v40  ;;  %v12952_v21 = vcombine.high %v10555_v43, %v10562_v40 }
0x127c   : > { %v18830_v51 = vrot.slane %v11179_v38, %v15725_v55  ;;  %v18833_v57 = vrot.slane %v12955_v9, %v15725_v55  ;;  %v18836_v20 = vrot.slane %v11195_v18, %v15725_v55  ;;  %v18839_v22 = vrot.slane %v12956_v13, %v15725_v55 }
0x127d   : > { %v18842_v42 = vrot.slane %v11043_v27, %v15725_v55  ;;  %v18845_v34 = vrot.slane %v12951_v41, %v15725_v55  ;;  %v18848_v56 = vrot.slane %v11059_v61, %v15725_v55  ;;  %v18851_v19 = vrot.slane %v12952_v21, %v15725_v55 }
0x127e   : > { %v10727_v17 = vrot.slane %v10719_v31, %v15725_v55  ;;  %v10734_v7 = vrot.slane %v10720_v10, %v15725_v55  ;;  %v10591_v30 = vrot.slane %v10583_v49, %v15725_v55  ;;  %v10598_v62 = vrot.slane %v10584_v2, %v15725_v55 }
0x127f   : > { %v10940_v16 = vcombine.high %v18708_v1, %v18711_v52  ;;  %v10956_v33 = vcombine.high %v18714_v47, %v18717_v36  ;;  %v11008_v32 = vcombine.high %v18762_v29, %v18765_v54  ;;  %v11024_v63 = vcombine.high %v18768_v35, %v18771_v28 }
0x1280   : > { %v10735_v11 = vcombine.low %v10711_v4, %v10727_v17  ;;  %v10736_v31 = vcombine.high %v10711_v4, %v10727_v17  ;;  %v10751_v10 = vcombine.low %v18801_v59, %v10734_v7  ;;  %v10752_v49 = vcombine.high %v18801_v59, %v10734_v7 }
0x1281   : > { %v10599_v2 = vcombine.low %v18804_v60, %v10591_v30  ;;  %v10600_v15 = vcombine.high %v18804_v60, %v10591_v30  ;;  %v10615_v8 = vcombine.low %v18807_v5, %v10598_v62  ;;  %v10616_v24 = vcombine.high %v18807_v5, %v10598_v62 }
0x1282   : > { %v10743_v43 = vrot.slane %v10735_v11, %v15732_v39  ;;  %v10750_v40 = vrot.slane %v10736_v31, %v15732_v39  ;;  %v10759_v38 = vrot.slane %v10751_v10, %v15732_v39  ;;  %v10766_v4 = vrot.slane %v10752_v49, %v15732_v39 }
0x1283   : > { %v10607_v9 = vrot.slane %v10599_v2, %v15732_v39  ;;  %v10614_v59 = vrot.slane %v10600_v15, %v15732_v39  ;;  %v10623_v18 = vrot.slane %v10615_v8, %v15732_v39  ;;  %v10630_v60 = vrot.slane %v10616_v24, %v15732_v39  ;;  %v13925_v8 = vld [vmem:[#allocation17 + $0x8] sm:$0xff]  }
0x1284   : > { %v11247_v13 = vcombine.low %v10743_v43, %v10750_v40  ;;  %v12957_v27 = vcombine.high %v10743_v43, %v10750_v40  ;;  %v11263_v41 = vcombine.low %v10759_v38, %v10766_v4  ;;  %v12958_v5 = vcombine.high %v10759_v38, %v10766_v4  ;;  %13512 = vmatprep.subr.bf16.mxu1 %v13925_v8 }
0x1285   : > { %v11111_v61 = vcombine.low %v10607_v9, %v10614_v59  ;;  %v12953_v21 = vcombine.high %v10607_v9, %v10614_v59  ;;  %v11127_v17 = vcombine.low %v10623_v18, %v10630_v60  ;;  %v12954_v7 = vcombine.high %v10623_v18, %v10630_v60  ;;  %13513 = vmatpush3.bf16.msra.mxu1 %v13925_v8 }
0x1286   : > { %v18880_v30 = vrot.slane %v11247_v13, %v15725_v55  ;;  %v18883_v62 = vrot.slane %v12957_v27, %v15725_v55  ;;  %v18886_v11 = vrot.slane %v11263_v41, %v15725_v55  ;;  %v18889_v31 = vrot.slane %v12958_v5, %v15725_v55 }
0x1287   : > { %v18892_v10 = vrot.slane %v11111_v61, %v15725_v55  ;;  %v18895_v49 = vrot.slane %v12953_v21, %v15725_v55  ;;  %v18898_v2 = vrot.slane %v11127_v17, %v15725_v55  ;;  %v18901_v15 = vrot.slane %v12954_v7, %v15725_v55 }
0x1288   : > { %v10954_v24 = vrot.slane %v10940_v16, %v15732_v39  ;;  %v10970_v43 = vrot.slane %v10956_v33, %v15732_v39  ;;  %v11022_v40 = vrot.slane %v11008_v32, %v15732_v39  ;;  %v11038_v38 = vrot.slane %v11024_v63, %v15732_v39  ;;  %v13926_v63 = vld [vmem:[#allocation17 + $0x10] sm:$0xff]  }
0x1289   : > { %v10939_v4 = vcombine.low %v18708_v1, %v18711_v52  ;;  %v10955_v9 = vcombine.low %v18714_v47, %v18717_v36  ;;  %v11007_v59 = vcombine.low %v18762_v29, %v18765_v54  ;;  %v11023_v55 = vcombine.low %v18768_v35, %v18771_v28  ;;  %13514 = vmatprep.subr.bf16.mxu1 %v13926_v63 }
0x128a   : > { %v10973_v16 = vcombine.low %v10954_v24, %v10970_v43  ;;  %v11041_v18 = vcombine.low %v11022_v40, %v11038_v38  ;;  %v10804_v33 = vcombine.high %v18722_v3, %v18725_v6  ;;  %v10820_v32 = vcombine.high %v18728_v0, %v18731_v46  ;;  %13515 = vmatpush3.bf16.msra.mxu1 %v13926_v63 }
0x128b   : > { %v18920_v1 = vrot.slane %v10939_v4, %v15732_v39  ;;  %v18923_v52 = vrot.slane %v10955_v9, %v15732_v39  ;;  %v18926_v47 = vrot.slane %v11007_v59, %v15732_v39  ;;  %v18929_v36 = vrot.slane %v11023_v55, %v15732_v39 }
0x128c   : > { %v13841_v29 = vpack.i.bf16 %v11041_v18, %v10973_v16  ;;  %v10818_v54 = vrot.slane %v10804_v33, %v15732_v39  ;;  %v10834_v35 = vrot.slane %v10820_v32, %v15732_v39  ;;  %v10872_v28 = vcombine.high %v18774_v48, %v18777_v58  ;;  %v13927_v16 = vld [vmem:[#allocation17 + $0x18] sm:$0xff]  }
0x128d   : > { %v10972_v60 = vcombine.high %v18920_v1, %v18923_v52  ;;  %v11040_v13 = vcombine.high %v18926_v47, %v18929_v36  ;;  %v10888_v27 = vcombine.high %v18780_v45, %v18783_v50  ;;  %v10803_v41 = vcombine.low %v18722_v3, %v18725_v6  ;;  %13516 = vmatprep.subr.bf16.mxu1 %v13927_v16 }
0x128e   : > { %13842 = vrot.lane.b32.xlu0 %v13841_v29, %s19791_s7  ;;  %v10837_v5 = vcombine.low %v10818_v54, %v10834_v35  ;;  %v10886_v61 = vrot.slane %v10872_v28, %v15732_v39  ;;  %v10819_v21 = vcombine.low %v18728_v0, %v18731_v46  ;;  %v10871_v17 = vcombine.low %v18774_v48, %v18777_v58 }
0x128f   : > { %v13836_v7 = vpack.i.bf16 %v11040_v13, %v10972_v60  ;;  %v10902_v8 = vrot.slane %v10888_v27, %v15732_v39  ;;  %v18951_v4 = vrot.slane %v10803_v41, %v15732_v39  ;;  %v10887_v3 = vcombine.low %v18780_v45, %v18783_v50  ;;  %13517 = vmatpush3.bf16.msra.mxu1 %v13927_v16 }
0x1290   : > { %v18956_v6 = vrot.slane %v10819_v21, %v15732_v39  ;;  %v18959_v9 = vrot.slane %v10871_v17, %v15732_v39  ;;  %v10838_v0 = vcombine.high %v10818_v54, %v10834_v35  ;;  %v10974_v46 = vcombine.high %v10954_v24, %v10970_v43 }
0x1291   : > { %13837 = vrot.lane.b32.xlu1 %v13836_v7, %s19792_s8  ;;  %v10905_v48 = vcombine.low %v10886_v61, %v10902_v8  ;;  %v18963_v58 = vrot.slane %v10887_v3, %v15732_v39  ;;  %v10906_v59 = vcombine.high %v10886_v61, %v10902_v8  ;;  %v11042_v55 = vcombine.high %v11022_v40, %v11038_v38 }
0x1292   : > { %v10836_v45 = vcombine.high %v18951_v4, %v18956_v6  ;;  %v11211_v50 = vcombine.low %v18830_v51, %v18833_v57  ;;  %v11227_v18 = vcombine.low %v18836_v20, %v18839_v22  ;;  %v11279_v24 = vcombine.low %v18880_v30, %v18883_v62 }
0x1293   : > { %v13851_v43 = vpack.i.bf16 %v10905_v48, %v10837_v5  ;;  %v10904_v33 = vcombine.high %v18959_v9, %v18963_v58  ;;  %v13856_v32 = vpack.i.bf16 %v10906_v59, %v10838_v0  ;;  %v13861_v29 = vpack.i.bf16 %v11042_v55, %v10974_v46 }
0x1294   : > { %v18976_v40 = vrot.slane %v11211_v50, %v15732_v39  ;;  %v18979_v38 = vrot.slane %v11227_v18, %v15732_v39  ;;  %v18982_v54 = vrot.slane %v11279_v24, %v15732_v39  ;;  %v11295_v35 = vcombine.low %v18886_v11, %v18889_v31 }
0x1295   : > { %13852 = vrot.lane.b32.xlu1 %v13851_v43, %s19791_s7  ;;  %v13846_v28 = vpack.i.bf16 %v10904_v33, %v10836_v45  ;;  %v11075_v63 = vcombine.low %v18842_v42, %v18845_v34  ;;  %v11091_v60 = vcombine.low %v18848_v56, %v18851_v19  ;;  %v11143_v13 = vcombine.low %v18892_v10, %v18895_v49 }
0x1296   : > { %v11244_v27 = vcombine.high %v18976_v40, %v18979_v38  ;;  %v18996_v41 = vrot.slane %v11295_v35, %v15732_v39  ;;  %v11159_v5 = vcombine.low %v18898_v2, %v18901_v15  ;;  %v11212_v61 = vcombine.high %v18830_v51, %v18833_v57 }
0x1297   : > { %13847 = vrot.lane.b32.xlu0 %v13846_v28, %s19792_s8  ;;  %v19004_v21 = vrot.slane %v11075_v63, %v15732_v39  ;;  %v19007_v17 = vrot.slane %v11091_v60, %v15732_v39  ;;  %v19010_v7 = vrot.slane %v11143_v13, %v15732_v39  ;;  %v11228_v8 = vcombine.high %v18836_v20, %v18839_v22 }
0x1298   : > { %v11312_v3 = vcombine.high %v18982_v54, %v18996_v41  ;;  %v19017_v0 = vrot.slane %v11159_v5, %v15732_v39  ;;  %v11226_v51 = vrot.slane %v11212_v61, %v15732_v39  ;;  %v11280_v57 = vcombine.high %v18880_v30, %v18883_v62 }
0x1299   : > { %13857 = vrot.lane.b32.xlu1 %v13856_v32, %s19793_s1  ;;  %v11108_v46 = vcombine.high %v19004_v21, %v19007_v17  ;;  %v11242_v48 = vrot.slane %v11228_v8, %v15732_v39  ;;  %v11296_v20 = vcombine.high %v18886_v11, %v18889_v31  ;;  %v11076_v22 = vcombine.high %v18842_v42, %v18845_v34 }
0x129a   : > { %v13866_v59 = vpack.i.bf16 %v11312_v3, %v11244_v27  ;;  %v11176_v55 = vcombine.high %v19010_v7, %v19017_v0  ;;  %v11294_v16 = vrot.slane %v11280_v57, %v15732_v39  ;;  %v11092_v30 = vcombine.high %v18848_v56, %v18851_v19 }
0x129b   : > { %13862 = vrot.lane.b32.xlu0 %v13861_v29, %s19793_s1  ;;  %v11245_v62 = vcombine.low %v11226_v51, %v11242_v48  ;;  %v11310_v45 = vrot.slane %v11296_v20, %v15732_v39  ;;  %v11090_v50 = vrot.slane %v11076_v22, %v15732_v39  ;;  %v11144_v11 = vcombine.high %v18892_v10, %v18895_v49 }
0x129c   : > { %v13876_v42 = vpack.i.bf16 %v11176_v55, %v11108_v46  ;;  %v11106_v34 = vrot.slane %v11092_v30, %v15732_v39  ;;  %v11160_v31 = vcombine.high %v18898_v2, %v18901_v15  ;;  %v11246_v18 = vcombine.high %v11226_v51, %v11242_v48 }
0x129d   : > { %v11313_v24 = vcombine.low %v11294_v16, %v11310_v45  ;;  %v11158_v56 = vrot.slane %v11144_v11, %v15732_v39  ;;  %v11314_v19 = vcombine.high %v11294_v16, %v11310_v45  ;;  %v10971_v43 = vcombine.low %v18920_v1, %v18923_v52 }
0x129e   : > { %13877 = vrot.lane.b32.xlu1 %v13876_v42, %s19792_s8  ;;  %v11109_v33 = vcombine.low %v11090_v50, %v11106_v34  ;;  %v11174_v32 = vrot.slane %v11160_v31, %v15732_v39  ;;  %v11110_v10 = vcombine.high %v11090_v50, %v11106_v34  ;;  %v11039_v49 = vcombine.low %v18926_v47, %v18929_v36 }
0x129f   : > { %13867 = vrot.lane.b32.xlu0 %v13866_v59, %s19792_s8  ;;  %v13871_v2 = vpack.i.bf16 %v11313_v24, %v11245_v62  ;;  %v13891_v15 = vpack.i.bf16 %v11314_v19, %v11246_v18  ;;  %v10835_v29 = vcombine.low %v18951_v4, %v18956_v6  ;;  %v10903_v35 = vcombine.low %v18959_v9, %v18963_v58  ;;  %s19809_s8 = sld [smem:[#allocation85_spill]] }
0x12a0   : > { %v11177_v1 = vcombine.low %v11158_v56, %v11174_v32  ;;  %v11178_v52 = vcombine.high %v11158_v56, %v11174_v32  ;;  %v11243_v28 = vcombine.low %v18976_v40, %v18979_v38  ;;  %v11311_v39 = vcombine.low %v18982_v54, %v18996_v41 }
0x12a1   : > { %v11107_v47 = vcombine.low %v19004_v21, %v19007_v17  ;;  %v11175_v36 = vcombine.low %v19010_v7, %v19017_v0 }
0x12a2   : > { %v13881_v63 = vpack.i.bf16 %v11177_v1, %v11109_v33  ;;  %v13886_v60 = vpack.i.bf16 %v11178_v52, %v11110_v10 }
0x12a3   : > { %13872 = vrot.lane.b32.xlu0 %v13871_v2, %s19791_s7 }
0x12a4   : > { %13882 = vrot.lane.b32.xlu1 %v13881_v63, %s19791_s7 }
0x12a7   : > { %13892 = vrot.lane.b32.xlu0 %v13891_v15, %s19793_s1 }
0x12a8   : > { %13887 = vrot.lane.b32.xlu1 %v13886_v60, %s19793_s1  ;;  %s19522_s1 = scalar_lea.hbm %s19809_s8, %s13024_s3 }
0x1300   : > { %v13843_v6 = vpop.permute.xlu0 %13842 }
0x1301   : > { %v13845_v21 = vunpack.i.h.bf16 %v13843_v6  ;;  %v13844_v17 = vunpack.i.l.bf16 %v13843_v6 }
0x1303   : > { %v13838_v4 = vpop.permute.xlu1 %13837 }
0x1304   : > { %v13840_v9 = vunpack.i.h.bf16 %v13838_v4  ;;  %v13839_v58 = vunpack.i.l.bf16 %v13838_v4 }
0x1306   : > { %v11413_v5 = vsel %vm5053_vm3, %v10971_v43, %v13839_v58  ;;  %v11414_v61 = vsel %vm5053_vm3, %v11039_v49, %v13840_v9 }
0x1307   : > { %v13853_v40 = vpop.permute.xlu1 %13852  ;;  %v11422_v16 = vsel %vm7278_vm4, %v11414_v61, %v13845_v21  ;;  %v11421_v30 = vsel %vm7278_vm4, %v11413_v5, %v13844_v17 }
0x1308   : > { %v13855_v38 = vunpack.i.h.bf16 %v13853_v40  ;;  %v13854_v54 = vunpack.i.l.bf16 %v13853_v40 }
0x1309   : > { %v13848_v13 = vpop.permute.xlu0 %13847 }
0x130a   : > { %v13850_v27 = vunpack.i.h.bf16 %v13848_v13  ;;  %v13849_v41 = vunpack.i.l.bf16 %v13848_v13 }
0x130b   : > { %v13858_v7 = vpop.permute.xlu1 %13857 }
0x130c   : > { %v11412_v8 = vsel %vm5053_vm3, %v10903_v35, %v13850_v27  ;;  %v11411_v3 = vsel %vm5053_vm3, %v10835_v29, %v13849_v41  ;;  %v13860_v0 = vunpack.i.h.bf16 %v13858_v7  ;;  %v13859_v51 = vunpack.i.l.bf16 %v13858_v7  ;;  %v12959_v27 = vld [vmem:[#allocation19] ss:$0 sm:$0xff] }
0x130d   : > { %v11419_v57 = vsel %vm7278_vm4, %v11411_v3, %v13854_v54  ;;  %v11420_v46 = vsel %vm7278_vm4, %v11412_v8, %v13855_v38  ;;  %v13863_v48 = vpop.permute.xlu0 %13862 }
0x130e   : > { %v11427_v20 = vsel %vm7287_vm5, %v11419_v57, %v13859_v51  ;;  %v11428_v22 = vsel %vm7287_vm5, %v11420_v46, %v13860_v0  ;;  %v13865_v59 = vunpack.i.h.bf16 %v13863_v48  ;;  %v13864_v55 = vunpack.i.l.bf16 %v13863_v48 }
0x130f   : > { %v11435_v62 = vpack.c.bf16 %v11428_v22, %v11427_v20 }
0x1310   : > { %v11429_v45 = vsel %vm7287_vm5, %v11421_v30, %v13864_v55  ;;  %v11430_v50 = vsel %vm7287_vm5, %v11422_v16, %v13865_v59  ;;  %v13878_v11 = vpop.permute.xlu1 %13877 }
0x1311   : > { %v11436_v42 = vpack.c.bf16 %v11430_v50, %v11429_v45  ;;  %13518 = vmatprep.mubr.msk.bf16.mxu1 %vm882_vm1, %v11435_v62  ;;  %v13868_v34 = vpop.permute.xlu0 %13867  ;;  %v13880_v31 = vunpack.i.h.bf16 %v13878_v11  ;;  %v13879_v18 = vunpack.i.l.bf16 %v13878_v11 }
0x1312   : > { %v13870_v56 = vunpack.i.h.bf16 %v13868_v34  ;;  %v13869_v19 = vunpack.i.l.bf16 %v13868_v34  ;;  %v19794_v34 = vld [vmem:[#allocation67_spill] sm:$0xff] }
0x1313   : > { %13519 = vmatmul.mubr.msk.bf16.vlgmr.msra.gmra.mrb[84].mxu1 %vm882_vm1, %v11436_v42  ;;  %v11415_v2 = vsel %vm5053_vm3, %v11107_v47, %v13879_v18  ;;  %v11416_v15 = vsel %vm5053_vm3, %v11175_v36, %v13880_v31 }
0x1314   : > { %v11418_v35 = vsel %vm5053_vm3, %v11311_v39, %v13870_v56  ;;  %v11417_v1 = vsel %vm5053_vm3, %v11243_v28, %v13869_v19 }
0x1315   : > { %v13873_v24 = vpop.permute.xlu0 %13872 }
0x1316   : > { %v13883_v43 = vpop.permute.xlu1 %13882  ;;  %v13875_v33 = vunpack.i.h.bf16 %v13873_v24  ;;  %v13874_v32 = vunpack.i.l.bf16 %v13873_v24 }
0x1317   : > { %v13885_v10 = vunpack.i.h.bf16 %v13883_v43  ;;  %v13884_v49 = vunpack.i.l.bf16 %v13883_v43 }
0x1318   : > { %v11425_v4 = vsel %vm7278_vm4, %v11417_v1, %v13874_v32  ;;  %v11426_v6 = vsel %vm7278_vm4, %v11418_v35, %v13875_v33 }
0x1319   : > { %v13893_v29 = vpop.permute.xlu0 %13892  ;;  %v11423_v40 = vsel %vm7278_vm4, %v11415_v2, %v13884_v49  ;;  %v11424_v47 = vsel %vm7278_vm4, %v11416_v15, %v13885_v10 }
0x131a   : > { %v13895_v52 = vunpack.i.h.bf16 %v13893_v29  ;;  %v13894_v63 = vunpack.i.l.bf16 %v13893_v29  ;;  %v13888_v60 = vpop.permute.xlu1 %13887 }
0x131b   : > { %v13890_v9 = vunpack.i.h.bf16 %v13888_v60  ;;  %v13889_v58 = vunpack.i.l.bf16 %v13888_v60 }
0x131c   : > { %v11433_v36 = vsel %vm7287_vm5, %v11425_v4, %v13894_v63  ;;  %v11434_v38 = vsel %vm7287_vm5, %v11426_v6, %v13895_v52 }
0x131d   : > { %v11438_v39 = vpack.c.bf16 %v11434_v38, %v11433_v36  ;;  %v11431_v28 = vsel %vm7287_vm5, %v11423_v40, %v13889_v58  ;;  %v11432_v54 = vsel %vm7287_vm5, %v11424_v47, %v13890_v9 }
0x131e   : > { %v11437_v13 = vpack.c.bf16 %v11432_v54, %v11431_v28 }
0x1320   : > { %13522 = vmatprep.mubr.msk.bf16.mxu1 %vm882_vm1, %v11437_v13 }
0x1321   : > { %13523 = vmatmul.mubr.msk.bf16.gmra.mrb[88].mxu1 %vm882_vm1, %v11438_v39 }
0x1322   : > { %11906 = vmatprep.mubr.bf16.mxu1 %v19790_v25 }
0x13e6   : > { %v13520_v41 = vpop.f32.mrb[84].mxu1 }
0x13e7   : > { %v11524_v5 = vpop.f32.mrb[85].mxu1  ;;  %v11533_v8 = vadd.f32 %v13520_v41, %v12959_v27 }
0x13e8   : > { %v11525_v61 = vadd.f32 %v12959_v27, %v11524_v5  ;;  %v13521_v21 = vpop.f32.mrb[86].mxu1 }
0x13e9   : > { %v11536_v17 = vadd.f32 %v13521_v21, %v12959_v27  ;;  %v11527_v7 = vpop.f32.mrb[87].mxu1  ;;  %v19108_v48 = vadd.f32 %v11533_v8, %v17723_v37 }
0x13ea   : > { %v19097_v3 = vadd.f32 %v11525_v61, %v17720_v53  ;;  %v11528_v0 = vadd.f32 %v12959_v27, %v11527_v7 }
0x13eb   : > { %v19100_v51 = vadd.f32 %v11536_v17, %v17733_v14  ;;  %v11569_v14 = vsel %vm882_vm1, %v19108_v48, 0.0 }
0x13ec   : > { %v19103_v57 = vadd.f32 %v11528_v0, %v17726_v44  ;;  %v11563_v46 = vsel %vm882_vm1, %v19097_v3, 0.0 }
0x13ed   : > { %11564 = vadd.xlane.f32.xlu1 %v11563_v46  ;;  %v11572_v53 = vsel %vm882_vm1, %v19100_v51, 0.0 }
0x13ee   : > { %v11566_v20 = vsel %vm882_vm1, %v19103_v57, 0.0 }
0x13ef   : > { %11567 = vadd.xlane.f32.xlu0 %v11566_v20 }
0x13f1   : > { %11573 = vadd.xlane.f32.xlu1 %v11572_v53  ;;  %v13928_v53 = vld [vmem:[#allocation20] ss:$16 sps:$4 sm:$0xff]  }
0x13f3   : > { %11570 = vadd.xlane.f32.xlu0 %v11569_v14  ;;  %v13930_v14 = vld [vmem:[#allocation20 + $0x4] ss:$16 sps:$4 sm:$0xff]  }
0x13f4   : > { %v13524_v44 = vpop.f32.mrb[88].mxu1  ;;  %11801 = vmatprep.subr.bf16.mxu0 %v13930_v14 }
0x13f5   : > { %v11540_v22 = vpop.f32.mrb[89].mxu1  ;;  %v11549_v59 = vadd.f32 %v13524_v44, %v12959_v27  ;;  %v13931_v44 = vld [vmem:[#allocation20 + $0x8] ss:$16 sps:$4 sm:$0xff]   ;;  %11802 = vmatpush1.bf16.msra.mxu0 %v13928_v53 }
0x13f6   : > { %v11541_v55 = vadd.f32 %v12959_v27, %v11540_v22  ;;  %v13525_v16 = vpop.f32.mrb[90].mxu1  ;;  %v13933_v22 = vld [vmem:[#allocation20 + $0xc] ss:$16 sps:$4 sm:$0xff]  }
0x13f7   : > { %v11543_v30 = vpop.f32.mrb[91].mxu1  ;;  %v11552_v62 = vadd.f32 %v13525_v16, %v12959_v27  ;;  %v19120_v50 = vadd.f32 %v11549_v59, %v17743_v23  ;;  %v13936_v59 = vld [vmem:[#allocation20 + $0x24] ss:$16 sps:$4 sm:$0xff]   ;;  %11874 = vmatprep.subr.bf16.mxu1 %v13933_v22  ;;  %v13934_v16 = vld [vmem:[#allocation20 + $0x20] ss:$16 sps:$4 sm:$0xff]  }
0x13f8   : > { %v19117_v37 = vadd.f32 %v11541_v55, %v17738_v12  ;;  %v11544_v45 = vadd.f32 %v12959_v27, %v11543_v30  ;;  %v13939_v55 = vld [vmem:[#allocation20 + $0x2c] ss:$16 sps:$4 sm:$0xff]   ;;  %11875 = vmatpush1.bf16.msra.mxu1 %v13931_v44  ;;  %11803 = vmatprep.subr.bf16.mxu0 %v13936_v59  ;;  %v13937_v30 = vld [vmem:[#allocation20 + $0x28] ss:$16 sps:$4 sm:$0xff]  }
0x13f9   : > { %v19128_v31 = vadd.f32 %v11552_v62, %v19794_v34  ;;  %v11581_v12 = vsel %vm882_vm1, %v19120_v50, 0.0  ;;  %v13942_v62 = vld [vmem:[#allocation20 + $0x44] ss:$16 sps:$4 sm:$0xff]   ;;  %11876 = vmatprep.subr.bf16.mxu1 %v13939_v55  ;;  %11804 = vmatpush1.bf16.msra.mxu0 %v13934_v16  ;;  %v13943_v34 = vld [vmem:[#allocation20 + $0x48] ss:$16 sps:$4 sm:$0xff]  }
0x13fa   : > { %v19123_v11 = vadd.f32 %v11544_v45, %v17746_v26  ;;  %v11575_v42 = vsel %vm882_vm1, %v19117_v37, 0.0  ;;  %v13945_v45 = vld [vmem:[#allocation20 + $0x4c] ss:$16 sps:$4 sm:$0xff]   ;;  %11805 = vmatprep.subr.bf16.mxu0 %v13942_v62 }
0x13fb   : > { %11576 = vadd.xlane.f32.xlu0 %v11575_v42  ;;  %v11584_v23 = vsel %vm882_vm1, %v19128_v31, 0.0  ;;  %v13940_v42 = vld [vmem:[#allocation20 + $0x40] ss:$16 sps:$4 sm:$0xff]  }
0x13fc   : > { %v11578_v18 = vsel %vm882_vm1, %v19123_v11, 0.0  ;;  %11877 = vmatpush1.bf16.msra.mxu1 %v13937_v30 }
0x13fd   : > { %11579 = vadd.xlane.f32.xlu1 %v11578_v18  ;;  %v13948_v18 = vld [vmem:[#allocation20 + $0x64] ss:$16 sps:$4 sm:$0xff]   ;;  %11878 = vmatprep.subr.bf16.mxu1 %v13945_v45 }
0x13fe   : > { %11806 = vmatpush1.bf16.msra.mxu0 %v13940_v42  ;;  %v13957_v45 = vld [vmem:[%s19795_s21 + $0x10] sm:$0xff]   ;;  %v13958_v42 = vld [vmem:[%s19795_s21 + $0x58] sm:$0xff]  }
0x13ff   : > { %11582 = vadd.xlane.f32.xlu0 %v11581_v12  ;;  %v13951_v12 = vld [vmem:[#allocation20 + $0x6c] ss:$16 sps:$4 sm:$0xff]   ;;  %11807 = vmatprep.subr.bf16.mxu0 %v13948_v18 }
0x1400   : > { %11879 = vmatpush1.bf16.msra.mxu1 %v13943_v34  ;;  %v13959_v34 = vld [vmem:[%s19795_s21 + $0x18] sm:$0xff]   ;;  %v13960_v18 = vld [vmem:[%s19795_s21 + $0x60] sm:$0xff]  }
0x1401   : > { %11585 = vadd.xlane.f32.xlu1 %v11584_v23  ;;  %v13946_v23 = vld [vmem:[#allocation20 + $0x60] ss:$16 sps:$4 sm:$0xff]   ;;  %11880 = vmatprep.subr.bf16.mxu1 %v13951_v12 }
0x1402   : > { %11808 = vmatpush1.bf16.msra.mxu0 %v13946_v23  ;;  %v13961_v12 = vld [vmem:[%s19795_s21 + $0x20] sm:$0xff]   ;;  %v13962_v23 = vld [vmem:[%s19795_s21 + $0x68] sm:$0xff]  }
0x147a   : > { %v11565_v26 = vpop.xlane.xlu1 %11564 }
0x147b   : > { %v11587_v24 = vmul.f32 0.015625, %v11565_v26  ;;  %v13949_v26 = vld [vmem:[#allocation20 + $0x68] ss:$16 sps:$4 sm:$0xff]  }
0x147c   : > { %v11568_v56 = vpop.xlane.xlu0 %11567  ;;  %11881 = vmatpush1.bf16.msra.mxu1 %v13949_v26  ;;  %v13963_v26 = vld [vmem:[%s19795_s21 + $0x28] sm:$0xff]  }
0x147d   : > { %v19137_v19 = vsub.f32 %v19097_v3, %v11587_v24  ;;  %v11588_v43 = vmul.f32 0.015625, %v11568_v56 }
0x147e   : > { %v11574_v33 = vpop.xlane.xlu1 %11573 }
0x147f   : > { %v19140_v32 = vsub.f32 %v19103_v57, %v11588_v43  ;;  %v11590_v10 = vmul.f32 0.015625, %v11574_v33  ;;  %v11603_v49 = vmul.f32 %v19137_v19, %v19137_v19 }
0x1480   : > { %v11571_v2 = vpop.xlane.xlu0 %11570 }
0x1481   : > { %v19145_v15 = vsub.f32 %v19100_v51, %v11590_v10  ;;  %v11589_v29 = vmul.f32 0.015625, %v11571_v2  ;;  %v11611_v35 = vsel %vm882_vm1, %v11603_v49, 0.0  ;;  %v11604_v1 = vmul.f32 %v19140_v32, %v19140_v32 }
0x1482   : > { %11612 = vadd.xlane.f32.xlu0 %v11611_v35 }
0x1483   : > { %v19151_v52 = vsub.f32 %v19108_v48, %v11589_v29  ;;  %v11614_v63 = vsel %vm882_vm1, %v11604_v1, 0.0  ;;  %v11606_v60 = vmul.f32 %v19145_v15, %v19145_v15 }
0x1484   : > { %11615 = vadd.xlane.f32.xlu1 %v11614_v63 }
0x1485   : > { %v11605_v4 = vmul.f32 %v19151_v52, %v19151_v52  ;;  %v11620_v9 = vsel %vm882_vm1, %v11606_v60, 0.0 }
0x1487   : > { %v11617_v6 = vsel %vm882_vm1, %v11605_v4, 0.0 }
0x1488   : > { %11618 = vadd.xlane.f32.xlu0 %v11617_v6  ;;  %11621 = vadd.xlane.f32.xlu1 %v11620_v9  ;;  %v11577_v58 = vpop.xlane.xlu0 %11576 }
0x1489   : > { %v11591_v40 = vmul.f32 0.015625, %v11577_v58 }
0x148a   : > { %v11580_v47 = vpop.xlane.xlu1 %11579 }
0x148b   : > { %v19161_v36 = vsub.f32 %v19117_v37, %v11591_v40  ;;  %v11592_v38 = vmul.f32 0.015625, %v11580_v47 }
0x148c   : > { %v11583_v39 = vpop.xlane.xlu0 %11582 }
0x148d   : > { %v19164_v28 = vsub.f32 %v19123_v11, %v11592_v38  ;;  %v11593_v54 = vmul.f32 0.015625, %v11583_v39  ;;  %v11607_v13 = vmul.f32 %v19161_v36, %v19161_v36 }
0x148e   : > { %v11586_v27 = vpop.xlane.xlu1 %11585 }
0x148f   : > { %v19169_v41 = vsub.f32 %v19120_v50, %v11593_v54  ;;  %v11594_v5 = vmul.f32 0.015625, %v11586_v27  ;;  %v11623_v61 = vsel %vm882_vm1, %v11607_v13, 0.0  ;;  %v11608_v21 = vmul.f32 %v19164_v28, %v19164_v28 }
0x1490   : > { %11624 = vadd.xlane.f32.xlu0 %v11623_v61 }
0x1491   : > { %v19175_v17 = vsub.f32 %v19128_v31, %v11594_v5  ;;  %v11626_v7 = vsel %vm882_vm1, %v11608_v21, 0.0  ;;  %v11609_v8 = vmul.f32 %v19169_v41, %v19169_v41 }
0x1492   : > { %11627 = vadd.xlane.f32.xlu1 %v11626_v7 }
0x1493   : > { %v11629_v0 = vsel %vm882_vm1, %v11609_v8, 0.0  ;;  %v11610_v46 = vmul.f32 %v19175_v17, %v19175_v17 }
0x1494   : > { %11630 = vadd.xlane.f32.xlu0 %v11629_v0 }
0x1495   : > { %v11632_v20 = vsel %vm882_vm1, %v11610_v46, 0.0 }
0x1496   : > { %11633 = vadd.xlane.f32.xlu1 %v11632_v20 }
0x150f   : > { %v11613_v24 = vpop.xlane.xlu0 %11612 }
0x1510   : > { %v11635_v56 = vmul.f32 0.015625, %v11613_v24  ;;  %v13964_v24 = vld [vmem:[%s19795_s21 + $0x70] sm:$0xff]  }
0x1511   : > { %v11616_v43 = vpop.xlane.xlu1 %11615 }
0x1512   : > { %v11643_v33 = vadd.f32 1e-05, %v11635_v56  ;;  %v11636_v10 = vmul.f32 0.015625, %v11616_v43  ;;  %v13965_v56 = vld [vmem:[%s19795_s21 + $0x30] sm:$0xff]   ;;  %v13966_v43 = vld [vmem:[%s19795_s21 + $0x78] sm:$0xff]  }
0x1514   : > { %14262 = vrsqrt.f32 %v11643_v33  ;;  %v11644_v49 = vadd.f32 1e-05, %v11636_v10  ;;  %v13967_v33 = vld [vmem:[%s19795_s21 + $0x38] sm:$0xff]   ;;  %v13968_v10 = vld [vmem:[%s19796_s26] sm:$0xff]  }
0x1515   : > { %v11619_v2 = vpop.xlane.xlu0 %11618  ;;  %v11622_v29 = vpop.xlane.xlu1 %11621  ;;  %13526 = vmatprep.subr.bf16.mxu1 %v13968_v10 }
0x1516   : > { %14264 = vrsqrt.f32 %v11644_v49  ;;  %v11637_v35 = vmul.f32 0.015625, %v11619_v2  ;;  %v11638_v1 = vmul.f32 0.015625, %v11622_v29  ;;  %v13969_v49 = vld [vmem:[%s19796_s26 + $0x8] sm:$0xff]   ;;  %v19797_v2 = vld [vmem:[#allocation46_spill] sm:$0xff] }
0x1517   : > { %v11699_v29 = vsub.s32 2, %v19797_v2 }
0x1518   : > { %v11645_v63 = vadd.f32 1e-05, %v11637_v35  ;;  %v11646_v60 = vadd.f32 1e-05, %v11638_v1  ;;  %v11687_v35 = vld [vmem:[#allocation22] sm:$0xf] }
0x1519   : > { %v11703_v1 = vsub.s32 3, %v19797_v2 }
0x151a   : > { %14266 = vrsqrt.f32 %v11645_v63  ;;  %v19262_v63 = vrot.slane %v11687_v35, %v11699_v29 }
0x151b   : > { %14268 = vrsqrt.f32 %v11646_v60  ;;  %v19264_v60 = vrot.slane %v11687_v35, %v11703_v1 }
0x151d   : > { %v11625_v4 = vpop.xlane.xlu0 %11624 }
0x151e   : > { %v14263_v6 = vpop.eup %14262  ;;  %v11639_v9 = vmul.f32 0.015625, %v11625_v4 }
0x151f   : > { %v11628_v58 = vpop.xlane.xlu1 %11627  ;;  %v11659_v39 = vmul.f32 %v14263_v6, %v19137_v19 }
0x1520   : > { %v14265_v40 = vpop.eup %14264  ;;  %v11647_v47 = vadd.f32 1e-05, %v11639_v9  ;;  %v11640_v38 = vmul.f32 0.015625, %v11628_v58 }
0x1521   : > { %v11660_v54 = vmul.f32 %v14265_v40, %v19140_v32  ;;  %v11631_v13 = vpop.xlane.xlu0 %11630 }
0x1522   : > { %14270 = vrsqrt.f32 %v11647_v47  ;;  %v11648_v27 = vadd.f32 1e-05, %v11640_v38  ;;  %v11641_v7 = vmul.f32 0.015625, %v11631_v13 }
0x1523   : > { %v11667_v5 = vpack.c.bf16 %v11660_v54, %v11659_v39  ;;  %v11634_v61 = vpop.xlane.xlu1 %11633 }
0x1524   : > { %v14267_v21 = vpop.eup %14266  ;;  %14272 = vrsqrt.f32 %v11648_v27  ;;  %v11642_v8 = vmul.f32 0.015625, %v11634_v61  ;;  %v11649_v20 = vadd.f32 1e-05, %v11641_v7 }
0x1525   : > { %v14269_v0 = vpop.eup %14268  ;;  %12984 = vmatmul.mubr.msk.bf16.vlgmr.msra.gmra.mrb[92].mxu0 %vm882_vm1, %v11667_v5  ;;  %12988 = vmatmul.mubr.msk.bf16.vlgmr.msra.gmra.mrb[92].mxu1 %vm882_vm1, %v11667_v5  ;;  %v11661_v19 = vmul.f32 %v14267_v21, %v19151_v52 }
0x1526   : > { %v11650_v46 = vadd.f32 1e-05, %v11642_v8  ;;  %11843 = vmatprep.mubr.bf16.mxu0 %v19790_v25  ;;  %11916 = vmatprep.mubr.bf16.mxu1 %v19790_v25  ;;  %v11662_v32 = vmul.f32 %v14269_v0, %v19145_v15 }
0x1527   : > { %13527 = vmatpush3.bf16.msra.mxu1 %v13968_v10 }
0x1528   : > { %14274 = vrsqrt.f32 %v11650_v46  ;;  %v11668_v53 = vpack.c.bf16 %v11662_v32, %v11661_v19  ;;  %13528 = vmatprep.subr.bf16.mxu1 %v13969_v49 }
0x1529   : > { %14276 = vrsqrt.f32 %v11649_v20 }
0x152b   : > { %13529 = vmatpush3.bf16.msra.mxu1 %v13969_v49 }
0x152c   : > { %v14271_v14 = vpop.eup %14270 }
0x152d   : > { %12985 = vmatmul.mubr.msk.bf16.gmra.mrb[96].mxu0 %vm882_vm1, %v11668_v53  ;;  %12989 = vmatmul.mubr.msk.bf16.gmra.mrb[96].mxu1 %vm882_vm1, %v11668_v53  ;;  %v11663_v22 = vmul.f32 %v14271_v14, %v19161_v36  ;;  %v13952_v36 = vld [vmem:[%s19795_s21 + $0x40] sm:$0xff]  }
0x152e   : > { %v14273_v44 = vpop.eup %14272  ;;  %11853 = vmatprep.mubr.bf16.mxu0 %v19790_v25  ;;  %11926 = vmatprep.mubr.bf16.mxu1 %v19790_v25 }
0x152f   : > { %v11664_v52 = vmul.f32 %v14273_v44, %v19164_v28  ;;  %v13953_v28 = vld [vmem:[%s19795_s21] sm:$0xff]   ;;  %13175 = vmatprep.subr.bf16.mxu0 %v13952_v36 }
0x1530   : > { %13176 = vmatpush3.bf16.msra.mxu0 %v13953_v28 }
0x1531   : > { %v11669_v59 = vpack.c.bf16 %v11664_v52, %v11663_v22 }
0x1532   : > { %v14275_v15 = vpop.eup %14274 }
0x1533   : > { %v14277_v55 = vpop.eup %14276  ;;  %v11666_v16 = vmul.f32 %v14275_v15, %v19175_v17  ;;  %v13956_v17 = vld [vmem:[%s19795_s21 + $0x50] sm:$0xff]  }
0x1534   : > { %v11665_v30 = vmul.f32 %v14277_v55, %v19169_v41  ;;  %v13955_v41 = vld [vmem:[%s19795_s21 + $0x8] sm:$0xff]  }
0x1535   : > { %12986 = vmatmul.mubr.msk.bf16.gmra.mrb[100].mxu0 %vm882_vm1, %v11669_v59  ;;  %12990 = vmatmul.mubr.msk.bf16.gmra.mrb[100].mxu1 %vm882_vm1, %v11669_v59 }
0x1536   : > { %11863 = vmatprep.mubr.bf16.mxu0 %v19790_v25  ;;  %11936 = vmatprep.mubr.bf16.mxu1 %v19790_v25  ;;  %v11670_v62 = vpack.c.bf16 %v11666_v16, %v11665_v30  ;;  %v13954_v25 = vld [vmem:[%s19795_s21 + $0x48] sm:$0xff]  }
0x1537   : > { %13177 = vmatprep.subr.bf16.mxu0 %v13954_v25 }
0x1538   : > { %13178 = vmatpush3.bf16.msra.mxu0 %v13955_v41 }
0x1539   : > { %13179 = vmatprep.subr.bf16.mxu0 %v13956_v17 }
0x153c   : > { %13180 = vmatpush3.bf16.msra.mxu0 %v13957_v45 }
0x153d   : > { %12987 = vmatmul.mubr.msk.bf16.gmra.mrb[104].mxu0 %vm882_vm1, %v11670_v62  ;;  %12991 = vmatmul.mubr.msk.bf16.gmra.mrb[104].mxu1 %vm882_vm1, %v11670_v62 }
0x153e   : > { %13181 = vmatprep.subr.bf16.mxu0 %v13958_v42 }
0x1540   : > { %13182 = vmatpush3.bf16.msra.mxu0 %v13959_v34  ;;  %v19798_v34 = vld [vmem:[#allocation47_spill] sm:$0xff] }
0x1541   : > { %13183 = vmatprep.subr.bf16.mxu0 %v13960_v18  ;;  %v19312_v18 = vrot.slane %v11687_v35, %v19798_v34 }
0x1544   : > { %13184 = vmatpush3.bf16.msra.mxu0 %v13961_v12  ;;  %v19799_v12 = vld [vmem:[#allocation48_spill] sm:$0xff] }
0x1545   : > { %13185 = vmatprep.subr.bf16.mxu0 %v13962_v23  ;;  %v19315_v23 = vrot.slane %v11687_v35, %v19799_v12 }
0x1548   : > { %13186 = vmatpush3.bf16.msra.mxu0 %v13963_v26 }
0x1549   : > { %13187 = vmatprep.subr.bf16.mxu0 %v13964_v24 }
0x154c   : > { %13188 = vmatpush3.bf16.msra.mxu0 %v13965_v56 }
0x154d   : > { %13189 = vmatprep.subr.bf16.mxu0 %v13966_v43 }
0x1550   : > { %13190 = vmatpush3.bf16.msra.mxu0 %v13967_v33 }
0x15f8   : > { %v11835_v4 = vpop.f32.mrb[92].mxu0  ;;  %v11908_v6 = vpop.f32.mrb[92].mxu1 }
0x15f9   : > { %v19267_v9 = vadd.f32 %v11908_v6, %v19262_v63  ;;  %v11837_v58 = vpop.f32.mrb[93].mxu0  ;;  %v11910_v40 = vpop.f32.mrb[93].mxu1  ;;  %v19331_v1 = vadd.f32 %v11835_v4, %v19312_v18 }
0x15fa   : > { %v19270_v47 = vadd.f32 %v11910_v40, %v19264_v60  ;;  %v11839_v38 = vpop.f32.mrb[94].mxu0  ;;  %v11912_v39 = vpop.f32.mrb[94].mxu1  ;;  %v19334_v6 = vadd.f32 %v11837_v58, %v19315_v23 }
0x15fb   : > { %v11947_v54 = vmul.f32 %v19267_v9, %v19267_v9  ;;  %v19275_v13 = vadd.f32 %v11912_v39, %v19262_v63  ;;  %v19277_v27 = vpop.f32.mrb[95].mxu0  ;;  %v11914_v5 = vpop.f32.mrb[95].mxu1  ;;  %v19348_v58 = vadd.f32 %v11839_v38, %v19312_v18 }
0x15fc   : > { %v11948_v61 = vmul.f32 %v19270_v47, %v19270_v47  ;;  %v19282_v21 = vadd.f32 %v11914_v5, %v19264_v60 }
0x15fd   : > { %v11963_v7 = vmul.f32 %v11947_v54, %v19267_v9  ;;  %v11949_v8 = vmul.f32 %v19275_v13, %v19275_v13 }
0x15fe   : > { %v11964_v0 = vmul.f32 %v11948_v61, %v19270_v47  ;;  %v11950_v46 = vmul.f32 %v19282_v21, %v19282_v21 }
0x15ff   : > { %v11979_v19 = vmul.f32 0.044715, %v11963_v7  ;;  %v11965_v32 = vmul.f32 %v11949_v8, %v19275_v13 }
0x1600   : > { %v11980_v20 = vmul.f32 0.044715, %v11964_v0  ;;  %v11966_v53 = vmul.f32 %v11950_v46, %v19282_v21  ;;  %v19292_v14 = vpop.f32.mrb[96].mxu0  ;;  %v11918_v44 = vpop.f32.mrb[96].mxu1 }
0x1601   : > { %v11995_v22 = vadd.f32 %v11979_v19, %v19267_v9  ;;  %v11981_v52 = vmul.f32 0.044715, %v11965_v32  ;;  %v19296_v59 = vadd.f32 %v11918_v44, %v19262_v63  ;;  %v19298_v15 = vpop.f32.mrb[97].mxu0  ;;  %v11920_v55 = vpop.f32.mrb[97].mxu1  ;;  %v19374_v12 = vadd.f32 %v19292_v14, %v19312_v18 }
0x1602   : > { %v11982_v16 = vmul.f32 0.044715, %v11966_v53  ;;  %v19301_v30 = vadd.f32 %v11920_v55, %v19264_v60  ;;  %v19303_v62 = vpop.f32.mrb[98].mxu0  ;;  %v11922_v36 = vpop.f32.mrb[98].mxu1  ;;  %v11996_v25 = vadd.f32 %v11980_v20, %v19270_v47 }
0x1603   : > { %v12011_v28 = vmul.f32 0.7978846, %v11995_v22  ;;  %v11997_v41 = vadd.f32 %v11981_v52, %v19275_v13  ;;  %v11951_v17 = vmul.f32 %v19296_v59, %v19296_v59  ;;  %v19309_v45 = vpop.f32.mrb[99].mxu0  ;;  %v11924_v42 = vpop.f32.mrb[99].mxu1  ;;  %v19320_v24 = vadd.f32 %v11922_v36, %v19262_v63 }
0x1604   : > { %v11952_v26 = vmul.f32 %v19301_v30, %v19301_v30  ;;  %v11998_v43 = vadd.f32 %v11982_v16, %v19282_v21  ;;  %v12012_v2 = vmul.f32 0.7978846, %v11996_v25  ;;  %v19328_v35 = vadd.f32 %v11924_v42, %v19264_v60 }
0x1605   : > { %14278 = vtanh.f32 %v12011_v28  ;;  %v12013_v56 = vmul.f32 0.7978846, %v11997_v41  ;;  %v11967_v33 = vmul.f32 %v11951_v17, %v19296_v59  ;;  %v11953_v49 = vmul.f32 %v19320_v24, %v19320_v24 }
0x1606   : > { %v11968_v10 = vmul.f32 %v11952_v26, %v19301_v30  ;;  %v12014_v61 = vmul.f32 0.7978846, %v11998_v43  ;;  %v11954_v8 = vmul.f32 %v19328_v35, %v19328_v35  ;;  %v19369_v17 = vadd.f32 %v19277_v27, %v19315_v23 }
0x1607   : > { %14280 = vtanh.f32 %v12013_v56  ;;  %v11983_v29 = vmul.f32 0.044715, %v11967_v33  ;;  %v11969_v39 = vmul.f32 %v11953_v49, %v19320_v24 }
0x1608   : > { %v11984_v40 = vmul.f32 0.044715, %v11968_v10  ;;  %v19337_v54 = vpop.f32.mrb[100].mxu0  ;;  %v11928_v5 = vpop.f32.mrb[100].mxu1  ;;  %14282 = vtanh.f32 %v12012_v2  ;;  %v11970_v52 = vmul.f32 %v11954_v8, %v19328_v35 }
0x1609   : > { %v11999_v7 = vadd.f32 %v11983_v29, %v19296_v59  ;;  %v19343_v0 = vadd.f32 %v11928_v5, %v19262_v63  ;;  %v19345_v4 = vpop.f32.mrb[101].mxu0  ;;  %v11930_v46 = vpop.f32.mrb[101].mxu1  ;;  %v11985_v32 = vmul.f32 0.044715, %v11969_v39  ;;  %14284 = vtanh.f32 %v12014_v61 }
0x160a   : > { %v12000_v19 = vadd.f32 %v11984_v40, %v19301_v30  ;;  %v19352_v20 = vadd.f32 %v11930_v46, %v19264_v60  ;;  %v19354_v53 = vpop.f32.mrb[102].mxu0  ;;  %v11932_v44 = vpop.f32.mrb[102].mxu1  ;;  %v11986_v42 = vmul.f32 0.044715, %v11970_v52 }
0x160b   : > { %v12015_v22 = vmul.f32 0.7978846, %v11999_v7  ;;  %v11955_v55 = vmul.f32 %v19343_v0, %v19343_v0  ;;  %v19359_v16 = vpop.f32.mrb[103].mxu0  ;;  %v11934_v38 = vpop.f32.mrb[103].mxu1  ;;  %v12001_v28 = vadd.f32 %v11985_v32, %v19320_v24  ;;  %v19365_v41 = vadd.f32 %v11932_v44, %v19262_v63 }
0x160c   : > { %v12016_v36 = vmul.f32 0.7978846, %v12000_v19  ;;  %v11956_v25 = vmul.f32 %v19352_v20, %v19352_v20  ;;  %v12002_v10 = vadd.f32 %v11986_v42, %v19328_v35  ;;  %v19381_v49 = vadd.f32 %v11934_v38, %v19264_v60 }
0x160d   : > { %v11971_v34 = vmul.f32 %v11955_v55, %v19343_v0  ;;  %v12017_v26 = vmul.f32 0.7978846, %v12001_v28  ;;  %v11957_v43 = vmul.f32 %v19365_v41, %v19365_v41 }
0x160e   : > { %v11972_v56 = vmul.f32 %v11956_v25, %v19352_v20  ;;  %14286 = vtanh.f32 %v12016_v36  ;;  %v12018_v61 = vmul.f32 0.7978846, %v12002_v10  ;;  %v11958_v8 = vmul.f32 %v19381_v49, %v19381_v49 }
0x160f   : > { %v14279_v33 = vpop.eup %14278  ;;  %v11987_v27 = vmul.f32 0.044715, %v11971_v34  ;;  %14288 = vtanh.f32 %v12015_v22  ;;  %v11973_v14 = vmul.f32 %v11957_v43, %v19365_v41 }
0x1610   : > { %v12043_v2 = vadd.f32 1.0, %v14279_v33  ;;  %v11988_v29 = vmul.f32 0.044715, %v11972_v56  ;;  %v19384_v40 = vpop.f32.mrb[104].mxu0  ;;  %v11938_v39 = vpop.f32.mrb[104].mxu1  ;;  %14290 = vtanh.f32 %v12017_v26  ;;  %v11974_v28 = vmul.f32 %v11958_v8, %v19381_v49 }
0x1611   : > { %v14281_v5 = vpop.eup %14280  ;;  %v12003_v7 = vadd.f32 %v11987_v27, %v19343_v0  ;;  %v19389_v46 = vpop.f32.mrb[105].mxu0  ;;  %v11989_v52 = vmul.f32 0.044715, %v11973_v14  ;;  %14292 = vtanh.f32 %v12018_v61  ;;  %v19396_v25 = vadd.f32 %v11938_v39, %v19262_v63 }
0x1612   : > { %v11940_v19 = vpop.f32.mrb[105].mxu1  ;;  %v12059_v32 = vmul.f32 0.5, %v12043_v2  ;;  %v12045_v44 = vadd.f32 1.0, %v14281_v5  ;;  %v12004_v22 = vadd.f32 %v11988_v29, %v19352_v20  ;;  %v19392_v55 = vpop.f32.mrb[106].mxu0  ;;  %v19404_v27 = vadd.f32 %v19298_v15, %v19315_v23 }
0x1613   : > { %v11942_v38 = vpop.f32.mrb[106].mxu1  ;;  %v12019_v36 = vmul.f32 0.7978846, %v12003_v7  ;;  %v19398_v42 = vpop.f32.mrb[107].mxu0  ;;  %v12005_v33 = vadd.f32 %v11989_v52, %v19365_v41  ;;  %v19408_v2 = vadd.f32 %v19303_v62, %v19312_v18  ;;  %v11990_v29 = vmul.f32 0.044715, %v11974_v28 }
0x1614   : > { %v11944_v34 = vpop.f32.mrb[107].mxu1  ;;  %v12075_v26 = vmul.f32 %v12059_v32, %v19267_v9  ;;  %v12061_v56 = vmul.f32 0.5, %v12045_v44  ;;  %v12020_v43 = vmul.f32 0.7978846, %v12004_v22  ;;  %v14283_v10 = vpop.eup %14282  ;;  %v11959_v14 = vmul.f32 %v19396_v25, %v19396_v25 }
0x1615   : > { %14294 = vtanh.f32 %v12019_v36  ;;  %v12021_v5 = vmul.f32 0.7978846, %v12005_v33  ;;  %v14285_v61 = vpop.eup %14284  ;;  %v12006_v15 = vadd.f32 %v11990_v29, %v19381_v49  ;;  %v19419_v62 = vadd.f32 %v11940_v19, %v19264_v60 }
0x1616   : > { %v19413_v39 = vmul.f32 %v12075_v26, %v19331_v1  ;;  %v12077_v9 = vmul.f32 %v12061_v56, %v19275_v13  ;;  %14296 = vtanh.f32 %v12020_v43  ;;  %v11975_v7 = vmul.f32 %v11959_v14, %v19396_v25 }
0x1617   : > { %v11852_v32 = vadd.f32 %v19309_v45, %v19315_v23  ;;  %14298 = vtanh.f32 %v12021_v5  ;;  %v19425_v1 = vadd.f32 %v11942_v38, %v19262_v63  ;;  %v12022_v44 = vmul.f32 0.7978846, %v12006_v15 }
0x1618   : > { %v12093_v8 = vmul.f32 %v12077_v9, %v19348_v58  ;;  %v14287_v13 = vpop.eup %14286  ;;  %v11991_v22 = vmul.f32 0.044715, %v11975_v7  ;;  %v11960_v52 = vmul.f32 %v19419_v62, %v19419_v62  ;;  %v19430_v36 = vadd.f32 %v11944_v34, %v19264_v60 }
0x1619   : > { %v14289_v19 = vpop.eup %14288  ;;  %v11961_v58 = vmul.f32 %v19425_v1, %v19425_v1  ;;  %v12044_v28 = vadd.f32 1.0, %v14283_v10  ;;  %v12046_v26 = vadd.f32 1.0, %v14285_v61  ;;  %14300 = vtanh.f32 %v12022_v44 }
0x161a   : > { %v12107_v45 = vpack.c.bf16 %v12093_v8, %v19413_v39  ;;  %v14291_v56 = vpop.eup %14290  ;;  %v12007_v63 = vadd.f32 %v11991_v22, %v19396_v25  ;;  %v11976_v38 = vmul.f32 %v11960_v52, %v19419_v62  ;;  %v11962_v43 = vmul.f32 %v19430_v36, %v19430_v36 }
0x161b   : > { %v11977_v60 = vmul.f32 %v11961_v58, %v19425_v1  ;;  %v12060_v34 = vmul.f32 0.5, %v12044_v28  ;;  %v12062_v33 = vmul.f32 0.5, %v12046_v26  ;;  %v12048_v29 = vadd.f32 1.0, %v14287_v13  ;;  %v14293_v14 = vpop.eup %14292 }
0x161c   : > { %v12023_v9 = vmul.f32 0.7978846, %v12007_v63  ;;  %v11992_v10 = vmul.f32 0.044715, %v11976_v38  ;;  %v11978_v5 = vmul.f32 %v11962_v43, %v19430_v36  ;;  %v12047_v39 = vadd.f32 1.0, %v14289_v19 }
0x161d   : > { %v11993_v61 = vmul.f32 0.044715, %v11977_v60  ;;  %v12076_v15 = vmul.f32 %v12060_v34, %v19270_v47  ;;  %v12078_v7 = vmul.f32 %v12062_v33, %v19282_v21  ;;  %v12050_v8 = vadd.f32 1.0, %v14293_v14 }
0x161e   : > { %14302 = vtanh.f32 %v12023_v9  ;;  %v12008_v44 = vadd.f32 %v11992_v10, %v19419_v62  ;;  %v11994_v22 = vmul.f32 0.044715, %v11978_v5  ;;  %v12064_v52 = vmul.f32 0.5, %v12048_v29 }
0x161f   : > { %v14295_v58 = vpop.eup %14294  ;;  %v12009_v13 = vadd.f32 %v11993_v61, %v19425_v1  ;;  %v12092_v28 = vmul.f32 %v12076_v15, %v19334_v6  ;;  %v12094_v26 = vmul.f32 %v12078_v7, %v19369_v17  ;;  %v12066_v63 = vmul.f32 0.5, %v12050_v8 }
0x1620   : > { %v14297_v19 = vpop.eup %14296  ;;  %v12024_v38 = vmul.f32 0.7978846, %v12008_v44  ;;  %v12010_v47 = vadd.f32 %v11994_v22, %v19430_v36  ;;  %v12080_v21 = vmul.f32 %v12064_v52, %v19301_v30  ;;  %v12049_v43 = vadd.f32 1.0, %v14291_v56 }
0x1621   : > { %v14299_v60 = vpop.eup %14298  ;;  %v12025_v34 = vmul.f32 0.7978846, %v12009_v13  ;;  %v12108_v33 = vpack.c.bf16 %v12094_v26, %v12092_v28  ;;  %v12082_v29 = vmul.f32 %v12066_v63, %v19328_v35  ;;  %v12063_v14 = vmul.f32 0.5, %v12047_v39 }
0x1622   : > { %14304 = vtanh.f32 %v12024_v38  ;;  %v12026_v9 = vmul.f32 0.7978846, %v12010_v47  ;;  %v12096_v6 = vmul.f32 %v12080_v21, %v19404_v27  ;;  %v12065_v10 = vmul.f32 0.5, %v12049_v43 }
0x1623   : > { %14306 = vtanh.f32 %v12025_v34  ;;  %12282 = vmatprep.mubr.bf16.mxu0 %v12108_v33  ;;  %v12098_v17 = vmul.f32 %v12082_v29, %v11852_v32  ;;  %v12079_v5 = vmul.f32 %v12063_v14, %v19296_v59  ;;  %v12052_v61 = vadd.f32 1.0, %v14297_v19  ;;  %v14301_v15 = vpop.eup %14300 }
0x1624   : > { %14308 = vtanh.f32 %v12026_v9  ;;  %12283 = vmatmul.mubr.bf16.vlgmr.msra.gmra.mrb[108].mxu0 %v12107_v45  ;;  %v12081_v30 = vmul.f32 %v12065_v10, %v19320_v24  ;;  %v12051_v56 = vadd.f32 1.0, %v14295_v58  ;;  %v12053_v7 = vadd.f32 1.0, %v14299_v60 }
0x1625   : > { %v12110_v35 = vpack.c.bf16 %v12098_v17, %v12096_v6  ;;  %v12095_v39 = vmul.f32 %v12079_v5, %v19374_v12  ;;  %v12054_v8 = vadd.f32 1.0, %v14301_v15  ;;  %v12068_v44 = vmul.f32 0.5, %v12052_v61 }
0x1626   : > { %v12097_v27 = vmul.f32 %v12081_v30, %v19408_v2  ;;  %v12067_v22 = vmul.f32 0.5, %v12051_v56  ;;  %v12069_v52 = vmul.f32 0.5, %v12053_v7  ;;  %v11856_v59 = vadd.f32 %v19337_v54, %v19312_v18 }
0x1627   : > { %v11858_v32 = vadd.f32 %v19345_v4, %v19315_v23  ;;  %12290 = vmatprep.mubr.bf16.mxu0 %v12110_v35  ;;  %v12070_v45 = vmul.f32 0.5, %v12054_v8  ;;  %v12084_v24 = vmul.f32 %v12068_v44, %v19352_v20  ;;  %v11860_v12 = vadd.f32 %v19354_v53, %v19312_v18 }
0x1628   : > { %v14303_v58 = vpop.eup %14302  ;;  %v12109_v13 = vpack.c.bf16 %v12097_v27, %v12095_v39  ;;  %v12083_v28 = vmul.f32 %v12067_v22, %v19343_v0  ;;  %v12085_v2 = vmul.f32 %v12069_v52, %v19365_v41  ;;  %v11862_v26 = vadd.f32 %v19359_v16, %v19315_v23 }
0x1629   : > { %v12086_v54 = vmul.f32 %v12070_v45, %v19381_v49  ;;  %v12100_v63 = vmul.f32 %v12084_v24, %v11858_v32  ;;  %v12055_v4 = vadd.f32 1.0, %v14303_v58  ;;  %v11866_v0 = vadd.f32 %v19384_v40, %v19312_v18 }
0x162a   : > { %v12099_v19 = vmul.f32 %v12083_v28, %v11856_v59  ;;  %v12101_v38 = vmul.f32 %v12085_v2, %v11860_v12  ;;  %v11868_v6 = vadd.f32 %v19389_v46, %v19315_v23  ;;  %v11870_v40 = vadd.f32 %v19392_v55, %v19312_v18  ;;  %v13970_v46 = vld [vmem:[%s19796_s26 + $0x10] sm:$0xff]   ;;  %v13971_v18 = vld [vmem:[%s19796_s26 + $0x18] sm:$0xff]  }
0x162b   : > { %v12102_v47 = vmul.f32 %v12086_v54, %v11862_v26  ;;  %v12071_v20 = vmul.f32 0.5, %v12055_v4  ;;  %13530 = vmatprep.subr.bf16.mxu1 %v13970_v46  ;;  %v12992_v55 = vld [vmem:[#allocation23] ss:$0 sm:$0xff] }
0x162c   : > { %v14305_v21 = vpop.eup %14304  ;;  %12291 = vmatmul.mubr.bf16.gmra.mrb[112].mxu0 %v12109_v13  ;;  %v12111_v43 = vpack.c.bf16 %v12101_v38, %v12099_v19  ;;  %13531 = vmatpush3.bf16.msra.mxu1 %v13970_v46 }
0x162d   : > { %v14307_v53 = vpop.eup %14306  ;;  %v12112_v60 = vpack.c.bf16 %v12102_v47, %v12100_v63  ;;  %v12056_v41 = vadd.f32 1.0, %v14305_v21  ;;  %v12087_v34 = vmul.f32 %v12071_v20, %v19396_v25  ;;  %v11872_v25 = vadd.f32 %v19398_v42, %v19315_v23  ;;  %13532 = vmatprep.subr.bf16.mxu1 %v13971_v18 }
0x162e   : > { %v14309_v16 = vpop.eup %14308  ;;  %v12057_v33 = vadd.f32 1.0, %v14307_v53 }
0x162f   : > { %12298 = vmatprep.mubr.bf16.mxu0 %v12112_v60  ;;  %v12058_v49 = vadd.f32 1.0, %v14309_v16  ;;  %v12072_v29 = vmul.f32 0.5, %v12056_v41  ;;  %v12103_v14 = vmul.f32 %v12087_v34, %v11866_v0 }
0x1630   : > { %v12073_v9 = vmul.f32 0.5, %v12057_v33  ;;  %13533 = vmatpush3.bf16.msra.mxu1 %v13971_v18 }
0x1631   : > { %v12074_v10 = vmul.f32 0.5, %v12058_v49  ;;  %v12088_v17 = vmul.f32 %v12072_v29, %v19419_v62 }
0x1632   : > { %v12089_v5 = vmul.f32 %v12073_v9, %v19425_v1 }
0x1633   : > { %v12090_v61 = vmul.f32 %v12074_v10, %v19430_v36  ;;  %v12104_v15 = vmul.f32 %v12088_v17, %v11868_v6 }
0x1634   : > { %12299 = vmatmul.mubr.bf16.gmra.mrb[116].mxu0 %v12111_v43  ;;  %v12105_v30 = vmul.f32 %v12089_v5, %v11870_v40  ;;  %v19801_v40 = vld [vmem:[#allocation38_spill] sm:$0xff] }
0x1635   : > { %v12106_v56 = vmul.f32 %v12090_v61, %v11872_v25 }
0x1636   : > { %v12113_v7 = vpack.c.bf16 %v12105_v30, %v12103_v14 }
0x1637   : > { %v12114_v35 = vpack.c.bf16 %v12106_v56, %v12104_v15 }
0x1639   : > { %12306 = vmatprep.mubr.bf16.mxu0 %v12114_v35 }
0x163c   : > { %12307 = vmatmul.mubr.bf16.gmra.mrb[120].mxu0 %v12113_v7  ;;  %v19804_v7 = vld [vmem:[#allocation41_spill] sm:$0xff] }
0x16f7   : > { %v13191_v23 = vpop.f32.mrb[108].mxu0 }
0x16f8   : > { %v13192_v42 = vpop.f32.mrb[109].mxu0 }
0x16f9   : > { %v13193_v62 = vadd.f32 %v13192_v42, %v13191_v23  ;;  %v13194_v1 = vpop.f32.mrb[110].mxu0 }
0x16fa   : > { %v13195_v36 = vpop.f32.mrb[111].mxu0 }
0x16fb   : > { %v12285_v39 = vadd.f32 %v13193_v62, %v12992_v55  ;;  %v13196_v8 = vadd.f32 %v13195_v36, %v13194_v1  ;;  %v19805_v62 = vld [vmem:[#allocation42_spill] sm:$0xff] }
0x16fd   : > { %v12288_v44 = vadd.f32 %v13196_v8, %v12992_v55  ;;  %v12315_v27 = vadd.f32 %v12285_v39, %v19097_v3  ;;  %v19806_v8 = vld [vmem:[#allocation43_spill] sm:$0xff] }
0x16ff   : > { %v12316_v22 = vadd.f32 %v12288_v44, %v19103_v57  ;;  %v13197_v52 = vpop.f32.mrb[112].mxu0 }
0x1700   : > { %v13198_v59 = vpop.f32.mrb[113].mxu0 }
0x1701   : > { %v12323_v32 = vpack.c.bf16 %v12316_v22, %v12315_v27  ;;  %v13199_v45 = vadd.f32 %v13198_v59, %v13197_v52  ;;  %v13200_v24 = vpop.f32.mrb[114].mxu0  ;;  %v19807_v27 = vld [vmem:[#allocation44_spill] sm:$0xff]  ;;  %v19808_v59 = vld [vmem:[#allocation45_spill] sm:$0xff] }
0x1702   : > { %v13201_v58 = vpop.f32.mrb[115].mxu0 }
0x1703   : > { %v12293_v12 = vadd.f32 %v13199_v45, %v12992_v55  ;;  %v13202_v13 = vadd.f32 %v13201_v58, %v13200_v24  ;;  %13534 = vmatprep.mubr.msk.bf16.mxu1 %vm882_vm1, %v12323_v32 }
0x1705   : > { %v12296_v28 = vadd.f32 %v13202_v13, %v12992_v55  ;;  %v12317_v2 = vadd.f32 %v12293_v12, %v19108_v48 }
0x1707   : > { %v12318_v26 = vadd.f32 %v12296_v28, %v19100_v51  ;;  %v13203_v54 = vpop.f32.mrb[116].mxu0 }
0x1708   : > { %v13204_v63 = vpop.f32.mrb[117].mxu0 }
0x1709   : > { %v12324_v3 = vpack.c.bf16 %v12318_v26, %v12317_v2  ;;  %v13205_v4 = vadd.f32 %v13204_v63, %v13203_v54  ;;  %v13206_v57 = vpop.f32.mrb[118].mxu0 }
0x170a   : > { %v13207_v19 = vpop.f32.mrb[119].mxu0 }
0x170b   : > { %v12301_v38 = vadd.f32 %v13205_v4, %v12992_v55  ;;  %v13208_v47 = vadd.f32 %v13207_v19, %v13206_v57  ;;  %13535 = vmatmul.mubr.msk.bf16.vlgmr.msra.gmra.mrb[108].mxu1 %vm882_vm1, %v12324_v3 }
0x170d   : > { %v12304_v20 = vadd.f32 %v13208_v47, %v12992_v55  ;;  %v12319_v21 = vadd.f32 %v12301_v38, %v19117_v37  ;;  %v13009_v37 = vld [vmem:[%s19800_s0] ss:$0 sm:$0xff]  ;;  %s14704_s0 = scalar_lea.vmem %s19516_s5, 1024 }
0x170e   : > { %p14705_p9 = scmp.ne.s32.totalorder %s19516_s5, %s14704_s0  ;;  %p14712_p2 = scmp.lt.s32.totalorder %s14710_s9, %s14704_s0 }
0x170f   : > { %v12320_v43 = vadd.f32 %v12304_v20, %v19123_v11  ;;  %v13209_v53 = vpop.f32.mrb[120].mxu0 }
0x1710   : > { %v13210_v0 = vpop.f32.mrb[121].mxu0  ;;  %p14706_p8 = pnand %p14705_p9, %p19810_p4  ;;  %p14713_p7 = por %p14712_p2, %p14711_p5 }
0x1711   : > { %v12325_v48 = vpack.c.bf16 %v12320_v43, %v12319_v21  ;;  %v13211_v60 = vadd.f32 %v13210_v0, %v13209_v53  ;;  %v13212_v51 = vpop.f32.mrb[122].mxu0 }
0x1712   : > { %v13213_v41 = vpop.f32.mrb[123].mxu0  ;;  %p14707_p0 = pneg %p14706_p8 }
0x1713   : > { %v12309_v34 = vadd.f32 %v13211_v60, %v12992_v55  ;;  %v13214_v16 = vadd.f32 %v13213_v41, %v13212_v51  ;;  %13538 = vmatprep.mubr.msk.bf16.mxu1 %vm882_vm1, %v12325_v48 }
0x1714   : > { %p14714_p10 = pnand %p14713_p7, %p14707_p0 }
0x1715   : > { %v12312_v33 = vadd.f32 %v13214_v16, %v12992_v55  ;;  %v12321_v49 = vadd.f32 %v12309_v34, %v19120_v50  ;;  %v19802_v50 = vld [vmem:[#allocation39_spill] sm:$0xff] }
0x1717   : > { %v12322_v29 = vadd.f32 %v12312_v33, %v19128_v31  ;;  %v19803_v31 = vld [vmem:[#allocation40_spill] sm:$0xff] }
0x1719   : > { %v12326_v14 = vpack.c.bf16 %v12322_v29, %v12321_v49 }
0x171b   : > { %13539 = vmatmul.mubr.msk.bf16.gmra.mrb[112].mxu1 %vm882_vm1, %v12326_v14 }
0x17de   : > { %v13536_v11 = vpop.f32.mrb[108].mxu1 }
0x17df   : > { %v12412_v9 = vpop.f32.mrb[109].mxu1  ;;  %v12421_v61 = vadd.f32 %v13536_v11, %v13009_v37 }
0x17e0   : > { %v12413_v6 = vadd.f32 %v13009_v37, %v12412_v9  ;;  %v13537_v10 = vpop.f32.mrb[110].mxu1 }
0x17e1   : > { %v12415_v17 = vpop.f32.mrb[111].mxu1  ;;  %v12445_v30 = vadd.f32 %v12421_v61, %v19803_v31  ;;  %v12424_v56 = vadd.f32 %v13537_v10, %v13009_v37 }
0x17e2   : > { %v12443_v5 = vadd.f32 %v12413_v6, %v19801_v40  ;;  %v12416_v25 = vadd.f32 %v13009_v37, %v12415_v17 }
0x17e3   : > { %v12446_v35 = vadd.f32 %v12424_v56, %v19804_v7 }
0x17e4   : > { %12451 = vxpose.xlu0.b32.start [1/8] (short) (narrow) %v12443_v5, 64  ;;  %v12444_v15 = vadd.f32 %v12416_v25, %v19802_v50 }
0x17e8   : > { %12452 = vxpose.xlu0.b32.cont [2/8] (short) (narrow) %v12444_v15, 64 }
0x17ec   : > { %12453 = vxpose.xlu0.b32.cont [3/8] (short) (narrow) %v12445_v30, 64 }
0x17ee   : > { %v13540_v46 = vpop.f32.mrb[112].mxu1 }
0x17ef   : > { %v12428_v18 = vpop.f32.mrb[113].mxu1  ;;  %v12437_v39 = vadd.f32 %v13540_v46, %v13009_v37 }
0x17f0   : > { %12454 = vxpose.xlu0.b32.cont [4/8] (short) (narrow) %v12446_v35, 64  ;;  %v12429_v23 = vadd.f32 %v13009_v37, %v12428_v18  ;;  %v13541_v55 = vpop.f32.mrb[114].mxu1 }
0x17f1   : > { %v12431_v42 = vpop.f32.mrb[115].mxu1  ;;  %v12449_v22 = vadd.f32 %v12437_v39, %v19807_v27  ;;  %v12440_v52 = vadd.f32 %v13541_v55, %v13009_v37 }
0x17f2   : > { %v12447_v1 = vadd.f32 %v12429_v23, %v19805_v62  ;;  %v12432_v36 = vadd.f32 %v13009_v37, %v12431_v42 }
0x17f3   : > { %v12450_v32 = vadd.f32 %v12440_v52, %v19808_v59 }
0x17f4   : > { %12455 = vxpose.xlu0.b32.cont [5/8] (short) (narrow) %v12447_v1, 64  ;;  %v12448_v44 = vadd.f32 %v12432_v36, %v19806_v8 }
0x17f8   : > { %12456 = vxpose.xlu0.b32.cont [6/8] (short) (narrow) %v12448_v44, 64 }
0x17fc   : > { %12457 = vxpose.xlu0.b32.cont [7/8] (short) (narrow) %v12449_v22, 64 }
0x1800   : > { %12458 = vxpose.xlu0.b32.end [8/8] (short) (narrow) %v12450_v32, 64 }
0x1864   : > { %v12467_v45 = vpop.trf.xlu0 }
0x1865   : > { %12483 = vst.msk [vmem:[%s834_s27] sm:$0xff] %vm882_vm1, %v12467_v45 }
0x1868   : > { %v12468_v24 = vpop.trf.xlu0 }
0x1869   : > { %12484 = vst.msk [vmem:[%s834_s27 + $0x8] sm:$0xff] %vm882_vm1, %v12468_v24 }
0x186c   : > { %v12469_v58 = vpop.trf.xlu0 }
0x186d   : > { %12485 = vst.msk [vmem:[%s834_s27 + $0x10] sm:$0xff] %vm882_vm1, %v12469_v58 }
0x1870   : > { %v12470_v12 = vpop.trf.xlu0 }
0x1871   : > { %12486 = vst.msk [vmem:[%s834_s27 + $0x18] sm:$0xff] %vm882_vm1, %v12470_v12 }
0x1874   : > { %v12471_v13 = vpop.trf.xlu0 }
0x1875   : > { %12487 = vst.msk [vmem:[%s834_s27 + $0x20] sm:$0xff] %vm882_vm1, %v12471_v13 }
0x1878   : > { %v12472_v28 = vpop.trf.xlu0 }
0x1879   : > { %12488 = vst.msk [vmem:[%s834_s27 + $0x28] sm:$0xff] %vm882_vm1, %v12472_v28 }
0x187c   : > { %v12473_v2 = vpop.trf.xlu0 }
0x187d   : > { %12489 = vst.msk [vmem:[%s834_s27 + $0x30] sm:$0xff] %vm882_vm1, %v12473_v2 }
0x1880   : > { %v12474_v26 = vpop.trf.xlu0 }
0x1881   : > { %12490 = vst.msk [vmem:[%s834_s27 + $0x38] sm:$0xff] %vm882_vm1, %v12474_v26 }
0x1882   : > { %14717 = shalt.err (!%p14714_p10)
}
0x1883   : > { %s14718_s27 = scalar_lea.hbm %s19522_s1, 1024  ;;  %s14722_s7 = scalar_lea.hbm %s19809_s8, 2048 }
0x1884   : > { %p14719_p1 = scmp.ne.s32.totalorder %s19522_s1, %s14718_s27  ;;  %p14723_p13 = scmp.lt.u32.totalorder %s19522_s1, %s19809_s8 }
0x1885   : > { %p14724_p3 = scmp.lt.u32.totalorder %s14722_s7, %s14718_s27  ;;  %p14726_p9 = scmp.lt.u32.totalorder %s14718_s27, %s19522_s1 }
0x1886   : > { %p14720_p11 = pnand %p14719_p1, %p19810_p4 }
0x1887   : > { %p14725_p6 = por %p14724_p3, %p14723_p13 }
0x1888   : > { %p14721_p12 = pneg %p14720_p11 }
0x1889   : > { %p14727_p8 = por %p14726_p9, %p14725_p6 }
0x188b   : > { %p14728_p0 = pnand %p14727_p8, %p14721_p12 }
0x188d   : > { %14731 = shalt.err (!%p14728_p0)
}
0x188e   : > { %s14834_s9 = smov 128   ;;  %s14835_s0 = smov 8  }
0x188f   : > { %13632 = dma.vmem_to_hbm [thread:$0]  (%p19810_p4), %s19516_s5, 1024, %s19522_s1, %s12492_s25, %s14834_s9, %s14834_s9, %s14835_s0  }
0x1890 PF: > { %s19811_s3 = sld [smem:[#allocation35_spill]]  ;;  %p19812_p5 = scmp.ne.s32.totalorder %s19695_s29, 0 }
0x1891   : > { %p19813_p2 = scmp.ge.s32.totalorder %s14798_s24, 2 }
0x1893   : > { %p13679_p7 = pnand %p19813_p2, %p19812_p5 }
0x1896   : > { %s12520_s6 = sand.u32 1, %s19811_s3  }
0x1897   : > { %s12521_s27 = scalar_lea.sflag [#allocation4], %s12520_s6 }
0x1898   : > { %14781 = dma.done.wait (!%p13679_p7), %s12521_s27, 1024  }
0x1899   : > { %14783 = vsyncadd (!%p13679_p7), %s12521_s27, 4294966272  ;;  %p40_p10 = scmp.ge.s32.totalorder %s15272_s4, 4   ;;  %s19814_s1 = smov %s14790_s22 }
0x189a   : > { %s19815_s22 = smov %s14794_s23  ;;  %s19816_s23 = smov %s15284_s20 }
0x189b   : > { %s19817_s24 = smov %s15272_s4  ;;  %42 = sbr.rel (!%p40_p10) target bundleno = 27 (0x1b), region = 200 }
0x18a2   :  { %12526 = vsyncpa [#allocation3], 1 }
0x18a3   :  { %12528 = vsyncpa [#allocation3 + $0x1], 1 }
0x18a4   :  { %12529 = vsyncpa [#allocation6], 1 }
0x18a5   :  { %12530 = vsyncpa [#allocation9], 1 }
0x18a6   :  { %12531 = vsyncpa [#allocation12], 1 }
0x18a7   :  { %12532 = vsyncpa [#allocation15], 1 }
0x18a8   :  { %12533 = vsyncpa [#allocation18], 1 }
0x18a9   :  { %12534 = vsyncpa [#allocation21], 1 }
0x18aa   :  { %12535 = vsyncpa [#allocation24], 1 }
0x18ab   :  { %12536 = vsyncpa [#allocation4], 1 }
0x18ac   :  { %12538 = vsyncpa [#allocation4 + $0x1], 1 }

</bundles_post_ra>
